<compile_context>
chip_gen: v6e
topology: v6e:2x2x1
jax: 0.10.0
libtpu: 0.0.40
codegen_flags: <defaults>
</compile_context>

<pallas_src>
import numpy as np
import jax
import jax.numpy as jnp
from jax.experimental import pallas as pl
from jax.experimental.pallas import tpu as pltpu

# Make the pure-JAX reference use full f32 matmuls (kernel requests f32 on the MXU too).
jax.config.update("jax_default_matmul_precision", "highest")

# ----------------------- small, module-consistent config -----------------------
N  = 16            # num_epochs (batch)
C  = 2             # num_channels
T  = 8             # seq_len / time bins within an epoch
M  = 16            # num_filters (filterbank size per channel)
F  = 256 // 2 + 1  # 129 freq bins (nfft=256 fixed inside LearnableFilterbank)
FL = 128           # lane-aligned freq bins actually used (tri row 128 is exactly zero)
H  = 32            # LSTM hidden size
A  = 32            # attention size
D  = M * C         # BLSTM input size


# --------------------- FilterbankShape.lin_tri_filter_shape ---------------------
def lin_tri_filter_shape(nfilt, nfft, samplerate, lowfreq, highfreq):
    highfreq = highfreq or samplerate / 2
    hzpoints = np.linspace(lowfreq, highfreq, nfilt + 2)
    bins = np.floor((nfft + 1) * hzpoints / samplerate)
    fbank = np.zeros([nfilt, nfft // 2 + 1])
    for j in range(nfilt):
        for i in range(int(bins[j]), int(bins[j + 1])):
            fbank[j, i] = (i - bins[j]) / (bins[j + 1] - bins[j])
        for i in range(int(bins[j + 1]), int(bins[j + 2])):
            fbank[j, i] = (bins[j + 2] - i) / (bins[j + 2] - bins[j + 1])
    return np.transpose(fbank).astype(np.float32)   # (F, nfilt)


# --------------------------------- the kernel ----------------------------------
def encoder_kernel(x_ref, fb_ref, wihf_ref, wihb_ref, b8_ref, whh8_ref,
                   aw_ref, ab_ref, au_ref, out_ref, xo_ref):
    f32 = jnp.float32
    T_, BN_, CFL = x_ref.shape
    H2 = whh8_ref.shape[0]          # 2H (fused fwd|bwd hidden width)
    Hh = H2 // 2                    # H

    # ---- 1. learnable filterbank: one matmul, all channels fused --------------
    x2 = x_ref[...].reshape(T_ * BN_, CFL)                          # layout-free reshape
    feat = jnp.dot(x2, fb_ref[...], preferred_element_type=f32)     # (T*BN, D)

    # ---- 2. fused bidirectional LSTM -------------------------------------------
    # Gate column layout (8H): [i_f,i_b, f_f,f_b, o_f,o_b, g_f,g_b]; g columns of the
    # weights/biases were pre-scaled by 2 in the wrapper so tanh(g) = 2*sigmoid(2g)-1.
    gin_f = jnp.dot(feat, wihf_ref[...], preferred_element_type=f32) + b8_ref[...]
    gin_b = jnp.dot(feat, wihb_ref[...], preferred_element_type=f32)
    whh8 = whh8_ref[...]                                            # (2H, 8H) block-diag

    hs = jnp.zeros((BN_, H2), f32)                                  # fused [h_f | h_b]
    cs = jnp.zeros((BN_, H2), f32)                                  # fused [c_f | c_b]
    for s in range(T_):                                             # static unroll (T=8)
        tf = s
        tb = T_ - 1 - s
        gates = (gin_f[tf * BN_:(tf + 1) * BN_, :]
                 + gin_b[tb * BN_:(tb + 1) * BN_, :]
                 + jnp.dot(hs, whh8, preferred_element_type=f32))   # (BN, 8H)
        sig = jax.nn.sigmoid(gates)                                 # single EUP op per step
        i_g = sig[:, 0:H2]
        f_g = sig[:, H2:2 * H2]
        o_g = sig[:, 2 * H2:3 * H2]
        g_g = 2.0 * sig[:, 3 * H2:4 * H2] - 1.0                     # == tanh(pre-activation)
        cs = f_g * cs + i_g * g_g
        hs = o_g * jnp.tanh(cs)
        # write per-step outputs straight to the VMEM slab (bounds live ranges)
        xo_ref[tf * BN_:(tf + 1) * BN_, 0:Hh] = hs[:, 0:Hh]         # forward @ time tf
        xo_ref[tb * BN_:(tb + 1) * BN_, Hh:H2] = hs[:, Hh:H2]       # backward @ time tb

    # ---- 3. attention over time, batched ---------------------------------------
    big = xo_ref[...]                                               # (T*BN, 2H)
    v = jnp.tanh(jnp.dot(big, aw_ref[...], preferred_element_type=f32)
                 + ab_ref[...])                                     # (T*BN, A)
    sc = jnp.sum(v * au_ref[...], axis=-1, keepdims=True)           # (T*BN, 1)
    ex = jnp.exp(sc)            # matches PyTorch: exp/sum without max-subtraction
    ex3 = ex.reshape(T_, BN_, 1)
    denom = jnp.sum(ex3, axis=0)                                    # (BN, 1)
    alphas = ex3 * (1.0 / denom)                                    # exact reciprocal
    acc = jnp.sum(big.reshape(T_, BN_, H2) * alphas, axis=0)        # (BN, 2H)

    if out_ref.shape[-1] == 2 * H2:                                 # lane-dense packed output
        half = BN_ // 2
        out_ref[...] = jnp.concatenate([acc[:half, :], acc[half:, :]], axis=1)
    else:
        out_ref[...] = acc


# --------------------------------- wrapper --------------------------------------
def _interleave_gates(fwd4, bwd4):
    """(.., 4H) PyTorch gate order [i,f,g,o] x 2 dirs -> (.., 8H) [i_f,i_b,f_f,f_b,o_f,o_b,g_f,g_b].
    g columns are pre-scaled by 2 so the kernel can use tanh(x) = 2*sigmoid(2x) - 1."""
    i_f, f_f, g_f, o_f = jnp.split(fwd4, 4, axis=-1)
    i_b, f_b, g_b, o_b = jnp.split(bwd4, 4, axis=-1)
    return jnp.concatenate([i_f, i_b, f_f, f_b, o_f, o_b, 2.0 * g_f, 2.0 * g_b], axis=-1)


def _tensorcores_per_chip():
    # v5e/v6e: 1 TensorCore per chip -> grid=1; v7x: 2 -> grid=2 (megacore sharding).
    try:
        kind = jax.devices()[0].device_kind.lower()
    except Exception:
        kind = ""
    return 2 if "v7" in kind else 1


def single_epoch_encoder(x, p):
    n = x.shape[0]
    # Lane-align F: dropping freq bin 128 is exact because tri's row 128 is all zeros
    # for these filterbank params (samplerate=100, highfreq=50). Guard it.
    assert not np.any(np.asarray(p["tri"])[FL:, :]), "tri rows beyond 128 must be zero"

    # Generation-aware grid: one grid step per TensorCore (serial recurrence is the
    # dominant chain, so don't split the batch on single-core chips).
    num_tc = _tensorcores_per_chip()
    grid_n = num_tc if (num_tc > 1 and n % num_tc == 0 and (n // num_tc) % 8 == 0) else 1
    bn = n // grid_n

    # x: (N, C, T, F) -> (T, N, C*FL) t-major slab, feature dim = [chan0 freqs | chan1 freqs]
    xt = jnp.transpose(x[..., :FL], (2, 0, 1, 3)).reshape(T, n, C * FL)

    # Block-diagonal sigmoid(fw)*tri filterbank (C*FL, C*M): all channels in one matmul.
    blocks = []
    for c in range(C):
        fb_c = (jax.nn.sigmoid(p["filter_weights"][:, c]) * p["tri"])[:FL]      # (FL, M)
        row = [jnp.zeros((FL, M), jnp.float32) for _ in range(C)]
        row[c] = fb_c
        blocks.append(jnp.concatenate(row, axis=1))
    fb_bd = jnp.concatenate(blocks, axis=0)                                      # (C*FL, D)

    zeros4 = jnp.zeros((D, 4 * H), jnp.float32)
    zeros4h = jnp.zeros((H, 4 * H), jnp.float32)
    wih_f8 = _interleave_gates(p["wih_f"].T, zeros4)             # (D, 8H), bwd cols zero
    wih_b8 = _interleave_gates(zeros4, p["wih_b"].T)             # (D, 8H), fwd cols zero
    b8 = _interleave_gates((p["bih_f"] + p["bhh_f"]).reshape(1, 4 * H),
                           (p["bih_b"] + p["bhh_b"]).reshape(1, 4 * H))          # (1, 8H)
    whh8 = jnp.concatenate([_interleave_gates(p["whh_f"].T, zeros4h),
                            _interleave_gates(zeros4h, p["whh_b"].T)], axis=0)   # (2H, 8H)

    args = (xt, fb_bd, wih_f8, wih_b8, b8, whh8,
            p["attw"], p["attb"].reshape(1, A), p["attu"].reshape(1, A))

    full2 = lambda i: (0, 0)
    in_specs = [
        pl.BlockSpec((T, bn, C * FL), lambda i: (0, i, 0)),    # x: block over epochs
        pl.BlockSpec((C * FL, D), full2),                      # block-diag filterbank
        pl.BlockSpec((D, 8 * H), full2),                       # W_ih fwd (interleaved 8H)
        pl.BlockSpec((D, 8 * H), full2),                       # W_ih bwd (interleaved 8H)
        pl.BlockSpec((1, 8 * H), full2),                       # bias (both dirs)
        pl.BlockSpec((2 * H, 8 * H), full2),                   # block-diag W_hh
        pl.BlockSpec((2 * H, A), full2),                       # attweight_w
        pl.BlockSpec((1, A), full2),                           # attweight_b
        pl.BlockSpec((1, A), full2),                           # attweight_u (row vector)
    ]

    # Lane-dense output when legal: pack the two batch halves side-by-side into 128 lanes
    # (unmasked full-lane stores); otherwise fall back to the plain (bn, 2H) block.
    pack = (bn % 16 == 0)
    if pack:
        out_shape = jax.ShapeDtypeStruct((n // 2, 4 * H), jnp.float32)
        out_spec = pl.BlockSpec((bn // 2, 4 * H), lambda i: (i, 0))
    else:
        out_shape = jax.ShapeDtypeStruct((n, 2 * H), jnp.float32)
        out_spec = pl.BlockSpec((bn, 2 * H), lambda i: (i, 0))

    out = pl.pallas_call(
        encoder_kernel,
        out_shape=out_shape,
        grid=(grid_n,),
        in_specs=in_specs,
        out_specs=out_spec,
        scratch_shapes=[pltpu.VMEM((T * bn, 2 * H), jnp.float32)],   # per-step BLSTM outputs
        compiler_params=pltpu.CompilerParams(dimension_semantics=("parallel",)),
    )(*args)

    if pack:   # unpack: row r = [result[r] | result[r + n/2]]
        out = jnp.concatenate([out[:, :2 * H], out[:, 2 * H:]], axis=0)
    return out


# ----------------------- deterministic parameter init ---------------------------
def init_params(key):
    ks = jax.random.split(key, 12)
    lstm_scale = 1.0 / np.sqrt(H)
    u = lambda k, shape: jax.random.uniform(k, shape, jnp.float32, -lstm_scale, lstm_scale)
    return dict(
        tri=jnp.asarray(lin_tri_filter_shape(M, 256, 100, 0, 50)),     # (F, M)
        filter_weights=jax.random.normal(ks[0], (M, C), jnp.float32),  # torch.randn(M, C)
        wih_f=u(ks[1], (4 * H, D)), whh_f=u(ks[2], (4 * H, H)),
        bih_f=u(ks[3], (4 * H,)),   bhh_f=u(ks[4], (4 * H,)),
        wih_b=u(ks[5], (4 * H, D)), whh_b=u(ks[6], (4 * H, H)),
        bih_b=u(ks[7], (4 * H,)),   bhh_b=u(ks[8], (4 * H,)),
        attw=jax.random.normal(ks[9], (2 * H, A), jnp.float32),        # torch.randn(2H, A)
        attb=jax.random.normal(ks[10], (A,), jnp.float32),
        attu=jax.random.normal(ks[11], (A,), jnp.float32),
    )


# ------------------------------ pure-JAX reference -------------------------------
def reference_forward(x, p):
    n = x.shape[0]
    chnls = []
    for c in range(C):
        fb = jax.nn.sigmoid(p["filter_weights"][:, c]) * p["tri"]      # (F, M)
        chnls.append(jnp.matmul(x[:, c, :, :], fb))                    # (n, T, M)
    feat = jnp.concatenate(chnls, axis=2)                              # (n, T, D)

    def run_lstm(wih, whh, bih, bhh, reverse):
        def step(carry, x_t):
            h, cc = carry
            gates = x_t @ wih.T + h @ whh.T + bih + bhh
            i, f, g, o = jnp.split(gates, 4, axis=-1)
            cc = jax.nn.sigmoid(f) * cc + jax.nn.sigmoid(i) * jnp.tanh(g)
            h = jax.nn.sigmoid(o) * jnp.tanh(cc)
            return (h, cc), h
        xs = jnp.swapaxes(feat, 0, 1)
        if reverse:
            xs = xs[::-1]
        init = (jnp.zeros((n, H), jnp.float32), jnp.zeros((n, H), jnp.float32))
        _, hs = jax.lax.scan(step, init, xs)
        if reverse:
            hs = hs[::-1]
        return jnp.swapaxes(hs, 0, 1)                                  # (n, T, H)

    hf = run_lstm(p["wih_f"], p["whh_f"], p["bih_f"], p["bhh_f"], False)
    hb = run_lstm(p["wih_b"], p["whh_b"], p["bih_b"], p["bhh_b"], True)
    xo = jnp.concatenate([hf, hb], axis=-1)                            # (n, T, 2H)

    v = jnp.tanh(xo.reshape(-1, 2 * H) @ p["attw"] + p["attb"][None, :])
    vu = v @ p["attu"].reshape(-1, 1)
    exps = jnp.exp(vu).reshape(-1, T)
    alphas = exps / jnp.sum(exps, axis=1, keepdims=True)
    return jnp.sum(xo * alphas[:, :, None], axis=1)                    # (n, 2H)


# ----------------------------------- main ----------------------------------------
if __name__ == "__main__":
    key = jax.random.PRNGKey(0)
    kx, kp = jax.random.split(key)
    x = jax.random.normal(kx, (N, C, T, F), jnp.float32)
    params = init_params(kp)

    out = jax.block_until_ready(single_epoch_encoder(x, params))
    ref = jax.block_until_ready(reference_forward(x, params))

    assert out.shape == (N, 2 * H)
    np.testing.assert_allclose(np.asarray(out), np.asarray(ref), rtol=2e-3, atol=2e-3)
    print("KERNEL_OK")
</pallas_src>

<mosaic_0001>
module attributes {stable_mosaic.version = 11 : i64} {
  func.func @encoder_kernel(%arg0: i32, %arg1: memref<8x16x256xf32, #tpu.memory_space<vmem>>, %arg2: memref<256x32xf32, #tpu.memory_space<vmem>>, %arg3: memref<32x256xf32, #tpu.memory_space<vmem>>, %arg4: memref<32x256xf32, #tpu.memory_space<vmem>>, %arg5: memref<1x256xf32, #tpu.memory_space<vmem>>, %arg6: memref<64x256xf32, #tpu.memory_space<vmem>>, %arg7: memref<64x32xf32, #tpu.memory_space<vmem>>, %arg8: memref<1x32xf32, #tpu.memory_space<vmem>>, %arg9: memref<1x32xf32, #tpu.memory_space<vmem>>, %arg10: memref<8x128xf32, #tpu.memory_space<vmem>>, %arg11: memref<128x64xf32, #tpu.memory_space<vmem>>) attributes {dimension_semantics = [#tpu.dimension_semantics<parallel>], iteration_bounds = array<i64: 1>, scalar_prefetch = 0 : i64, scratch_operands = 1 : i64, tpu.core_type = #tpu.core_type<tc>, window_params = [{transform_indices = @transform_0, window_bounds = array<i64: 8, 16, 256>}, {pipeline_mode = #tpu.pipeline_mode<synchronous>, transform_indices = @transform_1, window_bounds = array<i64: 256, 32>}, {pipeline_mode = #tpu.pipeline_mode<synchronous>, transform_indices = @transform_2, window_bounds = array<i64: 32, 256>}, {pipeline_mode = #tpu.pipeline_mode<synchronous>, transform_indices = @transform_3, window_bounds = array<i64: 32, 256>}, {pipeline_mode = #tpu.pipeline_mode<synchronous>, transform_indices = @transform_4, window_bounds = array<i64: 1, 256>}, {pipeline_mode = #tpu.pipeline_mode<synchronous>, transform_indices = @transform_5, window_bounds = array<i64: 64, 256>}, {pipeline_mode = #tpu.pipeline_mode<synchronous>, transform_indices = @transform_6, window_bounds = array<i64: 64, 32>}, {pipeline_mode = #tpu.pipeline_mode<synchronous>, transform_indices = @transform_7, window_bounds = array<i64: 1, 32>}, {pipeline_mode = #tpu.pipeline_mode<synchronous>, transform_indices = @transform_8, window_bounds = array<i64: 1, 32>}, {transform_indices = @transform_9, window_bounds = array<i64: 8, 128>}]} {
    %c0 = arith.constant 0 : index
    %c0_0 = arith.constant 0 : index
    %c0_1 = arith.constant 0 : index
    %0 = vector.load %arg1[%c0, %c0_0, %c0_1] : memref<8x16x256xf32, #tpu.memory_space<vmem>>, vector<8x16x256xf32>
    %1 = vector.shape_cast %0 : vector<8x16x256xf32> to vector<128x256xf32>
    %c0_2 = arith.constant 0 : index
    %c0_3 = arith.constant 0 : index
    %2 = vector.load %arg2[%c0_2, %c0_3] : memref<256x32xf32, #tpu.memory_space<vmem>>, vector<256x32xf32>
    %cst = arith.constant dense<0.000000e+00> : vector<128x32xf32>
    %3 = tpu.matmul %1, %2, %cst {dimension_numbers = #tpu.dot_dimension_numbers<[1], [0], [0], [1], [0, 0, 1, 1], [], []>, precision = #tpu.contract_precision<fp32>} : vector<128x256xf32>, vector<256x32xf32>, vector<128x32xf32> -> vector<128x32xf32>
    %c0_4 = arith.constant 0 : index
    %c0_5 = arith.constant 0 : index
    %4 = vector.load %arg3[%c0_4, %c0_5] : memref<32x256xf32, #tpu.memory_space<vmem>>, vector<32x256xf32>
    %cst_6 = arith.constant dense<0.000000e+00> : vector<128x256xf32>
    %5 = tpu.matmul %3, %4, %cst_6 {dimension_numbers = #tpu.dot_dimension_numbers<[1], [0], [0], [1], [0, 0, 1, 1], [], []>, precision = #tpu.contract_precision<fp32>} : vector<128x32xf32>, vector<32x256xf32>, vector<128x256xf32> -> vector<128x256xf32>
    %c0_7 = arith.constant 0 : index
    %c0_8 = arith.constant 0 : index
    %6 = vector.load %arg5[%c0_7, %c0_8] : memref<1x256xf32, #tpu.memory_space<vmem>>, vector<1x256xf32>
    %7 = vector.broadcast %6 : vector<1x256xf32> to vector<128x256xf32>
    %8 = arith.addf %5, %7 : vector<128x256xf32>
    %c0_9 = arith.constant 0 : index
    %c0_10 = arith.constant 0 : index
    %9 = vector.load %arg4[%c0_9, %c0_10] : memref<32x256xf32, #tpu.memory_space<vmem>>, vector<32x256xf32>
    %cst_11 = arith.constant dense<0.000000e+00> : vector<128x256xf32>
    %10 = tpu.matmul %3, %9, %cst_11 {dimension_numbers = #tpu.dot_dimension_numbers<[1], [0], [0], [1], [0, 0, 1, 1], [], []>, precision = #tpu.contract_precision<fp32>} : vector<128x32xf32>, vector<32x256xf32>, vector<128x256xf32> -> vector<128x256xf32>
    %c0_12 = arith.constant 0 : index
    %c0_13 = arith.constant 0 : index
    %11 = vector.load %arg6[%c0_12, %c0_13] : memref<64x256xf32, #tpu.memory_space<vmem>>, vector<64x256xf32>
    %cst_14 = arith.constant 0.000000e+00 : f32
    %12 = vector.broadcast %cst_14 : f32 to vector<16x64xf32>
    %cst_15 = arith.constant 0.000000e+00 : f32
    %13 = vector.broadcast %cst_15 : f32 to vector<16x64xf32>
    %14 = vector.extract_strided_slice %8 {offsets = [0, 0], sizes = [16, 256], strides = [1, 1]} : vector<128x256xf32> to vector<16x256xf32>
    %15 = vector.extract_strided_slice %10 {offsets = [112, 0], sizes = [16, 256], strides = [1, 1]} : vector<128x256xf32> to vector<16x256xf32>
    %16 = arith.addf %14, %15 : vector<16x256xf32>
    %cst_16 = arith.constant dense<0.000000e+00> : vector<16x256xf32>
    %17 = tpu.matmul %12, %11, %cst_16 {dimension_numbers = #tpu.dot_dimension_numbers<[1], [0], [0], [1], [0, 0, 1, 1], [], []>, precision = #tpu.contract_precision<fp32>} : vector<16x64xf32>, vector<64x256xf32>, vector<16x256xf32> -> vector<16x256xf32>
    %18 = arith.addf %16, %17 : vector<16x256xf32>
    %19 = arith.negf %18 : vector<16x256xf32>
    %20 = math.exp %19 : vector<16x256xf32>
    %cst_17 = arith.constant 1.000000e+00 : f32
    %21 = vector.broadcast %cst_17 : f32 to vector<16x256xf32>
    %22 = arith.addf %21, %20 : vector<16x256xf32>
    %23 = arith.divf %21, %22 : vector<16x256xf32>
    %24 = vector.extract_strided_slice %23 {offsets = [0, 0], sizes = [16, 64], strides = [1, 1]} : vector<16x256xf32> to vector<16x64xf32>
    %25 = vector.extract_strided_slice %23 {offsets = [0, 64], sizes = [16, 64], strides = [1, 1]} : vector<16x256xf32> to vector<16x64xf32>
    %26 = vector.extract_strided_slice %23 {offsets = [0, 128], sizes = [16, 64], strides = [1, 1]} : vector<16x256xf32> to vector<16x64xf32>
    %27 = vector.extract_strided_slice %23 {offsets = [0, 192], sizes = [16, 64], strides = [1, 1]} : vector<16x256xf32> to vector<16x64xf32>
    %cst_18 = arith.constant 2.000000e+00 : f32
    %28 = vector.broadcast %cst_18 : f32 to vector<16x64xf32>
    %29 = arith.mulf %28, %27 : vector<16x64xf32>
    %cst_19 = arith.constant 1.000000e+00 : f32
    %30 = vector.broadcast %cst_19 : f32 to vector<16x64xf32>
    %31 = arith.subf %29, %30 : vector<16x64xf32>
    %32 = arith.mulf %25, %13 : vector<16x64xf32>
    %33 = arith.mulf %24, %31 : vector<16x64xf32>
    %34 = arith.addf %32, %33 : vector<16x64xf32>
    %35 = math.tanh %34 : vector<16x64xf32>
    %36 = arith.mulf %26, %35 : vector<16x64xf32>
    %37 = vector.extract_strided_slice %36 {offsets = [0, 0], sizes = [16, 32], strides = [1, 1]} : vector<16x64xf32> to vector<16x32xf32>
    %c0_20 = arith.constant 0 : index
    %c0_21 = arith.constant 0 : index
    %38 = vector.load %arg11[%c0_20, %c0_21] : memref<128x64xf32, #tpu.memory_space<vmem>>, vector<16x32xf32>
    tpu.vector_store %arg11[%c0_20, %c0_21], %37 {strides = array<i32>} : memref<128x64xf32, #tpu.memory_space<vmem>>, vector<16x32xf32>,
    %39 = vector.extract_strided_slice %36 {offsets = [0, 32], sizes = [16, 32], strides = [1, 1]} : vector<16x64xf32> to vector<16x32xf32>
    %c112 = arith.constant 112 : index
    %c32 = arith.constant 32 : index
    %40 = vector.load %arg11[%c112, %c32] : memref<128x64xf32, #tpu.memory_space<vmem>>, vector<16x32xf32>
    tpu.vector_store %arg11[%c112, %c32], %39 {strides = array<i32>} : memref<128x64xf32, #tpu.memory_space<vmem>>, vector<16x32xf32>,
    %41 = vector.extract_strided_slice %8 {offsets = [16, 0], sizes = [16, 256], strides = [1, 1]} : vector<128x256xf32> to vector<16x256xf32>
    %42 = vector.extract_strided_slice %10 {offsets = [96, 0], sizes = [16, 256], strides = [1, 1]} : vector<128x256xf32> to vector<16x256xf32>
    %43 = arith.addf %41, %42 : vector<16x256xf32>
    %cst_22 = arith.constant dense<0.000000e+00> : vector<16x256xf32>
    %44 = tpu.matmul %36, %11, %cst_22 {dimension_numbers = #tpu.dot_dimension_numbers<[1], [0], [0], [1], [0, 0, 1, 1], [], []>, precision = #tpu.contract_precision<fp32>} : vector<16x64xf32>, vector<64x256xf32>, vector<16x256xf32> -> vector<16x256xf32>
    %45 = arith.addf %43, %44 : vector<16x256xf32>
    %46 = arith.negf %45 : vector<16x256xf32>
    %47 = math.exp %46 : vector<16x256xf32>
    %cst_23 = arith.constant 1.000000e+00 : f32
    %48 = vector.broadcast %cst_23 : f32 to vector<16x256xf32>
    %49 = arith.addf %48, %47 : vector<16x256xf32>
    %50 = arith.divf %48, %49 : vector<16x256xf32>
    %51 = vector.extract_strided_slice %50 {offsets = [0, 0], sizes = [16, 64], strides = [1, 1]} : vector<16x256xf32> to vector<16x64xf32>
    %52 = vector.extract_strided_slice %50 {offsets = [0, 64], sizes = [16, 64], strides = [1, 1]} : vector<16x256xf32> to vector<16x64xf32>
    %53 = vector.extract_strided_slice %50 {offsets = [0, 128], sizes = [16, 64], strides = [1, 1]} : vector<16x256xf32> to vector<16x64xf32>
    %54 = vector.extract_strided_slice %50 {offsets = [0, 192], sizes = [16, 64], strides = [1, 1]} : vector<16x256xf32> to vector<16x64xf32>
    %cst_24 = arith.constant 2.000000e+00 : f32
    %55 = vector.broadcast %cst_24 : f32 to vector<16x64xf32>
    %56 = arith.mulf %55, %54 : vector<16x64xf32>
    %cst_25 = arith.constant 1.000000e+00 : f32
    %57 = vector.broadcast %cst_25 : f32 to vector<16x64xf32>
    %58 = arith.subf %56, %57 : vector<16x64xf32>
    %59 = arith.mulf %52, %34 : vector<16x64xf32>
    %60 = arith.mulf %51, %58 : vector<16x64xf32>
    %61 = arith.addf %59, %60 : vector<16x64xf32>
    %62 = math.tanh %61 : vector<16x64xf32>
    %63 = arith.mulf %53, %62 : vector<16x64xf32>
    %64 = vector.extract_strided_slice %63 {offsets = [0, 0], sizes = [16, 32], strides = [1, 1]} : vector<16x64xf32> to vector<16x32xf32>
    %c16 = arith.constant 16 : index
    %c0_26 = arith.constant 0 : index
    %65 = vector.load %arg11[%c16, %c0_26] : memref<128x64xf32, #tpu.memory_space<vmem>>, vector<16x32xf32>
    tpu.vector_store %arg11[%c16, %c0_26], %64 {strides = array<i32>} : memref<128x64xf32, #tpu.memory_space<vmem>>, vector<16x32xf32>,
    %66 = vector.extract_strided_slice %63 {offsets = [0, 32], sizes = [16, 32], strides = [1, 1]} : vector<16x64xf32> to vector<16x32xf32>
    %c96 = arith.constant 96 : index
    %c32_27 = arith.constant 32 : index
    %67 = vector.load %arg11[%c96, %c32_27] : memref<128x64xf32, #tpu.memory_space<vmem>>, vector<16x32xf32>
    tpu.vector_store %arg11[%c96, %c32_27], %66 {strides = array<i32>} : memref<128x64xf32, #tpu.memory_space<vmem>>, vector<16x32xf32>,
    %68 = vector.extract_strided_slice %8 {offsets = [32, 0], sizes = [16, 256], strides = [1, 1]} : vector<128x256xf32> to vector<16x256xf32>
    %69 = vector.extract_strided_slice %10 {offsets = [80, 0], sizes = [16, 256], strides = [1, 1]} : vector<128x256xf32> to vector<16x256xf32>
    %70 = arith.addf %68, %69 : vector<16x256xf32>
    %cst_28 = arith.constant dense<0.000000e+00> : vector<16x256xf32>
    %71 = tpu.matmul %63, %11, %cst_28 {dimension_numbers = #tpu.dot_dimension_numbers<[1], [0], [0], [1], [0, 0, 1, 1], [], []>, precision = #tpu.contract_precision<fp32>} : vector<16x64xf32>, vector<64x256xf32>, vector<16x256xf32> -> vector<16x256xf32>
    %72 = arith.addf %70, %71 : vector<16x256xf32>
    %73 = arith.negf %72 : vector<16x256xf32>
    %74 = math.exp %73 : vector<16x256xf32>
    %cst_29 = arith.constant 1.000000e+00 : f32
    %75 = vector.broadcast %cst_29 : f32 to vector<16x256xf32>
    %76 = arith.addf %75, %74 : vector<16x256xf32>
    %77 = arith.divf %75, %76 : vector<16x256xf32>
    %78 = vector.extract_strided_slice %77 {offsets = [0, 0], sizes = [16, 64], strides = [1, 1]} : vector<16x256xf32> to vector<16x64xf32>
    %79 = vector.extract_strided_slice %77 {offsets = [0, 64], sizes = [16, 64], strides = [1, 1]} : vector<16x256xf32> to vector<16x64xf32>
    %80 = vector.extract_strided_slice %77 {offsets = [0, 128], sizes = [16, 64], strides = [1, 1]} : vector<16x256xf32> to vector<16x64xf32>
    %81 = vector.extract_strided_slice %77 {offsets = [0, 192], sizes = [16, 64], strides = [1, 1]} : vector<16x256xf32> to vector<16x64xf32>
    %cst_30 = arith.constant 2.000000e+00 : f32
    %82 = vector.broadcast %cst_30 : f32 to vector<16x64xf32>
    %83 = arith.mulf %82, %81 : vector<16x64xf32>
    %cst_31 = arith.constant 1.000000e+00 : f32
    %84 = vector.broadcast %cst_31 : f32 to vector<16x64xf32>
    %85 = arith.subf %83, %84 : vector<16x64xf32>
    %86 = arith.mulf %79, %61 : vector<16x64xf32>
    %87 = arith.mulf %78, %85 : vector<16x64xf32>
    %88 = arith.addf %86, %87 : vector<16x64xf32>
    %89 = math.tanh %88 : vector<16x64xf32>
    %90 = arith.mulf %80, %89 : vector<16x64xf32>
    %91 = vector.extract_strided_slice %90 {offsets = [0, 0], sizes = [16, 32], strides = [1, 1]} : vector<16x64xf32> to vector<16x32xf32>
    %c32_32 = arith.constant 32 : index
    %c0_33 = arith.constant 0 : index
    %92 = vector.load %arg11[%c32_32, %c0_33] : memref<128x64xf32, #tpu.memory_space<vmem>>, vector<16x32xf32>
    tpu.vector_store %arg11[%c32_32, %c0_33], %91 {strides = array<i32>} : memref<128x64xf32, #tpu.memory_space<vmem>>, vector<16x32xf32>,
    %93 = vector.extract_strided_slice %90 {offsets = [0, 32], sizes = [16, 32], strides = [1, 1]} : vector<16x64xf32> to vector<16x32xf32>
    %c80 = arith.constant 80 : index
    %c32_34 = arith.constant 32 : index
    %94 = vector.load %arg11[%c80, %c32_34] : memref<128x64xf32, #tpu.memory_space<vmem>>, vector<16x32xf32>
    tpu.vector_store %arg11[%c80, %c32_34], %93 {strides = array<i32>} : memref<128x64xf32, #tpu.memory_space<vmem>>, vector<16x32xf32>,
    %95 = vector.extract_strided_slice %8 {offsets = [48, 0], sizes = [16, 256], strides = [1, 1]} : vector<128x256xf32> to vector<16x256xf32>
    %96 = vector.extract_strided_slice %10 {offsets = [64, 0], sizes = [16, 256], strides = [1, 1]} : vector<128x256xf32> to vector<16x256xf32>
    %97 = arith.addf %95, %96 : vector<16x256xf32>
    %cst_35 = arith.constant dense<0.000000e+00> : vector<16x256xf32>
    %98 = tpu.matmul %90, %11, %cst_35 {dimension_numbers = #tpu.dot_dimension_numbers<[1], [0], [0], [1], [0, 0, 1, 1], [], []>, precision = #tpu.contract_precision<fp32>} : vector<16x64xf32>, vector<64x256xf32>, vector<16x256xf32> -> vector<16x256xf32>
    %99 = arith.addf %97, %98 : vector<16x256xf32>
    %100 = arith.negf %99 : vector<16x256xf32>
    %101 = math.exp %100 : vector<16x256xf32>
    %cst_36 = arith.constant 1.000000e+00 : f32
    %102 = vector.broadcast %cst_36 : f32 to vector<16x256xf32>
    %103 = arith.addf %102, %101 : vector<16x256xf32>
    %104 = arith.divf %102, %103 : vector<16x256xf32>
    %105 = vector.extract_strided_slice %104 {offsets = [0, 0], sizes = [16, 64], strides = [1, 1]} : vector<16x256xf32> to vector<16x64xf32>
    %106 = vector.extract_strided_slice %104 {offsets = [0, 64], sizes = [16, 64], strides = [1, 1]} : vector<16x256xf32> to vector<16x64xf32>
    %107 = vector.extract_strided_slice %104 {offsets = [0, 128], sizes = [16, 64], strides = [1, 1]} : vector<16x256xf32> to vector<16x64xf32>
    %108 = vector.extract_strided_slice %104 {offsets = [0, 192], sizes = [16, 64], strides = [1, 1]} : vector<16x256xf32> to vector<16x64xf32>
    %cst_37 = arith.constant 2.000000e+00 : f32
    %109 = vector.broadcast %cst_37 : f32 to vector<16x64xf32>
    %110 = arith.mulf %109, %108 : vector<16x64xf32>
    %cst_38 = arith.constant 1.000000e+00 : f32
    %111 = vector.broadcast %cst_38 : f32 to vector<16x64xf32>
    %112 = arith.subf %110, %111 : vector<16x64xf32>
    %113 = arith.mulf %106, %88 : vector<16x64xf32>
    %114 = arith.mulf %105, %112 : vector<16x64xf32>
    %115 = arith.addf %113, %114 : vector<16x64xf32>
    %116 = math.tanh %115 : vector<16x64xf32>
    %117 = arith.mulf %107, %116 : vector<16x64xf32>
    %118 = vector.extract_strided_slice %117 {offsets = [0, 0], sizes = [16, 32], strides = [1, 1]} : vector<16x64xf32> to vector<16x32xf32>
    %c48 = arith.constant 48 : index
    %c0_39 = arith.constant 0 : index
    %119 = vector.load %arg11[%c48, %c0_39] : memref<128x64xf32, #tpu.memory_space<vmem>>, vector<16x32xf32>
    tpu.vector_store %arg11[%c48, %c0_39], %118 {strides = array<i32>} : memref<128x64xf32, #tpu.memory_space<vmem>>, vector<16x32xf32>,
    %120 = vector.extract_strided_slice %117 {offsets = [0, 32], sizes = [16, 32], strides = [1, 1]} : vector<16x64xf32> to vector<16x32xf32>
    %c64 = arith.constant 64 : index
    %c32_40 = arith.constant 32 : index
    %121 = vector.load %arg11[%c64, %c32_40] : memref<128x64xf32, #tpu.memory_space<vmem>>, vector<16x32xf32>
    tpu.vector_store %arg11[%c64, %c32_40], %120 {strides = array<i32>} : memref<128x64xf32, #tpu.memory_space<vmem>>, vector<16x32xf32>,
    %122 = vector.extract_strided_slice %8 {offsets = [64, 0], sizes = [16, 256], strides = [1, 1]} : vector<128x256xf32> to vector<16x256xf32>
    %123 = vector.extract_strided_slice %10 {offsets = [48, 0], sizes = [16, 256], strides = [1, 1]} : vector<128x256xf32> to vector<16x256xf32>
    %124 = arith.addf %122, %123 : vector<16x256xf32>
    %cst_41 = arith.constant dense<0.000000e+00> : vector<16x256xf32>
    %125 = tpu.matmul %117, %11, %cst_41 {dimension_numbers = #tpu.dot_dimension_numbers<[1], [0], [0], [1], [0, 0, 1, 1], [], []>, precision = #tpu.contract_precision<fp32>} : vector<16x64xf32>, vector<64x256xf32>, vector<16x256xf32> -> vector<16x256xf32>
    %126 = arith.addf %124, %125 : vector<16x256xf32>
    %127 = arith.negf %126 : vector<16x256xf32>
    %128 = math.exp %127 : vector<16x256xf32>
    %cst_42 = arith.constant 1.000000e+00 : f32
    %129 = vector.broadcast %cst_42 : f32 to vector<16x256xf32>
    %130 = arith.addf %129, %128 : vector<16x256xf32>
    %131 = arith.divf %129, %130 : vector<16x256xf32>
    %132 = vector.extract_strided_slice %131 {offsets = [0, 0], sizes = [16, 64], strides = [1, 1]} : vector<16x256xf32> to vector<16x64xf32>
    %133 = vector.extract_strided_slice %131 {offsets = [0, 64], sizes = [16, 64], strides = [1, 1]} : vector<16x256xf32> to vector<16x64xf32>
    %134 = vector.extract_strided_slice %131 {offsets = [0, 128], sizes = [16, 64], strides = [1, 1]} : vector<16x256xf32> to vector<16x64xf32>
    %135 = vector.extract_strided_slice %131 {offsets = [0, 192], sizes = [16, 64], strides = [1, 1]} : vector<16x256xf32> to vector<16x64xf32>
    %cst_43 = arith.constant 2.000000e+00 : f32
    %136 = vector.broadcast %cst_43 : f32 to vector<16x64xf32>
    %137 = arith.mulf %136, %135 : vector<16x64xf32>
    %cst_44 = arith.constant 1.000000e+00 : f32
    %138 = vector.broadcast %cst_44 : f32 to vector<16x64xf32>
    %139 = arith.subf %137, %138 : vector<16x64xf32>
    %140 = arith.mulf %133, %115 : vector<16x64xf32>
    %141 = arith.mulf %132, %139 : vector<16x64xf32>
    %142 = arith.addf %140, %141 : vector<16x64xf32>
    %143 = math.tanh %142 : vector<16x64xf32>
    %144 = arith.mulf %134, %143 : vector<16x64xf32>
    %145 = vector.extract_strided_slice %144 {offsets = [0, 0], sizes = [16, 32], strides = [1, 1]} : vector<16x64xf32> to vector<16x32xf32>
    %c64_45 = arith.constant 64 : index
    %c0_46 = arith.constant 0 : index
    %146 = vector.load %arg11[%c64_45, %c0_46] : memref<128x64xf32, #tpu.memory_space<vmem>>, vector<16x32xf32>
    tpu.vector_store %arg11[%c64_45, %c0_46], %145 {strides = array<i32>} : memref<128x64xf32, #tpu.memory_space<vmem>>, vector<16x32xf32>,
    %147 = vector.extract_strided_slice %144 {offsets = [0, 32], sizes = [16, 32], strides = [1, 1]} : vector<16x64xf32> to vector<16x32xf32>
    %c48_47 = arith.constant 48 : index
    %c32_48 = arith.constant 32 : index
    %148 = vector.load %arg11[%c48_47, %c32_48] : memref<128x64xf32, #tpu.memory_space<vmem>>, vector<16x32xf32>
    tpu.vector_store %arg11[%c48_47, %c32_48], %147 {strides = array<i32>} : memref<128x64xf32, #tpu.memory_space<vmem>>, vector<16x32xf32>,
    %149 = vector.extract_strided_slice %8 {offsets = [80, 0], sizes = [16, 256], strides = [1, 1]} : vector<128x256xf32> to vector<16x256xf32>
    %150 = vector.extract_strided_slice %10 {offsets = [32, 0], sizes = [16, 256], strides = [1, 1]} : vector<128x256xf32> to vector<16x256xf32>
    %151 = arith.addf %149, %150 : vector<16x256xf32>
    %cst_49 = arith.constant dense<0.000000e+00> : vector<16x256xf32>
    %152 = tpu.matmul %144, %11, %cst_49 {dimension_numbers = #tpu.dot_dimension_numbers<[1], [0], [0], [1], [0, 0, 1, 1], [], []>, precision = #tpu.contract_precision<fp32>} : vector<16x64xf32>, vector<64x256xf32>, vector<16x256xf32> -> vector<16x256xf32>
    %153 = arith.addf %151, %152 : vector<16x256xf32>
    %154 = arith.negf %153 : vector<16x256xf32>
    %155 = math.exp %154 : vector<16x256xf32>
    %cst_50 = arith.constant 1.000000e+00 : f32
    %156 = vector.broadcast %cst_50 : f32 to vector<16x256xf32>
    %157 = arith.addf %156, %155 : vector<16x256xf32>
    %158 = arith.divf %156, %157 : vector<16x256xf32>
    %159 = vector.extract_strided_slice %158 {offsets = [0, 0], sizes = [16, 64], strides = [1, 1]} : vector<16x256xf32> to vector<16x64xf32>
    %160 = vector.extract_strided_slice %158 {offsets = [0, 64], sizes = [16, 64], strides = [1, 1]} : vector<16x256xf32> to vector<16x64xf32>
    %161 = vector.extract_strided_slice %158 {offsets = [0, 128], sizes = [16, 64], strides = [1, 1]} : vector<16x256xf32> to vector<16x64xf32>
    %162 = vector.extract_strided_slice %158 {offsets = [0, 192], sizes = [16, 64], strides = [1, 1]} : vector<16x256xf32> to vector<16x64xf32>
    %cst_51 = arith.constant 2.000000e+00 : f32
    %163 = vector.broadcast %cst_51 : f32 to vector<16x64xf32>
    %164 = arith.mulf %163, %162 : vector<16x64xf32>
    %cst_52 = arith.constant 1.000000e+00 : f32
    %165 = vector.broadcast %cst_52 : f32 to vector<16x64xf32>
    %166 = arith.subf %164, %165 : vector<16x64xf32>
    %167 = arith.mulf %160, %142 : vector<16x64xf32>
    %168 = arith.mulf %159, %166 : vector<16x64xf32>
    %169 = arith.addf %167, %168 : vector<16x64xf32>
    %170 = math.tanh %169 : vector<16x64xf32>
    %171 = arith.mulf %161, %170 : vector<16x64xf32>
    %172 = vector.extract_strided_slice %171 {offsets = [0, 0], sizes = [16, 32], strides = [1, 1]} : vector<16x64xf32> to vector<16x32xf32>
    %c80_53 = arith.constant 80 : index
    %c0_54 = arith.constant 0 : index
    %173 = vector.load %arg11[%c80_53, %c0_54] : memref<128x64xf32, #tpu.memory_space<vmem>>, vector<16x32xf32>
    tpu.vector_store %arg11[%c80_53, %c0_54], %172 {strides = array<i32>} : memref<128x64xf32, #tpu.memory_space<vmem>>, vector<16x32xf32>,
    %174 = vector.extract_strided_slice %171 {offsets = [0, 32], sizes = [16, 32], strides = [1, 1]} : vector<16x64xf32> to vector<16x32xf32>
    %c32_55 = arith.constant 32 : index
    %c32_56 = arith.constant 32 : index
    %175 = vector.load %arg11[%c32_55, %c32_56] : memref<128x64xf32, #tpu.memory_space<vmem>>, vector<16x32xf32>
    tpu.vector_store %arg11[%c32_55, %c32_56], %174 {strides = array<i32>} : memref<128x64xf32, #tpu.memory_space<vmem>>, vector<16x32xf32>,
    %176 = vector.extract_strided_slice %8 {offsets = [96, 0], sizes = [16, 256], strides = [1, 1]} : vector<128x256xf32> to vector<16x256xf32>
    %177 = vector.extract_strided_slice %10 {offsets = [16, 0], sizes = [16, 256], strides = [1, 1]} : vector<128x256xf32> to vector<16x256xf32>
    %178 = arith.addf %176, %177 : vector<16x256xf32>
    %cst_57 = arith.constant dense<0.000000e+00> : vector<16x256xf32>
    %179 = tpu.matmul %171, %11, %cst_57 {dimension_numbers = #tpu.dot_dimension_numbers<[1], [0], [0], [1], [0, 0, 1, 1], [], []>, precision = #tpu.contract_precision<fp32>} : vector<16x64xf32>, vector<64x256xf32>, vector<16x256xf32> -> vector<16x256xf32>
    %180 = arith.addf %178, %179 : vector<16x256xf32>
    %181 = arith.negf %180 : vector<16x256xf32>
    %182 = math.exp %181 : vector<16x256xf32>
    %cst_58 = arith.constant 1.000000e+00 : f32
    %183 = vector.broadcast %cst_58 : f32 to vector<16x256xf32>
    %184 = arith.addf %183, %182 : vector<16x256xf32>
    %185 = arith.divf %183, %184 : vector<16x256xf32>
    %186 = vector.extract_strided_slice %185 {offsets = [0, 0], sizes = [16, 64], strides = [1, 1]} : vector<16x256xf32> to vector<16x64xf32>
    %187 = vector.extract_strided_slice %185 {offsets = [0, 64], sizes = [16, 64], strides = [1, 1]} : vector<16x256xf32> to vector<16x64xf32>
    %188 = vector.extract_strided_slice %185 {offsets = [0, 128], sizes = [16, 64], strides = [1, 1]} : vector<16x256xf32> to vector<16x64xf32>
    %189 = vector.extract_strided_slice %185 {offsets = [0, 192], sizes = [16, 64], strides = [1, 1]} : vector<16x256xf32> to vector<16x64xf32>
    %cst_59 = arith.constant 2.000000e+00 : f32
    %190 = vector.broadcast %cst_59 : f32 to vector<16x64xf32>
    %191 = arith.mulf %190, %189 : vector<16x64xf32>
    %cst_60 = arith.constant 1.000000e+00 : f32
    %192 = vector.broadcast %cst_60 : f32 to vector<16x64xf32>
    %193 = arith.subf %191, %192 : vector<16x64xf32>
    %194 = arith.mulf %187, %169 : vector<16x64xf32>
    %195 = arith.mulf %186, %193 : vector<16x64xf32>
    %196 = arith.addf %194, %195 : vector<16x64xf32>
    %197 = math.tanh %196 : vector<16x64xf32>
    %198 = arith.mulf %188, %197 : vector<16x64xf32>
    %199 = vector.extract_strided_slice %198 {offsets = [0, 0], sizes = [16, 32], strides = [1, 1]} : vector<16x64xf32> to vector<16x32xf32>
    %c96_61 = arith.constant 96 : index
    %c0_62 = arith.constant 0 : index
    %200 = vector.load %arg11[%c96_61, %c0_62] : memref<128x64xf32, #tpu.memory_space<vmem>>, vector<16x32xf32>
    tpu.vector_store %arg11[%c96_61, %c0_62], %199 {strides = array<i32>} : memref<128x64xf32, #tpu.memory_space<vmem>>, vector<16x32xf32>,
    %201 = vector.extract_strided_slice %198 {offsets = [0, 32], sizes = [16, 32], strides = [1, 1]} : vector<16x64xf32> to vector<16x32xf32>
    %c16_63 = arith.constant 16 : index
    %c32_64 = arith.constant 32 : index
    %202 = vector.load %arg11[%c16_63, %c32_64] : memref<128x64xf32, #tpu.memory_space<vmem>>, vector<16x32xf32>
    tpu.vector_store %arg11[%c16_63, %c32_64], %201 {strides = array<i32>} : memref<128x64xf32, #tpu.memory_space<vmem>>, vector<16x32xf32>,
    %203 = vector.extract_strided_slice %8 {offsets = [112, 0], sizes = [16, 256], strides = [1, 1]} : vector<128x256xf32> to vector<16x256xf32>
    %204 = vector.extract_strided_slice %10 {offsets = [0, 0], sizes = [16, 256], strides = [1, 1]} : vector<128x256xf32> to vector<16x256xf32>
    %205 = arith.addf %203, %204 : vector<16x256xf32>
    %cst_65 = arith.constant dense<0.000000e+00> : vector<16x256xf32>
    %206 = tpu.matmul %198, %11, %cst_65 {dimension_numbers = #tpu.dot_dimension_numbers<[1], [0], [0], [1], [0, 0, 1, 1], [], []>, precision = #tpu.contract_precision<fp32>} : vector<16x64xf32>, vector<64x256xf32>, vector<16x256xf32> -> vector<16x256xf32>
    %207 = arith.addf %205, %206 : vector<16x256xf32>
    %208 = arith.negf %207 : vector<16x256xf32>
    %209 = math.exp %208 : vector<16x256xf32>
    %cst_66 = arith.constant 1.000000e+00 : f32
    %210 = vector.broadcast %cst_66 : f32 to vector<16x256xf32>
    %211 = arith.addf %210, %209 : vector<16x256xf32>
    %212 = arith.divf %210, %211 : vector<16x256xf32>
    %213 = vector.extract_strided_slice %212 {offsets = [0, 0], sizes = [16, 64], strides = [1, 1]} : vector<16x256xf32> to vector<16x64xf32>
    %214 = vector.extract_strided_slice %212 {offsets = [0, 64], sizes = [16, 64], strides = [1, 1]} : vector<16x256xf32> to vector<16x64xf32>
    %215 = vector.extract_strided_slice %212 {offsets = [0, 128], sizes = [16, 64], strides = [1, 1]} : vector<16x256xf32> to vector<16x64xf32>
    %216 = vector.extract_strided_slice %212 {offsets = [0, 192], sizes = [16, 64], strides = [1, 1]} : vector<16x256xf32> to vector<16x64xf32>
    %cst_67 = arith.constant 2.000000e+00 : f32
    %217 = vector.broadcast %cst_67 : f32 to vector<16x64xf32>
    %218 = arith.mulf %217, %216 : vector<16x64xf32>
    %cst_68 = arith.constant 1.000000e+00 : f32
    %219 = vector.broadcast %cst_68 : f32 to vector<16x64xf32>
    %220 = arith.subf %218, %219 : vector<16x64xf32>
    %221 = arith.mulf %214, %196 : vector<16x64xf32>
    %222 = arith.mulf %213, %220 : vector<16x64xf32>
    %223 = arith.addf %221, %222 : vector<16x64xf32>
    %224 = math.tanh %223 : vector<16x64xf32>
    %225 = arith.mulf %215, %224 : vector<16x64xf32>
    %226 = vector.extract_strided_slice %225 {offsets = [0, 0], sizes = [16, 32], strides = [1, 1]} : vector<16x64xf32> to vector<16x32xf32>
    %c112_69 = arith.constant 112 : index
    %c0_70 = arith.constant 0 : index
    %227 = vector.load %arg11[%c112_69, %c0_70] : memref<128x64xf32, #tpu.memory_space<vmem>>, vector<16x32xf32>
    tpu.vector_store %arg11[%c112_69, %c0_70], %226 {strides = array<i32>} : memref<128x64xf32, #tpu.memory_space<vmem>>, vector<16x32xf32>,
    %228 = vector.extract_strided_slice %225 {offsets = [0, 32], sizes = [16, 32], strides = [1, 1]} : vector<16x64xf32> to vector<16x32xf32>
    %c0_71 = arith.constant 0 : index
    %c32_72 = arith.constant 32 : index
    %229 = vector.load %arg11[%c0_71, %c32_72] : memref<128x64xf32, #tpu.memory_space<vmem>>, vector<16x32xf32>
    tpu.vector_store %arg11[%c0_71, %c32_72], %228 {strides = array<i32>} : memref<128x64xf32, #tpu.memory_space<vmem>>, vector<16x32xf32>,
    %c0_73 = arith.constant 0 : index
    %c0_74 = arith.constant 0 : index
    %230 = vector.load %arg11[%c0_73, %c0_74] : memref<128x64xf32, #tpu.memory_space<vmem>>, vector<128x64xf32>
    %c0_75 = arith.constant 0 : index
    %c0_76 = arith.constant 0 : index
    %231 = vector.load %arg7[%c0_75, %c0_76] : memref<64x32xf32, #tpu.memory_space<vmem>>, vector<64x32xf32>
    %cst_77 = arith.constant dense<0.000000e+00> : vector<128x32xf32>
    %232 = tpu.matmul %230, %231, %cst_77 {dimension_numbers = #tpu.dot_dimension_numbers<[1], [0], [0], [1], [0, 0, 1, 1], [], []>, precision = #tpu.contract_precision<fp32>} : vector<128x64xf32>, vector<64x32xf32>, vector<128x32xf32> -> vector<128x32xf32>
    %c0_78 = arith.constant 0 : index
    %c0_79 = arith.constant 0 : index
    %233 = vector.load %arg8[%c0_78, %c0_79] : memref<1x32xf32, #tpu.memory_space<vmem>>, vector<1x32xf32>
    %234 = vector.broadcast %233 : vector<1x32xf32> to vector<128x32xf32>
    %235 = arith.addf %232, %234 : vector<128x32xf32>
    %236 = math.tanh %235 : vector<128x32xf32>
    %c0_80 = arith.constant 0 : index
    %c0_81 = arith.constant 0 : index
    %237 = vector.load %arg9[%c0_80, %c0_81] : memref<1x32xf32, #tpu.memory_space<vmem>>, vector<1x32xf32>
    %238 = vector.broadcast %237 : vector<1x32xf32> to vector<128x32xf32>
    %239 = arith.mulf %236, %238 : vector<128x32xf32>
    %cst_82 = arith.constant dense<0.000000e+00> : vector<128xf32>
    %240 = vector.multi_reduction <add>, %239, %cst_82 [1] : vector<128x32xf32> to vector<128xf32>
    %241 = vector.shape_cast %240 : vector<128xf32> to vector<128x1xf32>
    %242 = math.exp %241 : vector<128x1xf32>
    %243 = vector.shape_cast %242 : vector<128x1xf32> to vector<8x16x1xf32>
    %cst_83 = arith.constant dense<0.000000e+00> : vector<16x1xf32>
    %244 = vector.multi_reduction <add>, %243, %cst_83 [0] : vector<8x16x1xf32> to vector<16x1xf32>
    %cst_84 = arith.constant 1.000000e+00 : f32
    %245 = vector.broadcast %cst_84 : f32 to vector<16x1xf32>
    %246 = arith.divf %245, %244 : vector<16x1xf32>
    %247 = vector.shape_cast %246 : vector<16x1xf32> to vector<1x16x1xf32>
    %248 = vector.broadcast %247 : vector<1x16x1xf32> to vector<8x16x1xf32>
    %249 = arith.mulf %243, %248 : vector<8x16x1xf32>
    %250 = vector.shape_cast %230 : vector<128x64xf32> to vector<8x16x64xf32>
    %251 = vector.broadcast %249 : vector<8x16x1xf32> to vector<8x16x64xf32>
    %252 = arith.mulf %250, %251 : vector<8x16x64xf32>
    %cst_85 = arith.constant dense<0.000000e+00> : vector<16x64xf32>
    %253 = vector.multi_reduction <add>, %252, %cst_85 [0] : vector<8x16x64xf32> to vector<16x64xf32>
    %254 = vector.extract_strided_slice %253 {offsets = [0, 0], sizes = [8, 64], strides = [1, 1]} : vector<16x64xf32> to vector<8x64xf32>
    %255 = vector.extract_strided_slice %253 {offsets = [8, 0], sizes = [8, 64], strides = [1, 1]} : vector<16x64xf32> to vector<8x64xf32>
    %256 = tpu.concatenate %254, %255 in 1 : vector<8x64xf32>, vector<8x64xf32> -> vector<8x128xf32>
    %c0_86 = arith.constant 0 : index
    %c0_87 = arith.constant 0 : index
    %257 = vector.load %arg10[%c0_86, %c0_87] : memref<8x128xf32, #tpu.memory_space<vmem>>, vector<8x128xf32>
    tpu.vector_store %arg10[%c0_86, %c0_87], %256 {strides = array<i32>} : memref<8x128xf32, #tpu.memory_space<vmem>>, vector<8x128xf32>,
    return
  }
  func.func @transform_0(%arg0: i32) -> (i32, i32, i32) {
    %c0_i32 = arith.constant 0 : i32
    %c0_i32_0 = arith.constant 0 : i32
    %c0_i32_1 = arith.constant 0 : i32
    return %c0_i32, %arg0, %c0_i32_0 : i32, i32, i32
  }
  func.func @transform_1(%arg0: i32) -> (i32, i32) {
    %c0_i32 = arith.constant 0 : i32
    %c0_i32_0 = arith.constant 0 : i32
    %c0_i32_1 = arith.constant 0 : i32
    return %c0_i32, %c0_i32_0 : i32, i32
  }
  func.func @transform_2(%arg0: i32) -> (i32, i32) {
    %c0_i32 = arith.constant 0 : i32
    %c0_i32_0 = arith.constant 0 : i32
    %c0_i32_1 = arith.constant 0 : i32
    return %c0_i32, %c0_i32_0 : i32, i32
  }
  func.func @transform_3(%arg0: i32) -> (i32, i32) {
    %c0_i32 = arith.constant 0 : i32
    %c0_i32_0 = arith.constant 0 : i32
    %c0_i32_1 = arith.constant 0 : i32
    return %c0_i32, %c0_i32_0 : i32, i32
  }
  func.func @transform_4(%arg0: i32) -> (i32, i32) {
    %c0_i32 = arith.constant 0 : i32
    %c0_i32_0 = arith.constant 0 : i32
    %c0_i32_1 = arith.constant 0 : i32
    return %c0_i32, %c0_i32_0 : i32, i32
  }
  func.func @transform_5(%arg0: i32) -> (i32, i32) {
    %c0_i32 = arith.constant 0 : i32
    %c0_i32_0 = arith.constant 0 : i32
    %c0_i32_1 = arith.constant 0 : i32
    return %c0_i32, %c0_i32_0 : i32, i32
  }
  func.func @transform_6(%arg0: i32) -> (i32, i32) {
    %c0_i32 = arith.constant 0 : i32
    %c0_i32_0 = arith.constant 0 : i32
    %c0_i32_1 = arith.constant 0 : i32
    return %c0_i32, %c0_i32_0 : i32, i32
  }
  func.func @transform_7(%arg0: i32) -> (i32, i32) {
    %c0_i32 = arith.constant 0 : i32
    %c0_i32_0 = arith.constant 0 : i32
    %c0_i32_1 = arith.constant 0 : i32
    return %c0_i32, %c0_i32_0 : i32, i32
  }
  func.func @transform_8(%arg0: i32) -> (i32, i32) {
    %c0_i32 = arith.constant 0 : i32
    %c0_i32_0 = arith.constant 0 : i32
    %c0_i32_1 = arith.constant 0 : i32
    return %c0_i32, %c0_i32_0 : i32, i32
  }
  func.func @transform_9(%arg0: i32) -> (i32, i32) {
    %c0_i32 = arith.constant 0 : i32
    %c0_i32_0 = arith.constant 0 : i32
    return %arg0, %c0_i32 : i32, i32
  }
}

</mosaic_0001>

<bundles_post_ra>
// kernel: tpu_custom_call.1
= control target key start
LH: loop header
LB: loop body
LE: loop exit
PB: predicated region body
PF: predicated region fallthrough
CT: control target
= control target key end

     0   :  { %14 = vsyncpa [#allocation4], 0  ;;  %s18596_s0 = inlined_call_operand.vmem [shape: f32[8,16,256], index: 0, kind: input, shape index: {}]   ;;  %s18597_s1 = inlined_call_operand.vmem [shape: f32[256,32], index: 1, kind: input, shape index: {}]   ;;  %s18598_s2 = inlined_call_operand.hbm [shape: f32[32,256], index: 2, kind: input, shape index: {}]   ;;  %s18599_s3 = inlined_call_operand.hbm [shape: f32[32,256], index: 3, kind: input, shape index: {}]   ;;  %s18600_s4 = inlined_call_operand.vmem [shape: f32[1,256], index: 4, kind: input, shape index: {}]   ;;  %s18601_s5 = inlined_call_operand.vmem [shape: f32[64,256], index: 5, kind: input, shape index: {}]   ;;  %s18602_s6 = inlined_call_operand.vmem [shape: f32[64,32], index: 6, kind: input, shape index: {}]   ;;  %s18603_s7 = inlined_call_operand.vmem [shape: f32[1,32], index: 7, kind: input, shape index: {}]   ;;  %s18604_s8 = inlined_call_operand.vmem [shape: f32[1,32], index: 8, kind: input, shape index: {}]   ;;  %s18605_s9 = inlined_call_operand.hbm [shape: f32[8,128], index: 9, kind: output, shape index: {}]  }
   0x1   :  { %15 = vsyncpa [#allocation7], 0 }
   0x2   :  { %16 = vsyncpa [#allocation5], 0  ;;  %s13396_s30 = smov [#allocation3]  }
   0x3   :  { %s26_s10 = sshll.u32 %s13396_s30, 4  ;;  %s27_s10 = int_to_ptr.vmem [resolvable:$true] %s26_s10 }
   0x4   :  { %s13338_s11 = scalar_lea.vmem %s27_s10, 1024  ;;  %p13343_p1 = scmp.lt.s32.totalorder %s27_s10, %s27_s10 }
   0x5   :  { %p13339_p0 = scmp.ne.s32.totalorder %s27_s10, %s13338_s11  ;;  %p13344_p2 = scmp.lt.s32.totalorder %s13338_s11, %s13338_s11 }
   0x7   :  { %p13345_p3 = por %p13344_p2, %p13343_p1 }
   0x9   :  { %p13346_p4 = pnand %p13345_p3, %p13339_p0 }
   0xb   :  { %13349 = shalt.err (!%p13346_p4)
}
   0xc   :  { %s13397_s12 = smov 256   ;;  %s13398_s13 = smov 16  }
   0xd   :  { %32 = dma.hbm_to_vmem [thread:$0]  %s18598_s2, 1024, %s27_s10, [#allocation4], %s13397_s12, %s13397_s12, %s13398_s13  }
   0xe   :  { %s13399_s16 = smov [#allocation6]  }
   0xf   :  { %s38_s17 = sshll.u32 %s13399_s16, 4  ;;  %s39_s17 = int_to_ptr.vmem [resolvable:$true] %s38_s17 }
  0x10   :  { %s13358_s18 = scalar_lea.vmem %s39_s17, 1024  ;;  %p13363_p6 = scmp.lt.s32.totalorder %s39_s17, %s39_s17 }
  0x11   :  { %p13359_p5 = scmp.ne.s32.totalorder %s39_s17, %s13358_s18  ;;  %p13364_p7 = scmp.lt.s32.totalorder %s13358_s18, %s13358_s18 }
  0x13   :  { %p13365_p8 = por %p13364_p7, %p13363_p6 }
  0x15   :  { %p13366_p9 = pnand %p13365_p8, %p13359_p5 }
  0x17   :  { %13369 = shalt.err (!%p13366_p9)
}
  0x18   :  { %44 = dma.hbm_to_vmem [thread:$0]  %s18599_s3, 1024, %s39_s17, [#allocation7], %s13397_s12, %s13397_s12, %s13398_s13  }
  0x19   :  { %13390 = dma.done.wait [#allocation4], 1024  }
  0x1a   :  { %13391 = vsyncadd [#allocation4], 4294966272 }
  0x1b   :  { %13392 = dma.done.wait [#allocation7], 1024  }
  0x1c   :  { %13393 = vsyncadd [#allocation7], 4294966272  ;;  %v124_v0 = vld [vmem:[%s18597_s1 + $0xf8] sm:$0xff]  ;;  %v123_v2 = vld [vmem:[%s18597_s1 + $0xf0] sm:$0xff]  ;;  %vm1847_vm0 = vcmask 261120   ;;  %vm4480_vm1 = vcmask 523264  }
  0x1d   :  { %v108_v1 = vld [vmem:[%s18597_s1 + $0x78] sm:$0xff]  ;;  %v13468_v3 = vand.u32 4294901760, %v124_v0  ;;  %v13472_v5 = vand.u32 4294901760, %v123_v2  ;;  %v107_v6 = vld [vmem:[%s18597_s1 + $0x70] sm:$0xff]  ;;  %v122_v7 = vld [vmem:[%s18597_s1 + $0xe8] sm:$0xff]  ;;  %vm5248_vm2 = vcmask 523520  }
  0x1e   :  { %v13470_v4 = vand.u32 4294901760, %v108_v1  ;;  %v106_v8 = vld [vmem:[%s18597_s1 + $0x68] sm:$0xff]  ;;  %v13483_v9 = vand.u32 4294901760, %v107_v6  ;;  %v13485_v10 = vand.u32 4294901760, %v122_v7  ;;  %v121_v12 = vld [vmem:[%s18597_s1 + $0xe0] sm:$0xff]  ;;  %v120_v14 = vld [vmem:[%s18597_s1 + $0xd8] sm:$0xff] }
  0x1f   :  { %v13487_v11 = vand.u32 4294901760, %v106_v8  ;;  %v105_v13 = vld [vmem:[%s18597_s1 + $0x60] sm:$0xff]  ;;  %12215 = vmatprep.subr.mxu0 %v13468_v3  ;;  %v13499_v15 = vand.u32 4294901760, %v121_v12  ;;  %v13503_v17 = vand.u32 4294901760, %v120_v14  ;;  %v13506_v18 = vsub.f32 %v124_v0, %v13468_v3  ;;  %v13511_v19 = vld [vmem:[%s18597_s1 + $0x58] sm:$0xff]  ;;  %v13516_v20 = vld [vmem:[%s18597_s1 + $0xd0] sm:$0xff] }
  0x20   :  { %19027 = vst [vmem:[#allocation12_spill] sm:$0xff] %v13485_v10  ;;  %v13501_v16 = vand.u32 4294901760, %v105_v13  ;;  %v13521_v21 = vld [vmem:[%s18597_s1 + $0x50] sm:$0xff]  ;;  %12216 = vmatpush3.msra.mxu0 %v13470_v4  ;;  %v13525_v22 = vand.u32 4294901760, %v13511_v19  ;;  %v13528_v23 = vsub.f32 %v108_v1, %v13470_v4  ;;  %v13531_v24 = vand.u32 4294901760, %v13516_v20  ;;  %v13539_v26 = vld [vmem:[%s18597_s1 + $0xc8] sm:$0xff] }
  0x21   :  { %19028 = vst [vmem:[#allocation13_spill] sm:$0xff] %v13506_v18  ;;  %v13534_v25 = vsub.f32 %v123_v2, %v13472_v5  ;;  %v13544_v27 = vld [vmem:[%s18597_s1 + $0x48] sm:$0xff]  ;;  %v13549_v28 = vld [vmem:[%s18597_s1 + $0xc0] sm:$0xff]  ;;  %12217 = vmatprep.subr.mxu0 %v13472_v5  ;;  %v18619_v29 = vand.u32 4294901760, %v13506_v18  ;;  %v13554_v30 = vand.u32 4294901760, %v13521_v21  ;;  %v13557_v31 = vsub.f32 %v107_v6, %v13483_v9  ;;  %v13601_v46 = vld [vmem:[%s18597_s1 + $0xb8] sm:$0xff] }
  0x22   :  { %19029 = vst [vmem:[#allocation14_spill] sm:$0xff] %v13525_v22  ;;  %19030 = vst [vmem:[#allocation15_spill] sm:$0xff] %v13528_v23  ;;  %v13560_v32 = vand.u32 4294901760, %v13539_v26  ;;  %12218 = vmatpush3.msra.mxu0 %v13483_v9  ;;  %v18618_v33 = vand.u32 4294901760, %v13528_v23  ;;  %v13566_v35 = vsub.f32 %v122_v7, %v13485_v10  ;;  %v13569_v36 = vand.u32 4294901760, %v13544_v27  ;;  %v13574_v37 = vld [vmem:[%s18597_s1 + $0x40] sm:$0xff] }
  0x23   :  { %19031 = vst [vmem:[#allocation16_spill] sm:$0xff] %v13531_v24  ;;  %19032 = vst [vmem:[#allocation17_spill] sm:$0xff] %v13534_v25  ;;  %v18616_v34 = vand.u32 4294901760, %v13534_v25  ;;  %12219 = vmatprep.subr.mxu0 %v13485_v10  ;;  %v578_v38 = vsub.f32 %v13506_v18, %v18619_v29  ;;  %v18615_v39 = vand.u32 4294901760, %v13557_v31  ;;  %v13582_v40 = vsub.f32 %v106_v8, %v13487_v11  ;;  %v13614_v51 = vld [vmem:[%s18597_s1 + $0x38] sm:$0xff]  ;;  %v13624_v56 = vld [vmem:[%s18597_s1 + $0xb0] sm:$0xff] }
  0x24   :  { %19033 = vst [vmem:[#allocation18_spill] sm:$0xff] %v13557_v31  ;;  %19034 = vst [vmem:[#allocation19_spill] sm:$0xff] %v13566_v35  ;;  %v13585_v41 = vand.u32 4294901760, %v13549_v28  ;;  %12220 = vmatpush3.msra.mxu0 %v13487_v11  ;;  %v466_v42 = vsub.f32 %v13528_v23, %v18618_v33  ;;  %v18613_v44 = vand.u32 4294901760, %v13566_v35  ;;  %v13596_v45 = vsub.f32 %v121_v12, %v13499_v15  ;;  %v13639_v61 = vld [vmem:[%s18597_s1 + $0x30] sm:$0xff]  ;;  %v13654_v2 = vld [vmem:[%s18597_s1 + $0xa8] sm:$0xff] }
  0x25   :  { %19035 = vst [vmem:[#allocation20_spill] sm:$0xff] %v13582_v40  ;;  %v585_v43 = vsub.f32 %v13534_v25, %v18616_v34  ;;  %12221 = vmatprep.subr.mxu0 %v13499_v15  ;;  %v579_v47 = vand.u32 4294901760, %v578_v38  ;;  %v473_v48 = vsub.f32 %v13557_v31, %v18615_v39  ;;  %v18611_v49 = vand.u32 4294901760, %v13582_v40  ;;  %v13790_v33 = vld [vmem:[%s18597_s1 + $0x88] sm:$0xff] }
  0x26   :  { %19036 = vst [vmem:[#allocation21_spill] sm:$0xff] %v13585_v41  ;;  %19037 = vst [vmem:[#allocation22_spill] sm:$0xff] %v13596_v45  ;;  %v13609_v50 = vand.u32 4294901760, %v13574_v37  ;;  %12222 = vmatpush3.msra.mxu0 %v13501_v16  ;;  %v467_v52 = vand.u32 4294901760, %v466_v42  ;;  %v592_v54 = vsub.f32 %v13566_v35, %v18613_v44  ;;  %v18610_v55 = vand.u32 4294901760, %v13596_v45  ;;  %v13763_v44 = vld [vmem:[%s18597_s1 + $0x90] sm:$0xff] }
  0x27   :  { %v586_v53 = vand.u32 4294901760, %v585_v43  ;;  %12223 = vmatprep.subr.mxu0 %v13503_v17  ;;  %12295 = vmatprep.subr.mxu1 %v579_v47  ;;  %v474_v57 = vand.u32 4294901760, %v473_v48  ;;  %v480_v58 = vsub.f32 %v13582_v40, %v18611_v49  ;;  %v13631_v59 = vsub.f32 %v105_v13, %v13501_v16  ;;  %v13668_v13 = vld [vmem:[%s18597_s1 + $0x28] sm:$0xff]  ;;  %v13747_v49 = vld [vmem:[%s18597_s1 + $0x18] sm:$0xff] }
  0x28   :  { %19038 = vst [vmem:[#allocation23_spill] sm:$0xff] %v13609_v50  ;;  %v13634_v60 = vand.u32 4294901760, %v13601_v46  ;;  %12224 = vmatpush3.msra.mxu0 %v13525_v22  ;;  %12296 = vmatpush3.msra.mxu1 %v467_v52  ;;  %v593_v62 = vand.u32 4294901760, %v592_v54  ;;  %v599_v63 = vsub.f32 %v13596_v45, %v18610_v55  ;;  %v13646_v0 = vsub.f32 %v120_v14, %v13503_v17 }
  0x29   :  { %19039 = vst [vmem:[#allocation24_spill] sm:$0xff] %v13631_v59  ;;  %v13649_v1 = vand.u32 4294901760, %v13614_v51  ;;  %12225 = vmatprep.subr.mxu0 %v13531_v24  ;;  %12297 = vmatprep.subr.mxu1 %v586_v53  ;;  %v481_v6 = vand.u32 4294901760, %v480_v58  ;;  %v18608_v7 = vand.u32 4294901760, %v13631_v59  ;;  %v13660_v8 = vsub.f32 %v13511_v19, %v13525_v22 }
  0x2a   :  { %19040 = vst [vmem:[#allocation25_spill] sm:$0xff] %v13634_v60  ;;  %v13663_v12 = vand.u32 4294901760, %v13624_v56  ;;  %12226 = vmatpush3.msra.mxu0 %v13554_v30  ;;  %12298 = vmatpush3.msra.mxu1 %v474_v57  ;;  %v600_v14 = vand.u32 4294901760, %v599_v63  ;;  %v18606_v38 = vand.u32 4294901760, %v13646_v0  ;;  %v13674_v42 = vsub.f32 %v13516_v20, %v13531_v24  ;;  %v13694_v20 = vld [vmem:[%s18597_s1 + $0xa0] sm:$0xff] }
  0x2b   :  { %19041 = vst [vmem:[#allocation26_spill] sm:$0xff] %v13649_v1  ;;  %v13677_v19 = vand.u32 4294901760, %v13639_v61  ;;  %12227 = vmatprep.subr.mxu0 %v13560_v32  ;;  %12299 = vmatprep.subr.mxu1 %v593_v62  ;;  %v487_v43 = vsub.f32 %v13631_v59, %v18608_v7  ;;  %v18607_v47 = vand.u32 4294901760, %v13660_v8  ;;  %v13686_v48 = vsub.f32 %v13521_v21, %v13554_v30 }
  0x2c   :  { %19042 = vst [vmem:[#allocation27_spill] sm:$0xff] %v13663_v12  ;;  %v13689_v52 = vand.u32 4294901760, %v13654_v2  ;;  %12228 = vmatpush3.msra.mxu0 %v13569_v36  ;;  %12300 = vmatpush3.msra.mxu1 %v481_v6  ;;  %v606_v53 = vsub.f32 %v13646_v0, %v18606_v38  ;;  %v18609_v54 = vand.u32 4294901760, %v13674_v42  ;;  %v13703_v21 = vsub.f32 %v13539_v26, %v13560_v32  ;;  %v13720_v26 = vld [vmem:[%s18597_s1 + $0x20] sm:$0xff] }
  0x2d   :  { %19043 = vst [vmem:[#allocation28_spill] sm:$0xff] %v13677_v19  ;;  %v13706_v57 = vand.u32 4294901760, %v13668_v13  ;;  %12229 = vmatprep.subr.mxu0 %v13585_v41  ;;  %12301 = vmatprep.subr.mxu1 %v600_v14  ;;  %v488_v58 = vand.u32 4294901760, %v487_v43  ;;  %v494_v62 = vsub.f32 %v13660_v8, %v18607_v47  ;;  %v18612_v63 = vand.u32 4294901760, %v13686_v48 }
  0x2e   :  { %19044 = vst [vmem:[#allocation29_spill] sm:$0xff] %v13689_v52  ;;  %v13715_v6 = vsub.f32 %v13544_v27, %v13569_v36  ;;  %12230 = vmatpush3.msra.mxu0 %v13609_v50  ;;  %v607_v38 = vand.u32 4294901760, %v606_v53  ;;  %v613_v14 = vsub.f32 %v13674_v42, %v18609_v54  ;;  %v18614_v43 = vand.u32 4294901760, %v13703_v21  ;;  %v13733_v27 = vld [vmem:[%s18597_s1 + $0x98] sm:$0xff] }
  0x2f   :  { %19045 = vst [vmem:[#allocation30_spill] sm:$0xff] %v13706_v57  ;;  %v13728_v47 = vand.u32 4294901760, %v13694_v20  ;;  %12302 = vmatpush3.msra.mxu1 %v488_v58  ;;  %12231 = vmatprep.subr.mxu0 %v13634_v60  ;;  %v495_v7 = vand.u32 4294901760, %v494_v62  ;;  %v501_v53 = vsub.f32 %v13686_v48, %v18612_v63  ;;  %v13742_v55 = vsub.f32 %v13549_v28, %v13585_v41 }
  0x30   :  { %v18617_v54 = vand.u32 4294901760, %v13715_v6  ;;  %12303 = vmatprep.subr.mxu1 %v607_v38  ;;  %12232 = vmatpush3.msra.mxu0 %v13649_v1  ;;  %v614_v58 = vand.u32 4294901760, %v613_v14  ;;  %v620_v62 = vsub.f32 %v13703_v21, %v18614_v43  ;;  %v13754_v63 = vand.u32 4294901760, %v13720_v26 }
  0x31   :  { %19046 = vst [vmem:[#allocation31_spill] sm:$0xff] %v13728_v47  ;;  %v13758_v28 = vsub.f32 %v13574_v37, %v13609_v50  ;;  %12304 = vmatpush3.msra.mxu1 %v495_v7  ;;  %12233 = vmatprep.subr.mxu0 %v13663_v12  ;;  %v502_v38 = vand.u32 4294901760, %v501_v53  ;;  %v18622_v43 = vand.u32 4294901760, %v13742_v55  ;;  %v13771_v39 = vand.u32 4294901760, %v13733_v27  ;;  %v13776_v37 = vld [vmem:[%s18597_s1 + $0x10] sm:$0xff] }
  0x32   :  { %v508_v14 = vsub.f32 %v13715_v6, %v18617_v54  ;;  %12305 = vmatprep.subr.mxu1 %v614_v58  ;;  %12234 = vmatpush3.msra.mxu0 %v13677_v19  ;;  %v621_v7 = vand.u32 4294901760, %v620_v62  ;;  %v13782_v34 = vsub.f32 %v13601_v46, %v13634_v60  ;;  %v13785_v54 = vand.u32 4294901760, %v13747_v49 }
  0x33   :  { %19047 = vst [vmem:[#allocation32_spill] sm:$0xff] %v13758_v28  ;;  %19048 = vst [vmem:[#allocation33_spill] sm:$0xff] %v13771_v39  ;;  %v18623_v53 = vand.u32 4294901760, %v13758_v28  ;;  %12306 = vmatpush3.msra.mxu1 %v502_v38  ;;  %12235 = vmatprep.subr.mxu0 %v13689_v52  ;;  %v627_v62 = vsub.f32 %v13742_v55, %v18622_v43  ;;  %v13798_v46 = vsub.f32 %v13614_v51, %v13649_v1  ;;  %v13818_v51 = vld [vmem:[%s18597_s1 + $0x8] sm:$0xff] }
  0x34   :  { %19049 = vst [vmem:[#allocation34_spill] sm:$0xff] %v13782_v34  ;;  %19050 = vst [vmem:[#allocation35_spill] sm:$0xff] %v13785_v54  ;;  %v509_v58 = vand.u32 4294901760, %v508_v14  ;;  %v13801_v29 = vand.u32 4294901760, %v13763_v44  ;;  %12307 = vmatprep.subr.mxu1 %v621_v7  ;;  %12236 = vmatpush3.msra.mxu0 %v13706_v57  ;;  %v13810_v60 = vsub.f32 %v13624_v56, %v13663_v12  ;;  %v13813_v43 = vand.u32 4294901760, %v13776_v37  ;;  %v13832_v12 = vld [vmem:[%s18597_s1 + $0x80] sm:$0xff] }
  0x35   :  { %19051 = vst [vmem:[#allocation36_spill] sm:$0xff] %v13798_v46  ;;  %v515_v38 = vsub.f32 %v13758_v28, %v18623_v53  ;;  %12237 = vmatprep.subr.mxu0 %v13728_v47  ;;  %v628_v7 = vand.u32 4294901760, %v627_v62  ;;  %v13824_v14 = vsub.f32 %v13639_v61, %v13677_v19  ;;  %v13827_v56 = vand.u32 4294901760, %v13790_v33 }
  0x36   :  { %19052 = vst [vmem:[#allocation37_spill] sm:$0xff] %v13801_v29  ;;  %19053 = vst [vmem:[#allocation38_spill] sm:$0xff] %v13810_v60  ;;  %12308 = vmatpush3.msra.mxu1 %v509_v58  ;;  %12238 = vmatpush3.msra.mxu0 %v13754_v63  ;;  %v19055_v1 = vand.u32 4294901760, %v13782_v34  ;;  %v18642_v53 = vand.u32 4294901760, %v13810_v60  ;;  %v13841_v61 = vsub.f32 %v13654_v2, %v13689_v52  ;;  %v19057_v19 = vand.u32 4294901760, %v13798_v46  ;;  %v13858_v2 = vld [vmem:[%s18597_s1] sm:$0xff] }
  0x37   :  { %19054 = vst [vmem:[#allocation39_spill] sm:$0xff] %v13824_v14  ;;  %v516_v58 = vand.u32 4294901760, %v515_v38  ;;  %12309 = vmatprep.subr.mxu1 %v628_v7  ;;  %12239 = vmatprep.subr.mxu0 %v13771_v39  ;;  %v13849_v38 = vand.u32 4294901760, %v13818_v51  ;;  %v62_v7 = vld [vmem:[%s18596_s0 + $0x8] sm:$0xff] }
  0x38   :  { %v634_v62 = vsub.f32 %v13782_v34, %v19055_v1  ;;  %19056 = vst [vmem:[#allocation40_spill] sm:$0xff] %v13841_v61  ;;  %v522_v28 = vsub.f32 %v13798_v46, %v19057_v19  ;;  %v13853_v1 = vsub.f32 %v13668_v13, %v13706_v57  ;;  %12240 = vmatpush3.msra.mxu0 %v13785_v54  ;;  %v13869_v57 = vand.u32 4294901760, %v13832_v12 }
  0x39   :  { %12310 = vmatpush3.msra.mxu1 %v516_v58  ;;  %v641_v50 = vsub.f32 %v13810_v60, %v18642_v53  ;;  %12241 = vmatprep.subr.mxu0 %v13801_v29  ;;  %v19059_v46 = vand.u32 4294901760, %v13824_v14  ;;  %v61_v53 = vld [vmem:[%s18596_s0] sm:$0xff]  ;;  %v13890_v58 = vand.u32 4294901760, %v62_v7 }
  0x3a   :  { %v635_v19 = vand.u32 4294901760, %v634_v62  ;;  %19058 = vst [vmem:[#allocation41_spill] sm:$0xff] %v13869_v57  ;;  %v523_v52 = vand.u32 4294901760, %v522_v28  ;;  %v13878_v62 = vsub.f32 %v13694_v20, %v13728_v47  ;;  %12242 = vmatpush3.msra.mxu0 %v13813_v43  ;;  %v19060_v28 = vand.u32 4294901760, %v13841_v61 }
  0x3b   :  { %v529_v34 = vsub.f32 %v13824_v14, %v19059_v46  ;;  %v642_v13 = vand.u32 4294901760, %v641_v50  ;;  %v13888_v46 = vand.u32 4294901760, %v13858_v2  ;;  %19062 = vst [vmem:[#allocation43_spill] sm:$0xff] %v13890_v58  ;;  %12243 = vmatprep.subr.mxu0 %v13827_v56  ;;  %v19063_v47 = vand.u32 4294901760, %v13853_v1  ;;  %687 = vmatprep.mubr.f32.mxu1 %v13890_v58 }
  0x3c   :  { %12311 = vmatprep.subr.mxu1 %v635_v19  ;;  %v648_v60 = vsub.f32 %v13841_v61, %v19060_v28  ;;  %v18653_v50 = vand.u32 4294901760, %v13878_v62  ;;  %v13899_v14 = vsub.f32 %v13720_v26, %v13754_v63  ;;  %12244 = vmatpush3.msra.mxu0 %v13849_v38  ;;  %v13903_v61 = vsub.f32 %v62_v7, %v13890_v58 }
  0x3d   :  { %19061 = vst [vmem:[#allocation42_spill] sm:$0xff] %v13888_v46  ;;  %12312 = vmatpush3.msra.mxu1 %v523_v52  ;;  %v530_v20 = vand.u32 4294901760, %v529_v34  ;;  %v536_v19 = vsub.f32 %v13853_v1, %v19063_v47  ;;  %v13905_v34 = vand.u32 4294901760, %v61_v53  ;;  %v13909_v52 = vsub.f32 %v13733_v27, %v13771_v39  ;;  %v64_v47 = vld [vmem:[%s18596_s0 + $0x18] sm:$0xff]  ;;  %12245 = vmatprep.subr.mxu0 %v13869_v57 }
  0x3e   :  { %12313 = vmatprep.subr.mxu1 %v642_v13  ;;  %v649_v28 = vand.u32 4294901760, %v648_v60  ;;  %19064 = vst [vmem:[#allocation44_spill] sm:$0xff] %v13903_v61  ;;  %v655_v60 = vsub.f32 %v13878_v62, %v18653_v50  ;;  %v18656_v7 = vand.u32 4294901760, %v13899_v14  ;;  %v13921_v13 = vsub.f32 %v13747_v49, %v13785_v54  ;;  %12246 = vmatpush3.msra.mxu0 %v13888_v46 }
  0x3f   :  { %19065 = vst [vmem:[#allocation45_spill] sm:$0xff] %v13905_v34  ;;  %19066 = vst [vmem:[#allocation46_spill] sm:$0xff] %v13909_v52  ;;  %12314 = vmatpush3.msra.mxu1 %v530_v20  ;;  %v537_v26 = vand.u32 4294901760, %v536_v19  ;;  %v18658_v27 = vand.u32 4294901760, %v13903_v61  ;;  %v13926_v20 = vsub.f32 %v61_v53, %v13905_v34  ;;  %v13931_v39 = vsub.f32 %v13763_v44, %v13801_v29 }
  0x40   :  { %19067 = vst [vmem:[#allocation47_spill] sm:$0xff] %v13921_v13  ;;  %12315 = vmatprep.subr.mxu1 %v649_v28  ;;  %v656_v50 = vand.u32 4294901760, %v655_v60  ;;  %v543_v49 = vsub.f32 %v13899_v14, %v18656_v7  ;;  %v13937_v54 = vand.u32 4294901760, %v64_v47  ;;  %12375 = vmatprep.subr.mxu0 %v13506_v18  ;;  %v19070_v44 = vand.u32 4294901760, %v13909_v52  ;;  %v63_v7 = vld [vmem:[%s18596_s0 + $0x10] sm:$0xff] }
  0x41   :  { %19068 = vst [vmem:[#allocation48_spill] sm:$0xff] %v13926_v20  ;;  %12316 = vmatpush3.msra.mxu1 %v537_v26  ;;  %v224_v53 = vsub.f32 %v13903_v61, %v18658_v27  ;;  %v19071_v18 = vand.u32 4294901760, %v13921_v13  ;;  %v19073_v61 = vand.u32 4294901760, %v13926_v20 }
  0x42   :  { %19069 = vst [vmem:[#allocation49_spill] sm:$0xff] %v13937_v54  ;;  %v662_v26 = vsub.f32 %v13909_v52, %v19070_v44  ;;  %12317 = vmatprep.subr.mxu1 %v656_v50  ;;  %v544_v28 = vand.u32 4294901760, %v543_v49  ;;  %v13956_v19 = vsub.f32 %v64_v47, %v13937_v54  ;;  %v13960_v44 = vsub.f32 %v13776_v37, %v13813_v43  ;;  %v66_v37 = vld [vmem:[%s18596_s0 + $0x28] sm:$0xff] }
  0x43   :  { %v550_v27 = vsub.f32 %v13921_v13, %v19071_v18  ;;  %v225_v60 = vand.u32 4294901760, %v224_v53  ;;  %v230_v29 = vsub.f32 %v13926_v20, %v19073_v61  ;;  %v19074_v50 = vand.u32 4294901760, %v13931_v39  ;;  %v72_v20 = vld [vmem:[%s18596_s0 + $0x58] sm:$0xff] }
  0x44   :  { %19072 = vst [vmem:[#allocation50_spill] sm:$0xff] %v13956_v19  ;;  %v663_v52 = vand.u32 4294901760, %v662_v26  ;;  %12318 = vmatpush3.msra.mxu1 %v544_v28  ;;  %v18670_v18 = vand.u32 4294901760, %v13956_v19  ;;  %v18669_v47 = vand.u32 4294901760, %v13960_v44  ;;  %v13970_v13 = vand.u32 4294901760, %v63_v7 }
  0x45   :  { %v669_v49 = vsub.f32 %v13931_v39, %v19074_v50  ;;  %v551_v58 = vand.u32 4294901760, %v550_v27  ;;  %226 = vmatprep.mubr.f32.mxu0 %v225_v60  ;;  %v231_v53 = vand.u32 4294901760, %v230_v29  ;;  %v13977_v26 = vsub.f32 %v13790_v33, %v13827_v56 }
  0x46   :  { %19075 = vst [vmem:[#allocation51_spill] sm:$0xff] %v13970_v13  ;;  %12319 = vmatprep.subr.mxu1 %v663_v52  ;;  %v13981_v27 = vsub.f32 %v13818_v51, %v13849_v38  ;;  %v239_v28 = vsub.f32 %v13956_v19, %v18670_v18  ;;  %v557_v60 = vsub.f32 %v13960_v44, %v18669_v47  ;;  %v13998_v52 = vand.u32 4294901760, %v66_v37 }
  0x47   :  { %v670_v61 = vand.u32 4294901760, %v669_v49  ;;  %12320 = vmatpush3.msra.mxu1 %v551_v58  ;;  %v13990_v29 = vsub.f32 %v63_v7, %v13970_v13  ;;  %v13994_v33 = vsub.f32 %v13832_v12, %v13869_v57  ;;  %232 = vmatmul.mubr.f32.vlgmr.msra.gmra.mxu0 %v231_v53  ;;  %v18673_v51 = vand.u32 4294901760, %v13977_v26  ;;  %v65_v7 = vld [vmem:[%s18596_s0 + $0x20] sm:$0xff]  ;;  %v68_v12 = vld [vmem:[%s18596_s0 + $0x38] sm:$0xff] }
  0x48   :  { %v18675_v58 = vand.u32 4294901760, %v13981_v27  ;;  %19077 = vst [vmem:[#allocation53_spill] sm:$0xff] %v13998_v52  ;;  %v14002_v50 = vsub.f32 %v13858_v2, %v13888_v46  ;;  %v240_v49 = vand.u32 4294901760, %v239_v28  ;;  %v558_v53 = vand.u32 4294901760, %v557_v60  ;;  %12376 = vmatpush3.msra.mxu0 %v13528_v23 }
  0x49   :  { %19076 = vst [vmem:[#allocation52_spill] sm:$0xff] %v13990_v29  ;;  %12321 = vmatprep.subr.mxu1 %v670_v61  ;;  %v18676_v61 = vand.u32 4294901760, %v13990_v29  ;;  %v18679_v47 = vand.u32 4294901760, %v13994_v33  ;;  %v676_v2 = vsub.f32 %v13977_v26, %v18673_v51  ;;  %v14020_v19 = vsub.f32 %v66_v37, %v13998_v52  ;;  %12377 = vmatprep.subr.mxu0 %v13534_v25  ;;  %v67_v37 = vld [vmem:[%s18596_s0 + $0x30] sm:$0xff]  ;;  %v69_v25 = vld [vmem:[%s18596_s0 + $0x40] sm:$0xff] }
  0x4a   :  { %19078 = vst [vmem:[#allocation54_spill] sm:$0xff] %v14002_v50  ;;  %v564_v18 = vsub.f32 %v13981_v27, %v18675_v58  ;;  %241 = vmatprep.mubr.f32.mxu0 %v240_v49  ;;  %12322 = vmatpush3.msra.mxu1 %v558_v53  ;;  %v14030_v23 = vand.u32 4294901760, %v65_v7  ;;  %v14032_v58 = vand.u32 4294901760, %v68_v12  ;;  %v70_v49 = vld [vmem:[%s18596_s0 + $0x48] sm:$0xff] }
  0x4b   :  { %19079 = vst [vmem:[#allocation55_spill] sm:$0xff] %v14020_v19  ;;  %v245_v60 = vsub.f32 %v13990_v29, %v18676_v61  ;;  %v683_v51 = vsub.f32 %v13994_v33, %v18679_v47  ;;  %v677_v53 = vand.u32 4294901760, %v676_v2  ;;  %v18691_v61 = vand.u32 4294901760, %v14020_v19  ;;  %12378 = vmatpush3.msra.mxu0 %v13557_v31 }
  0x4c   :  { %19080 = vst [vmem:[#allocation56_spill] sm:$0xff] %v14030_v23  ;;  %19081 = vst [vmem:[#allocation57_spill] sm:$0xff] %v14032_v58  ;;  %v565_v28 = vand.u32 4294901760, %v564_v18  ;;  %v19082_v29 = vand.u32 4294901760, %v14002_v50  ;;  %v14052_v18 = vsub.f32 %v65_v7, %v14030_v23  ;;  %v14055_v2 = vsub.f32 %v68_v12, %v14032_v58  ;;  %12379 = vmatprep.subr.mxu0 %v13566_v35 }
  0x4d   :  { %v246_v46 = vand.u32 4294901760, %v245_v60  ;;  %v684_v57 = vand.u32 4294901760, %v683_v51  ;;  %12323 = vmatprep.subr.mxu1 %v677_v53  ;;  %v254_v31 = vsub.f32 %v14020_v19, %v18691_v61  ;;  %v14064_v60 = vand.u32 4294901760, %v67_v37  ;;  %12380 = vmatpush3.msra.mxu0 %v13582_v40 }
  0x4e   :  { %v571_v47 = vsub.f32 %v14002_v50, %v19082_v29  ;;  %19083 = vst [vmem:[#allocation58_spill] sm:$0xff] %v14052_v18  ;;  %19084 = vst [vmem:[#allocation59_spill] sm:$0xff] %v14055_v2  ;;  %v71_v29 = vld [vmem:[%s18596_s0 + $0x50] sm:$0xff]  ;;  %v14066_v51 = vand.u32 4294901760, %v70_v49  ;;  %12324 = vmatpush3.msra.mxu1 %v565_v28  ;;  %v18696_v7 = vand.u32 4294901760, %v14052_v18  ;;  %v14071_v35 = vand.u32 4294901760, %v69_v25  ;;  %12381 = vmatprep.subr.mxu0 %v13596_v45 }
  0x4f   :  { %19085 = vst [vmem:[#allocation60_spill] sm:$0xff] %v14064_v60  ;;  %247 = vmatmul.mubr.f32.gmra.mxu0 %v246_v46  ;;  %v14073_v53 = vand.u32 4294901760, %v72_v20  ;;  %12325 = vmatprep.subr.mxu1 %v684_v57  ;;  %v255_v61 = vand.u32 4294901760, %v254_v31  ;;  %v14079_v19 = vsub.f32 %v67_v37, %v14064_v60  ;;  %v14085_v28 = vand.u32 4294901760, %v71_v29 }
  0x50   :  { %v572_v50 = vand.u32 4294901760, %v571_v47  ;;  %19086 = vst [vmem:[#allocation61_spill] sm:$0xff] %v14066_v51  ;;  %19087 = vst [vmem:[#allocation62_spill] sm:$0xff] %v14071_v35  ;;  %v74_v47 = vld [vmem:[%s18596_s0 + $0x68] sm:$0xff]  ;;  %v14082_v46 = vsub.f32 %v70_v49, %v14066_v51  ;;  %v260_v12 = vsub.f32 %v14052_v18, %v18696_v7  ;;  %v19092_v40 = vand.u32 4294901760, %v14055_v2  ;;  %12382 = vmatpush3.msra.mxu0 %v13631_v59 }
  0x51   :  { %19088 = vst [vmem:[#allocation63_spill] sm:$0xff] %v14073_v53  ;;  %19089 = vst [vmem:[#allocation64_spill] sm:$0xff] %v14079_v19  ;;  %v14094_v31 = vsub.f32 %v69_v25, %v14071_v35  ;;  %v14097_v37 = vsub.f32 %v72_v20, %v14073_v53  ;;  %256 = vmatprep.mubr.f32.mxu0 %v255_v61  ;;  %v18703_v49 = vand.u32 4294901760, %v14079_v19  ;;  %v14105_v7 = vand.u32 4294901760, %v74_v47  ;;  %v73_v25 = vld [vmem:[%s18596_s0 + $0x60] sm:$0xff] }
  0x52   :  { %19090 = vst [vmem:[#allocation65_spill] sm:$0xff] %v14082_v46  ;;  %19091 = vst [vmem:[#allocation66_spill] sm:$0xff] %v14085_v28  ;;  %12326 = vmatpush3.msra.mxu1 %v572_v50  ;;  %v269_v57 = vsub.f32 %v14055_v2, %v19092_v40  ;;  %v14103_v45 = vsub.f32 %v71_v29, %v14085_v28  ;;  %v76_v40 = vld [vmem:[%s18596_s0 + $0x78] sm:$0xff]  ;;  %v261_v20 = vand.u32 4294901760, %v260_v12  ;;  %v19097_v2 = vand.u32 4294901760, %v14082_v46 }
  0x53   :  { %19093 = vst [vmem:[#allocation67_spill] sm:$0xff] %v14094_v31  ;;  %19094 = vst [vmem:[#allocation68_spill] sm:$0xff] %v14097_v37  ;;  %689 = vmatmul.mubr.f32.vlgmr.msra.gmra.mxu1 %v13905_v34  ;;  %12455 = vmatprep.subr.mxu1 %v13468_v3  ;;  %v18708_v50 = vand.u32 4294901760, %v14094_v31  ;;  %v275_v34 = vsub.f32 %v14079_v19, %v18703_v49  ;;  %v19099_v49 = vand.u32 4294901760, %v14097_v37  ;;  %v14136_v19 = vand.u32 4294901760, %v73_v25 }
  0x54   :  { %19095 = vst [vmem:[#allocation69_spill] sm:$0xff] %v14103_v45  ;;  %19096 = vst [vmem:[#allocation70_spill] sm:$0xff] %v14105_v7  ;;  %v270_v61 = vand.u32 4294901760, %v269_v57  ;;  %694 = vmatprep.mubr.f32.mxu1 %v13937_v54  ;;  %12456 = vmatpush3.msra.mxu1 %v13470_v4  ;;  %v284_v18 = vsub.f32 %v14082_v46, %v19097_v2  ;;  %v14127_v57 = vsub.f32 %v74_v47, %v14105_v7  ;;  %v75_v47 = vld [vmem:[%s18596_s0 + $0x70] sm:$0xff] }
  0x55   :  { %262 = vmatmul.mubr.f32.gmra.mxu0 %v261_v20  ;;  %12457 = vmatprep.subr.mxu1 %v13472_v5  ;;  %v290_v29 = vsub.f32 %v14094_v31, %v18708_v50  ;;  %v299_v54 = vsub.f32 %v14097_v37, %v19099_v49  ;;  %19100 = vst [vmem:[#allocation72_spill] sm:$0xff] %v14136_v19  ;;  %v14138_v2 = vand.u32 4294901760, %v76_v40  ;;  %v78_v20 = vld [vmem:[%s18596_s0 + $0x88] sm:$0xff]  ;;  %v276_v12 = vand.u32 4294901760, %v275_v34  ;;  %v77_v49 = vld [vmem:[%s18596_s0 + $0x80] sm:$0xff]  ;;  %v80_v34 = vld [vmem:[%s18596_s0 + $0x98] sm:$0xff] }
  0x56   :  { %19098 = vst [vmem:[#allocation71_spill] sm:$0xff] %v14127_v57  ;;  %271 = vmatprep.mubr.f32.mxu0 %v270_v61  ;;  %v285_v50 = vand.u32 4294901760, %v284_v18  ;;  %12458 = vmatpush3.msra.mxu1 %v13483_v9  ;;  %v14154_v37 = vsub.f32 %v73_v25, %v14136_v19  ;;  %v19104_v61 = vand.u32 4294901760, %v14103_v45  ;;  %v14169_v25 = vand.u32 4294901760, %v78_v20 }
  0x57   :  { %19101 = vst [vmem:[#allocation73_spill] sm:$0xff] %v14138_v2  ;;  %696 = vmatmul.mubr.f32.gmra.mxu1 %v13970_v13  ;;  %v14157_v59 = vsub.f32 %v76_v40, %v14138_v2  ;;  %v291_v18 = vand.u32 4294901760, %v290_v29  ;;  %12459 = vmatprep.subr.mxu1 %v13485_v10  ;;  %v300_v40 = vand.u32 4294901760, %v299_v54  ;;  %v19107_v13 = vand.u32 4294901760, %v14127_v57 }
  0x58   :  { %701 = vmatprep.mubr.f32.mxu1 %v13998_v52  ;;  %19102 = vst [vmem:[#allocation74_spill] sm:$0xff] %v14154_v37  ;;  %v305_v31 = vsub.f32 %v14103_v45, %v19104_v61  ;;  %12383 = vmatprep.subr.mxu0 %v13646_v0  ;;  %v14167_v52 = vand.u32 4294901760, %v75_v47  ;;  %19106 = vst [vmem:[#allocation77_spill] sm:$0xff] %v14169_v25  ;;  %v14176_v10 = vand.u32 4294901760, %v77_v49  ;;  %v79_v61 = vld [vmem:[%s18596_s0 + $0x90] sm:$0xff] }
  0x59   :  { %19103 = vst [vmem:[#allocation75_spill] sm:$0xff] %v14157_v59  ;;  %277 = vmatmul.mubr.f32.gmra.mxu0 %v276_v12  ;;  %12460 = vmatpush3.msra.mxu1 %v13487_v11  ;;  %v314_v29 = vsub.f32 %v14127_v57, %v19107_v13  ;;  %v14187_v54 = vsub.f32 %v78_v20, %v14169_v25  ;;  %v14189_v13 = vand.u32 4294901760, %v80_v34  ;;  %v19113_v12 = vand.u32 4294901760, %v14154_v37 }
  0x5a   :  { %19105 = vst [vmem:[#allocation76_spill] sm:$0xff] %v14167_v52  ;;  %19108 = vst [vmem:[#allocation78_spill] sm:$0xff] %v14176_v10  ;;  %286 = vmatprep.mubr.f32.mxu0 %v285_v50  ;;  %v14184_v45 = vsub.f32 %v75_v47, %v14167_v52  ;;  %12461 = vmatprep.subr.mxu1 %v13499_v15  ;;  %v82_v50 = vld [vmem:[%s18596_s0 + $0xa8] sm:$0xff]  ;;  %v306_v46 = vand.u32 4294901760, %v305_v31  ;;  %v14198_v47 = vand.u32 4294901760, %v79_v61  ;;  %v81_v31 = vld [vmem:[%s18596_s0 + $0xa0] sm:$0xff] }
  0x5b   :  { %703 = vmatmul.mubr.f32.gmra.mxu1 %v14030_v23  ;;  %19110 = vst [vmem:[#allocation80_spill] sm:$0xff] %v14187_v54  ;;  %19111 = vst [vmem:[#allocation81_spill] sm:$0xff] %v14189_v13  ;;  %12384 = vmatpush3.msra.mxu0 %v13660_v8  ;;  %v315_v20 = vand.u32 4294901760, %v314_v29  ;;  %v320_v23 = vsub.f32 %v14154_v37, %v19113_v12  ;;  %v14206_v57 = vsub.f32 %v77_v49, %v14176_v10  ;;  %v84_v49 = vld [vmem:[%s18596_s0 + $0xb8] sm:$0xff] }
  0x5c   :  { %19109 = vst [vmem:[#allocation79_spill] sm:$0xff] %v14184_v45  ;;  %708 = vmatprep.mubr.f32.mxu1 %v14032_v58  ;;  %12462 = vmatpush3.msra.mxu1 %v13501_v16  ;;  %19112 = vst [vmem:[#allocation82_spill] sm:$0xff] %v14198_v47  ;;  %v14217_v37 = vsub.f32 %v80_v34, %v14189_v13  ;;  %v14219_v58 = vand.u32 4294901760, %v82_v50  ;;  %v19120_v12 = vand.u32 4294901760, %v14184_v45 }
  0x5d   :  { %292 = vmatmul.mubr.f32.gmra.mxu0 %v291_v18  ;;  %12463 = vmatprep.subr.mxu1 %v13503_v17  ;;  %19114 = vst [vmem:[#allocation83_spill] sm:$0xff] %v14206_v57  ;;  %v19115_v18 = vand.u32 4294901760, %v14157_v59  ;;  %v321_v34 = vand.u32 4294901760, %v320_v23 }
  0x5e   :  { %301 = vmatprep.mubr.f32.mxu0 %v300_v40  ;;  %19116 = vst [vmem:[#allocation84_spill] sm:$0xff] %v14217_v37  ;;  %19117 = vst [vmem:[#allocation85_spill] sm:$0xff] %v14219_v58  ;;  %12464 = vmatpush3.msra.mxu1 %v13525_v22  ;;  %v14229_v40 = vsub.f32 %v79_v61, %v14198_v47  ;;  %v19122_v61 = vand.u32 4294901760, %v14187_v54 }
  0x5f   :  { %710 = vmatmul.mubr.f32.gmra.mxu1 %v14064_v60  ;;  %v329_v29 = vsub.f32 %v14157_v59, %v19115_v18  ;;  %12385 = vmatprep.subr.mxu0 %v13674_v42  ;;  %v14231_v18 = vand.u32 4294901760, %v81_v31  ;;  %v335_v60 = vsub.f32 %v14184_v45, %v19120_v12  ;;  %v14238_v59 = vand.u32 4294901760, %v84_v49  ;;  %v83_v12 = vld [vmem:[%s18596_s0 + $0xb0] sm:$0xff] }
  0x60   :  { %715 = vmatprep.mubr.f32.mxu1 %v14066_v51  ;;  %12465 = vmatprep.subr.mxu1 %v13531_v24  ;;  %19118 = vst [vmem:[#allocation86_spill] sm:$0xff] %v14229_v40  ;;  %v18745_v51 = vand.u32 4294901760, %v14206_v57  ;;  %v344_v22 = vsub.f32 %v14187_v54, %v19122_v61  ;;  %v87_v45 = vld [vmem:[%s18596_s0 + $0xd0] sm:$0xff] }
  0x61   :  { %19119 = vst [vmem:[#allocation87_spill] sm:$0xff] %v14231_v18  ;;  %307 = vmatmul.mubr.f32.gmra.mxu0 %v306_v46  ;;  %12466 = vmatpush3.msra.mxu1 %v13554_v30  ;;  %19121 = vst [vmem:[#allocation88_spill] sm:$0xff] %v14238_v59  ;;  %v330_v24 = vand.u32 4294901760, %v329_v29  ;;  %v14246_v46 = vsub.f32 %v82_v50, %v14219_v58  ;;  %v14260_v50 = vsub.f32 %v81_v31, %v14231_v18 }
  0x62   :  { %316 = vmatprep.mubr.f32.mxu0 %v315_v20  ;;  %12386 = vmatpush3.msra.mxu0 %v13686_v48  ;;  %v86_v20 = vld [vmem:[%s18596_s0 + $0xc8] sm:$0xff]  ;;  %v336_v61 = vand.u32 4294901760, %v335_v60  ;;  %v350_v23 = vsub.f32 %v14206_v57, %v18745_v51  ;;  %v345_v29 = vand.u32 4294901760, %v344_v22  ;;  %v19126_v31 = vand.u32 4294901760, %v14217_v37  ;;  %v85_v51 = vld [vmem:[%s18596_s0 + $0xc0] sm:$0xff]  ;;  %v88_v22 = vld [vmem:[%s18596_s0 + $0xd8] sm:$0xff] }
  0x63   :  { %717 = vmatmul.mubr.f32.gmra.mxu1 %v14071_v35  ;;  %19123 = vst [vmem:[#allocation89_spill] sm:$0xff] %v14246_v46  ;;  %12387 = vmatprep.subr.mxu0 %v13703_v21  ;;  %19124 = vst [vmem:[#allocation90_spill] sm:$0xff] %v14260_v50  ;;  %v14269_v35 = vand.u32 4294901760, %v83_v12  ;;  %v14276_v54 = vand.u32 4294901760, %v86_v20  ;;  %v14297_v57 = vand.u32 4294901760, %v85_v51 }
  0x64   :  { %722 = vmatprep.mubr.f32.mxu1 %v14073_v53  ;;  %12467 = vmatprep.subr.mxu1 %v13560_v32  ;;  %v14267_v53 = vsub.f32 %v84_v49, %v14238_v59  ;;  %v351_v60 = vand.u32 4294901760, %v350_v23 }
  0x65   :  { %322 = vmatmul.mubr.f32.gmra.mxu0 %v321_v34  ;;  %12468 = vmatpush3.msra.mxu1 %v13569_v36  ;;  %v359_v34 = vsub.f32 %v14217_v37, %v19126_v31  ;;  %19127 = vst [vmem:[#allocation92_spill] sm:$0xff] %v14276_v54  ;;  %v14295_v37 = vsub.f32 %v83_v12, %v14269_v35  ;;  %19131 = vst [vmem:[#allocation94_spill] sm:$0xff] %v14297_v57  ;;  %v19135_v12 = vld [vmem:[#allocation32_spill] sm:$0xff] }
  0x66   :  { %19125 = vst [vmem:[#allocation91_spill] sm:$0xff] %v14267_v53  ;;  %331 = vmatprep.mubr.f32.mxu0 %v330_v24  ;;  %12388 = vmatpush3.msra.mxu0 %v13715_v6  ;;  %v19128_v24 = vand.u32 4294901760, %v14229_v40  ;;  %v14307_v31 = vsub.f32 %v86_v20, %v14276_v54  ;;  %v14321_v20 = vand.u32 4294901760, %v87_v45 }
  0x67   :  { %724 = vmatmul.mubr.f32.gmra.mxu1 %v14085_v28  ;;  %12389 = vmatprep.subr.mxu0 %v13742_v55  ;;  %v19129_v28 = vld [vmem:[#allocation23_spill] sm:$0xff]  ;;  %19130 = vst [vmem:[#allocation93_spill] sm:$0xff] %v14295_v37 }
  0x68   :  { %729 = vmatprep.mubr.f32.mxu1 %v14105_v7  ;;  %v365_v49 = vsub.f32 %v14229_v40, %v19128_v24  ;;  %12469 = vmatprep.subr.mxu1 %v13585_v41  ;;  %v360_v24 = vand.u32 4294901760, %v359_v34  ;;  %19133 = vst [vmem:[#allocation95_spill] sm:$0xff] %v14307_v31  ;;  %v14309_v7 = vand.u32 4294901760, %v88_v22  ;;  %v19136_v40 = vld [vmem:[#allocation34_spill] sm:$0xff]  ;;  %v19137_v34 = vand.u32 4294901760, %v14260_v50  ;;  %19139 = vst [vmem:[#allocation97_spill] sm:$0xff] %v14321_v20 }
  0x69   :  { %337 = vmatmul.mubr.f32.gmra.mxu0 %v336_v61  ;;  %12470 = vmatpush3.msra.mxu1 %v19129_v28  ;;  %v19132_v61 = vand.u32 4294901760, %v14246_v46  ;;  %v19140_v28 = vld [vmem:[#allocation26_spill] sm:$0xff]  ;;  %v19143_v41 = vld [vmem:[#allocation36_spill] sm:$0xff] }
  0x6a   :  { %346 = vmatprep.mubr.f32.mxu0 %v345_v29  ;;  %19134 = vst [vmem:[#allocation96_spill] sm:$0xff] %v14309_v7  ;;  %12390 = vmatpush3.msra.mxu0 %v19135_v12  ;;  %v90_v29 = vld [vmem:[%s18596_s0 + $0xe8] sm:$0xff] }
  0x6b   :  { %731 = vmatmul.mubr.f32.gmra.mxu1 %v14136_v19  ;;  %v374_v23 = vsub.f32 %v14246_v46, %v19132_v61  ;;  %12391 = vmatprep.subr.mxu0 %v19136_v40  ;;  %v380_v19 = vsub.f32 %v14260_v50, %v19137_v34  ;;  %v19138_v61 = vld [vmem:[#allocation25_spill] sm:$0xff]  ;;  %v366_v46 = vand.u32 4294901760, %v365_v49  ;;  %v14329_v40 = vsub.f32 %v85_v51, %v14297_v57  ;;  %v92_v51 = vld [vmem:[%s18596_s0 + $0xf8] sm:$0xff]  ;;  %v19145_v50 = vld [vmem:[#allocation27_spill] sm:$0xff] }
  0x6c   :  { %736 = vmatprep.mubr.f32.mxu1 %v14138_v2  ;;  %12471 = vmatprep.subr.mxu1 %v19138_v61  ;;  %v19141_v2 = vand.u32 4294901760, %v14267_v53  ;;  %v14336_v49 = vand.u32 4294901760, %v90_v29 }
  0x6d   :  { %352 = vmatmul.mubr.f32.gmra.mxu0 %v351_v60  ;;  %12472 = vmatpush3.msra.mxu1 %v19140_v28  ;;  %v375_v34 = vand.u32 4294901760, %v374_v23  ;;  %v14334_v60 = vsub.f32 %v88_v22, %v14309_v7  ;;  %v19144_v23 = vld [vmem:[#allocation38_spill] sm:$0xff]  ;;  %v14349_v22 = vsub.f32 %v87_v45, %v14321_v20  ;;  %v19147_v28 = vld [vmem:[#allocation28_spill] sm:$0xff] }
  0x6e   :  { %v389_v12 = vsub.f32 %v14267_v53, %v19141_v2  ;;  %361 = vmatprep.mubr.f32.mxu0 %v360_v24  ;;  %19142 = vst [vmem:[#allocation98_spill] sm:$0xff] %v14336_v49  ;;  %v89_v2 = vld [vmem:[%s18596_s0 + $0xe0] sm:$0xff]  ;;  %12392 = vmatpush3.msra.mxu0 %v19143_v41  ;;  %v381_v24 = vand.u32 4294901760, %v380_v19  ;;  %v19146_v53 = vand.u32 4294901760, %v14295_v37  ;;  %v19149_v19 = vand.u32 4294901760, %v14307_v31  ;;  %v19152_v41 = vld [vmem:[#allocation40_spill] sm:$0xff] }
  0x6f   :  { %738 = vmatmul.mubr.f32.gmra.mxu1 %v14167_v52  ;;  %12393 = vmatprep.subr.mxu0 %v19144_v23  ;;  %v14356_v61 = vand.u32 4294901760, %v89_v2 }
  0x70   :  { %743 = vmatprep.mubr.f32.mxu1 %v14169_v25  ;;  %12473 = vmatprep.subr.mxu1 %v19145_v50  ;;  %v390_v52 = vand.u32 4294901760, %v389_v12  ;;  %v395_v25 = vsub.f32 %v14295_v37, %v19146_v53  ;;  %v404_v45 = vsub.f32 %v14307_v31, %v19149_v19  ;;  %v14364_v12 = vsub.f32 %v90_v29, %v14336_v49  ;;  %v91_v53 = vld [vmem:[%s18596_s0 + $0xf0] sm:$0xff]  ;;  %v19155_v37 = vld [vmem:[#allocation30_spill] sm:$0xff] }
  0x71   :  { %367 = vmatmul.mubr.f32.gmra.mxu0 %v366_v46  ;;  %12474 = vmatpush3.msra.mxu1 %v19147_v28  ;;  %19148 = vst [vmem:[#allocation38_spill] sm:$0xff] %v14356_v61  ;;  %v14366_v50 = vand.u32 4294901760, %v92_v51  ;;  %v19154_v29 = vand.u32 4294901760, %v14329_v40  ;;  %v14381_v28 = vsub.f32 %v89_v2, %v14356_v61  ;;  %v19158_v2 = vld [vmem:[#allocation31_spill] sm:$0xff] }
  0x72   :  { %376 = vmatprep.mubr.f32.mxu0 %v375_v34  ;;  %v19151_v34 = vld [vmem:[#allocation39_spill] sm:$0xff]  ;;  %v396_v46 = vand.u32 4294901760, %v395_v25 }
  0x73   :  { %745 = vmatmul.mubr.f32.gmra.mxu1 %v14176_v10  ;;  %19150 = vst [vmem:[#allocation99_spill] sm:$0xff] %v14366_v50  ;;  %12394 = vmatpush3.msra.mxu0 %v19151_v34  ;;  %v19153_v10 = vld [vmem:[#allocation29_spill] sm:$0xff]  ;;  %v410_v31 = vsub.f32 %v14329_v40, %v19154_v29  ;;  %v14391_v19 = vsub.f32 %v92_v51, %v14366_v50 }
  0x74   :  { %750 = vmatprep.mubr.f32.mxu1 %v14189_v13  ;;  %12395 = vmatprep.subr.mxu0 %v19152_v41  ;;  %v14383_v13 = vand.u32 4294901760, %v91_v53  ;;  %v405_v41 = vand.u32 4294901760, %v404_v45  ;;  %v19159_v45 = vand.u32 4294901760, %v14349_v22 }
  0x75   :  { %12475 = vmatprep.subr.mxu1 %v19153_v10  ;;  %382 = vmatmul.mubr.f32.gmra.mxu0 %v381_v24  ;;  %v19157_v10 = vand.u32 4294901760, %v14334_v60 }
  0x76   :  { %12476 = vmatpush3.msra.mxu1 %v19155_v37  ;;  %19156 = vst [vmem:[#allocation39_spill] sm:$0xff] %v14383_v13  ;;  %391 = vmatprep.mubr.f32.mxu0 %v390_v52  ;;  %v411_v52 = vand.u32 4294901760, %v410_v31  ;;  %v425_v29 = vsub.f32 %v14349_v22, %v19159_v45  ;;  %v14403_v51 = vsub.f32 %v91_v53, %v14383_v13  ;;  %v19161_v45 = vld [vmem:[#allocation46_spill] sm:$0xff] }
  0x77   :  { %752 = vmatmul.mubr.f32.gmra.mxu1 %v14198_v47  ;;  %v419_v24 = vsub.f32 %v14334_v60, %v19157_v10  ;;  %12396 = vmatpush3.msra.mxu0 %v13853_v1  ;;  %v19162_v10 = vld [vmem:[#allocation33_spill] sm:$0xff] }
  0x78   :  { %757 = vmatprep.mubr.f32.mxu1 %v14219_v58  ;;  %12397 = vmatprep.subr.mxu0 %v13878_v62  ;;  %v19160_v58 = vand.u32 4294901760, %v14364_v12  ;;  %v426_v53 = vand.u32 4294901760, %v425_v29  ;;  %v19167_v29 = vld [vmem:[#allocation37_spill] sm:$0xff] }
  0x79   :  { %12477 = vmatprep.subr.mxu1 %v19158_v2  ;;  %397 = vmatmul.mubr.f32.gmra.mxu0 %v396_v46  ;;  %v420_v25 = vand.u32 4294901760, %v419_v24 }
  0x7a   :  { %12478 = vmatpush3.msra.mxu1 %v13754_v63  ;;  %406 = vmatprep.mubr.f32.mxu0 %v405_v41  ;;  %v434_v46 = vsub.f32 %v14364_v12, %v19160_v58  ;;  %v19163_v41 = vand.u32 4294901760, %v14381_v28  ;;  %v18789_v58 = vand.u32 4294901760, %v14403_v51 }
  0x7b   :  { %759 = vmatmul.mubr.f32.gmra.mxu1 %v14231_v18  ;;  %12398 = vmatpush3.msra.mxu0 %v13899_v14  ;;  %v19164_v18 = vld [vmem:[#allocation35_spill] sm:$0xff] }
  0x7c   :  { %764 = vmatprep.mubr.f32.mxu1 %v14238_v59  ;;  %12399 = vmatprep.subr.mxu0 %v19161_v45  ;;  %v440_v24 = vsub.f32 %v14381_v28, %v19163_v41  ;;  %v435_v31 = vand.u32 4294901760, %v434_v46  ;;  %v19165_v59 = vand.u32 4294901760, %v14391_v19 }
  0x7d   :  { %12479 = vmatprep.subr.mxu1 %v19162_v10  ;;  %412 = vmatmul.mubr.f32.gmra.mxu0 %v411_v52  ;;  %v19166_v52 = vld [vmem:[#allocation47_spill] sm:$0xff] }
  0x7e   :  { %12480 = vmatpush3.msra.mxu1 %v19164_v18  ;;  %421 = vmatprep.mubr.f32.mxu0 %v420_v25  ;;  %v449_v47 = vsub.f32 %v14391_v19, %v19165_v59  ;;  %v441_v41 = vand.u32 4294901760, %v440_v24  ;;  %v455_v25 = vsub.f32 %v14403_v51, %v18789_v58  ;;  %v19171_v24 = vld [vmem:[#allocation44_spill] sm:$0xff]  ;;  %v19175_v58 = vld [vmem:[#allocation50_spill] sm:$0xff] }
  0x7f   :  { %766 = vmatmul.mubr.f32.gmra.mxu1 %v14269_v35  ;;  %12400 = vmatpush3.msra.mxu0 %v19166_v52 }
  0x80   :  { %771 = vmatprep.mubr.f32.mxu1 %v14276_v54  ;;  %12401 = vmatprep.subr.mxu0 %v13931_v39  ;;  %v450_v59 = vand.u32 4294901760, %v449_v47  ;;  %v456_v46 = vand.u32 4294901760, %v455_v25  ;;  %v19168_v47 = vld [vmem:[#allocation41_spill] sm:$0xff]  ;;  %v19186_v54 = vld [vmem:[#allocation55_spill] sm:$0xff] }
  0x81   :  { %12481 = vmatprep.subr.mxu1 %v19167_v29  ;;  %427 = vmatmul.mubr.f32.gmra.mxu0 %v426_v53  ;;  %v19170_v53 = vld [vmem:[#allocation54_spill] sm:$0xff] }
  0x82   :  { %12482 = vmatpush3.msra.mxu1 %v13813_v43  ;;  %436 = vmatprep.mubr.f32.mxu0 %v435_v31  ;;  %v19169_v31 = vld [vmem:[#allocation42_spill] sm:$0xff] }
  0x83   :  { %773 = vmatmul.mubr.f32.gmra.mxu1 %v14297_v57  ;;  %12402 = vmatpush3.msra.mxu0 %v13960_v44 }
  0x84   :  { %778 = vmatprep.mubr.f32.mxu1 %v14309_v7  ;;  %12403 = vmatprep.subr.mxu0 %v13977_v26 }
  0x85   :  { %12483 = vmatprep.subr.mxu1 %v13827_v56  ;;  %442 = vmatmul.mubr.f32.gmra.mxu0 %v441_v41  ;;  %v19172_v41 = vld [vmem:[#allocation13_spill] sm:$0xff] }
  0x86   :  { %12484 = vmatpush3.msra.mxu1 %v13849_v38  ;;  %451 = vmatprep.mubr.f32.mxu0 %v450_v59  ;;  %v19173_v25 = vand.u32 4294901760, %v19172_v41  ;;  %v19174_v59 = vld [vmem:[#allocation48_spill] sm:$0xff]  ;;  %v19181_v41 = vld [vmem:[#allocation18_spill] sm:$0xff] }
  0x87   :  { %780 = vmatmul.mubr.f32.gmra.mxu1 %v14321_v20  ;;  %12404 = vmatpush3.msra.mxu0 %v13981_v27  ;;  %v19178_v20 = vld [vmem:[#allocation17_spill] sm:$0xff] }
  0x88   :  { %785 = vmatprep.mubr.f32.mxu1 %v14336_v49  ;;  %12405 = vmatprep.subr.mxu0 %v13994_v33  ;;  %v19179_v7 = vand.u32 4294901760, %v19178_v20 }
  0x89   :  { %12485 = vmatprep.subr.mxu1 %v19168_v47  ;;  %457 = vmatmul.mubr.f32.gmra.mxu0 %v456_v46  ;;  %v19176_v46 = vld [vmem:[#allocation15_spill] sm:$0xff] }
  0x8a   :  { %12486 = vmatpush3.msra.mxu1 %v19169_v31  ;;  %12406 = vmatpush3.msra.mxu0 %v19170_v53  ;;  %v19177_v49 = vand.u32 4294901760, %v19176_v46  ;;  %v19187_v46 = vld [vmem:[#allocation20_spill] sm:$0xff] }
  0x8b   :  { %929 = vmatprep.mubr.f32.mxu0 %v19171_v24  ;;  %787 = vmatmul.mubr.f32.gmra.mxu1 %v14356_v61  ;;  %v19180_v61 = vand.u32 4294901760, %v19171_v24  ;;  %v19193_v24 = vld [vmem:[#allocation58_spill] sm:$0xff] }
  0x8c   :  { %12535 = vmatprep.subr.mxu0 %v19173_v25  ;;  %792 = vmatprep.mubr.f32.mxu1 %v14366_v50  ;;  %v19182_v25 = vand.u32 4294901760, %v19181_v41  ;;  %v19183_v50 = vld [vmem:[#allocation52_spill] sm:$0xff] }
  0x8d   :  { %12615 = vmatprep.subr.mxu1 %v13468_v3  ;;  %932 = vmatmul.mubr.f32.vlgmr.msra.gmra.mxu0 %v19174_v59  ;;  %v19184_v3 = vld [vmem:[#allocation19_spill] sm:$0xff]  ;;  %v19195_v41 = vand.u32 4294901760, %v19183_v50 }
  0x8e   :  { %938 = vmatprep.mubr.f32.mxu0 %v19175_v58  ;;  %12536 = vmatpush3.msra.mxu0 %v19177_v49  ;;  %v19185_v57 = vand.u32 4294901760, %v19184_v3  ;;  %v19188_v49 = vand.u32 4294901760, %v19187_v46  ;;  %v19207_v3 = vand.u32 4294901760, %v13660_v8  ;;  %v19215_v8 = vand.u32 4294901760, %v13686_v48 }
  0x8f   :  { %794 = vmatmul.mubr.f32.gmra.mxu1 %v14383_v13  ;;  %12537 = vmatprep.subr.mxu0 %v19179_v7  ;;  %v19189_v13 = vand.u32 4294901760, %v19174_v59  ;;  %v19190_v7 = vld [vmem:[#allocation22_spill] sm:$0xff]  ;;  %v19197_v59 = vand.u32 4294901760, %v19186_v54  ;;  %v19221_v48 = vand.u32 4294901760, %v13715_v6 }
  0x90   :  { %1171 = vmatprep.mubr.f32.mxu1 %v19180_v61  ;;  %12538 = vmatpush3.msra.mxu0 %v19182_v25  ;;  %v19191_v20 = vand.u32 4294901760, %v19190_v7  ;;  %v19192_v61 = vand.u32 4294901760, %v19175_v58  ;;  %v19199_v58 = vld [vmem:[#allocation65_spill] sm:$0xff]  ;;  %v19211_v7 = vld [vmem:[#allocation14_spill] sm:$0xff] }
  0x91   :  { %941 = vmatmul.mubr.f32.gmra.mxu0 %v19183_v50  ;;  %12539 = vmatprep.subr.mxu0 %v19185_v57  ;;  %v19194_v57 = vld [vmem:[#allocation59_spill] sm:$0xff]  ;;  %v19203_v50 = vand.u32 4294901760, %v13646_v0  ;;  %v19209_v0 = vand.u32 4294901760, %v13674_v42  ;;  %v19217_v42 = vand.u32 4294901760, %v13703_v21  ;;  %v19223_v21 = vand.u32 4294901760, %v13742_v55 }
  0x92   :  { %947 = vmatprep.mubr.f32.mxu0 %v19186_v54  ;;  %12540 = vmatpush3.msra.mxu0 %v19188_v49  ;;  %v19204_v54 = vand.u32 4294901760, %v19194_v57  ;;  %v19210_v49 = vand.u32 4294901760, %v19199_v58 }
  0x93   :  { %1175 = vmatmul.mubr.f32.vlgmr.msra.gmra.mxu1 %v19189_v13  ;;  %12541 = vmatprep.subr.mxu0 %v19191_v20  ;;  %v19196_v13 = vld [vmem:[#allocation12_spill] sm:$0xff] }
  0x94   :  { %12616 = vmatpush3.msra.mxu1 %v13470_v4  ;;  %1182 = vmatprep.mubr.f32.mxu1 %v19192_v61  ;;  %v19198_v4 = vld [vmem:[#allocation64_spill] sm:$0xff] }
  0x95   :  { %950 = vmatmul.mubr.f32.gmra.mxu0 %v19193_v24  ;;  %12617 = vmatprep.subr.mxu1 %v13472_v5  ;;  %v19200_v5 = vld [vmem:[#allocation24_spill] sm:$0xff]  ;;  %v19208_v46 = vand.u32 4294901760, %v19198_v4 }
  0x96   :  { %956 = vmatprep.mubr.f32.mxu0 %v19194_v57  ;;  %12618 = vmatpush3.msra.mxu1 %v13483_v9  ;;  %v19201_v25 = vand.u32 4294901760, %v19200_v5  ;;  %v19202_v9 = vand.u32 4294901760, %v19193_v24  ;;  %v19213_v20 = vld [vmem:[#allocation16_spill] sm:$0xff]  ;;  %v19219_v57 = vld [vmem:[#allocation74_spill] sm:$0xff] }
  0x97   :  { %1186 = vmatmul.mubr.f32.gmra.mxu1 %v19195_v41  ;;  %12619 = vmatprep.subr.mxu1 %v19196_v13  ;;  %v19220_v41 = vld [vmem:[#allocation75_spill] sm:$0xff]  ;;  %v19230_v5 = vand.u32 4294901760, %v19219_v57 }
  0x98   :  { %1193 = vmatprep.mubr.f32.mxu1 %v19197_v59  ;;  %12620 = vmatpush3.msra.mxu1 %v13487_v11  ;;  %v19205_v11 = vld [vmem:[#allocation67_spill] sm:$0xff] }
  0x99   :  { %959 = vmatmul.mubr.f32.gmra.mxu0 %v19198_v4  ;;  %12621 = vmatprep.subr.mxu1 %v13499_v15  ;;  %v19206_v15 = vld [vmem:[#allocation68_spill] sm:$0xff]  ;;  %v19216_v61 = vand.u32 4294901760, %v19205_v11  ;;  %v19226_v4 = vld [vmem:[#allocation21_spill] sm:$0xff] }
  0x9a   :  { %965 = vmatprep.mubr.f32.mxu0 %v19199_v58  ;;  %12542 = vmatpush3.msra.mxu0 %v19201_v25  ;;  %v19218_v24 = vand.u32 4294901760, %v19206_v15  ;;  %v19228_v58 = vld [vmem:[#allocation32_spill] sm:$0xff]  ;;  %v19231_v25 = vld [vmem:[#allocation34_spill] sm:$0xff] }
  0x9b   :  { %1197 = vmatmul.mubr.f32.gmra.mxu1 %v19202_v9  ;;  %12543 = vmatprep.subr.mxu0 %v19203_v50  ;;  %v19229_v6 = vand.u32 4294901760, %v19228_v58  ;;  %v19232_v55 = vand.u32 4294901760, %v19231_v25  ;;  %v19233_v9 = vand.u32 4294901760, %v19220_v41  ;;  %v19234_v50 = vld [vmem:[#allocation23_spill] sm:$0xff]  ;;  %v19294_v25 = vld [vmem:[#allocation70_spill] sm:$0xff] }
  0x9c   :  { %1204 = vmatprep.mubr.f32.mxu1 %v19204_v54  ;;  %12622 = vmatpush3.msra.mxu1 %v13501_v16  ;;  %v19212_v16 = vld [vmem:[#allocation69_spill] sm:$0xff] }
  0x9d   :  { %968 = vmatmul.mubr.f32.gmra.mxu0 %v19205_v11  ;;  %12623 = vmatprep.subr.mxu1 %v13503_v17  ;;  %v19214_v17 = vld [vmem:[#allocation71_spill] sm:$0xff]  ;;  %v19222_v13 = vand.u32 4294901760, %v19212_v16  ;;  %v19236_v54 = vld [vmem:[#allocation25_spill] sm:$0xff]  ;;  %v19237_v11 = vld [vmem:[#allocation84_spill] sm:$0xff] }
  0x9e   :  { %974 = vmatprep.mubr.f32.mxu0 %v19206_v15  ;;  %12544 = vmatpush3.msra.mxu0 %v19207_v3  ;;  %v19224_v59 = vand.u32 4294901760, %v19214_v17  ;;  %v19238_v15 = vld [vmem:[#allocation36_spill] sm:$0xff] }
  0x9f   :  { %1208 = vmatmul.mubr.f32.gmra.mxu1 %v19208_v46  ;;  %12545 = vmatprep.subr.mxu0 %v19209_v0  ;;  %v19239_v3 = vand.u32 4294901760, %v19238_v15  ;;  %v19241_v0 = vand.u32 4294901760, %v19144_v23 }
  0xa0   :  { %1215 = vmatprep.mubr.f32.mxu1 %v19210_v49  ;;  %12624 = vmatpush3.msra.mxu1 %v19211_v7  ;;  %v19243_v7 = vld [vmem:[#allocation26_spill] sm:$0xff] }
  0xa1   :  { %977 = vmatmul.mubr.f32.gmra.mxu0 %v19212_v16  ;;  %12625 = vmatprep.subr.mxu1 %v19213_v20  ;;  %v19244_v16 = vld [vmem:[#allocation86_spill] sm:$0xff]  ;;  %v19245_v20 = vld [vmem:[#allocation27_spill] sm:$0xff] }
  0xa2   :  { %983 = vmatprep.mubr.f32.mxu0 %v19214_v17  ;;  %12546 = vmatpush3.msra.mxu0 %v19215_v8  ;;  %v19246_v17 = vld [vmem:[#allocation89_spill] sm:$0xff]  ;;  %v19247_v8 = vand.u32 4294901760, %v19151_v34  ;;  %v19256_v34 = vand.u32 4294901760, %v13853_v1  ;;  %v19262_v1 = vand.u32 4294901760, %v13899_v14  ;;  %v19266_v14 = vand.u32 4294901760, %v19166_v52 }
  0xa3   :  { %1219 = vmatmul.mubr.f32.gmra.mxu1 %v19216_v61  ;;  %12547 = vmatprep.subr.mxu0 %v19217_v42  ;;  %v19249_v42 = vld [vmem:[#allocation40_spill] sm:$0xff]  ;;  %v19273_v52 = vand.u32 4294901760, %v14334_v60 }
  0xa4   :  { %1226 = vmatprep.mubr.f32.mxu1 %v19218_v24  ;;  %12626 = vmatpush3.msra.mxu1 %v13554_v30  ;;  %v19225_v30 = vld [vmem:[#allocation79_spill] sm:$0xff]  ;;  %v19250_v23 = vand.u32 4294901760, %v19249_v42  ;;  %v19251_v24 = vand.u32 4294901760, %v19237_v11  ;;  %v19303_v42 = vld [vmem:[#allocation85_spill] sm:$0xff] }
  0xa5   :  { %986 = vmatmul.mubr.f32.gmra.mxu0 %v19219_v57  ;;  %12627 = vmatprep.subr.mxu1 %v13560_v32  ;;  %v19227_v32 = vld [vmem:[#allocation80_spill] sm:$0xff]  ;;  %v19240_v46 = vand.u32 4294901760, %v19225_v30 }
  0xa6   :  { %992 = vmatprep.mubr.f32.mxu0 %v19220_v41  ;;  %12548 = vmatpush3.msra.mxu0 %v19221_v48  ;;  %v19242_v49 = vand.u32 4294901760, %v19227_v32  ;;  %v19252_v57 = vld [vmem:[#allocation28_spill] sm:$0xff]  ;;  %v19253_v41 = vld [vmem:[#allocation90_spill] sm:$0xff]  ;;  %v19254_v48 = vld [vmem:[#allocation29_spill] sm:$0xff] }
  0xa7   :  { %1230 = vmatmul.mubr.f32.gmra.mxu1 %v19222_v13  ;;  %12549 = vmatprep.subr.mxu0 %v19223_v21  ;;  %v19255_v13 = vld [vmem:[#allocation91_spill] sm:$0xff]  ;;  %v19257_v21 = vand.u32 4294901760, %v19244_v16  ;;  %v19263_v58 = vand.u32 4294901760, %v19253_v41 }
  0xa8   :  { %1237 = vmatprep.mubr.f32.mxu1 %v19224_v59  ;;  %12628 = vmatpush3.msra.mxu1 %v13569_v36  ;;  %v19235_v36 = vld [vmem:[#allocation83_spill] sm:$0xff]  ;;  %v19258_v59 = vand.u32 4294901760, %v13878_v62  ;;  %v19264_v62 = vand.u32 4294901760, %v19161_v45 }
  0xa9   :  { %995 = vmatmul.mubr.f32.gmra.mxu0 %v19225_v30  ;;  %12629 = vmatprep.subr.mxu1 %v19226_v4  ;;  %v19248_v61 = vand.u32 4294901760, %v19235_v36  ;;  %v19259_v30 = vand.u32 4294901760, %v19246_v17  ;;  %v19260_v4 = vld [vmem:[#allocation93_spill] sm:$0xff] }
  0xaa   :  { %1001 = vmatprep.mubr.f32.mxu0 %v19227_v32  ;;  %12550 = vmatpush3.msra.mxu0 %v19229_v6  ;;  %v19261_v32 = vld [vmem:[#allocation95_spill] sm:$0xff]  ;;  %v19265_v6 = vand.u32 4294901760, %v19255_v13 }
  0xab   :  { %1241 = vmatmul.mubr.f32.gmra.mxu1 %v19230_v5  ;;  %12551 = vmatprep.subr.mxu0 %v19232_v55  ;;  %v19269_v45 = vand.u32 4294901760, %v19261_v32  ;;  %v19293_v5 = vld [vmem:[#allocation66_spill] sm:$0xff]  ;;  %v19295_v55 = vld [vmem:[#allocation72_spill] sm:$0xff] }
  0xac   :  { %1248 = vmatprep.mubr.f32.mxu1 %v19233_v9  ;;  %12630 = vmatpush3.msra.mxu1 %v19234_v50  ;;  %v19296_v9 = vld [vmem:[#allocation73_spill] sm:$0xff]  ;;  %v19297_v50 = vld [vmem:[#allocation76_spill] sm:$0xff] }
  0xad   :  { %1004 = vmatmul.mubr.f32.gmra.mxu0 %v19235_v36  ;;  %12631 = vmatprep.subr.mxu1 %v19236_v54  ;;  %v19298_v36 = vld [vmem:[#allocation77_spill] sm:$0xff]  ;;  %v1834_v54 = vld [vmem:[#allocation3 + $0x38] sm:$0xff] }
  0xae   :  { %1010 = vmatprep.mubr.f32.mxu0 %v19237_v11  ;;  %12552 = vmatpush3.msra.mxu0 %v19239_v3  ;;  %v1833_v11 = vld [vmem:[#allocation3 + $0x30] sm:$0xff]  ;;  %v14670_v15 = vand.u32 4294901760, %v1834_v54 }
  0xaf   :  { %1252 = vmatmul.mubr.f32.gmra.mxu1 %v19240_v46  ;;  %12553 = vmatprep.subr.mxu0 %v19241_v0  ;;  %v14672_v3 = vand.u32 4294901760, %v1833_v11  ;;  %v19299_v46 = vld [vmem:[#allocation78_spill] sm:$0xff] }
  0xb0   :  { %1259 = vmatprep.mubr.f32.mxu1 %v19242_v49  ;;  %12632 = vmatpush3.msra.mxu1 %v19243_v7  ;;  %v14681_v49 = vsub.f32 %v1834_v54, %v14670_v15  ;;  %v19301_v7 = vld [vmem:[#allocation81_spill] sm:$0xff] }
  0xb1   :  { %1013 = vmatmul.mubr.f32.gmra.mxu0 %v19244_v16  ;;  %12633 = vmatprep.subr.mxu1 %v19245_v20  ;;  %v14678_v0 = vsub.f32 %v1833_v11, %v14672_v3 }
  0xb2   :  { %1019 = vmatprep.mubr.f32.mxu0 %v19246_v17  ;;  %12554 = vmatpush3.msra.mxu0 %v19247_v8  ;;  %19300 = vst [vmem:[#allocation30_spill] sm:$0xff] %v14681_v49  ;;  %v18813_v16 = vand.u32 4294901760, %v14681_v49  ;;  %v19302_v17 = vld [vmem:[#allocation82_spill] sm:$0xff] }
  0xb3   :  { %1263 = vmatmul.mubr.f32.gmra.mxu1 %v19248_v61  ;;  %12555 = vmatprep.subr.mxu0 %v19250_v23  ;;  %v18812_v20 = vand.u32 4294901760, %v14678_v0 }
  0xb4   :  { %1270 = vmatprep.mubr.f32.mxu1 %v19251_v24  ;;  %12634 = vmatpush3.msra.mxu1 %v19252_v57  ;;  %v2172_v8 = vsub.f32 %v14681_v49, %v18813_v16  ;;  %v19304_v57 = vld [vmem:[#allocation87_spill] sm:$0xff] }
  0xb5   :  { %1022 = vmatmul.mubr.f32.gmra.mxu0 %v19253_v41  ;;  %12635 = vmatprep.subr.mxu1 %v19254_v48  ;;  %v2178_v61 = vsub.f32 %v14678_v0, %v18812_v20  ;;  %v19305_v41 = vld [vmem:[#allocation88_spill] sm:$0xff] }
  0xb6   :  { %1028 = vmatprep.mubr.f32.mxu0 %v19255_v13  ;;  %12556 = vmatpush3.msra.mxu0 %v19256_v34  ;;  %v2173_v23 = vand.u32 4294901760, %v2172_v8  ;;  %v19306_v48 = vld [vmem:[#allocation92_spill] sm:$0xff]  ;;  %v1831_v34 = vld [vmem:[#allocation3 + $0x20] sm:$0xff] }
  0xb7   :  { %1274 = vmatmul.mubr.f32.gmra.mxu1 %v19257_v21  ;;  %12557 = vmatprep.subr.mxu0 %v19258_v59  ;;  %v2179_v24 = vand.u32 4294901760, %v2178_v61  ;;  %v1832_v13 = vld [vmem:[#allocation3 + $0x28] sm:$0xff]  ;;  %v14708_v59 = vand.u32 4294901760, %v1831_v34 }
  0xb8   :  { %1281 = vmatprep.mubr.f32.mxu1 %v19259_v30  ;;  %12636 = vmatpush3.msra.mxu1 %v19155_v37  ;;  %v19267_v37 = vand.u32 4294901760, %v19260_v4  ;;  %v14706_v21 = vand.u32 4294901760, %v1832_v13  ;;  %v19307_v30 = vld [vmem:[#allocation94_spill] sm:$0xff] }
  0xb9   :  { %1031 = vmatmul.mubr.f32.gmra.mxu0 %v19260_v4  ;;  %12637 = vmatprep.subr.mxu1 %v19158_v2  ;;  %v19268_v2 = vand.u32 4294901760, %v13931_v39  ;;  %v19272_v39 = vand.u32 4294901760, %v13977_v26  ;;  %v19277_v26 = vand.u32 4294901760, %v19170_v53  ;;  %v19292_v53 = vld [vmem:[#allocation63_spill] sm:$0xff]  ;;  %v14714_v4 = vsub.f32 %v1831_v34, %v14708_v59 }
  0xba   :  { %1037 = vmatprep.mubr.f32.mxu0 %v19261_v32  ;;  %12558 = vmatpush3.msra.mxu0 %v19262_v1  ;;  %v14717_v32 = vsub.f32 %v1832_v13, %v14706_v21  ;;  %v19308_v1 = vld [vmem:[#allocation96_spill] sm:$0xff] }
  0xbb   :  { %1285 = vmatmul.mubr.f32.gmra.mxu1 %v19263_v58  ;;  %12559 = vmatprep.subr.mxu0 %v19264_v62  ;;  %v18810_v62 = vand.u32 4294901760, %v14714_v4 }
  0xbc   :  { %1292 = vmatprep.mubr.f32.mxu1 %v19265_v6  ;;  %12638 = vmatpush3.msra.mxu1 %v13754_v63  ;;  %v19270_v63 = vand.u32 4294901760, %v13960_v44  ;;  %v19275_v44 = vand.u32 4294901760, %v13994_v33  ;;  %v19281_v33 = vand.u32 4294901760, %v14391_v19  ;;  %v18811_v58 = vand.u32 4294901760, %v14717_v32  ;;  %v19309_v6 = vld [vmem:[#allocation97_spill] sm:$0xff] }
  0xbd   :  { %1040 = vmatmul.mubr.f32.gmra.mxu0 %v14329_v40  ;;  %12639 = vmatprep.subr.mxu1 %v19162_v10  ;;  %v19271_v10 = vand.u32 4294901760, %v14329_v40  ;;  %v19276_v40 = vand.u32 4294901760, %v14349_v22 }
  0xbe   :  { %1046 = vmatprep.mubr.f32.mxu0 %v14334_v60  ;;  %12560 = vmatpush3.msra.mxu0 %v19266_v14  ;;  %v19278_v60 = vand.u32 4294901760, %v14364_v12  ;;  %v2184_v14 = vsub.f32 %v14717_v32, %v18811_v58 }
  0xbf   :  { %1296 = vmatmul.mubr.f32.gmra.mxu1 %v19267_v37  ;;  %12561 = vmatprep.subr.mxu0 %v19268_v2  ;;  %v2190_v37 = vsub.f32 %v14714_v4, %v18810_v62  ;;  %v19310_v2 = vld [vmem:[#allocation98_spill] sm:$0xff] }
  0xc0   :  { %1303 = vmatprep.mubr.f32.mxu1 %v19269_v45  ;;  %12640 = vmatpush3.msra.mxu1 %v19164_v18  ;;  %v19274_v18 = vand.u32 4294901760, %v13981_v27  ;;  %v19280_v27 = vand.u32 4294901760, %v14381_v28 }
  0xc1   :  { %1049 = vmatmul.mubr.f32.gmra.mxu0 %v14349_v22  ;;  %12641 = vmatprep.subr.mxu1 %v19167_v29  ;;  %v19282_v22 = vld [vmem:[#allocation45_spill] sm:$0xff]  ;;  %v2191_v45 = vand.u32 4294901760, %v2190_v37 }
  0xc2   :  { %1055 = vmatprep.mubr.f32.mxu0 %v14364_v12  ;;  %12562 = vmatpush3.msra.mxu0 %v19270_v63  ;;  %v19283_v12 = vld [vmem:[#allocation49_spill] sm:$0xff]  ;;  %v19311_v63 = vld [vmem:[#allocation38_spill] sm:$0xff] }
  0xc3   :  { %1307 = vmatmul.mubr.f32.gmra.mxu1 %v19271_v10  ;;  %12563 = vmatprep.subr.mxu0 %v19272_v39  ;;  %v19286_v29 = vld [vmem:[#allocation53_spill] sm:$0xff]  ;;  %v19312_v10 = vld [vmem:[#allocation99_spill] sm:$0xff] }
  0xc4   :  { %1314 = vmatprep.mubr.f32.mxu1 %v19273_v52  ;;  %12564 = vmatpush3.msra.mxu0 %v19274_v18  ;;  %v19313_v52 = vld [vmem:[#allocation39_spill] sm:$0xff]  ;;  %v1830_v18 = vld [vmem:[#allocation3 + $0x18] sm:$0xff] }
  0xc5   :  { %1058 = vmatmul.mubr.f32.gmra.mxu0 %v14381_v28  ;;  %12642 = vmatpush3.msra.mxu1 %v13813_v43  ;;  %v19279_v43 = vld [vmem:[#allocation43_spill] sm:$0xff]  ;;  %v19287_v28 = vld [vmem:[#allocation56_spill] sm:$0xff] }
  0xc6   :  { %1064 = vmatprep.mubr.f32.mxu0 %v14391_v19  ;;  %12565 = vmatprep.subr.mxu0 %v19275_v44  ;;  %v19288_v19 = vld [vmem:[#allocation57_spill] sm:$0xff] }
  0xc7   :  { %1318 = vmatmul.mubr.f32.gmra.mxu1 %v19276_v40  ;;  %12566 = vmatpush3.msra.mxu0 %v19277_v26  ;;  %v1829_v44 = vld [vmem:[#allocation3 + $0x10] sm:$0xff]  ;;  %v14741_v26 = vand.u32 4294901760, %v1830_v18 }
  0xc8   :  { %1325 = vmatprep.mubr.f32.mxu1 %v19278_v60  ;;  %12643 = vmatprep.subr.mxu1 %v13827_v56  ;;  %v19284_v56 = vand.u32 4294901760, %v14403_v51  ;;  %v14743_v60 = vand.u32 4294901760, %v1829_v44 }
  0xc9   :  { %1067 = vmatmul.mubr.f32.gmra.mxu0 %v14403_v51  ;;  %12644 = vmatpush3.msra.mxu1 %v13849_v38  ;;  %v19285_v38 = vld [vmem:[#allocation51_spill] sm:$0xff]  ;;  %v19289_v51 = vld [vmem:[#allocation60_spill] sm:$0xff] }
  0xca   :  { %1506 = vmatprep.mubr.f32.mxu0 %v19279_v43  ;;  %12645 = vmatprep.subr.mxu1 %v19168_v47  ;;  %v19290_v47 = vld [vmem:[#allocation61_spill] sm:$0xff] }
  0xcb   :  { %1329 = vmatmul.mubr.f32.gmra.mxu1 %v19280_v27  ;;  %1921 = vmatprep.subr.mxu0 %v14670_v15  ;;  %v14751_v27 = vsub.f32 %v1830_v18, %v14741_v26 }
  0xcc   :  { %1336 = vmatprep.mubr.f32.mxu1 %v19281_v33  ;;  %12646 = vmatpush3.msra.mxu1 %v19169_v31  ;;  %v19291_v31 = vld [vmem:[#allocation62_spill] sm:$0xff] }
  0xcd   :  { %1508 = vmatmul.mubr.f32.vlgmr.msra.gmra.mxu0 %v19282_v22  ;;  %2174 = vmatprep.subr.mxu1 %v2173_v23 }
  0xce   :  { %1513 = vmatprep.mubr.f32.mxu0 %v19283_v12  ;;  %1923 = vmatpush1.msra.mxu0 %v14672_v3 }
  0xcf   :  { %1340 = vmatmul.mubr.f32.gmra.mxu1 %v19284_v56  ;;  %1925 = vmatprep.subr.mxu0 %v14706_v21 }
  0xd0   :  { %1715 = vmatprep.mubr.f32.mxu1 %v19279_v43  ;;  %1927 = vmatpush1.msra.mxu0 %v14708_v59  ;;  %v14748_v43 = vsub.f32 %v1829_v44, %v14743_v60 }
  0xd1   :  { %1515 = vmatmul.mubr.f32.gmra.mxu0 %v19285_v38  ;;  %1929 = vmatprep.subr.mxu0 %v14741_v26 }
  0xd2   :  { %1520 = vmatprep.mubr.f32.mxu0 %v19286_v29  ;;  %19314 = vst [vmem:[#allocation31_spill] sm:$0xff] %v14748_v43  ;;  %1931 = vmatpush1.msra.mxu0 %v14743_v60 }
  0xd3   :  { %1717 = vmatmul.mubr.f32.vlgmr.msra.gmra.mxu1 %v19282_v22  ;;  %v18809_v22 = vand.u32 4294901760, %v14751_v27 }
  0xd4   :  { %1722 = vmatprep.mubr.f32.mxu1 %v19283_v12  ;;  %2180 = vmatpush1.msra.mxu1 %v2179_v24  ;;  %v18808_v12 = vand.u32 4294901760, %v14748_v43 }
  0xd5   :  { %1522 = vmatmul.mubr.f32.gmra.mxu0 %v19287_v28 }
  0xd6   :  { %1527 = vmatprep.mubr.f32.mxu0 %v19288_v19 }
  0xd7   :  { %1724 = vmatmul.mubr.f32.gmra.mxu1 %v19285_v38  ;;  %v2196_v38 = vsub.f32 %v14751_v27, %v18809_v22 }
  0xd8   :  { %1729 = vmatprep.mubr.f32.mxu1 %v19286_v29  ;;  %v2202_v29 = vsub.f32 %v14748_v43, %v18808_v12 }
  0xd9   :  { %1529 = vmatmul.mubr.f32.gmra.mxu0 %v19289_v51 }
  0xda   :  { %1534 = vmatprep.mubr.f32.mxu0 %v19290_v47 }
  0xdb   :  { %1731 = vmatmul.mubr.f32.gmra.mxu1 %v19287_v28 }
  0xdc   :  { %1736 = vmatprep.mubr.f32.mxu1 %v19288_v19  ;;  %v1828_v19 = vld [vmem:[#allocation3 + $0x8] sm:$0xff] }
  0xdd   :  { %1536 = vmatmul.mubr.f32.gmra.mxu0 %v19291_v31 }
  0xde   :  { %1541 = vmatprep.mubr.f32.mxu0 %v19292_v53 }
  0xdf   :  { %1738 = vmatmul.mubr.f32.gmra.mxu1 %v19289_v51  ;;  %v2197_v51 = vand.u32 4294901760, %v2196_v38 }
  0xe0   :  { %1743 = vmatprep.mubr.f32.mxu1 %v19290_v47  ;;  %v2203_v47 = vand.u32 4294901760, %v2202_v29 }
  0xe1   :  { %1543 = vmatmul.mubr.f32.gmra.mxu0 %v19293_v5 }
  0xe2   :  { %1548 = vmatprep.mubr.f32.mxu0 %v19294_v25 }
  0xe3   :  { %1745 = vmatmul.mubr.f32.gmra.mxu1 %v19291_v31  ;;  %v14763_v31 = vand.u32 4294901760, %v1828_v19 }
  0xe4   :  { %1750 = vmatprep.mubr.f32.mxu1 %v19292_v53  ;;  %v1827_v53 = vld [vmem:[#allocation3] sm:$0xff] }
  0xe5   :  { %1550 = vmatmul.mubr.f32.gmra.mxu0 %v19295_v55  ;;  %1933 = vmatprep.subr.mxu0 %v14763_v31 }
  0xe6   :  { %1555 = vmatprep.mubr.f32.mxu0 %v19296_v9 }
  0xe7   :  { %1752 = vmatmul.mubr.f32.gmra.mxu1 %v19293_v5 }
  0xe8   :  { %1757 = vmatprep.mubr.f32.mxu1 %v19294_v25  ;;  %v14765_v25 = vand.u32 4294901760, %v1827_v53 }
  0xe9   :  { %1557 = vmatmul.mubr.f32.gmra.mxu0 %v19297_v50 }
  0xea   :  { %1562 = vmatprep.mubr.f32.mxu0 %v19298_v36  ;;  %1935 = vmatpush1.msra.mxu0 %v14765_v25  ;;  %v14773_v11 = vsub.f32 %v1827_v53, %v14765_v25 }
  0xeb   :  { %1759 = vmatmul.mubr.f32.gmra.mxu1 %v19295_v55  ;;  %2388 = vmatprep.subr.mxu0 %v14681_v49 }
  0xec   :  { %1764 = vmatprep.mubr.f32.mxu1 %v19296_v9  ;;  %19316 = vst [vmem:[#allocation33_spill] sm:$0xff] %v14773_v11  ;;  %v18806_v61 = vand.u32 4294901760, %v14773_v11 }
  0xed   :  { %1564 = vmatmul.mubr.f32.gmra.mxu0 %v19299_v46 }
  0xee   :  { %1569 = vmatprep.mubr.f32.mxu0 %v19301_v7 }
  0xef   :  { %1766 = vmatmul.mubr.f32.gmra.mxu1 %v19297_v50 }
  0xf0   :  { %1771 = vmatprep.mubr.f32.mxu1 %v19298_v36  ;;  %v14769_v36 = vsub.f32 %v1828_v19, %v14763_v31 }
  0xf1   :  { %1571 = vmatmul.mubr.f32.gmra.mxu0 %v19302_v17 }
  0xf2   :  { %1576 = vmatprep.mubr.f32.mxu0 %v19303_v42  ;;  %19315 = vst [vmem:[#allocation46_spill] sm:$0xff] %v14769_v36 }
  0xf3   :  { %1773 = vmatmul.mubr.f32.gmra.mxu1 %v19299_v46 }
  0xf4   :  { %1778 = vmatprep.mubr.f32.mxu1 %v19301_v7 }
  0xf5   :  { %1578 = vmatmul.mubr.f32.gmra.mxu0 %v19304_v57 }
  0xf6   :  { %1583 = vmatprep.mubr.f32.mxu0 %v19305_v41 }
  0xf7   :  { %1780 = vmatmul.mubr.f32.gmra.mxu1 %v19302_v17  ;;  %v18807_v17 = vand.u32 4294901760, %v14769_v36 }
  0xf8   :  { %1785 = vmatprep.mubr.f32.mxu1 %v19303_v42 }
  0xf9   :  { %1585 = vmatmul.mubr.f32.gmra.mxu0 %v14269_v35 }
  0xfa   :  { %1590 = vmatprep.mubr.f32.mxu0 %v19306_v48 }
  0xfb   :  { %1787 = vmatmul.mubr.f32.gmra.mxu1 %v19304_v57  ;;  %v2208_v57 = vsub.f32 %v14769_v36, %v18807_v17 }
  0xfc   :  { %1792 = vmatprep.mubr.f32.mxu1 %v19305_v41 }
  0xfd   :  { %1592 = vmatmul.mubr.f32.gmra.mxu0 %v19307_v30 }
  0xfe   :  { %1597 = vmatprep.mubr.f32.mxu0 %v19308_v1 }
  0xff   :  { %1794 = vmatmul.mubr.f32.gmra.mxu1 %v14269_v35  ;;  %v2185_v35 = vand.u32 4294901760, %v2184_v14 }
 0x100   :  { %1799 = vmatprep.mubr.f32.mxu1 %v19306_v48  ;;  %v2214_v48 = vsub.f32 %v14773_v11, %v18806_v61 }
 0x101   :  { %1599 = vmatmul.mubr.f32.gmra.mxu0 %v19309_v6  ;;  %2186 = vmatprep.subr.mxu1 %v2185_v35 }
 0x102   :  { %1604 = vmatprep.mubr.f32.mxu0 %v19310_v2  ;;  %2192 = vmatpush1.msra.mxu1 %v2191_v45  ;;  %v18814_v45 = vmov 0.0  }
 0x103   :  { %1801 = vmatmul.mubr.f32.gmra.mxu1 %v19307_v30  ;;  %2198 = vmatprep.subr.mxu1 %v2197_v51  ;;  %v2209_v30 = vand.u32 4294901760, %v2208_v57 }
 0x104   :  { %1806 = vmatprep.mubr.f32.mxu1 %v19308_v1  ;;  %2204 = vmatpush1.msra.mxu1 %v2203_v47 }
 0x105   :  { %1606 = vmatmul.mubr.f32.gmra.mxu0 %v19311_v63  ;;  %2210 = vmatprep.subr.mxu1 %v2209_v30 }
 0x106   :  { %1611 = vmatprep.mubr.f32.mxu0 %v19312_v10 }
 0x107   :  { %1808 = vmatmul.mubr.f32.gmra.mxu1 %v19309_v6  ;;  %v12247_v39 = vpop.f32.mrf.mxu0  ;;  %v2215_v6 = vand.u32 4294901760, %v2214_v48 }
 0x108   :  { %1813 = vmatprep.mubr.f32.mxu1 %v19310_v2 }
 0x109   :  { %1613 = vmatmul.mubr.f32.gmra.mxu0 %v19313_v52  ;;  %v12248_v40 = vpop.f32.mrf.mxu0  ;;  %2216 = vmatpush1.msra.mxu1 %v2215_v6 }
 0x10a   :  { %v12249_v55 = vadd.f32 %v12248_v40, %v12247_v39  ;;  %1968 = vmatprep.mubr.f32.mxu0 %v18814_v45  ;;  %2596 = vmatprep.subr.mxu1 %v14670_v15 }
 0x10b   :  { %1815 = vmatmul.mubr.f32.gmra.mxu1 %v19311_v63 }
 0x10c   :  { %1820 = vmatprep.mubr.f32.mxu1 %v19312_v10 }
 0x10f   :  { %v12250_v33 = vpop.f32.mrf.mxu0  ;;  %1822 = vmatmul.mubr.f32.gmra.mxu1 %v19313_v52 }
 0x110   :  { %2249 = vmatprep.mubr.f32.mxu1 %v18814_v45 }
 0x111   :  { %v12251_v56 = vpop.f32.mrf.mxu0 }
 0x112   :  { %v12252_v42 = vadd.f32 %v12251_v56, %v12250_v33 }
 0x113   :  { %v12327_v28 = vpop.f32.mrf.mxu1 }
 0x115   :  { %v12328_v5 = vpop.f32.mrf.mxu1  ;;  %v12253_v9 = vpop.f32.mrf.mxu0 }
 0x116   :  { %v12329_v50 = vadd.f32 %v12328_v5, %v12327_v28 }
 0x117   :  { %v12330_v54 = vpop.f32.mrf.mxu1  ;;  %v12254_v46 = vpop.f32.mrf.mxu0 }
 0x118   :  { %v14775_v7 = vadd.f32 %v12329_v50, %v12249_v55  ;;  %v12255_v14 = vadd.f32 %v12254_v46, %v12253_v9 }
 0x119   :  { %v12331_v8 = vpop.f32.mrf.mxu1  ;;  %v12256_v23 = vpop.f32.mrf.mxu0 }
 0x11a   :  { %v12332_v24 = vadd.f32 %v12331_v8, %v12330_v54 }
 0x11b   :  { %v12333_v41 = vpop.f32.mrf.mxu1  ;;  %v12257_v13 = vpop.f32.mrf.mxu0 }
 0x11c   :  { %v14786_v34 = vadd.f32 %v12332_v24, %v12252_v42  ;;  %v12258_v52 = vadd.f32 %v12257_v13, %v12256_v23 }
 0x11d   :  { %v12334_v1 = vpop.f32.mrf.mxu1  ;;  %v12259_v37 = vpop.f32.mrf.mxu0 }
 0x11e   :  { %v12335_v2 = vadd.f32 %v12334_v1, %v12333_v41 }
 0x11f   :  { %v12336_v35 = vpop.f32.mrf.mxu1  ;;  %v12260_v63 = vpop.f32.mrf.mxu0 }
 0x120   :  { %v14789_v10 = vadd.f32 %v12335_v2, %v12255_v14  ;;  %v12261_v29 = vadd.f32 %v12260_v63, %v12259_v37 }
 0x121   :  { %v12337_v39 = vpop.f32.mrf.mxu1  ;;  %v12262_v18 = vpop.f32.mrf.mxu0 }
 0x122   :  { %v12338_v44 = vadd.f32 %v12337_v39, %v12336_v35 }
 0x123   :  { %v12339_v40 = vpop.f32.mrf.mxu1  ;;  %v12263_v33 = vpop.f32.mrf.mxu0 }
 0x124   :  { %v14793_v56 = vadd.f32 %v12338_v44, %v12258_v52  ;;  %v12264_v55 = vadd.f32 %v12263_v33, %v12262_v18 }
 0x125   :  { %v12340_v38 = vpop.f32.mrf.mxu1  ;;  %v12265_v28 = vpop.f32.mrf.mxu0 }
 0x126   :  { %v12341_v19 = vadd.f32 %v12340_v38, %v12339_v40 }
 0x127   :  { %v12342_v51 = vpop.f32.mrf.mxu1  ;;  %v12266_v47 = vpop.f32.mrf.mxu0 }
 0x128   :  { %v14795_v53 = vadd.f32 %v12341_v19, %v12261_v29  ;;  %v12267_v23 = vadd.f32 %v12266_v47, %v12265_v28 }
 0x129   :  { %v12343_v5 = vpop.f32.mrf.mxu1  ;;  %v12268_v9 = vpop.f32.mrf.mxu0 }
 0x12a   :  { %v12344_v50 = vadd.f32 %v12343_v5, %v12342_v51 }
 0x12b   :  { %v12345_v54 = vpop.f32.mrf.mxu1  ;;  %v12269_v46 = vpop.f32.mrf.mxu0 }
 0x12c   :  { %v14797_v8 = vadd.f32 %v12344_v50, %v12264_v55  ;;  %v12270_v1 = vadd.f32 %v12269_v46, %v12268_v9 }
 0x12d   :  { %v12346_v42 = vpop.f32.mrf.mxu1  ;;  %v12271_v24 = vpop.f32.mrf.mxu0 }
 0x12e   :  { %v12347_v57 = vadd.f32 %v12346_v42, %v12345_v54 }
 0x12f   :  { %v12348_v41 = vpop.f32.mrf.mxu1  ;;  %v12272_v48 = vpop.f32.mrf.mxu0 }
 0x130   :  { %v14799_v13 = vadd.f32 %v12347_v57, %v12267_v23  ;;  %v12273_v39 = vadd.f32 %v12272_v48, %v12271_v24 }
 0x131   :  { %v12349_v30 = vpop.f32.mrf.mxu1  ;;  %v12274_v6 = vpop.f32.mrf.mxu0 }
 0x132   :  { %v12350_v14 = vadd.f32 %v12349_v30, %v12348_v41 }
 0x133   :  { %v12351_v37 = vpop.f32.mrf.mxu1  ;;  %v12275_v2 = vpop.f32.mrf.mxu0 }
 0x134   :  { %v14801_v35 = vadd.f32 %v12350_v14, %v12270_v1  ;;  %v12276_v29 = vadd.f32 %v12275_v2, %v12274_v6 }
 0x135   :  { %v12352_v63 = vpop.f32.mrf.mxu1  ;;  %v12277_v52 = vpop.f32.mrf.mxu0 }
 0x136   :  { %19317 = vst [vmem:[#allocation35_spill] sm:$0xff] %v14801_v35  ;;  %v12353_v18 = vadd.f32 %v12352_v63, %v12351_v37 }
 0x137   :  { %v12354_v44 = vpop.f32.mrf.mxu1  ;;  %v12278_v40 = vpop.f32.mrf.mxu0 }
 0x138   :  { %v14803_v33 = vadd.f32 %v12353_v18, %v12273_v39  ;;  %v12279_v9 = vadd.f32 %v12278_v40, %v12277_v52 }
 0x139   :  { %v12355_v38 = vpop.f32.mrf.mxu1  ;;  %v12280_v28 = vpop.f32.mrf.mxu0 }
 0x13a   :  { %19318 = vst [vmem:[#allocation47_spill] sm:$0xff] %v14803_v33  ;;  %v12356_v19 = vadd.f32 %v12355_v38, %v12354_v44 }
 0x13b   :  { %v12357_v51 = vpop.f32.mrf.mxu1  ;;  %v12281_v47 = vpop.f32.mrf.mxu0 }
 0x13c   :  { %v14805_v5 = vadd.f32 %v12356_v19, %v12276_v29  ;;  %v12282_v57 = vadd.f32 %v12281_v47, %v12280_v28 }
 0x13d   :  { %v12358_v55 = vpop.f32.mrf.mxu1  ;;  %v12283_v50 = vpop.f32.mrf.mxu0 }
 0x13e   :  { %19319 = vst [vmem:[#allocation37_spill] sm:$0xff] %v14805_v5  ;;  %v12359_v54 = vadd.f32 %v12358_v55, %v12357_v51 }
 0x13f   :  { %v12360_v46 = vpop.f32.mrf.mxu1  ;;  %v12284_v42 = vpop.f32.mrf.mxu0 }
 0x140   :  { %v14807_v23 = vadd.f32 %v12359_v54, %v12279_v9  ;;  %v12285_v37 = vadd.f32 %v12284_v42, %v12283_v50 }
 0x141   :  { %v12361_v24 = vpop.f32.mrf.mxu1  ;;  %v12286_v41 = vpop.f32.mrf.mxu0 }
 0x142   :  { %19320 = vst [vmem:[#allocation41_spill] sm:$0xff] %v14807_v23  ;;  %v12362_v48 = vadd.f32 %v12361_v24, %v12360_v46 }
 0x143   :  { %v12363_v30 = vpop.f32.mrf.mxu1  ;;  %v12287_v1 = vpop.f32.mrf.mxu0 }
 0x144   :  { %v14809_v6 = vadd.f32 %v12362_v48, %v12282_v57  ;;  %v12288_v40 = vadd.f32 %v12287_v1, %v12286_v41 }
 0x145   :  { %v12364_v14 = vpop.f32.mrf.mxu1  ;;  %v12289_v2 = vpop.f32.mrf.mxu0 }
 0x146   :  { %19321 = vst [vmem:[#allocation42_spill] sm:$0xff] %v14809_v6  ;;  %v12365_v63 = vadd.f32 %v12364_v14, %v12363_v30 }
 0x147   :  { %v12366_v39 = vpop.f32.mrf.mxu1  ;;  %v12290_v52 = vpop.f32.mrf.mxu0 }
 0x148   :  { %v14811_v18 = vadd.f32 %v12365_v63, %v12285_v37  ;;  %v12291_v9 = vadd.f32 %v12290_v52, %v12289_v2 }
 0x149   :  { %v12367_v44 = vpop.f32.mrf.mxu1  ;;  %v12292_v38 = vpop.f32.mrf.mxu0 }
 0x14a   :  { %19322 = vst [vmem:[#allocation54_spill] sm:$0xff] %v14811_v18  ;;  %v12368_v29 = vadd.f32 %v12367_v44, %v12366_v39 }
 0x14b   :  { %v12293_v19 = vpop.f32.mrf.mxu0  ;;  %v12369_v51 = vpop.f32.mrf.mxu1 }
 0x14c   :  { %v14813_v28 = vadd.f32 %v12368_v29, %v12288_v40  ;;  %v12294_v41 = vadd.f32 %v12293_v19, %v12292_v38 }
 0x14d   :  { %v14815_v47 = vpop.f32.mrf.mxu0  ;;  %v12370_v55 = vpop.f32.mrf.mxu1 }
 0x14e   :  { %19323 = vst [vmem:[#allocation44_spill] sm:$0xff] %v14813_v28  ;;  %v12371_v54 = vadd.f32 %v12370_v55, %v12369_v51 }
 0x14f   :  { %v14817_v50 = vpop.f32.mrf.mxu0  ;;  %v12372_v46 = vpop.f32.mrf.mxu1 }
 0x150   :  { %v14819_v42 = vadd.f32 %v12371_v54, %v12291_v9 }
 0x151   :  { %v14821_v24 = vpop.f32.mrf.mxu0  ;;  %v12373_v57 = vpop.f32.mrf.mxu1 }
 0x152   :  { %19324 = vst [vmem:[#allocation13_spill] sm:$0xff] %v14819_v42  ;;  %v12374_v48 = vadd.f32 %v12373_v57, %v12372_v46 }
 0x153   :  { %v14823_v30 = vpop.f32.mrf.mxu0  ;;  %v14825_v1 = vpop.f32.mrf.mxu1 }
 0x154   :  { %v14827_v14 = vadd.f32 %v12374_v48, %v12294_v41 }
 0x155   :  { %v14829_v37 = vpop.f32.mrf.mxu0  ;;  %v12488_v2 = vpop.f32.mrf.mxu1 }
 0x156   :  { %19325 = vst [vmem:[#allocation48_spill] sm:$0xff] %v14827_v14 }
 0x157   :  { %v14831_v63 = vpop.f32.mrf.mxu0  ;;  %v14833_v39 = vpop.f32.mrf.mxu1 }
 0x159   :  { %v14835_v52 = vpop.f32.mrf.mxu0  ;;  %v14837_v44 = vpop.f32.mrf.mxu1 }
 0x15b   :  { %v14839_v40 = vpop.f32.mrf.mxu0  ;;  %v14841_v38 = vpop.f32.mrf.mxu1 }
 0x15d   :  { %v14843_v29 = vpop.f32.mrf.mxu0  ;;  %v14845_v19 = vpop.f32.mrf.mxu1 }
 0x15f   :  { %v14847_v51 = vpop.f32.mrf.mxu0  ;;  %v14849_v55 = vpop.f32.mrf.mxu1 }
 0x161   :  { %v14851_v9 = vpop.f32.mrf.mxu0  ;;  %v14853_v54 = vpop.f32.mrf.mxu1 }
 0x163   :  { %v14855_v46 = vpop.f32.mrf.mxu0  ;;  %v14857_v57 = vpop.f32.mrf.mxu1 }
 0x165   :  { %v14859_v41 = vpop.f32.mrf.mxu0  ;;  %v14861_v48 = vpop.f32.mrf.mxu1 }
 0x167   :  { %v14863_v61 = vpop.f32.mrf.mxu0  ;;  %v14865_v17 = vpop.f32.mrf.mxu1 }
 0x169   :  { %v14867_v12 = vpop.f32.mrf.mxu0  ;;  %v14869_v22 = vpop.f32.mrf.mxu1 }
 0x16b   :  { %v14871_v62 = vpop.f32.mrf.mxu0  ;;  %v14873_v58 = vpop.f32.mrf.mxu1 }
 0x16d   :  { %v14875_v20 = vpop.f32.mrf.mxu0  ;;  %v14877_v16 = vpop.f32.mrf.mxu1 }
 0x16f   :  { %v14879_v45 = vpop.f32.mrf.mxu0  ;;  %v14881_v14 = vpop.f32.mrf.mxu1 }
 0x170   :  { %19326 = vst [vmem:[#allocation50_spill] sm:$0xff] %v14879_v45  ;;  %19327 = vst [vmem:[#allocation15_spill] sm:$0xff] %v14881_v14 }
 0x171   :  { %v14883_v42 = vpop.f32.mrf.mxu0  ;;  %v14885_v28 = vpop.f32.mrf.mxu1 }
 0x172   :  { %19328 = vst [vmem:[#allocation17_spill] sm:$0xff] %v14883_v42  ;;  %19329 = vst [vmem:[#allocation18_spill] sm:$0xff] %v14885_v28 }
 0x173   :  { %v14887_v18 = vpop.f32.mrf.mxu0  ;;  %v14889_v6 = vpop.f32.mrf.mxu1 }
 0x174   :  { %19330 = vst [vmem:[#allocation52_spill] sm:$0xff] %v14887_v18  ;;  %19331 = vst [vmem:[#allocation19_spill] sm:$0xff] %v14889_v6 }
 0x175   :  { %v14891_v23 = vpop.f32.mrf.mxu0  ;;  %v14893_v5 = vpop.f32.mrf.mxu1 }
 0x176   :  { %19332 = vst [vmem:[#allocation55_spill] sm:$0xff] %v14891_v23  ;;  %19333 = vst [vmem:[#allocation20_spill] sm:$0xff] %v14893_v5 }
 0x177   :  { %v14895_v49 = vpop.f32.mrf.mxu0  ;;  %v14897_v11 = vpop.f32.mrf.mxu1 }
 0x178   :  { %19334 = vst [vmem:[#allocation22_spill] sm:$0xff] %v14895_v49  ;;  %19335 = vst [vmem:[#allocation58_spill] sm:$0xff] %v14897_v11 }
 0x179   :  { %v14899_v33 = vpop.f32.mrf.mxu0  ;;  %v14901_v36 = vpop.f32.mrf.mxu1 }
 0x17a   :  { %19336 = vst [vmem:[#allocation59_spill] sm:$0xff] %v14899_v33  ;;  %19337 = vst [vmem:[#allocation12_spill] sm:$0xff] %v14901_v36 }
 0x17b   :  { %v14903_v35 = vpop.f32.mrf.mxu0  ;;  %v14905_v42 = vpop.f32.mrf.mxu1 }
 0x17c   :  { %19338 = vst [vmem:[#allocation64_spill] sm:$0xff] %v14903_v35  ;;  %19339 = vst [vmem:[#allocation65_spill] sm:$0xff] %v14905_v42 }
 0x17d   :  { %v14907_v43 = vpop.f32.mrf.mxu0  ;;  %v14909_v18 = vpop.f32.mrf.mxu1 }
 0x17e   :  { %19340 = vst [vmem:[#allocation24_spill] sm:$0xff] %v14907_v43  ;;  %19341 = vst [vmem:[#allocation67_spill] sm:$0xff] %v14909_v18 }
 0x17f   :  { %v14911_v6 = vpop.f32.mrf.mxu0  ;;  %v14913_v23 = vpop.f32.mrf.mxu1 }
 0x180   :  { %19342 = vst [vmem:[#allocation68_spill] sm:$0xff] %v14911_v6  ;;  %19343 = vst [vmem:[#allocation14_spill] sm:$0xff] %v14913_v23 }
 0x181   :  { %v14915_v5 = vpop.f32.mrf.mxu0  ;;  %v14917_v49 = vpop.f32.mrf.mxu1 }
 0x182   :  { %19344 = vst [vmem:[#allocation69_spill] sm:$0xff] %v14915_v5  ;;  %19345 = vst [vmem:[#allocation16_spill] sm:$0xff] %v14917_v49 }
 0x183   :  { %v14919_v11 = vpop.f32.mrf.mxu0  ;;  %v14921_v33 = vpop.f32.mrf.mxu1 }
 0x184   :  { %19346 = vst [vmem:[#allocation71_spill] sm:$0xff] %v14919_v11  ;;  %19347 = vst [vmem:[#allocation74_spill] sm:$0xff] %v14921_v33 }
 0x185   :  { %v14923_v36 = vpop.f32.mrf.mxu0  ;;  %v14925_v35 = vpop.f32.mrf.mxu1 }
 0x186   :  { %19348 = vst [vmem:[#allocation75_spill] sm:$0xff] %v14923_v36  ;;  %19349 = vst [vmem:[#allocation79_spill] sm:$0xff] %v14925_v35  ;;  %v12409_v36 = vadd.f32 %v14817_v50, %v14815_v47  ;;  %v12492_v47 = vadd.f32 %v14837_v44, %v14833_v39  ;;  %v12415_v50 = vadd.f32 %v14831_v63, %v14829_v37 }
 0x187   :  { %v14927_v42 = vpop.f32.mrf.mxu0  ;;  %v14929_v43 = vpop.f32.mrf.mxu1 }
 0x188   :  { %19350 = vst [vmem:[#allocation21_spill] sm:$0xff] %v14927_v42  ;;  %19351 = vst [vmem:[#allocation80_spill] sm:$0xff] %v14929_v43  ;;  %v12489_v42 = vadd.f32 %v12488_v2, %v14825_v1 }
 0x189   :  { %v14931_v18 = vpop.f32.mrf.mxu0  ;;  %v14933_v6 = vpop.f32.mrf.mxu1 }
 0x18a   :  { %19352 = vst [vmem:[#allocation32_spill] sm:$0xff] %v14931_v18  ;;  %19353 = vst [vmem:[#allocation34_spill] sm:$0xff] %v14933_v6  ;;  %v934_v18 = vadd.f32 %v12409_v36, %v14775_v7 }
 0x18b   :  { %v14935_v23 = vpop.f32.mrf.mxu0  ;;  %v14937_v5 = vpop.f32.mrf.mxu1 }
 0x18c   :  { %19354 = vst [vmem:[#allocation23_spill] sm:$0xff] %v14935_v23  ;;  %19355 = vst [vmem:[#allocation83_spill] sm:$0xff] %v14937_v5  ;;  %v12412_v23 = vadd.f32 %v14823_v30, %v14821_v24  ;;  %v12418_v30 = vadd.f32 %v14839_v40, %v14835_v52 }
 0x18d   :  { %v12567_v49 = vpop.f32.mrf.mxu0  ;;  %v14939_v11 = vpop.f32.mrf.mxu1 }
 0x18e   :  { %19356 = vst [vmem:[#allocation25_spill] sm:$0xff] %v14939_v11  ;;  %v1177_v11 = vadd.f32 %v12489_v42, %v934_v18  ;;  %v943_v2 = vadd.f32 %v12412_v23, %v14786_v34  ;;  %v952_v42 = vadd.f32 %v12415_v50, %v14789_v10  ;;  %v12498_v10 = vadd.f32 %v14853_v54, %v14849_v55 }
 0x18f   :  { %v12568_v33 = vpop.f32.mrf.mxu0  ;;  %v14943_v35 = vpop.f32.mrf.mxu1  ;;  %v961_v52 = vadd.f32 %v12418_v30, %v14793_v56 }
 0x190   :  { %19357 = vst [vmem:[#allocation84_spill] sm:$0xff] %v14943_v35  ;;  %v12569_v5 = vadd.f32 %v12568_v33, %v12567_v49  ;;  %v1188_v49 = vadd.f32 %v12492_v47, %v943_v2  ;;  %v12495_v33 = vadd.f32 %v14845_v19, %v14841_v38 }
 0x191   :  { %v12570_v43 = vpop.f32.mrf.mxu0  ;;  %v14946_v28 = vpop.f32.mrf.mxu1  ;;  %v1210_v2 = vadd.f32 %v12498_v10, %v961_v52 }
 0x192   :  { %19358 = vst [vmem:[#allocation36_spill] sm:$0xff] %v14946_v28  ;;  %v1510_v28 = vadd.f32 %v12569_v5, %v1177_v11 }
 0x193   :  { %v12571_v6 = vpop.f32.mrf.mxu0  ;;  %v12647_v14 = vpop.f32.mrf.mxu1 }
 0x194   :  { %v12572_v45 = vadd.f32 %v12571_v6, %v12570_v43 }
 0x195   :  { %v12573_v35 = vpop.f32.mrf.mxu0  ;;  %v12648_v1 = vpop.f32.mrf.mxu1 }
 0x196   :  { %v12649_v36 = vadd.f32 %v12648_v1, %v12647_v14  ;;  %v1517_v39 = vadd.f32 %v12572_v45, %v1188_v49  ;;  %v12421_v14 = vadd.f32 %v14847_v51, %v14843_v29  ;;  %v19361_v29 = vmov 0.0  }
 0x197   :  { %v12574_v7 = vpop.f32.mrf.mxu0  ;;  %v12650_v24 = vpop.f32.mrf.mxu1 }
 0x198   :  { %v1719_v18 = vadd.f32 %v12649_v36, %v1510_v28  ;;  %v12575_v34 = vadd.f32 %v12574_v7, %v12573_v35  ;;  %v1199_v28 = vadd.f32 %v12495_v33, %v952_v42  ;;  %v970_v1 = vadd.f32 %v12421_v14, %v14795_v53 }
 0x199   :  { %v12576_v37 = vpop.f32.mrf.mxu0  ;;  %v12651_v63 = vpop.f32.mrf.mxu1  ;;  %v12501_v36 = vadd.f32 %v14861_v48, %v14857_v57 }
 0x19a   :  { %v1849_v43 = vsel %vm1847_vm0, %v1719_v18, 0  ;;  %v12652_v11 = vadd.f32 %v12651_v63, %v12650_v24  ;;  %v1524_v38 = vadd.f32 %v12575_v34, %v1199_v28  ;;  %v12424_v24 = vadd.f32 %v14855_v46, %v14851_v9 }
 0x19b   :  { %v14962_v5 = vand.u32 4294901760, %v1849_v43  ;;  %v12577_v23 = vpop.f32.mrf.mxu0  ;;  %v12653_v6 = vpop.f32.mrf.mxu1  ;;  %v12427_v9 = vadd.f32 %v14863_v61, %v14859_v41 }
 0x19c   :  { %v1726_v44 = vadd.f32 %v12652_v11, %v1517_v39  ;;  %v12578_v19 = vadd.f32 %v12577_v23, %v12576_v37  ;;  %v12504_v11 = vadd.f32 %v14869_v22, %v14865_v17  ;;  %v979_v61 = vadd.f32 %v12424_v24, %v14797_v8 }
 0x19d   :  { %19359 = vst [vmem:[#allocation26_spill] sm:$0xff] %v14962_v5  ;;  %v14970_v45 = vsub.f32 %v1849_v43, %v14962_v5  ;;  %v12579_v35 = vpop.f32.mrf.mxu0  ;;  %v12654_v40 = vpop.f32.mrf.mxu1  ;;  %2251 = vmatmul.mubr.f32.vlgmr.msra.gmra.mxu1 %v14962_v5  ;;  %v1221_v43 = vadd.f32 %v12501_v36, %v970_v1  ;;  %v988_v8 = vadd.f32 %v12427_v9, %v14799_v13 }
 0x19e   :  { %v1852_v47 = vsel %vm1847_vm0, %v1726_v44, 0  ;;  %v12655_v50 = vadd.f32 %v12654_v40, %v12653_v6  ;;  %2256 = vmatprep.mubr.f32.mxu1 %v19361_v29  ;;  %2598 = vmatpush1.msra.mxu1 %v14672_v3  ;;  %v1531_v42 = vadd.f32 %v12578_v19, %v1210_v2  ;;  %v12430_v13 = vadd.f32 %v14871_v62, %v14867_v12 }
 0x19f   :  { %19360 = vst [vmem:[#allocation86_spill] sm:$0xff] %v14970_v45  ;;  %v14977_v51 = vand.u32 4294901760, %v14970_v45  ;;  %v14979_v56 = vand.u32 4294901760, %v1852_v47  ;;  %v12580_v55 = vpop.f32.mrf.mxu0  ;;  %v12656_v54 = vpop.f32.mrf.mxu1  ;;  %2600 = vmatprep.subr.mxu1 %v14706_v21 }
 0x1a0   :  { %v1733_v7 = vadd.f32 %v12655_v50, %v1524_v38  ;;  %2602 = vmatpush1.msra.mxu1 %v14708_v59  ;;  %v12581_v57 = vadd.f32 %v12580_v55, %v12579_v35  ;;  %v12507_v50 = vadd.f32 %v14877_v16, %v14873_v58 }
 0x1a1   :  { %19362 = vst [vmem:[#allocation27_spill] sm:$0xff] %v14979_v56  ;;  %v14989_v49 = vsub.f32 %v1852_v47, %v14979_v56  ;;  %v12582_v33 = vpop.f32.mrf.mxu0  ;;  %v12657_v18 = vpop.f32.mrf.mxu1  ;;  %2258 = vmatmul.mubr.f32.gmra.mxu1 %v14979_v56  ;;  %v1972_v53 = vsub.f32 %v14970_v45, %v14977_v51  ;;  %2604 = vmatprep.subr.mxu1 %v14741_v26 }
 0x1a2   :  { %v1855_v48 = vsel %vm1847_vm0, %v1733_v7, 0  ;;  %v12658_v30 = vadd.f32 %v12657_v18, %v12656_v54  ;;  %2263 = vmatprep.mubr.f32.mxu1 %v19361_v29  ;;  %2606 = vmatpush1.msra.mxu1 %v14743_v60  ;;  %v1538_v10 = vadd.f32 %v12581_v57, %v1221_v43  ;;  %v1232_v47 = vadd.f32 %v12504_v11, %v979_v61  ;;  %v19374_v43 = vld [vmem:[#allocation35_spill] sm:$0xff] }
 0x1a3   :  { %v15000_v46 = vand.u32 4294901760, %v1855_v48  ;;  %v12583_v37 = vpop.f32.mrf.mxu0  ;;  %v12659_v63 = vpop.f32.mrf.mxu1  ;;  %v15002_v39 = vand.u32 4294901760, %v1972_v53  ;;  %v15005_v34 = vand.u32 4294901760, %v14989_v49  ;;  %2608 = vmatprep.subr.mxu1 %v14763_v31  ;;  %v19370_v53 = vld [vmem:[#allocation50_spill] sm:$0xff]  ;;  %v1243_v57 = vadd.f32 %v12507_v50, %v988_v8  ;;  %v19379_v50 = vld [vmem:[#allocation47_spill] sm:$0xff] }
 0x1a4   :  { %v1740_v23 = vadd.f32 %v12658_v30, %v1531_v42  ;;  %2610 = vmatpush1.msra.mxu1 %v14765_v25  ;;  %v12584_v44 = vadd.f32 %v12583_v37, %v12582_v33  ;;  %v12433_v42 = vadd.f32 %v19370_v53, %v14875_v20  ;;  %v19372_v30 = vld [vmem:[#allocation18_spill] sm:$0xff]  ;;  %v997_v11 = vadd.f32 %v12430_v13, %v19374_v43 }
 0x1a5   :  { %19363 = vst [vmem:[#allocation89_spill] sm:$0xff] %v15000_v46  ;;  %19364 = vst [vmem:[#allocation40_spill] sm:$0xff] %v15002_v39  ;;  %v15013_v41 = vsub.f32 %v1855_v48, %v15000_v46  ;;  %v12585_v6 = vpop.f32.mrf.mxu0  ;;  %v12660_v14 = vpop.f32.mrf.mxu1  ;;  %1974 = vmatmul.mubr.f32.vlgmr.msra.gmra.mxu0 %v15002_v39  ;;  %2265 = vmatmul.mubr.f32.gmra.mxu1 %v15000_v46  ;;  %v1983_v28 = vsub.f32 %v14989_v49, %v15005_v34  ;;  %v19371_v48 = vld [vmem:[#allocation15_spill] sm:$0xff] }
 0x1a6   :  { %v1858_v22 = vsel %vm1847_vm0, %v1740_v23, 0  ;;  %v12661_v17 = vadd.f32 %v12660_v14, %v12659_v63  ;;  %2391 = vmatpush1.msra.mxu0 %v14678_v0  ;;  %1979 = vmatprep.mubr.f32.mxu0 %v19361_v29  ;;  %v1545_v58 = vadd.f32 %v12584_v44, %v1232_v47  ;;  %v12510_v9 = vadd.f32 %v19372_v30, %v19371_v48  ;;  %v19373_v63 = vld [vmem:[#allocation31_spill] sm:$0xff]  ;;  %v19378_v47 = vld [vmem:[#allocation46_spill] sm:$0xff] }
 0x1a7   :  { %v15023_v52 = vand.u32 4294901760, %v1858_v22  ;;  %v12586_v35 = vpop.f32.mrf.mxu0  ;;  %v12662_v40 = vpop.f32.mrf.mxu1  ;;  %2270 = vmatprep.mubr.f32.mxu1 %v19361_v29  ;;  %v15026_v38 = vand.u32 4294901760, %v1983_v28  ;;  %v15029_v19 = vand.u32 4294901760, %v15013_v41  ;;  %2394 = vmatprep.subr.mxu0 %v14717_v32 }
 0x1a8   :  { %v1747_v55 = vadd.f32 %v12661_v17, %v1538_v10  ;;  %2397 = vmatpush1.msra.mxu0 %v14714_v4  ;;  %3014 = vmatprep.subr.mxu1 %v14670_v15  ;;  %v12587_v36 = vadd.f32 %v12586_v35, %v12585_v6  ;;  %v1254_v13 = vadd.f32 %v12510_v9, %v997_v11 }
 0x1a9   :  { %19365 = vst [vmem:[#allocation28_spill] sm:$0xff] %v15023_v52  ;;  %19366 = vst [vmem:[#allocation90_spill] sm:$0xff] %v15026_v38  ;;  %v15039_v54 = vsub.f32 %v1858_v22, %v15023_v52  ;;  %v12588_v1 = vpop.f32.mrf.mxu0  ;;  %v12663_v2 = vpop.f32.mrf.mxu1  ;;  %1985 = vmatmul.mubr.f32.gmra.mxu0 %v15026_v38  ;;  %2272 = vmatmul.mubr.f32.gmra.mxu1 %v15023_v52  ;;  %v1994_v16 = vsub.f32 %v15013_v41, %v15029_v19 }
 0x1aa   :  { %v1861_v7 = vsel %vm1847_vm0, %v1747_v55, 0  ;;  %v12664_v15 = vadd.f32 %v12663_v2, %v12662_v40  ;;  %1990 = vmatprep.mubr.f32.mxu0 %v19361_v29  ;;  %2277 = vmatprep.mubr.f32.mxu1 %v19361_v29  ;;  %v1552_v14 = vadd.f32 %v12587_v36, %v1243_v57  ;;  %v1006_v55 = vadd.f32 %v12433_v42, %v19379_v50  ;;  %v19381_v2 = vld [vmem:[#allocation20_spill] sm:$0xff]  ;;  %v19382_v36 = vld [vmem:[#allocation33_spill] sm:$0xff]  ;;  %v19393_v50 = vld [vmem:[#allocation58_spill] sm:$0xff] }
 0x1ab   :  { %19367 = vst [vmem:[#allocation29_spill] sm:$0xff] %v15039_v54  ;;  %v15048_v62 = vand.u32 4294901760, %v1861_v7  ;;  %v12589_v12 = vpop.f32.mrf.mxu0  ;;  %v12665_v24 = vpop.f32.mrf.mxu1  ;;  %v15050_v33 = vand.u32 4294901760, %v1994_v16  ;;  %v15053_v18 = vand.u32 4294901760, %v15039_v54  ;;  %2400 = vmatprep.subr.mxu0 %v14751_v27 }
 0x1ac   :  { %v1754_v37 = vadd.f32 %v12664_v15, %v1545_v58  ;;  %2403 = vmatpush1.msra.mxu0 %v19373_v63  ;;  %v12590_v28 = vadd.f32 %v12589_v12, %v12588_v1  ;;  %v19380_v1 = vld [vmem:[#allocation19_spill] sm:$0xff]  ;;  %v19384_v15 = vld [vmem:[#allocation52_spill] sm:$0xff] }
 0x1ad   :  { %19368 = vst [vmem:[#allocation91_spill] sm:$0xff] %v15048_v62  ;;  %19369 = vst [vmem:[#allocation93_spill] sm:$0xff] %v15050_v33  ;;  %v15063_v23 = vsub.f32 %v1861_v7, %v15048_v62  ;;  %v12591_v61 = vpop.f32.mrf.mxu0  ;;  %v12666_v6 = vpop.f32.mrf.mxu1  ;;  %1996 = vmatmul.mubr.f32.gmra.mxu0 %v15050_v33  ;;  %2279 = vmatmul.mubr.f32.gmra.mxu1 %v15048_v62  ;;  %v2005_v20 = vsub.f32 %v15039_v54, %v15053_v18  ;;  %v19383_v7 = vld [vmem:[#allocation17_spill] sm:$0xff] }
 0x1ae   :  { %v1864_v10 = vsel %vm1847_vm0, %v1754_v37, 0  ;;  %v12667_v44 = vadd.f32 %v12666_v6, %v12665_v24  ;;  %2001 = vmatprep.mubr.f32.mxu0 %v19361_v29  ;;  %2284 = vmatprep.mubr.f32.mxu1 %v19361_v29  ;;  %v12513_v16 = vadd.f32 %v19381_v2, %v19380_v1  ;;  %v12436_v12 = vadd.f32 %v19384_v15, %v19383_v7 }
 0x1af   :  { %19375 = vst [vmem:[#allocation95_spill] sm:$0xff] %v15063_v23  ;;  %v15072_v22 = vand.u32 4294901760, %v1864_v10  ;;  %v12592_v17 = vpop.f32.mrf.mxu0  ;;  %v12668_v8 = vpop.f32.mrf.mxu1  ;;  %v15074_v35 = vand.u32 4294901760, %v2005_v20  ;;  %v15077_v40 = vand.u32 4294901760, %v15063_v23  ;;  %2406 = vmatprep.subr.mxu0 %v19378_v47  ;;  %v1559_v48 = vadd.f32 %v12590_v28, %v1254_v13  ;;  %v19392_v28 = vld [vmem:[#allocation22_spill] sm:$0xff]  ;;  %v19394_v13 = vld [vmem:[#allocation12_spill] sm:$0xff] }
 0x1b0   :  { %v1761_v58 = vadd.f32 %v12667_v44, %v1552_v14  ;;  %2409 = vmatpush1.msra.mxu0 %v19382_v36  ;;  %v12593_v30 = vadd.f32 %v12592_v17, %v12591_v61  ;;  %v19391_v61 = vld [vmem:[#allocation55_spill] sm:$0xff]  ;;  %v12516_v1 = vadd.f32 %v19394_v13, %v19393_v50  ;;  %v19400_v50 = vld [vmem:[#allocation41_spill] sm:$0xff] }
 0x1b1   :  { %19376 = vst [vmem:[#allocation43_spill] sm:$0xff] %v15072_v22  ;;  %19377 = vst [vmem:[#allocation45_spill] sm:$0xff] %v15074_v35  ;;  %v15087_v24 = vsub.f32 %v1864_v10, %v15072_v22  ;;  %v12594_v53 = vpop.f32.mrf.mxu0  ;;  %v12669_v57 = vpop.f32.mrf.mxu1  ;;  %2007 = vmatmul.mubr.f32.gmra.mxu0 %v15074_v35  ;;  %2286 = vmatmul.mubr.f32.gmra.mxu1 %v15072_v22  ;;  %v2016_v42 = vsub.f32 %v15063_v23, %v15077_v40  ;;  %v19389_v10 = vld [vmem:[#allocation30_spill] sm:$0xff] }
 0x1b2   :  { %v1867_v9 = vsel %vm1847_vm0, %v1761_v58, 0  ;;  %v12670_v37 = vadd.f32 %v12669_v57, %v12668_v8  ;;  %2012 = vmatprep.mubr.f32.mxu0 %v19361_v29  ;;  %2291 = vmatprep.mubr.f32.mxu1 %v19361_v29  ;;  %v19390_v44 = vand.u32 4294901760, %v19389_v10  ;;  %v12439_v17 = vadd.f32 %v19392_v28, %v19391_v61  ;;  %v19395_v58 = vld [vmem:[#allocation37_spill] sm:$0xff] }
 0x1b3   :  { %19385 = vst [vmem:[#allocation49_spill] sm:$0xff] %v15087_v24  ;;  %v15096_v43 = vand.u32 4294901760, %v1867_v9  ;;  %v12595_v11 = vpop.f32.mrf.mxu0  ;;  %v12671_v6 = vpop.f32.mrf.mxu1  ;;  %v15098_v20 = vand.u32 4294901760, %v2016_v42  ;;  %v15101_v14 = vand.u32 4294901760, %v15087_v24  ;;  %v1265_v8 = vadd.f32 %v12513_v16, %v1006_v55 }
 0x1b4   :  { %2815 = vmatprep.subr.mxu0 %v19390_v44  ;;  %v1768_v2 = vadd.f32 %v12670_v37, %v1559_v48  ;;  %v1015_v7 = vadd.f32 %v12436_v12, %v19395_v58  ;;  %v12596_v55 = vadd.f32 %v12595_v11, %v12594_v53  ;;  %v1024_v13 = vadd.f32 %v12439_v17, %v19400_v50  ;;  %v19401_v53 = vld [vmem:[#allocation65_spill] sm:$0xff]  ;;  %v19402_v11 = vld [vmem:[#allocation67_spill] sm:$0xff]  ;;  %v19404_v58 = vld [vmem:[#allocation64_spill] sm:$0xff] }
 0x1b5   :  { %19386 = vst [vmem:[#allocation51_spill] sm:$0xff] %v15096_v43  ;;  %19387 = vst [vmem:[#allocation53_spill] sm:$0xff] %v15098_v20  ;;  %v15111_v15 = vsub.f32 %v1867_v9, %v15096_v43  ;;  %v12597_v57 = vpop.f32.mrf.mxu0  ;;  %v12672_v42 = vpop.f32.mrf.mxu1  ;;  %2018 = vmatmul.mubr.f32.gmra.mxu0 %v15098_v20  ;;  %2293 = vmatmul.mubr.f32.gmra.mxu1 %v15096_v43  ;;  %v2027_v10 = vsub.f32 %v15087_v24, %v15101_v14 }
 0x1b6   :  { %19388 = vst [vmem:[#allocation56_spill] sm:$0xff] %v15101_v14  ;;  %v1566_v44 = vadd.f32 %v12593_v30, %v1265_v8  ;;  %v1870_v16 = vsel %vm1847_vm0, %v1768_v2, 0  ;;  %v12673_v61 = vadd.f32 %v12672_v42, %v12671_v6  ;;  %2023 = vmatprep.mubr.f32.mxu0 %v19361_v29  ;;  %2298 = vmatprep.mubr.f32.mxu1 %v19361_v29  ;;  %v19403_v2 = vld [vmem:[#allocation59_spill] sm:$0xff] }
 0x1b7   :  { %19396 = vst [vmem:[#allocation57_spill] sm:$0xff] %v15111_v15  ;;  %v15120_v12 = vand.u32 4294901760, %v1870_v16  ;;  %v12598_v48 = vpop.f32.mrf.mxu0  ;;  %v12674_v9 = vpop.f32.mrf.mxu1  ;;  %v15122_v37 = vand.u32 4294901760, %v2027_v10  ;;  %v15125_v28 = vand.u32 4294901760, %v15111_v15  ;;  %v1276_v30 = vadd.f32 %v12516_v1, %v1015_v7 }
 0x1b8   :  { %v12519_v8 = vadd.f32 %v19402_v11, %v19401_v53  ;;  %v1775_v6 = vadd.f32 %v12673_v61, %v1566_v44  ;;  %v12442_v42 = vadd.f32 %v19404_v58, %v19403_v2  ;;  %v12599_v7 = vadd.f32 %v12598_v48, %v12597_v57  ;;  %v19409_v2 = vld [vmem:[#allocation24_spill] sm:$0xff]  ;;  %v19411_v48 = vld [vmem:[#allocation14_spill] sm:$0xff] }
 0x1b9   :  { %19397 = vst [vmem:[#allocation60_spill] sm:$0xff] %v15120_v12  ;;  %19398 = vst [vmem:[#allocation61_spill] sm:$0xff] %v15122_v37  ;;  %v15133_v20 = vsub.f32 %v1870_v16, %v15120_v12  ;;  %v12600_v35 = vpop.f32.mrf.mxu0  ;;  %v12675_v33 = vpop.f32.mrf.mxu1  ;;  %2029 = vmatmul.mubr.f32.gmra.mxu0 %v15122_v37  ;;  %2300 = vmatmul.mubr.f32.gmra.mxu1 %v15120_v12  ;;  %v2038_v17 = vsub.f32 %v15111_v15, %v15125_v28  ;;  %v19410_v58 = vld [vmem:[#allocation68_spill] sm:$0xff] }
 0x1ba   :  { %19399 = vst [vmem:[#allocation62_spill] sm:$0xff] %v15125_v28  ;;  %v1573_v1 = vadd.f32 %v12596_v55, %v1276_v30  ;;  %v1873_v10 = vsel %vm1847_vm0, %v1775_v6, 0  ;;  %v12676_v44 = vadd.f32 %v12675_v33, %v12674_v9  ;;  %2034 = vmatprep.mubr.f32.mxu0 %v19361_v29  ;;  %2305 = vmatprep.mubr.f32.mxu1 %v19361_v29  ;;  %v19412_v30 = vld [vmem:[#allocation16_spill] sm:$0xff]  ;;  %v19413_v6 = vld [vmem:[#allocation42_spill] sm:$0xff] }
 0x1bb   :  { %19405 = vst [vmem:[#allocation63_spill] sm:$0xff] %v15133_v20  ;;  %v15142_v16 = vand.u32 4294901760, %v1873_v10  ;;  %v12601_v61 = vpop.f32.mrf.mxu0  ;;  %v12677_v50 = vpop.f32.mrf.mxu1  ;;  %v15144_v53 = vand.u32 4294901760, %v2038_v17  ;;  %v15147_v11 = vand.u32 4294901760, %v15133_v20  ;;  %v12445_v55 = vadd.f32 %v19410_v58, %v19409_v2 }
 0x1bc   :  { %v1287_v57 = vadd.f32 %v12519_v8, %v1024_v13  ;;  %v12522_v33 = vadd.f32 %v19412_v30, %v19411_v48  ;;  %v1782_v9 = vadd.f32 %v12676_v44, %v1573_v1  ;;  %v1033_v37 = vadd.f32 %v12442_v42, %v19413_v6  ;;  %v19418_v30 = vld [vmem:[#allocation54_spill] sm:$0xff] }
 0x1bd   :  { %19406 = vst [vmem:[#allocation66_spill] sm:$0xff] %v15142_v16  ;;  %19407 = vst [vmem:[#allocation70_spill] sm:$0xff] %v15144_v53  ;;  %v15155_v38 = vsub.f32 %v1873_v10, %v15142_v16  ;;  %v12603_v39 = vpop.f32.mrf.mxu0  ;;  %v12678_v12 = vpop.f32.mrf.mxu1  ;;  %2040 = vmatmul.mubr.f32.gmra.mxu0 %v15144_v53  ;;  %2307 = vmatmul.mubr.f32.gmra.mxu1 %v15142_v16  ;;  %v2049_v17 = vsub.f32 %v15133_v20, %v15147_v11 }
 0x1be   :  { %19408 = vst [vmem:[#allocation72_spill] sm:$0xff] %v15147_v11  ;;  %v1580_v2 = vadd.f32 %v12599_v7, %v1287_v57  ;;  %v12602_v13 = vadd.f32 %v12601_v61, %v12600_v35  ;;  %v1876_v8 = vsel %vm1847_vm0, %v1782_v9, 0  ;;  %v12679_v58 = vadd.f32 %v12678_v12, %v12677_v50  ;;  %2045 = vmatprep.mubr.f32.mxu0 %v19361_v29  ;;  %v19419_v35 = vld [vmem:[#allocation74_spill] sm:$0xff]  ;;  %v19420_v61 = vld [vmem:[#allocation79_spill] sm:$0xff]  ;;  %v19421_v50 = vld [vmem:[#allocation69_spill] sm:$0xff] }
 0x1bf   :  { %19414 = vst [vmem:[#allocation73_spill] sm:$0xff] %v15155_v38  ;;  %2312 = vmatprep.mubr.f32.mxu1 %v19361_v29  ;;  %v15164_v42 = vand.u32 4294901760, %v1876_v8  ;;  %v12604_v1 = vpop.f32.mrf.mxu0  ;;  %v12680_v10 = vpop.f32.mrf.mxu1  ;;  %v15166_v44 = vand.u32 4294901760, %v2049_v17  ;;  %v15169_v48 = vand.u32 4294901760, %v15155_v38  ;;  %v1042_v6 = vadd.f32 %v12445_v55, %v19418_v30  ;;  %v19422_v9 = vld [vmem:[#allocation71_spill] sm:$0xff] }
 0x1c0   :  { %v1298_v7 = vadd.f32 %v12522_v33, %v1033_v37  ;;  %v12525_v57 = vadd.f32 %v19420_v61, %v19419_v35  ;;  %v1789_v12 = vadd.f32 %v12679_v58, %v1580_v2  ;;  %v12448_v53 = vadd.f32 %v19422_v9, %v19421_v50  ;;  %v19427_v50 = vld [vmem:[#allocation75_spill] sm:$0xff]  ;;  %v19428_v9 = vld [vmem:[#allocation21_spill] sm:$0xff] }
 0x1c1   :  { %19415 = vst [vmem:[#allocation76_spill] sm:$0xff] %v15164_v42  ;;  %19416 = vst [vmem:[#allocation77_spill] sm:$0xff] %v15166_v44  ;;  %v15177_v16 = vsub.f32 %v1876_v8, %v15164_v42  ;;  %v12606_v43 = vpop.f32.mrf.mxu0  ;;  %v12681_v22 = vpop.f32.mrf.mxu1  ;;  %2051 = vmatmul.mubr.f32.gmra.mxu0 %v15166_v44  ;;  %2314 = vmatmul.mubr.f32.gmra.mxu1 %v15164_v42  ;;  %v2060_v55 = vsub.f32 %v15155_v38, %v15169_v48 }
 0x1c2   :  { %19417 = vst [vmem:[#allocation78_spill] sm:$0xff] %v15169_v48  ;;  %v1587_v37 = vadd.f32 %v12602_v13, %v1298_v7  ;;  %v12605_v33 = vadd.f32 %v12604_v1, %v12603_v39  ;;  %v1879_v17 = vsel %vm1847_vm0, %v1789_v12, 0  ;;  %v12682_v2 = vadd.f32 %v12681_v22, %v12680_v10  ;;  %2056 = vmatprep.mubr.f32.mxu0 %v19361_v29  ;;  %v19429_v1 = vld [vmem:[#allocation80_spill] sm:$0xff]  ;;  %v19430_v7 = vld [vmem:[#allocation34_spill] sm:$0xff] }
 0x1c3   :  { %19423 = vst [vmem:[#allocation81_spill] sm:$0xff] %v15177_v16  ;;  %2319 = vmatprep.mubr.f32.mxu1 %v19361_v29  ;;  %v15186_v8 = vand.u32 4294901760, %v1879_v17  ;;  %v12607_v58 = vpop.f32.mrf.mxu0  ;;  %v12683_v30 = vpop.f32.mrf.mxu1  ;;  %v15188_v35 = vand.u32 4294901760, %v2060_v55  ;;  %v15191_v61 = vand.u32 4294901760, %v15177_v16  ;;  %v12451_v13 = vadd.f32 %v19428_v9, %v19427_v50  ;;  %v19431_v12 = vld [vmem:[#allocation44_spill] sm:$0xff] }
 0x1c4   :  { %v1309_v39 = vadd.f32 %v12525_v57, %v1042_v6  ;;  %v12528_v22 = vadd.f32 %v19430_v7, %v19429_v1  ;;  %v1796_v10 = vadd.f32 %v12682_v2, %v1587_v37  ;;  %v1051_v44 = vadd.f32 %v12448_v53, %v19431_v12  ;;  %v19436_v7 = vld [vmem:[#allocation13_spill] sm:$0xff] }
 0x1c5   :  { %19424 = vst [vmem:[#allocation82_spill] sm:$0xff] %v15186_v8  ;;  %19425 = vst [vmem:[#allocation85_spill] sm:$0xff] %v15188_v35  ;;  %v15199_v42 = vsub.f32 %v1879_v17, %v15186_v8  ;;  %v12609_v62 = vpop.f32.mrf.mxu0  ;;  %v12684_v52 = vpop.f32.mrf.mxu1  ;;  %2062 = vmatmul.mubr.f32.gmra.mxu0 %v15188_v35  ;;  %2321 = vmatmul.mubr.f32.gmra.mxu1 %v15186_v8  ;;  %v2071_v55 = vsub.f32 %v15177_v16, %v15191_v61 }
 0x1c6   :  { %19426 = vst [vmem:[#allocation87_spill] sm:$0xff] %v15191_v61  ;;  %v1594_v50 = vadd.f32 %v12605_v33, %v1309_v39  ;;  %v12608_v6 = vadd.f32 %v12607_v58, %v12606_v43  ;;  %v1882_v57 = vsel %vm1847_vm0, %v1796_v10, 0  ;;  %v12685_v9 = vadd.f32 %v12684_v52, %v12683_v30  ;;  %2067 = vmatprep.mubr.f32.mxu0 %v19361_v29  ;;  %v19437_v43 = vld [vmem:[#allocation83_spill] sm:$0xff]  ;;  %v19438_v58 = vld [vmem:[#allocation25_spill] sm:$0xff]  ;;  %v19439_v30 = vld [vmem:[#allocation32_spill] sm:$0xff] }
 0x1c7   :  { %19432 = vst [vmem:[#allocation88_spill] sm:$0xff] %v15199_v42  ;;  %2326 = vmatprep.mubr.f32.mxu1 %v19361_v29  ;;  %v15208_v53 = vand.u32 4294901760, %v1882_v57  ;;  %v12610_v37 = vpop.f32.mrf.mxu0  ;;  %v12686_v17 = vpop.f32.mrf.mxu1  ;;  %v15210_v2 = vand.u32 4294901760, %v2071_v55  ;;  %v15213_v1 = vand.u32 4294901760, %v15199_v42  ;;  %v1060_v12 = vadd.f32 %v12451_v13, %v19436_v7  ;;  %v19440_v10 = vld [vmem:[#allocation23_spill] sm:$0xff] }
 0x1c8   :  { %v1320_v33 = vadd.f32 %v12528_v22, %v1051_v44  ;;  %v12531_v39 = vadd.f32 %v19438_v58, %v19437_v43  ;;  %v1803_v52 = vadd.f32 %v12685_v9, %v1594_v50  ;;  %v12454_v35 = vadd.f32 %v19440_v10, %v19439_v30  ;;  %v19444_v10 = vld [vmem:[#allocation84_spill] sm:$0xff] }
 0x1c9   :  { %19433 = vst [vmem:[#allocation92_spill] sm:$0xff] %v15208_v53  ;;  %19434 = vst [vmem:[#allocation94_spill] sm:$0xff] %v15210_v2  ;;  %v15221_v8 = vsub.f32 %v1882_v57, %v15208_v53  ;;  %v12612_v46 = vpop.f32.mrf.mxu0  ;;  %v12687_v56 = vpop.f32.mrf.mxu1  ;;  %2073 = vmatmul.mubr.f32.gmra.mxu0 %v15210_v2  ;;  %2328 = vmatmul.mubr.f32.gmra.mxu1 %v15208_v53  ;;  %v2082_v13 = vsub.f32 %v15199_v42, %v15213_v1 }
 0x1ca   :  { %19435 = vst [vmem:[#allocation96_spill] sm:$0xff] %v15213_v1  ;;  %v1601_v44 = vadd.f32 %v12608_v6, %v1320_v33  ;;  %v12611_v22 = vadd.f32 %v12610_v37, %v12609_v62  ;;  %v1885_v55 = vsel %vm1847_vm0, %v1803_v52, 0  ;;  %v12688_v50 = vadd.f32 %v12687_v56, %v12686_v17  ;;  %2078 = vmatprep.mubr.f32.mxu0 %v19361_v29  ;;  %v19445_v6 = vld [vmem:[#allocation36_spill] sm:$0xff] }
 0x1cb   :  { %19441 = vst [vmem:[#allocation97_spill] sm:$0xff] %v15221_v8  ;;  %2333 = vmatprep.mubr.f32.mxu1 %v19361_v29  ;;  %v15230_v57 = vand.u32 4294901760, %v1885_v55  ;;  %v12613_v9 = vpop.f32.mrf.mxu0  ;;  %v12689_v7 = vpop.f32.mrf.mxu1  ;;  %v15232_v43 = vand.u32 4294901760, %v2082_v13  ;;  %v15235_v58 = vand.u32 4294901760, %v15221_v8  ;;  %v1331_v30 = vadd.f32 %v12531_v39, %v1060_v12  ;;  %v19446_v33 = vld [vmem:[#allocation48_spill] sm:$0xff] }
 0x1cc   :  { %v12534_v62 = vadd.f32 %v19445_v6, %v19444_v10  ;;  %v1810_v37 = vadd.f32 %v12688_v50, %v1601_v44  ;;  %v1069_v56 = vadd.f32 %v12454_v35, %v19446_v33  ;;  %v12614_v53 = vadd.f32 %v12613_v9, %v12612_v46 }
 0x1cd   :  { %19442 = vst [vmem:[#allocation98_spill] sm:$0xff] %v15230_v57  ;;  %19443 = vst [vmem:[#allocation38_spill] sm:$0xff] %v15235_v58  ;;  %v15241_v17 = vsub.f32 %v1885_v55, %v15230_v57  ;;  %v12690_v52 = vpop.f32.mrf.mxu1  ;;  %2084 = vmatmul.mubr.f32.gmra.mxu0 %v15232_v43  ;;  %2335 = vmatmul.mubr.f32.gmra.mxu1 %v15230_v57  ;;  %v2093_v13 = vsub.f32 %v15221_v8, %v15235_v58 }
 0x1ce   :  { %v1608_v2 = vadd.f32 %v12611_v22, %v1331_v30  ;;  %v1888_v12 = vsel %vm1847_vm0, %v1810_v37, 0  ;;  %v12691_v39 = vadd.f32 %v12690_v52, %v12689_v7  ;;  %2089 = vmatprep.mubr.f32.mxu0 %v19361_v29  ;;  %2340 = vmatprep.mubr.f32.mxu1 %v19361_v29  ;;  %v1342_v10 = vadd.f32 %v12534_v62, %v1069_v56 }
 0x1cf   :  { %19447 = vst [vmem:[#allocation99_spill] sm:$0xff] %v15241_v17  ;;  %v15250_v35 = vand.u32 4294901760, %v1888_v12  ;;  %v12692_v44 = vpop.f32.mrf.mxu1  ;;  %v15252_v55 = vand.u32 4294901760, %v2093_v13  ;;  %v15255_v50 = vand.u32 4294901760, %v15241_v17 }
 0x1d0   :  { %v1817_v6 = vadd.f32 %v12691_v39, %v1608_v2  ;;  %v1615_v7 = vadd.f32 %v12614_v53, %v1342_v10  ;;  %v3181_v10 = vld [vmem:[#allocation6 + $0x38] sm:$0xff] }
 0x1d1   :  { %19448 = vst [vmem:[#allocation39_spill] sm:$0xff] %v15250_v35  ;;  %19449 = vst [vmem:[#allocation50_spill] sm:$0xff] %v15255_v50  ;;  %v15258_v22 = vsub.f32 %v1888_v12, %v15250_v35  ;;  %v12693_v46 = vpop.f32.mrf.mxu1  ;;  %2095 = vmatmul.mubr.f32.gmra.mxu0 %v15252_v55  ;;  %2342 = vmatmul.mubr.f32.gmra.mxu1 %v15250_v35  ;;  %v2104_v9 = vsub.f32 %v15241_v17, %v15255_v50 }
 0x1d2   :  { %v1891_v30 = vsel %vm1847_vm0, %v1817_v6, 0  ;;  %v12694_v37 = vadd.f32 %v12693_v46, %v12692_v44  ;;  %2100 = vmatprep.mubr.f32.mxu0 %v19361_v29  ;;  %2347 = vmatprep.mubr.f32.mxu1 %v19361_v29 }
 0x1d3   :  { %19450 = vst [vmem:[#allocation15_spill] sm:$0xff] %v15258_v22  ;;  %v15267_v2 = vand.u32 4294901760, %v1891_v30  ;;  %v15269_v62 = vand.u32 4294901760, %v2104_v9  ;;  %v15272_v33 = vand.u32 4294901760, %v15258_v22 }
 0x1d4   :  { %v1824_v56 = vadd.f32 %v12694_v37, %v1615_v7 }
 0x1d5   :  { %19451 = vst [vmem:[#allocation18_spill] sm:$0xff] %v15267_v2  ;;  %19452 = vst [vmem:[#allocation31_spill] sm:$0xff] %v15272_v33  ;;  %v15275_v52 = vsub.f32 %v1891_v30, %v15267_v2  ;;  %2106 = vmatmul.mubr.f32.gmra.mxu0 %v15269_v62  ;;  %2349 = vmatmul.mubr.f32.gmra.mxu1 %v15267_v2  ;;  %v2115_v53 = vsub.f32 %v15258_v22, %v15272_v33  ;;  %v15305_v30 = vand.u32 4294901760, %v3181_v10 }
 0x1d6   :  { %v1894_v13 = vsel %vm1847_vm0, %v1824_v56, 0  ;;  %2111 = vmatprep.mubr.f32.mxu0 %v19361_v29  ;;  %2354 = vmatprep.mubr.f32.mxu1 %v19361_v29 }
 0x1d7   :  { %19453 = vst [vmem:[#allocation35_spill] sm:$0xff] %v15275_v52  ;;  %v15284_v12 = vand.u32 4294901760, %v1894_v13  ;;  %v15286_v39 = vand.u32 4294901760, %v2115_v53  ;;  %v15289_v44 = vand.u32 4294901760, %v15275_v52  ;;  %v15317_v53 = vsub.f32 %v3181_v10, %v15305_v30  ;;  %v15331_v10 = vld [vmem:[%s18600_s4] sm:$0x3] }
 0x1d9   :  { %19454 = vst [vmem:[#allocation46_spill] sm:$0xff] %v15284_v12  ;;  %19455 = vst [vmem:[#allocation47_spill] sm:$0xff] %v15289_v44  ;;  %v15292_v6 = vsub.f32 %v1894_v13, %v15284_v12  ;;  %2117 = vmatmul.mubr.f32.gmra.mxu0 %v15286_v39  ;;  %2356 = vmatmul.mubr.f32.gmra.mxu1 %v15284_v12  ;;  %v2126_v46 = vsub.f32 %v15275_v52, %v15289_v44  ;;  %v1837_v13 = vlaneseq }
 0x1da   :  { %2122 = vmatprep.mubr.f32.mxu0 %v19361_v29  ;;  %2643 = vmatprep.mubr.f32.mxu1 %v19361_v29 }
 0x1db   :  { %19456 = vst [vmem:[#allocation19_spill] sm:$0xff] %v15292_v6  ;;  %v15300_v9 = vand.u32 4294901760, %v2126_v46  ;;  %v15303_v7 = vand.u32 4294901760, %v15292_v6  ;;  %v15324_v46 = vshrl.u32 %v1837_v13, 7  ;;  %v19459_v13 = vand.u32 4294901760, %v14717_v32 }
 0x1dd   :  { %19457 = vst [vmem:[#allocation20_spill] sm:$0xff] %v15303_v7  ;;  %2128 = vmatmul.mubr.f32.gmra.mxu0 %v15300_v9  ;;  %2647 = vmatmul.mubr.f32.vlgmr.msra.gmra.mxu1 %v14977_v51  ;;  %v2137_v37 = vsub.f32 %v15292_v6, %v15303_v7 }
 0x1de   :  { %2133 = vmatprep.mubr.f32.mxu0 %v19361_v29  ;;  %2652 = vmatprep.mubr.f32.mxu1 %v19361_v29 }
 0x1df   :  { %v15313_v56 = vand.u32 4294901760, %v2137_v37  ;;  %3016 = vmatpush1.msra.mxu1 %v14672_v3  ;;  %v18856_v3 = vand.u32 4294901760, %v15317_v53  ;;  %v19458_v37 = vand.u32 4294901760, %v14678_v0  ;;  %v19461_v0 = vand.u32 4294901760, %v14751_v27  ;;  %v3180_v27 = vld [vmem:[#allocation6 + $0x30] sm:$0xff] }
 0x1e0   :  { %3018 = vmatprep.subr.mxu1 %v14706_v21  ;;  %v1839_v21 = vsub.s32 0, %v15324_v46 }
 0x1e1   :  { %2139 = vmatmul.mubr.f32.gmra.mxu0 %v15313_v56  ;;  %2656 = vmatmul.mubr.f32.gmra.mxu1 %v15005_v34 }
 0x1e2   :  { %2442 = vmatprep.mubr.f32.mxu0 %v19361_v29  ;;  %2661 = vmatprep.mubr.f32.mxu1 %v19361_v29 }
 0x1e3   :  { %3020 = vmatpush1.msra.mxu1 %v14708_v59  ;;  %v15341_v59 = vrot.slane %v15331_v10, %v1839_v21  ;;  %v19462_v21 = vand.u32 4294901760, %v19373_v63  ;;  %v3178_v63 = vld [vmem:[#allocation6 + $0x20] sm:$0xff] }
 0x1e4   :  { %3022 = vmatprep.subr.mxu1 %v14741_v26  ;;  %v3458_v26 = vsub.f32 %v15317_v53, %v18856_v3  ;;  %v3174_v3 = vld [vmem:[#allocation6] sm:$0xff] }
 0x1e5   :  { %2445 = vmatmul.mubr.f32.vlgmr.msra.gmra.mxu0 %v14970_v45  ;;  %2665 = vmatmul.mubr.f32.gmra.mxu1 %v15029_v19  ;;  %v19460_v45 = vand.u32 4294901760, %v14714_v4  ;;  %v19463_v4 = vand.u32 4294901760, %v19378_v47  ;;  %v3177_v47 = vld [vmem:[#allocation6 + $0x18] sm:$0xff] }
 0x1e6   :  { %2819 = vmatpush1.msra.mxu0 %v19458_v37  ;;  %2450 = vmatprep.mubr.f32.mxu0 %v19361_v29  ;;  %v3459_v32 = vand.u32 4294901760, %v3458_v26  ;;  %v15410_v37 = vand.u32 4294901760, %v3178_v63  ;;  %v15415_v26 = vand.u32 4294901760, %v3177_v47 }
 0x1e7   :  { %2670 = vmatprep.mubr.f32.mxu1 %v19361_v29  ;;  %2823 = vmatprep.subr.mxu0 %v19459_v13 }
 0x1e8   :  { %2827 = vmatpush1.msra.mxu0 %v19460_v45  ;;  %3024 = vmatpush1.msra.mxu1 %v14743_v60  ;;  %v19464_v60 = vand.u32 4294901760, %v19382_v36 }
 0x1e9   :  { %2453 = vmatmul.mubr.f32.gmra.mxu0 %v14989_v49  ;;  %2674 = vmatmul.mubr.f32.gmra.mxu1 %v15053_v18 }
 0x1ea   :  { %2458 = vmatprep.mubr.f32.mxu0 %v19361_v29  ;;  %2679 = vmatprep.mubr.f32.mxu1 %v19361_v29 }
 0x1eb   :  { %2831 = vmatprep.subr.mxu0 %v19461_v0  ;;  %3026 = vmatprep.subr.mxu1 %v14763_v31  ;;  %v3179_v31 = vld [vmem:[#allocation6 + $0x28] sm:$0xff]  ;;  %v3176_v0 = vld [vmem:[#allocation6 + $0x10] sm:$0xff] }
 0x1ec   :  { %2835 = vmatpush1.msra.mxu0 %v19462_v21  ;;  %3028 = vmatpush1.msra.mxu1 %v14765_v25  ;;  %v15399_v25 = vand.u32 4294901760, %v3180_v27  ;;  %v15401_v45 = vand.u32 4294901760, %v3179_v31  ;;  %v15423_v21 = vsub.f32 %v3178_v63, %v15410_v37 }
 0x1ed   :  { %2461 = vmatmul.mubr.f32.gmra.mxu0 %v15013_v41  ;;  %2683 = vmatmul.mubr.f32.gmra.mxu1 %v15077_v40 }
 0x1ee   :  { %2466 = vmatprep.mubr.f32.mxu0 %v19361_v29  ;;  %2688 = vmatprep.mubr.f32.mxu1 %v19361_v29  ;;  %v15408_v36 = vsub.f32 %v3180_v27, %v15399_v25  ;;  %v15413_v13 = vsub.f32 %v3179_v31, %v15401_v45  ;;  %v15429_v27 = vsub.f32 %v3177_v47, %v15415_v26  ;;  %v3175_v31 = vld [vmem:[#allocation6 + $0x8] sm:$0xff] }
 0x1ef   :  { %2839 = vmatprep.subr.mxu0 %v19463_v4  ;;  %3460 = vmatprep.subr.mxu1 %v3459_v32  ;;  %v18868_v4 = vand.u32 4294901760, %v15423_v21 }
 0x1f0   :  { %2843 = vmatpush1.msra.mxu0 %v19464_v60  ;;  %v18862_v32 = vand.u32 4294901760, %v15408_v36  ;;  %v15426_v60 = vand.u32 4294901760, %v3176_v0  ;;  %v19465_v47 = vand.u32 4294901760, %v15413_v13 }
 0x1f1   :  { %2469 = vmatmul.mubr.f32.gmra.mxu0 %v15039_v54  ;;  %2692 = vmatmul.mubr.f32.gmra.mxu1 %v15101_v14  ;;  %v19481_v14 = vand.u32 4294901760, %v15317_v53 }
 0x1f2   :  { %2474 = vmatprep.mubr.f32.mxu0 %v19361_v29  ;;  %2697 = vmatprep.mubr.f32.mxu1 %v19361_v29  ;;  %v3464_v63 = vsub.f32 %v15408_v36, %v18862_v32 }
 0x1f3   :  { %3207 = vmatprep.subr.mxu0 %v15305_v30 }
 0x1f4   :  { %v3465_v32 = vand.u32 4294901760, %v3464_v63 }
 0x1f5   :  { %2477 = vmatmul.mubr.f32.gmra.mxu0 %v15063_v23  ;;  %2701 = vmatmul.mubr.f32.gmra.mxu1 %v15125_v28 }
 0x1f6   :  { %2482 = vmatprep.mubr.f32.mxu0 %v19361_v29  ;;  %2706 = vmatprep.mubr.f32.mxu1 %v19361_v29 }
 0x1f9   :  { %2485 = vmatmul.mubr.f32.gmra.mxu0 %v15087_v24  ;;  %2710 = vmatmul.mubr.f32.gmra.mxu1 %v15147_v11 }
 0x1fa   :  { %2490 = vmatprep.mubr.f32.mxu0 %v19361_v29  ;;  %2715 = vmatprep.mubr.f32.mxu1 %v19361_v29 }
 0x1fd   :  { %2493 = vmatmul.mubr.f32.gmra.mxu0 %v15111_v15  ;;  %2719 = vmatmul.mubr.f32.gmra.mxu1 %v15169_v48 }
 0x1fe   :  { %2498 = vmatprep.mubr.f32.mxu0 %v19361_v29  ;;  %2724 = vmatprep.mubr.f32.mxu1 %v19361_v29 }
 0x201   :  { %2501 = vmatmul.mubr.f32.gmra.mxu0 %v15133_v20  ;;  %2728 = vmatmul.mubr.f32.gmra.mxu1 %v15191_v61  ;;  %v19477_v20 = vld [vmem:[#allocation40_spill] sm:$0xff] }
 0x202   :  { %2506 = vmatprep.mubr.f32.mxu0 %v19361_v29  ;;  %2733 = vmatprep.mubr.f32.mxu1 %v19361_v29 }
 0x205   :  { %2509 = vmatmul.mubr.f32.gmra.mxu0 %v15155_v38  ;;  %2737 = vmatmul.mubr.f32.gmra.mxu1 %v15213_v1 }
 0x206   :  { %2514 = vmatprep.mubr.f32.mxu0 %v19361_v29  ;;  %2742 = vmatprep.mubr.f32.mxu1 %v19361_v29 }
 0x209   :  { %2517 = vmatmul.mubr.f32.gmra.mxu0 %v15177_v16  ;;  %2746 = vmatmul.mubr.f32.gmra.mxu1 %v15235_v58  ;;  %v1843_v16 = vsub.s32 1, %v15324_v46 }
 0x20a   :  { %2522 = vmatprep.mubr.f32.mxu0 %v19361_v29  ;;  %2751 = vmatprep.mubr.f32.mxu1 %v19361_v29 }
 0x20b   :  { %v15564_v38 = vrot.slane %v15331_v10, %v1843_v16 }
 0x20d   :  { %2525 = vmatmul.mubr.f32.gmra.mxu0 %v15199_v42  ;;  %2755 = vmatmul.mubr.f32.gmra.mxu1 %v15255_v50  ;;  %v15448_v50 = vand.u32 4294901760, %v3174_v3 }
 0x20e   :  { %2530 = vmatprep.mubr.f32.mxu0 %v19361_v29  ;;  %2760 = vmatprep.mubr.f32.mxu1 %v19361_v29 }
 0x211   :  { %2533 = vmatmul.mubr.f32.gmra.mxu0 %v15221_v8  ;;  %2764 = vmatmul.mubr.f32.gmra.mxu1 %v15272_v33  ;;  %v15439_v33 = vand.u32 4294901760, %v3175_v31  ;;  %v3470_v8 = vsub.f32 %v15413_v13, %v19465_v47  ;;  %v3476_v47 = vsub.f32 %v15423_v21, %v18868_v4  ;;  %v19466_v4 = vld [vmem:[#allocation27_spill] sm:$0xff] }
 0x212   :  { %2538 = vmatprep.mubr.f32.mxu0 %v19361_v29  ;;  %2769 = vmatprep.mubr.f32.mxu1 %v19361_v29 }
 0x213   :  { %v3471_v42 = vand.u32 4294901760, %v3470_v8 }
 0x215   :  { %2541 = vmatmul.mubr.f32.gmra.mxu0 %v15241_v17  ;;  %2773 = vmatmul.mubr.f32.gmra.mxu1 %v15289_v44  ;;  %v15445_v17 = vsub.f32 %v3176_v0, %v15426_v60  ;;  %v18867_v44 = vand.u32 4294901760, %v15429_v27  ;;  %v15458_v0 = vsub.f32 %v3175_v31, %v15439_v33  ;;  %v3477_v31 = vand.u32 4294901760, %v3476_v47  ;;  %v19467_v47 = vld [vmem:[#allocation89_spill] sm:$0xff] }
 0x216   :  { %2546 = vmatprep.mubr.f32.mxu0 %v19361_v29  ;;  %2778 = vmatprep.mubr.f32.mxu1 %v19361_v29 }
 0x217   :  { %v3482_v58 = vsub.f32 %v15429_v27, %v18867_v44  ;;  %v18870_v8 = vand.u32 4294901760, %v15458_v0 }
 0x219   :  { %2549 = vmatmul.mubr.f32.gmra.mxu0 %v15258_v22  ;;  %2782 = vmatmul.mubr.f32.gmra.mxu1 %v15303_v7  ;;  %v18871_v22 = vand.u32 4294901760, %v15445_v17  ;;  %v15465_v7 = vsub.f32 %v3174_v3, %v15448_v50  ;;  %v3483_v63 = vand.u32 4294901760, %v3482_v58 }
 0x21a   :  { %2554 = vmatprep.mubr.f32.mxu0 %v19361_v29  ;;  %3061 = vmatprep.mubr.f32.mxu1 %v19361_v29 }
 0x21b   :  { %v3488_v44 = vsub.f32 %v15445_v17, %v18871_v22  ;;  %v18869_v3 = vand.u32 4294901760, %v15465_v7  ;;  %v19476_v22 = vld [vmem:[#allocation92_spill] sm:$0xff] }
 0x21d   :  { %2557 = vmatmul.mubr.f32.gmra.mxu0 %v15275_v52  ;;  %3063 = vmatmul.mubr.f32.vlgmr.msra.gmra.mxu1 %v14962_v5  ;;  %v3489_v58 = vand.u32 4294901760, %v3488_v44 }
 0x21e   :  { %2562 = vmatprep.mubr.f32.mxu0 %v19361_v29  ;;  %3068 = vmatprep.mubr.f32.mxu1 %v19361_v29 }
 0x21f   :  { %3466 = vmatpush1.msra.mxu1 %v3465_v32  ;;  %v3500_v32 = vsub.f32 %v15465_v7, %v18869_v3  ;;  %v19474_v3 = vld [vmem:[#allocation76_spill] sm:$0xff] }
 0x220   :  { %3472 = vmatprep.subr.mxu1 %v3471_v42  ;;  %v3494_v42 = vsub.f32 %v15458_v0, %v18870_v8  ;;  %v19475_v8 = vld [vmem:[#allocation82_spill] sm:$0xff] }
 0x221   :  { %2565 = vmatmul.mubr.f32.gmra.mxu0 %v15292_v6  ;;  %3070 = vmatmul.mubr.f32.gmra.mxu1 %v19466_v4  ;;  %v3501_v44 = vand.u32 4294901760, %v3500_v32  ;;  %v19471_v32 = vld [vmem:[#allocation51_spill] sm:$0xff] }
 0x222   :  { %2876 = vmatprep.mubr.f32.mxu0 %v19361_v29  ;;  %3075 = vmatprep.mubr.f32.mxu1 %v19361_v29 }
 0x223   :  { %3478 = vmatpush1.msra.mxu1 %v3477_v31  ;;  %v3495_v31 = vand.u32 4294901760, %v3494_v42  ;;  %v19469_v42 = vld [vmem:[#allocation91_spill] sm:$0xff] }
 0x224   :  { %3484 = vmatprep.subr.mxu1 %v3483_v63  ;;  %v19468_v63 = vld [vmem:[#allocation28_spill] sm:$0xff] }
 0x225   :  { %2878 = vmatmul.mubr.f32.vlgmr.msra.gmra.mxu0 %v14962_v5  ;;  %3077 = vmatmul.mubr.f32.gmra.mxu1 %v19467_v47 }
 0x226   :  { %3209 = vmatpush1.msra.mxu0 %v15399_v25  ;;  %2883 = vmatprep.mubr.f32.mxu0 %v19361_v29 }
 0x227   :  { %3082 = vmatprep.mubr.f32.mxu1 %v19361_v29  ;;  %3211 = vmatprep.subr.mxu0 %v15401_v45 }
 0x228   :  { %3213 = vmatpush1.msra.mxu0 %v15410_v37  ;;  %3490 = vmatpush1.msra.mxu1 %v3489_v58  ;;  %v19470_v58 = vld [vmem:[#allocation43_spill] sm:$0xff] }
 0x229   :  { %2885 = vmatmul.mubr.f32.gmra.mxu0 %v19466_v4  ;;  %3084 = vmatmul.mubr.f32.gmra.mxu1 %v19468_v63 }
 0x22a   :  { %2890 = vmatprep.mubr.f32.mxu0 %v19361_v29  ;;  %3089 = vmatprep.mubr.f32.mxu1 %v19361_v29 }
 0x22b   :  { %3215 = vmatprep.subr.mxu0 %v15415_v26  ;;  %3496 = vmatprep.subr.mxu1 %v3495_v31  ;;  %v19472_v31 = vld [vmem:[#allocation60_spill] sm:$0xff] }
 0x22c   :  { %3217 = vmatpush1.msra.mxu0 %v15426_v60  ;;  %3502 = vmatpush1.msra.mxu1 %v3501_v44  ;;  %v19473_v44 = vld [vmem:[#allocation66_spill] sm:$0xff] }
 0x22d   :  { %2892 = vmatmul.mubr.f32.gmra.mxu0 %v19467_v47  ;;  %3091 = vmatmul.mubr.f32.gmra.mxu1 %v19469_v42 }
 0x22e   :  { %2897 = vmatprep.mubr.f32.mxu0 %v19361_v29  ;;  %3096 = vmatprep.mubr.f32.mxu1 %v19361_v29 }
 0x22f   :  { %3219 = vmatprep.subr.mxu0 %v15439_v33  ;;  %3882 = vmatprep.subr.mxu1 %v15305_v30 }
 0x230   :  { %3221 = vmatpush1.msra.mxu0 %v15448_v50 }
 0x231   :  { %2899 = vmatmul.mubr.f32.gmra.mxu0 %v19468_v63  ;;  %3098 = vmatmul.mubr.f32.gmra.mxu1 %v19470_v58 }
 0x232   :  { %2904 = vmatprep.mubr.f32.mxu0 %v19361_v29  ;;  %3103 = vmatprep.mubr.f32.mxu1 %v19361_v29 }
 0x233   :  { %3674 = vmatprep.subr.mxu0 %v15317_v53 }
 0x235   :  { %2906 = vmatmul.mubr.f32.gmra.mxu0 %v19469_v42  ;;  %3105 = vmatmul.mubr.f32.gmra.mxu1 %v19471_v32 }
 0x236   :  { %2911 = vmatprep.mubr.f32.mxu0 %v19361_v29  ;;  %3110 = vmatprep.mubr.f32.mxu1 %v19361_v29 }
 0x239   :  { %2913 = vmatmul.mubr.f32.gmra.mxu0 %v19470_v58  ;;  %3112 = vmatmul.mubr.f32.gmra.mxu1 %v19472_v31 }
 0x23a   :  { %2918 = vmatprep.mubr.f32.mxu0 %v19361_v29  ;;  %3117 = vmatprep.mubr.f32.mxu1 %v19361_v29 }
 0x23d   :  { %2920 = vmatmul.mubr.f32.gmra.mxu0 %v19471_v32  ;;  %3119 = vmatmul.mubr.f32.gmra.mxu1 %v19473_v44 }
 0x23e   :  { %2925 = vmatprep.mubr.f32.mxu0 %v19361_v29  ;;  %3124 = vmatprep.mubr.f32.mxu1 %v19361_v29 }
 0x241   :  { %2927 = vmatmul.mubr.f32.gmra.mxu0 %v19472_v31  ;;  %3126 = vmatmul.mubr.f32.gmra.mxu1 %v19474_v3 }
 0x242   :  { %2932 = vmatprep.mubr.f32.mxu0 %v19361_v29  ;;  %3131 = vmatprep.mubr.f32.mxu1 %v19361_v29 }
 0x245   :  { %2934 = vmatmul.mubr.f32.gmra.mxu0 %v19473_v44  ;;  %3133 = vmatmul.mubr.f32.gmra.mxu1 %v19475_v8 }
 0x246   :  { %2939 = vmatprep.mubr.f32.mxu0 %v19361_v29  ;;  %3138 = vmatprep.mubr.f32.mxu1 %v19361_v29 }
 0x249   :  { %2941 = vmatmul.mubr.f32.gmra.mxu0 %v19474_v3  ;;  %3140 = vmatmul.mubr.f32.gmra.mxu1 %v19476_v22 }
 0x24a   :  { %2946 = vmatprep.mubr.f32.mxu0 %v19361_v29  ;;  %3145 = vmatprep.mubr.f32.mxu1 %v19361_v29 }
 0x24d   :  { %2948 = vmatmul.mubr.f32.gmra.mxu0 %v19475_v8  ;;  %3147 = vmatmul.mubr.f32.gmra.mxu1 %v15230_v57 }
 0x24e   :  { %2953 = vmatprep.mubr.f32.mxu0 %v19361_v29  ;;  %3152 = vmatprep.mubr.f32.mxu1 %v19361_v29 }
 0x251   :  { %2955 = vmatmul.mubr.f32.gmra.mxu0 %v19476_v22  ;;  %3154 = vmatmul.mubr.f32.gmra.mxu1 %v15250_v35 }
 0x252   :  { %2960 = vmatprep.mubr.f32.mxu0 %v19361_v29  ;;  %3159 = vmatprep.mubr.f32.mxu1 %v19361_v29 }
 0x255   :  { %2962 = vmatmul.mubr.f32.gmra.mxu0 %v15230_v57  ;;  %3161 = vmatmul.mubr.f32.gmra.mxu1 %v15267_v2 }
 0x256   :  { %2967 = vmatprep.mubr.f32.mxu0 %v19361_v29  ;;  %3166 = vmatprep.mubr.f32.mxu1 %v19361_v29 }
 0x259   :  { %2969 = vmatmul.mubr.f32.gmra.mxu0 %v15250_v35  ;;  %3168 = vmatmul.mubr.f32.gmra.mxu1 %v15284_v12 }
 0x25a   :  { %2974 = vmatprep.mubr.f32.mxu0 %v19361_v29  ;;  %3535 = vmatprep.mubr.f32.mxu1 %v19361_v29 }
 0x25d   :  { %v2252_v6 = vpop.f32.mrf.mxu1  ;;  %2976 = vmatmul.mubr.f32.gmra.mxu0 %v15267_v2  ;;  %3537 = vmatmul.mubr.f32.vlgmr.msra.gmra.mxu1 %v14962_v5 }
 0x25e   :  { %2981 = vmatprep.mubr.f32.mxu0 %v19361_v29  ;;  %3542 = vmatprep.mubr.f32.mxu1 %v19361_v29 }
 0x25f   :  { %v2254_v52 = vpop.f32.mrf.mxu1  ;;  %3884 = vmatpush1.msra.mxu1 %v15399_v25 }
 0x260   :  { %3886 = vmatprep.subr.mxu1 %v15401_v45 }
 0x261   :  { %v2259_v1 = vpop.f32.mrf.mxu1  ;;  %2983 = vmatmul.mubr.f32.gmra.mxu0 %v15284_v12  ;;  %3544 = vmatmul.mubr.f32.gmra.mxu1 %v19466_v4 }
 0x262   :  { %3254 = vmatprep.mubr.f32.mxu0 %v19361_v29  ;;  %3549 = vmatprep.mubr.f32.mxu1 %v19361_v29 }
 0x263   :  { %v2261_v5 = vpop.f32.mrf.mxu1  ;;  %3888 = vmatpush1.msra.mxu1 %v15410_v37 }
 0x264   :  { %3890 = vmatprep.subr.mxu1 %v15415_v26 }
 0x265   :  { %v1975_v46 = vpop.f32.mrf.mxu0  ;;  %v2266_v61 = vpop.f32.mrf.mxu1  ;;  %3260 = vmatmul.mubr.f32.vlgmr.msra.gmra.mxu0 %v19477_v20  ;;  %3551 = vmatmul.mubr.f32.gmra.mxu1 %v19467_v47  ;;  %v19478_v47 = vld [vmem:[#allocation90_spill] sm:$0xff] }
 0x266   :  { %v1976_v4 = vadd.f32 %v1975_v46, %v15341_v59  ;;  %3677 = vmatpush1.msra.mxu0 %v15408_v36  ;;  %3265 = vmatprep.mubr.f32.mxu0 %v19361_v29 }
 0x267   :  { %v1977_v48 = vpop.f32.mrf.mxu0  ;;  %v2268_v15 = vpop.f32.mrf.mxu1  ;;  %3556 = vmatprep.mubr.f32.mxu1 %v19361_v29  ;;  %3680 = vmatprep.subr.mxu0 %v15413_v13 }
 0x268   :  { %v1978_v16 = vadd.f32 %v1977_v48, %v15564_v38  ;;  %3683 = vmatpush1.msra.mxu0 %v15423_v21  ;;  %3892 = vmatpush1.msra.mxu1 %v15426_v60  ;;  %v15577_v20 = vadd.f32 %v2252_v6, %v1976_v4 }
 0x269   :  { %v1986_v10 = vpop.f32.mrf.mxu0  ;;  %v2273_v46 = vpop.f32.mrf.mxu1  ;;  %3271 = vmatmul.mubr.f32.gmra.mxu0 %v19478_v47  ;;  %3558 = vmatmul.mubr.f32.gmra.mxu1 %v19468_v63  ;;  %v19479_v63 = vld [vmem:[#allocation93_spill] sm:$0xff] }
 0x26a   :  { %v1987_v11 = vadd.f32 %v1986_v10, %v15341_v59  ;;  %3276 = vmatprep.mubr.f32.mxu0 %v19361_v29  ;;  %3563 = vmatprep.mubr.f32.mxu1 %v19361_v29  ;;  %v15584_v24 = vadd.f32 %v2254_v52, %v1978_v16 }
 0x26b   :  { %v1988_v48 = vpop.f32.mrf.mxu0  ;;  %v2275_v28 = vpop.f32.mrf.mxu1  ;;  %3686 = vmatprep.subr.mxu0 %v15429_v27  ;;  %3894 = vmatprep.subr.mxu1 %v15439_v33 }
 0x26c   :  { %v1989_v6 = vadd.f32 %v1988_v48, %v15564_v38  ;;  %3689 = vmatpush1.msra.mxu0 %v15445_v17  ;;  %3896 = vmatpush1.msra.mxu1 %v15448_v50  ;;  %v15591_v4 = vadd.f32 %v2259_v1, %v1987_v11 }
 0x26d   :  { %v1997_v47 = vpop.f32.mrf.mxu0  ;;  %v2280_v10 = vpop.f32.mrf.mxu1  ;;  %3282 = vmatmul.mubr.f32.gmra.mxu0 %v19479_v63  ;;  %3565 = vmatmul.mubr.f32.gmra.mxu1 %v19469_v42  ;;  %v19480_v42 = vld [vmem:[#allocation45_spill] sm:$0xff] }
 0x26e   :  { %v1998_v52 = vadd.f32 %v1997_v47, %v15341_v59  ;;  %3287 = vmatprep.mubr.f32.mxu0 %v19361_v29  ;;  %3570 = vmatprep.mubr.f32.mxu1 %v19361_v29  ;;  %v15598_v16 = vadd.f32 %v2261_v5, %v1989_v6 }
 0x26f   :  { %v1999_v48 = vpop.f32.mrf.mxu0  ;;  %v2282_v23 = vpop.f32.mrf.mxu1  ;;  %3692 = vmatprep.subr.mxu0 %v15458_v0  ;;  %4300 = vmatprep.subr.mxu1 %v15305_v30 }
 0x270   :  { %v2000_v11 = vadd.f32 %v1999_v48, %v15564_v38  ;;  %3695 = vmatpush1.msra.mxu0 %v15465_v7  ;;  %v15604_v1 = vadd.f32 %v2266_v61, %v1998_v52 }
 0x271   :  { %v2008_v63 = vpop.f32.mrf.mxu0  ;;  %v2287_v47 = vpop.f32.mrf.mxu1  ;;  %3293 = vmatmul.mubr.f32.gmra.mxu0 %v19480_v42  ;;  %3572 = vmatmul.mubr.f32.gmra.mxu1 %v19470_v58  ;;  %v19483_v58 = vld [vmem:[#allocation53_spill] sm:$0xff] }
 0x272   :  { %v2009_v5 = vadd.f32 %v2008_v63, %v15341_v59  ;;  %3298 = vmatprep.mubr.f32.mxu0 %v19361_v29  ;;  %3577 = vmatprep.mubr.f32.mxu1 %v19361_v29  ;;  %v15611_v6 = vadd.f32 %v2268_v15, %v2000_v11 }
 0x273   :  { %v2010_v30 = vpop.f32.mrf.mxu0  ;;  %v2289_v48 = vpop.f32.mrf.mxu1  ;;  %4101 = vmatprep.subr.mxu0 %v19481_v14 }
 0x274   :  { %v2011_v61 = vadd.f32 %v2010_v30, %v15564_v38  ;;  %v15616_v52 = vadd.f32 %v2273_v46, %v2009_v5 }
 0x275   :  { %v2019_v42 = vpop.f32.mrf.mxu0  ;;  %v2294_v54 = vpop.f32.mrf.mxu1  ;;  %3304 = vmatmul.mubr.f32.gmra.mxu0 %v19483_v58  ;;  %3579 = vmatmul.mubr.f32.gmra.mxu1 %v19471_v32 }
 0x276   :  { %19482 = vst [vmem:[#allocation33_spill] sm:$0xff] %v15616_v52  ;;  %v2020_v63 = vadd.f32 %v2019_v42, %v15341_v59  ;;  %3309 = vmatprep.mubr.f32.mxu0 %v19361_v29  ;;  %3584 = vmatprep.mubr.f32.mxu1 %v19361_v29  ;;  %v15623_v15 = vadd.f32 %v2275_v28, %v2011_v61  ;;  %v19485_v52 = vld [vmem:[#allocation61_spill] sm:$0xff] }
 0x277   :  { %v2021_v53 = vpop.f32.mrf.mxu0  ;;  %v2296_v14 = vpop.f32.mrf.mxu1 }
 0x278   :  { %v2022_v11 = vadd.f32 %v2021_v53, %v15564_v38  ;;  %v15626_v46 = vadd.f32 %v2280_v10, %v2020_v63 }
 0x279   :  { %v2030_v5 = vpop.f32.mrf.mxu0  ;;  %v2301_v30 = vpop.f32.mrf.mxu1  ;;  %3315 = vmatmul.mubr.f32.gmra.mxu0 %v19485_v52  ;;  %3586 = vmatmul.mubr.f32.gmra.mxu1 %v19472_v31 }
 0x27a   :  { %19484 = vst [vmem:[#allocation17_spill] sm:$0xff] %v15626_v46  ;;  %v2031_v58 = vadd.f32 %v2030_v5, %v15341_v59  ;;  %3320 = vmatprep.mubr.f32.mxu0 %v19361_v29  ;;  %3591 = vmatprep.mubr.f32.mxu1 %v19361_v29  ;;  %v15633_v28 = vadd.f32 %v2282_v23, %v2022_v11  ;;  %v19487_v46 = vld [vmem:[#allocation70_spill] sm:$0xff] }
 0x27b   :  { %v2032_v61 = vpop.f32.mrf.mxu0  ;;  %v2303_v42 = vpop.f32.mrf.mxu1 }
 0x27c   :  { %v2033_v53 = vadd.f32 %v2032_v61, %v15564_v38  ;;  %v15636_v10 = vadd.f32 %v2287_v47, %v2031_v58 }
 0x27d   :  { %v2041_v63 = vpop.f32.mrf.mxu0  ;;  %v2308_v32 = vpop.f32.mrf.mxu1  ;;  %3326 = vmatmul.mubr.f32.gmra.mxu0 %v19487_v46  ;;  %3593 = vmatmul.mubr.f32.gmra.mxu1 %v19473_v44 }
 0x27e   :  { %19486 = vst [vmem:[#allocation52_spill] sm:$0xff] %v15636_v10  ;;  %v2042_v52 = vadd.f32 %v2041_v63, %v15341_v59  ;;  %3331 = vmatprep.mubr.f32.mxu0 %v19361_v29  ;;  %3598 = vmatprep.mubr.f32.mxu1 %v19361_v29  ;;  %v15643_v23 = vadd.f32 %v2289_v48, %v2033_v53  ;;  %v19489_v10 = vld [vmem:[#allocation77_spill] sm:$0xff] }
 0x27f   :  { %v2043_v11 = vpop.f32.mrf.mxu0  ;;  %v2310_v5 = vpop.f32.mrf.mxu1 }
 0x280   :  { %v2044_v61 = vadd.f32 %v2043_v11, %v15564_v38  ;;  %v15646_v47 = vadd.f32 %v2294_v54, %v2042_v52 }
 0x281   :  { %v2052_v58 = vpop.f32.mrf.mxu0  ;;  %v2315_v31 = vpop.f32.mrf.mxu1  ;;  %3337 = vmatmul.mubr.f32.gmra.mxu0 %v19489_v10  ;;  %3600 = vmatmul.mubr.f32.gmra.mxu1 %v19474_v3 }
 0x282   :  { %19488 = vst [vmem:[#allocation30_spill] sm:$0xff] %v15646_v47  ;;  %v2053_v46 = vadd.f32 %v2052_v58, %v15341_v59  ;;  %3342 = vmatprep.mubr.f32.mxu0 %v19361_v29  ;;  %3605 = vmatprep.mubr.f32.mxu1 %v19361_v29  ;;  %v15653_v48 = vadd.f32 %v2296_v14, %v2044_v61  ;;  %v19491_v47 = vld [vmem:[#allocation85_spill] sm:$0xff] }
 0x283   :  { %v2054_v53 = vpop.f32.mrf.mxu0  ;;  %v2317_v63 = vpop.f32.mrf.mxu1 }
 0x284   :  { %v2055_v11 = vadd.f32 %v2054_v53, %v15564_v38  ;;  %v15656_v54 = vadd.f32 %v2301_v30, %v2053_v46 }
 0x285   :  { %v2063_v52 = vpop.f32.mrf.mxu0  ;;  %v2322_v44 = vpop.f32.mrf.mxu1  ;;  %3348 = vmatmul.mubr.f32.gmra.mxu0 %v19491_v47  ;;  %3607 = vmatmul.mubr.f32.gmra.mxu1 %v19475_v8 }
 0x286   :  { %19490 = vst [vmem:[#allocation55_spill] sm:$0xff] %v15656_v54  ;;  %v2064_v10 = vadd.f32 %v2063_v52, %v15341_v59  ;;  %3353 = vmatprep.mubr.f32.mxu0 %v19361_v29  ;;  %3612 = vmatprep.mubr.f32.mxu1 %v19361_v29  ;;  %v15663_v14 = vadd.f32 %v2303_v42, %v2055_v11  ;;  %v19492_v54 = vld [vmem:[#allocation94_spill] sm:$0xff] }
 0x287   :  { %v2065_v61 = vpop.f32.mrf.mxu0  ;;  %v2324_v58 = vpop.f32.mrf.mxu1 }
 0x288   :  { %v2066_v53 = vadd.f32 %v2065_v61, %v15564_v38  ;;  %v15666_v30 = vadd.f32 %v2308_v32, %v2064_v10 }
 0x289   :  { %v2074_v46 = vpop.f32.mrf.mxu0  ;;  %v2329_v3 = vpop.f32.mrf.mxu1  ;;  %3359 = vmatmul.mubr.f32.gmra.mxu0 %v19492_v54  ;;  %3614 = vmatmul.mubr.f32.gmra.mxu1 %v19476_v22 }
 0x28a   :  { %v2075_v47 = vadd.f32 %v2074_v46, %v15341_v59  ;;  %3364 = vmatprep.mubr.f32.mxu0 %v19361_v29  ;;  %3619 = vmatprep.mubr.f32.mxu1 %v19361_v29  ;;  %v15673_v42 = vadd.f32 %v2310_v5, %v2066_v53 }
 0x28b   :  { %v2076_v11 = vpop.f32.mrf.mxu0  ;;  %v2331_v52 = vpop.f32.mrf.mxu1 }
 0x28c   :  { %v2077_v61 = vadd.f32 %v2076_v11, %v15564_v38  ;;  %v15676_v32 = vadd.f32 %v2315_v31, %v2075_v47 }
 0x28d   :  { %v2085_v10 = vpop.f32.mrf.mxu0  ;;  %v2336_v8 = vpop.f32.mrf.mxu1  ;;  %3370 = vmatmul.mubr.f32.gmra.mxu0 %v15232_v43  ;;  %3621 = vmatmul.mubr.f32.gmra.mxu1 %v15230_v57 }
 0x28e   :  { %v2086_v54 = vadd.f32 %v2085_v10, %v15341_v59  ;;  %3375 = vmatprep.mubr.f32.mxu0 %v19361_v29  ;;  %3626 = vmatprep.mubr.f32.mxu1 %v19361_v29  ;;  %v15683_v5 = vadd.f32 %v2317_v63, %v2077_v61 }
 0x28f   :  { %v2087_v53 = vpop.f32.mrf.mxu0  ;;  %v2338_v46 = vpop.f32.mrf.mxu1 }
 0x290   :  { %v2088_v11 = vadd.f32 %v2087_v53, %v15564_v38  ;;  %v15686_v31 = vadd.f32 %v2322_v44, %v2086_v54 }
 0x291   :  { %v2096_v47 = vpop.f32.mrf.mxu0  ;;  %v2343_v22 = vpop.f32.mrf.mxu1  ;;  %3381 = vmatmul.mubr.f32.gmra.mxu0 %v15252_v55  ;;  %3628 = vmatmul.mubr.f32.gmra.mxu1 %v15250_v35 }
 0x292   :  { %v2097_v43 = vadd.f32 %v2096_v47, %v15341_v59  ;;  %3386 = vmatprep.mubr.f32.mxu0 %v19361_v29  ;;  %3633 = vmatprep.mubr.f32.mxu1 %v19361_v29  ;;  %v15693_v63 = vadd.f32 %v2324_v58, %v2088_v11 }
 0x293   :  { %v2098_v61 = vpop.f32.mrf.mxu0  ;;  %v2345_v10 = vpop.f32.mrf.mxu1 }
 0x294   :  { %v2099_v53 = vadd.f32 %v2098_v61, %v15564_v38  ;;  %v15696_v44 = vadd.f32 %v2329_v3, %v2097_v43 }
 0x295   :  { %v2107_v54 = vpop.f32.mrf.mxu0  ;;  %v2350_v57 = vpop.f32.mrf.mxu1  ;;  %3392 = vmatmul.mubr.f32.gmra.mxu0 %v15269_v62  ;;  %3635 = vmatmul.mubr.f32.gmra.mxu1 %v15267_v2  ;;  %v4475_v62 = vld [vmem:[%s18601_s5 + $0x78] sm:$0xff] }
 0x296   :  { %v2108_v55 = vadd.f32 %v2107_v54, %v15341_v59  ;;  %3397 = vmatprep.mubr.f32.mxu0 %v19361_v29  ;;  %3640 = vmatprep.mubr.f32.mxu1 %v19361_v29  ;;  %v15703_v58 = vadd.f32 %v2331_v52, %v2099_v53 }
 0x297   :  { %v2109_v11 = vpop.f32.mrf.mxu0  ;;  %v2352_v47 = vpop.f32.mrf.mxu1 }
 0x298   :  { %v2110_v61 = vadd.f32 %v2109_v11, %v15564_v38  ;;  %v15706_v3 = vadd.f32 %v2336_v8, %v2108_v55  ;;  %v15718_v55 = vand.u32 4294901760, %v4475_v62 }
 0x299   :  { %v2118_v43 = vpop.f32.mrf.mxu0  ;;  %v2357_v2 = vpop.f32.mrf.mxu1  ;;  %3403 = vmatmul.mubr.f32.gmra.mxu0 %v15286_v39  ;;  %3642 = vmatmul.mubr.f32.gmra.mxu1 %v15284_v12 }
 0x29a   :  { %19493 = vst [vmem:[#allocation22_spill] sm:$0xff] %v15706_v3  ;;  %v2119_v54 = vadd.f32 %v2118_v43, %v15341_v59  ;;  %3408 = vmatprep.mubr.f32.mxu0 %v19361_v29  ;;  %3929 = vmatprep.mubr.f32.mxu1 %v19361_v29  ;;  %v15716_v52 = vadd.f32 %v2338_v46, %v2110_v61  ;;  %19494 = vst [vmem:[#allocation58_spill] sm:$0xff] %v15718_v55 }
 0x29b   :  { %v2120_v8 = vpop.f32.mrf.mxu0  ;;  %v2359_v53 = vpop.f32.mrf.mxu1 }
 0x29c   :  { %v2121_v11 = vadd.f32 %v2120_v8, %v15564_v38  ;;  %v15721_v35 = vadd.f32 %v2343_v22, %v2119_v54  ;;  %v15732_v22 = vsub.f32 %v4475_v62, %v15718_v55 }
 0x29d   :  { %v2129_v3 = vpop.f32.mrf.mxu0  ;;  %v2648_v39 = vpop.f32.mrf.mxu1  ;;  %3414 = vmatmul.mubr.f32.gmra.mxu0 %v15300_v9  ;;  %3933 = vmatmul.mubr.f32.vlgmr.msra.gmra.mxu1 %v14977_v51 }
 0x29e   :  { %v2130_v43 = vadd.f32 %v2129_v3, %v15341_v59  ;;  %3419 = vmatprep.mubr.f32.mxu0 %v19361_v29  ;;  %3938 = vmatprep.mubr.f32.mxu1 %v19361_v29  ;;  %v15728_v46 = vadd.f32 %v2345_v10, %v2121_v11  ;;  %19495 = vst [vmem:[#allocation12_spill] sm:$0xff] %v15732_v22  ;;  %v19497_v11 = vld [vmem:[#allocation86_spill] sm:$0xff] }
 0x29f   :  { %v2131_v61 = vpop.f32.mrf.mxu0  ;;  %v2650_v12 = vpop.f32.mrf.mxu1  ;;  %4302 = vmatpush1.msra.mxu1 %v15399_v25 }
 0x2a0   :  { %v2132_v54 = vadd.f32 %v2131_v61, %v15564_v38  ;;  %4304 = vmatprep.subr.mxu1 %v15401_v45  ;;  %v15736_v51 = vadd.f32 %v2350_v57, %v2130_v43  ;;  %v15747_v57 = vand.u32 4294901760, %v15732_v22  ;;  %v19498_v43 = vand.u32 4294901760, %v15408_v36 }
 0x2a1   :  { %v2140_v9 = vpop.f32.mrf.mxu0  ;;  %v2657_v3 = vpop.f32.mrf.mxu1  ;;  %3425 = vmatmul.mubr.f32.gmra.mxu0 %v15313_v56  ;;  %3942 = vmatmul.mubr.f32.gmra.mxu1 %v15005_v34 }
 0x2a2   :  { %v2141_v10 = vadd.f32 %v2140_v9, %v15341_v59  ;;  %3728 = vmatprep.mubr.f32.mxu0 %v19361_v29  ;;  %3947 = vmatprep.mubr.f32.mxu1 %v19361_v29  ;;  %v15743_v25 = vadd.f32 %v2352_v47, %v2132_v54  ;;  %19496 = vst [vmem:[#allocation37_spill] sm:$0xff] %v15747_v57 }
 0x2a3   :  { %v2142_v62 = vpop.f32.mrf.mxu0  ;;  %v2659_v8 = vpop.f32.mrf.mxu1  ;;  %4306 = vmatpush1.msra.mxu1 %v15410_v37 }
 0x2a4   :  { %v2143_v45 = vadd.f32 %v2142_v62, %v15564_v38  ;;  %4308 = vmatprep.subr.mxu1 %v15415_v26  ;;  %v15751_v34 = vadd.f32 %v2357_v2, %v2141_v10  ;;  %v19499_v2 = vand.u32 4294901760, %v15413_v13  ;;  %v4606_v26 = vsub.f32 %v15732_v22, %v15747_v57  ;;  %v19543_v57 = vld [vmem:[#allocation22_spill] sm:$0xff] }
 0x2a5   :  { %v2446_v56 = vpop.f32.mrf.mxu0  ;;  %v2666_v59 = vpop.f32.mrf.mxu1  ;;  %3731 = vmatmul.mubr.f32.vlgmr.msra.gmra.mxu0 %v19497_v11  ;;  %3951 = vmatmul.mubr.f32.gmra.mxu1 %v15029_v19 }
 0x2a6   :  { %v2447_v47 = vadd.f32 %v2446_v56, %v15577_v20  ;;  %4105 = vmatpush1.msra.mxu0 %v19498_v43  ;;  %3736 = vmatprep.mubr.f32.mxu0 %v19361_v29  ;;  %v15759_v37 = vadd.f32 %v2359_v53, %v2143_v45  ;;  %v19500_v20 = vand.u32 4294901760, %v15423_v21  ;;  %v19506_v45 = vld [vmem:[#allocation29_spill] sm:$0xff] }
 0x2a7   :  { %v2448_v38 = vpop.f32.mrf.mxu0  ;;  %v2668_v61 = vpop.f32.mrf.mxu1  ;;  %3956 = vmatprep.mubr.f32.mxu1 %v19361_v29  ;;  %4109 = vmatprep.subr.mxu0 %v19499_v2  ;;  %v19508_v56 = vld [vmem:[#allocation33_spill] sm:$0xff]  ;;  %v19509_v2 = vld [vmem:[#allocation95_spill] sm:$0xff] }
 0x2a8   :  { %v2449_v19 = vadd.f32 %v2448_v38, %v15584_v24  ;;  %4113 = vmatpush1.msra.mxu0 %v19500_v20  ;;  %4310 = vmatpush1.msra.mxu1 %v15426_v60  ;;  %v15770_v36 = vadd.f32 %v2648_v39, %v2447_v47  ;;  %v19501_v60 = vand.u32 4294901760, %v15429_v27  ;;  %v15782_v39 = vand.u32 4294901760, %v4606_v26  ;;  %v19510_v26 = vld [vmem:[#allocation62_spill] sm:$0xff] }
 0x2a9   :  { %v2454_v53 = vpop.f32.mrf.mxu0  ;;  %v2675_v54 = vpop.f32.mrf.mxu1  ;;  %3739 = vmatmul.mubr.f32.gmra.mxu0 %v14989_v49  ;;  %3960 = vmatmul.mubr.f32.gmra.mxu1 %v15053_v18  ;;  %v19503_v18 = vand.u32 4294901760, %v15445_v17 }
 0x2aa   :  { %v2455_v13 = vadd.f32 %v2454_v53, %v15591_v4  ;;  %3744 = vmatprep.mubr.f32.mxu0 %v19361_v29  ;;  %3965 = vmatprep.mubr.f32.mxu1 %v19361_v29  ;;  %v15777_v24 = vadd.f32 %v2650_v12, %v2449_v19  ;;  %19502 = vst [vmem:[#allocation41_spill] sm:$0xff] %v15782_v39  ;;  %v19511_v19 = vld [vmem:[#allocation17_spill] sm:$0xff] }
 0x2ab   :  { %v2456_v21 = vpop.f32.mrf.mxu0  ;;  %v2677_v9 = vpop.f32.mrf.mxu1  ;;  %4117 = vmatprep.subr.mxu0 %v19501_v60  ;;  %4312 = vmatprep.subr.mxu1 %v15439_v33 }
 0x2ac   :  { %v2457_v49 = vadd.f32 %v2456_v21, %v15598_v16  ;;  %4121 = vmatpush1.msra.mxu0 %v19503_v18  ;;  %4314 = vmatpush1.msra.mxu1 %v15448_v50  ;;  %v15788_v4 = vadd.f32 %v2657_v3, %v2455_v13  ;;  %v19504_v50 = vand.u32 4294901760, %v15458_v0  ;;  %v19513_v18 = vld [vmem:[#allocation72_spill] sm:$0xff] }
 0x2ad   :  { %v2462_v12 = vpop.f32.mrf.mxu0  ;;  %v2684_v10 = vpop.f32.mrf.mxu1  ;;  %3747 = vmatmul.mubr.f32.gmra.mxu0 %v15013_v41  ;;  %3969 = vmatmul.mubr.f32.gmra.mxu1 %v15077_v40  ;;  %v19505_v41 = vand.u32 4294901760, %v15465_v7 }
 0x2ae   :  { %v2463_v27 = vadd.f32 %v2462_v12, %v15604_v1  ;;  %3752 = vmatprep.mubr.f32.mxu0 %v19361_v29  ;;  %3974 = vmatprep.mubr.f32.mxu1 %v19361_v29  ;;  %v15795_v33 = vadd.f32 %v2659_v8, %v2457_v49  ;;  %v19507_v8 = vld [vmem:[#allocation56_spill] sm:$0xff]  ;;  %v19512_v49 = vld [vmem:[#allocation49_spill] sm:$0xff] }
 0x2af   :  { %v2464_v17 = vpop.f32.mrf.mxu0  ;;  %v2686_v16 = vpop.f32.mrf.mxu1  ;;  %4125 = vmatprep.subr.mxu0 %v19504_v50  ;;  %4608 = vmatprep.subr.mxu1 %v15782_v39  ;;  %v19514_v12 = vld [vmem:[#allocation52_spill] sm:$0xff] }
 0x2b0   :  { %v2465_v3 = vadd.f32 %v2464_v17, %v15611_v6  ;;  %4129 = vmatpush1.msra.mxu0 %v19505_v41  ;;  %v15803_v40 = vadd.f32 %v2666_v59, %v2463_v27 }
 0x2b1   :  { %v2470_v1 = vpop.f32.mrf.mxu0  ;;  %v2693_v62 = vpop.f32.mrf.mxu1  ;;  %3755 = vmatmul.mubr.f32.gmra.mxu0 %v19506_v45  ;;  %3978 = vmatmul.mubr.f32.gmra.mxu1 %v19507_v8  ;;  %v19516_v45 = vld [vmem:[#allocation78_spill] sm:$0xff] }
 0x2b2   :  { %v2471_v11 = vadd.f32 %v2470_v1, %v19508_v56  ;;  %3760 = vmatprep.mubr.f32.mxu0 %v19361_v29  ;;  %3983 = vmatprep.mubr.f32.mxu1 %v19361_v29  ;;  %v15810_v0 = vadd.f32 %v2668_v61, %v2465_v3  ;;  %v19515_v1 = vld [vmem:[#allocation57_spill] sm:$0xff]  ;;  %v19517_v8 = vld [vmem:[#allocation30_spill] sm:$0xff] }
 0x2b3   :  { %v2472_v6 = vpop.f32.mrf.mxu0  ;;  %v2695_v47 = vpop.f32.mrf.mxu1  ;;  %4501 = vmatprep.subr.mxu0 %v15718_v55 }
 0x2b4   :  { %v2473_v7 = vadd.f32 %v2472_v6, %v15623_v15  ;;  %v15814_v59 = vadd.f32 %v2675_v54, %v2471_v11 }
 0x2b5   :  { %v2478_v43 = vpop.f32.mrf.mxu0  ;;  %v2702_v38 = vpop.f32.mrf.mxu1  ;;  %3763 = vmatmul.mubr.f32.gmra.mxu0 %v19509_v2  ;;  %3987 = vmatmul.mubr.f32.gmra.mxu1 %v19510_v26  ;;  %v19518_v2 = vld [vmem:[#allocation63_spill] sm:$0xff] }
 0x2b6   :  { %v2479_v20 = vadd.f32 %v2478_v43, %v19511_v19  ;;  %3768 = vmatprep.mubr.f32.mxu0 %v19361_v29  ;;  %3992 = vmatprep.mubr.f32.mxu1 %v19361_v29  ;;  %v15821_v61 = vadd.f32 %v2677_v9, %v2473_v7  ;;  %v19519_v26 = vld [vmem:[#allocation87_spill] sm:$0xff] }
 0x2b7   :  { %v2480_v53 = vpop.f32.mrf.mxu0  ;;  %v2704_v13 = vpop.f32.mrf.mxu1  ;;  %v19520_v19 = vld [vmem:[#allocation55_spill] sm:$0xff] }
 0x2b8   :  { %v2481_v15 = vadd.f32 %v2480_v53, %v15633_v28  ;;  %v15824_v54 = vadd.f32 %v2684_v10, %v2479_v20 }
 0x2b9   :  { %v2486_v21 = vpop.f32.mrf.mxu0  ;;  %v2711_v60 = vpop.f32.mrf.mxu1  ;;  %3771 = vmatmul.mubr.f32.gmra.mxu0 %v19512_v49  ;;  %3996 = vmatmul.mubr.f32.gmra.mxu1 %v19513_v18  ;;  %v19521_v18 = vld [vmem:[#allocation73_spill] sm:$0xff] }
 0x2ba   :  { %v2487_v27 = vadd.f32 %v2486_v21, %v19514_v12  ;;  %3776 = vmatprep.mubr.f32.mxu0 %v19361_v29  ;;  %4001 = vmatprep.mubr.f32.mxu1 %v19361_v29  ;;  %v15831_v9 = vadd.f32 %v2686_v16, %v2481_v15  ;;  %v19522_v12 = vld [vmem:[#allocation96_spill] sm:$0xff] }
 0x2bb   :  { %v2488_v17 = vpop.f32.mrf.mxu0  ;;  %v2713_v50 = vpop.f32.mrf.mxu1 }
 0x2bc   :  { %v2489_v28 = vadd.f32 %v2488_v17, %v15643_v23  ;;  %v15834_v10 = vadd.f32 %v2693_v62, %v2487_v27 }
 0x2bd   :  { %v2494_v3 = vpop.f32.mrf.mxu0  ;;  %v2720_v41 = vpop.f32.mrf.mxu1  ;;  %3779 = vmatmul.mubr.f32.gmra.mxu0 %v19515_v1  ;;  %4005 = vmatmul.mubr.f32.gmra.mxu1 %v19516_v45 }
 0x2be   :  { %v2495_v56 = vadd.f32 %v2494_v3, %v19517_v8  ;;  %3784 = vmatprep.mubr.f32.mxu0 %v19361_v29  ;;  %4010 = vmatprep.mubr.f32.mxu1 %v19361_v29  ;;  %v15841_v16 = vadd.f32 %v2695_v47, %v2489_v28  ;;  %v4473_v3 = vld [vmem:[%s18601_s5 + $0x68] sm:$0xff]  ;;  %v19523_v8 = vld [vmem:[#allocation81_spill] sm:$0xff] }
 0x2bf   :  { %v2496_v11 = vpop.f32.mrf.mxu0  ;;  %v2722_v6 = vpop.f32.mrf.mxu1 }
 0x2c0   :  { %v2497_v23 = vadd.f32 %v2496_v11, %v15653_v48  ;;  %v15844_v62 = vadd.f32 %v2702_v38, %v2495_v56 }
 0x2c1   :  { %v2502_v7 = vpop.f32.mrf.mxu0  ;;  %v2729_v43 = vpop.f32.mrf.mxu1  ;;  %3787 = vmatmul.mubr.f32.gmra.mxu0 %v19518_v2  ;;  %4014 = vmatmul.mubr.f32.gmra.mxu1 %v19519_v26  ;;  %v4472_v26 = vld [vmem:[%s18601_s5 + $0x60] sm:$0xff] }
 0x2c2   :  { %v2503_v20 = vadd.f32 %v2502_v7, %v19520_v19  ;;  %3792 = vmatprep.mubr.f32.mxu0 %v19361_v29  ;;  %4019 = vmatprep.mubr.f32.mxu1 %v19361_v29  ;;  %v15851_v47 = vadd.f32 %v2704_v13, %v2497_v23 }
 0x2c3   :  { %v2504_v53 = vpop.f32.mrf.mxu0  ;;  %v2731_v15 = vpop.f32.mrf.mxu1 }
 0x2c4   :  { %v2505_v48 = vadd.f32 %v2504_v53, %v15663_v14  ;;  %v15854_v38 = vadd.f32 %v2711_v60, %v2503_v20  ;;  %v4474_v60 = vld [vmem:[%s18601_s5 + $0x70] sm:$0xff]  ;;  %v19527_v53 = vld [vmem:[#allocation88_spill] sm:$0xff] }
 0x2c5   :  { %v2510_v21 = vpop.f32.mrf.mxu0  ;;  %v2738_v49 = vpop.f32.mrf.mxu1  ;;  %3795 = vmatmul.mubr.f32.gmra.mxu0 %v19521_v18  ;;  %4023 = vmatmul.mubr.f32.gmra.mxu1 %v19522_v12  ;;  %v15879_v7 = vand.u32 4294901760, %v4474_v60 }
 0x2c6   :  { %v2511_v27 = vadd.f32 %v2510_v21, %v15666_v30  ;;  %3800 = vmatprep.mubr.f32.mxu0 %v19361_v29  ;;  %4028 = vmatprep.mubr.f32.mxu1 %v19361_v29  ;;  %v15861_v13 = vadd.f32 %v2713_v50, %v2505_v48  ;;  %v19524_v50 = vld [vmem:[#allocation38_spill] sm:$0xff] }
 0x2c7   :  { %v2512_v17 = vpop.f32.mrf.mxu0  ;;  %v2740_v28 = vpop.f32.mrf.mxu1  ;;  %v4471_v48 = vld [vmem:[%s18601_s5 + $0x58] sm:$0xff]  ;;  %v15900_v12 = vsub.f32 %v4474_v60, %v15879_v7  ;;  %v4470_v60 = vld [vmem:[%s18601_s5 + $0x50] sm:$0xff] }
 0x2c8   :  { %v2513_v14 = vadd.f32 %v2512_v17, %v15673_v42  ;;  %v15870_v1 = vadd.f32 %v2720_v41, %v2511_v27  ;;  %v15881_v41 = vand.u32 4294901760, %v4473_v3  ;;  %v15902_v27 = vand.u32 4294901760, %v4472_v26 }
 0x2c9   :  { %v2518_v30 = vpop.f32.mrf.mxu0  ;;  %v2747_v45 = vpop.f32.mrf.mxu1  ;;  %3803 = vmatmul.mubr.f32.gmra.mxu0 %v19523_v8  ;;  %4032 = vmatmul.mubr.f32.gmra.mxu1 %v19524_v50  ;;  %19530 = vst [vmem:[#allocation64_spill] sm:$0xff] %v15900_v12 }
 0x2ca   :  { %v2519_v56 = vadd.f32 %v2518_v30, %v15676_v32  ;;  %3808 = vmatprep.mubr.f32.mxu0 %v19361_v29  ;;  %4037 = vmatprep.mubr.f32.mxu1 %v19361_v29  ;;  %v15877_v42 = vadd.f32 %v2722_v6, %v2513_v14  ;;  %v19528_v6 = vld [vmem:[#allocation50_spill] sm:$0xff]  ;;  %v15905_v17 = vsub.f32 %v4473_v3, %v15881_v41  ;;  %v15908_v30 = vand.u32 4294901760, %v4471_v48 }
 0x2cb   :  { %v2520_v11 = vpop.f32.mrf.mxu0  ;;  %v2749_v23 = vpop.f32.mrf.mxu1 }
 0x2cc   :  { %19525 = vst [vmem:[#allocation65_spill] sm:$0xff] %v15877_v42  ;;  %v2521_v2 = vadd.f32 %v2520_v11, %v15683_v5  ;;  %v15887_v19 = vadd.f32 %v2729_v43, %v2519_v56  ;;  %19531 = vst [vmem:[#allocation24_spill] sm:$0xff] %v15905_v17  ;;  %v19534_v56 = vld [vmem:[#allocation31_spill] sm:$0xff] }
 0x2cd   :  { %v2526_v32 = vpop.f32.mrf.mxu0  ;;  %v2756_v20 = vpop.f32.mrf.mxu1  ;;  %3811 = vmatmul.mubr.f32.gmra.mxu0 %v19527_v53  ;;  %4041 = vmatmul.mubr.f32.gmra.mxu1 %v19528_v6  ;;  %v15931_v53 = vand.u32 4294901760, %v15905_v17  ;;  %v4468_v6 = vld [vmem:[%s18601_s5 + $0x40] sm:$0xff] }
 0x2ce   :  { %19526 = vst [vmem:[#allocation67_spill] sm:$0xff] %v15887_v19  ;;  %v2527_v21 = vadd.f32 %v2526_v32, %v15686_v31  ;;  %3816 = vmatprep.mubr.f32.mxu0 %v19361_v29  ;;  %4046 = vmatprep.mubr.f32.mxu1 %v19361_v29  ;;  %v15897_v5 = vadd.f32 %v2731_v15, %v2521_v2  ;;  %v19533_v15 = vld [vmem:[#allocation97_spill] sm:$0xff]  ;;  %v15928_v32 = vand.u32 4294901760, %v15900_v12  ;;  %v19568_v42 = vld [vmem:[#allocation19_spill] sm:$0xff] }
 0x2cf   :  { %v2528_v43 = vpop.f32.mrf.mxu0  ;;  %v2758_v18 = vpop.f32.mrf.mxu1  ;;  %19537 = vst [vmem:[#allocation42_spill] sm:$0xff] %v15931_v53 }
 0x2d0   :  { %19529 = vst [vmem:[#allocation59_spill] sm:$0xff] %v15897_v5  ;;  %v2529_v14 = vadd.f32 %v2528_v43, %v15693_v63  ;;  %v15910_v31 = vadd.f32 %v2738_v49, %v2527_v21  ;;  %v4469_v63 = vld [vmem:[%s18601_s5 + $0x48] sm:$0xff]  ;;  %19536 = vst [vmem:[#allocation16_spill] sm:$0xff] %v15928_v32  ;;  %v15943_v43 = vsub.f32 %v4471_v48, %v15908_v30 }
 0x2d1   :  { %v2534_v8 = vpop.f32.mrf.mxu0  ;;  %v2765_v50 = vpop.f32.mrf.mxu1  ;;  %3819 = vmatmul.mubr.f32.gmra.mxu0 %v19533_v15  ;;  %4050 = vmatmul.mubr.f32.gmra.mxu1 %v19534_v56  ;;  %v19541_v56 = vld [vmem:[#allocation99_spill] sm:$0xff]  ;;  %v15951_v39 = vand.u32 4294901760, %v4469_v63 }
 0x2d2   :  { %19532 = vst [vmem:[#allocation68_spill] sm:$0xff] %v15910_v31  ;;  %v2535_v11 = vadd.f32 %v2534_v8, %v15696_v44  ;;  %3824 = vmatprep.mubr.f32.mxu0 %v19361_v29  ;;  %4055 = vmatprep.mubr.f32.mxu1 %v19361_v29  ;;  %v15923_v49 = vadd.f32 %v2740_v28, %v2529_v14  ;;  %v15940_v28 = vand.u32 4294901760, %v4470_v60  ;;  %19539 = vst [vmem:[#allocation74_spill] sm:$0xff] %v15943_v43 }
 0x2d3   :  { %v2536_v3 = vpop.f32.mrf.mxu0  ;;  %v15925_v2 = vpop.f32.mrf.mxu1  ;;  %v15934_v44 = vsub.f32 %v4472_v26, %v15902_v27  ;;  %v19542_v26 = vld [vmem:[#allocation47_spill] sm:$0xff]  ;;  %v15989_v31 = vsub.f32 %v4469_v63, %v15951_v39 }
 0x2d4   :  { %19535 = vst [vmem:[#allocation14_spill] sm:$0xff] %v15923_v49  ;;  %v2537_v21 = vadd.f32 %v2536_v3, %v15703_v58  ;;  %v15945_v14 = vadd.f32 %v2747_v45, %v2535_v11  ;;  %v15956_v58 = vand.u32 4294901760, %v4468_v6  ;;  %v4467_v45 = vld [vmem:[%s18601_s5 + $0x38] sm:$0xff] }
 0x2d5   :  { %19538 = vst [vmem:[#allocation54_spill] sm:$0xff] %v15934_v44  ;;  %v2542_v8 = vpop.f32.mrf.mxu0  ;;  %v15947_v15 = vpop.f32.mrf.mxu1  ;;  %3827 = vmatmul.mubr.f32.gmra.mxu0 %v19541_v56  ;;  %4059 = vmatmul.mubr.f32.gmra.mxu1 %v19542_v26  ;;  %v4612_v56 = vsub.f32 %v15900_v12, %v15928_v32  ;;  %v4466_v26 = vld [vmem:[%s18601_s5 + $0x30] sm:$0xff]  ;;  %19551 = vst [vmem:[#allocation34_spill] sm:$0xff] %v15989_v31  ;;  %v15991_v5 = vand.u32 4294901760, %v4467_v45 }
 0x2d6   :  { %19540 = vst [vmem:[#allocation79_spill] sm:$0xff] %v15945_v14  ;;  %v2543_v49 = vadd.f32 %v2542_v8, %v19543_v57  ;;  %3832 = vmatprep.mubr.f32.mxu0 %v19361_v29  ;;  %4064 = vmatprep.mubr.f32.mxu1 %v19361_v29  ;;  %v15961_v48 = vadd.f32 %v2749_v23, %v2537_v21  ;;  %v15970_v8 = vand.u32 4294901760, %v15934_v44  ;;  %v15977_v23 = vand.u32 4294901760, %v15943_v43 }
 0x2d7   :  { %v2544_v11 = vpop.f32.mrf.mxu0  ;;  %v15963_v3 = vpop.f32.mrf.mxu1  ;;  %v4618_v57 = vsub.f32 %v15905_v17, %v15931_v53  ;;  %v15980_v21 = vsub.f32 %v4470_v60, %v15940_v28  ;;  %v19549_v53 = vld [vmem:[#allocation15_spill] sm:$0xff]  ;;  %v19550_v17 = vld [vmem:[#allocation20_spill] sm:$0xff]  ;;  %v15999_v60 = vand.u32 4294901760, %v4466_v26  ;;  %v16005_v63 = vand.u32 4294901760, %v4612_v56 }
 0x2d8   :  { %19544 = vst [vmem:[#allocation69_spill] sm:$0xff] %v15961_v48  ;;  %19545 = vst [vmem:[#allocation71_spill] sm:$0xff] %v15970_v8  ;;  %v2545_v14 = vadd.f32 %v2544_v11, %v15716_v52  ;;  %v15982_v48 = vadd.f32 %v2756_v20, %v2543_v49  ;;  %v15997_v20 = vsub.f32 %v4468_v6, %v15956_v58 }
 0x2d9   :  { %19546 = vst [vmem:[#allocation75_spill] sm:$0xff] %v15977_v23  ;;  %19547 = vst [vmem:[#allocation21_spill] sm:$0xff] %v15980_v21  ;;  %v2550_v32 = vpop.f32.mrf.mxu0  ;;  %v15984_v12 = vpop.f32.mrf.mxu1  ;;  %3835 = vmatmul.mubr.f32.gmra.mxu0 %v19549_v53  ;;  %4068 = vmatmul.mubr.f32.gmra.mxu1 %v19550_v17  ;;  %v16007_v11 = vand.u32 4294901760, %v4618_v57  ;;  %v4630_v6 = vsub.f32 %v15943_v43, %v15977_v23  ;;  %v16030_v23 = vand.u32 4294901760, %v15989_v31 }
 0x2da   :  { %19548 = vst [vmem:[#allocation80_spill] sm:$0xff] %v15982_v48  ;;  %v2551_v52 = vadd.f32 %v2550_v32, %v15721_v35  ;;  %3840 = vmatprep.mubr.f32.mxu0 %v19361_v29  ;;  %4347 = vmatprep.mubr.f32.mxu1 %v19361_v29  ;;  %19552 = vst [vmem:[#allocation44_spill] sm:$0xff] %v15997_v20  ;;  %v16001_v49 = vadd.f32 %v2758_v18, %v2545_v14  ;;  %v16015_v48 = vand.u32 4294901760, %v15980_v21  ;;  %v4465_v18 = vld [vmem:[%s18601_s5 + $0x28] sm:$0xff]  ;;  %v4464_v14 = vld [vmem:[%s18601_s5 + $0x20] sm:$0xff] }
 0x2db   :  { %v2552_v53 = vpop.f32.mrf.mxu0  ;;  %v16003_v17 = vpop.f32.mrf.mxu1  ;;  %19554 = vst [vmem:[#allocation83_spill] sm:$0xff] %v16005_v63  ;;  %19555 = vst [vmem:[#allocation25_spill] sm:$0xff] %v16007_v11  ;;  %v4624_v35 = vsub.f32 %v15934_v44, %v15970_v8  ;;  %v16033_v43 = vsub.f32 %v4467_v45, %v15991_v5 }
 0x2dc   :  { %19553 = vst [vmem:[#allocation13_spill] sm:$0xff] %v16001_v49  ;;  %v2553_v32 = vadd.f32 %v2552_v53, %v15728_v46  ;;  %19556 = vst [vmem:[#allocation32_spill] sm:$0xff] %v16015_v48  ;;  %v16023_v56 = vadd.f32 %v2765_v50, %v2551_v52  ;;  %v19558_v46 = vld [vmem:[#allocation35_spill] sm:$0xff]  ;;  %v19559_v53 = vld [vmem:[#allocation26_spill] sm:$0xff]  ;;  %v16039_v50 = vand.u32 4294901760, %v15997_v20  ;;  %v16042_v52 = vsub.f32 %v4466_v26, %v15999_v60 }
 0x2dd   :  { %v2558_v57 = vpop.f32.mrf.mxu0  ;;  %v16025_v8 = vpop.f32.mrf.mxu1  ;;  %3843 = vmatmul.mubr.f32.gmra.mxu0 %v19558_v46  ;;  %4349 = vmatmul.mubr.f32.vlgmr.msra.gmra.mxu1 %v19559_v53  ;;  %19560 = vst [vmem:[#allocation84_spill] sm:$0xff] %v16030_v23  ;;  %19561 = vst [vmem:[#allocation36_spill] sm:$0xff] %v16033_v43  ;;  %v16050_v45 = vand.u32 4294901760, %v4624_v35  ;;  %v16058_v26 = vand.u32 4294901760, %v4630_v6  ;;  %v4642_v6 = vsub.f32 %v15989_v31, %v16030_v23 }
 0x2de   :  { %19557 = vst [vmem:[#allocation23_spill] sm:$0xff] %v16023_v56  ;;  %v2559_v44 = vadd.f32 %v2558_v57, %v15736_v51  ;;  %3848 = vmatprep.mubr.f32.mxu0 %v19361_v29  ;;  %4354 = vmatprep.mubr.f32.mxu1 %v19361_v29  ;;  %19562 = vst [vmem:[#allocation48_spill] sm:$0xff] %v16039_v50  ;;  %v16045_v46 = vadd.f32 %v15925_v2, %v2553_v32  ;;  %v16052_v51 = vand.u32 4294901760, %v4465_v18  ;;  %v4463_v32 = vld [vmem:[%s18601_s5 + $0x18] sm:$0xff] }
 0x2df   :  { %19563 = vst [vmem:[#allocation40_spill] sm:$0xff] %v16042_v52  ;;  %v2560_v56 = vpop.f32.mrf.mxu0  ;;  %v16047_v49 = vpop.f32.mrf.mxu1  ;;  %4614 = vmatpush1.msra.mxu1 %v16005_v63  ;;  %19565 = vst [vmem:[#allocation93_spill] sm:$0xff] %v16050_v45  ;;  %v16054_v57 = vand.u32 4294901760, %v4464_v14  ;;  %v4636_v2 = vsub.f32 %v15980_v21, %v16015_v48  ;;  %v16100_v21 = vand.u32 4294901760, %v4463_v32 }
 0x2e0   :  { %19564 = vst [vmem:[#allocation90_spill] sm:$0xff] %v16045_v46  ;;  %v2561_v19 = vadd.f32 %v2560_v56, %v15743_v25  ;;  %4620 = vmatprep.subr.mxu1 %v16007_v11  ;;  %19567 = vst [vmem:[#allocation53_spill] sm:$0xff] %v16058_v26  ;;  %v16066_v35 = vadd.f32 %v15947_v15, %v2559_v44  ;;  %v19569_v25 = vld [vmem:[#allocation27_spill] sm:$0xff]  ;;  %v16075_v56 = vand.u32 4294901760, %v16033_v43  ;;  %v4462_v11 = vld [vmem:[%s18601_s5 + $0x10] sm:$0xff]  ;;  %v16086_v15 = vand.u32 4294901760, %v16042_v52 }
 0x2e1   :  { %19566 = vst [vmem:[#allocation45_spill] sm:$0xff] %v16054_v57  ;;  %v2566_v63 = vpop.f32.mrf.mxu0  ;;  %v16068_v46 = vpop.f32.mrf.mxu1  ;;  %3851 = vmatmul.mubr.f32.gmra.mxu0 %v19568_v42  ;;  %4356 = vmatmul.mubr.f32.gmra.mxu1 %v19569_v25  ;;  %v4648_v42 = vsub.f32 %v15997_v20, %v16039_v50  ;;  %19575 = vst [vmem:[#allocation86_spill] sm:$0xff] %v16100_v21  ;;  %v16104_v20 = vand.u32 4294901760, %v4636_v2  ;;  %v4460_v2 = vld [vmem:[%s18601_s5] sm:$0xff] }
 0x2e2   :  { %19570 = vst [vmem:[#allocation61_spill] sm:$0xff] %v16075_v56  ;;  %v2567_v44 = vadd.f32 %v2566_v63, %v15751_v34  ;;  %4162 = vmatprep.mubr.f32.mxu0 %v19361_v29  ;;  %4361 = vmatprep.mubr.f32.mxu1 %v19361_v29  ;;  %19571 = vst [vmem:[#allocation70_spill] sm:$0xff] %v16086_v15  ;;  %v16089_v23 = vadd.f32 %v15963_v3, %v2561_v19  ;;  %v16106_v19 = vand.u32 4294901760, %v4462_v11  ;;  %v4461_v3 = vld [vmem:[%s18601_s5 + $0x8] sm:$0xff]  ;;  %s13401_s5 = smov 64  }
 0x2e3   :  { %v2568_v48 = vpop.f32.mrf.mxu0  ;;  %v16091_v31 = vpop.f32.mrf.mxu1  ;;  %4626 = vmatpush1.msra.mxu1 %v16050_v45  ;;  %v16095_v34 = vsub.f32 %v4465_v18, %v16052_v51  ;;  %v16098_v63 = vsub.f32 %v4464_v14, %v16054_v57  ;;  %19576 = vst [vmem:[#allocation29_spill] sm:$0xff] %v16104_v20  ;;  %v19579_v45 = vld [vmem:[#allocation89_spill] sm:$0xff] }
 0x2e4   :  { %19572 = vst [vmem:[#allocation77_spill] sm:$0xff] %v16089_v23  ;;  %v2569_v50 = vadd.f32 %v2568_v48, %v15759_v37  ;;  %4632 = vmatprep.subr.mxu1 %v16058_v26  ;;  %19577 = vst [vmem:[#allocation56_spill] sm:$0xff] %v16106_v19  ;;  %v16112_v18 = vadd.f32 %v15984_v12, %v2567_v44  ;;  %v16118_v37 = vand.u32 4294901760, %v4642_v6  ;;  %v16128_v12 = vand.u32 4294901760, %v4648_v42 }
 0x2e5   :  { %19573 = vst [vmem:[#allocation85_spill] sm:$0xff] %v16095_v34  ;;  %19574 = vst [vmem:[#allocation94_spill] sm:$0xff] %v16098_v63  ;;  %v2879_v23 = vpop.f32.mrf.mxu0  ;;  %v16114_v14 = vpop.f32.mrf.mxu1  ;;  %4164 = vmatmul.mubr.f32.vlgmr.msra.gmra.mxu0 %v19559_v53  ;;  %4363 = vmatmul.mubr.f32.gmra.mxu1 %v19579_v45  ;;  %v4654_v48 = vsub.f32 %v16033_v43, %v16075_v56  ;;  %v4660_v53 = vsub.f32 %v16042_v52, %v16086_v15  ;;  %v16148_v15 = vand.u32 4294901760, %v4461_v3 }
 0x2e6   :  { %19578 = vst [vmem:[#allocation33_spill] sm:$0xff] %v16112_v18  ;;  %19580 = vst [vmem:[#allocation95_spill] sm:$0xff] %v16118_v37  ;;  %v2880_v26 = vadd.f32 %v2879_v23, %v15770_v36  ;;  %4503 = vmatpush1.msra.mxu0 %v15879_v7  ;;  %4169 = vmatprep.mubr.f32.mxu0 %v19361_v29  ;;  %v16133_v6 = vadd.f32 %v16003_v17, %v2569_v50  ;;  %v16140_v36 = vand.u32 4294901760, %v16095_v34 }
 0x2e7   :  { %19581 = vst [vmem:[#allocation62_spill] sm:$0xff] %v16128_v12  ;;  %v2881_v44 = vpop.f32.mrf.mxu0  ;;  %v16135_v56 = vpop.f32.mrf.mxu1  ;;  %4368 = vmatprep.mubr.f32.mxu1 %v19361_v29  ;;  %4505 = vmatprep.subr.mxu0 %v15881_v41  ;;  %v16143_v23 = vand.u32 4294901760, %v16098_v63  ;;  %v16146_v42 = vsub.f32 %v4463_v32, %v16100_v21  ;;  %19586 = vst [vmem:[#allocation57_spill] sm:$0xff] %v16148_v15  ;;  %v16159_v52 = vand.u32 4294901760, %v4460_v2  ;;  %v19590_v32 = vld [vmem:[#allocation28_spill] sm:$0xff] }
 0x2e8   :  { %19582 = vst [vmem:[#allocation17_spill] sm:$0xff] %v16133_v6  ;;  %19583 = vst [vmem:[#allocation49_spill] sm:$0xff] %v16140_v36  ;;  %v16151_v17 = vadd.f32 %v16025_v8, %v2880_v26  ;;  %v2882_v50 = vadd.f32 %v2881_v44, %v15777_v24  ;;  %4507 = vmatpush1.msra.mxu0 %v15902_v27  ;;  %4638 = vmatpush1.msra.mxu1 %v16104_v20  ;;  %v16169_v26 = vand.u32 4294901760, %v4654_v48 }
 0x2e9   :  { %19584 = vst [vmem:[#allocation72_spill] sm:$0xff] %v16143_v23  ;;  %19585 = vst [vmem:[#allocation52_spill] sm:$0xff] %v16146_v42  ;;  %v16157_v6 = vsub.f32 %v4462_v11, %v16106_v19  ;;  %v2886_v43 = vpop.f32.mrf.mxu0  ;;  %v3085_v18 = vpop.f32.mrf.mxu1  ;;  %4171 = vmatmul.mubr.f32.gmra.mxu0 %v19569_v25  ;;  %4370 = vmatmul.mubr.f32.gmra.mxu1 %v19590_v32  ;;  %v16171_v11 = vand.u32 4294901760, %v4660_v53  ;;  %v16183_v25 = vsub.f32 %v4461_v3, %v16148_v15  ;;  %v19599_v3 = vld [vmem:[#allocation91_spill] sm:$0xff] }
 0x2ea   :  { %19587 = vst [vmem:[#allocation78_spill] sm:$0xff] %v16151_v17  ;;  %19589 = vst [vmem:[#allocation63_spill] sm:$0xff] %v16159_v52  ;;  %v16164_v8 = vadd.f32 %v16047_v49, %v2882_v50  ;;  %v2887_v24 = vadd.f32 %v2886_v43, %v15788_v4  ;;  %4176 = vmatprep.mubr.f32.mxu0 %v19361_v29  ;;  %4375 = vmatprep.mubr.f32.mxu1 %v19361_v29  ;;  %v16180_v43 = vand.u32 4294901760, %v16146_v42 }
 0x2eb   :  { %19588 = vst [vmem:[#allocation30_spill] sm:$0xff] %v16157_v6  ;;  %19592 = vst [vmem:[#allocation55_spill] sm:$0xff] %v16169_v26  ;;  %v2888_v44 = vpop.f32.mrf.mxu0  ;;  %v3087_v17 = vpop.f32.mrf.mxu1  ;;  %4509 = vmatprep.subr.mxu0 %v15908_v30  ;;  %4644 = vmatprep.subr.mxu1 %v16118_v37  ;;  %v4666_v49 = vsub.f32 %v16095_v34, %v16140_v36  ;;  %v4672_v4 = vsub.f32 %v16098_v63, %v16143_v23  ;;  %v16192_v50 = vand.u32 4294901760, %v16157_v6 }
 0x2ec   :  { %19591 = vst [vmem:[#allocation87_spill] sm:$0xff] %v16164_v8  ;;  %19593 = vst [vmem:[#allocation73_spill] sm:$0xff] %v16171_v11  ;;  %v16186_v48 = vadd.f32 %v16068_v46, %v2887_v24  ;;  %v2889_v53 = vadd.f32 %v2888_v44, %v15795_v33  ;;  %4511 = vmatpush1.msra.mxu0 %v15940_v28  ;;  %4650 = vmatpush1.msra.mxu1 %v16128_v12 }
 0x2ed   :  { %19594 = vst [vmem:[#allocation96_spill] sm:$0xff] %v16180_v43  ;;  %19595 = vst [vmem:[#allocation81_spill] sm:$0xff] %v16183_v25  ;;  %v16195_v8 = vsub.f32 %v4460_v2, %v16159_v52  ;;  %v2893_v37 = vpop.f32.mrf.mxu0  ;;  %v3092_v20 = vpop.f32.mrf.mxu1  ;;  %4178 = vmatmul.mubr.f32.gmra.mxu0 %v19579_v45  ;;  %4377 = vmatmul.mubr.f32.gmra.mxu1 %v19599_v3  ;;  %v16207_v2 = vand.u32 4294901760, %v4666_v49  ;;  %v16209_v45 = vand.u32 4294901760, %v4672_v4 }
 0x2ee   :  { %19596 = vst [vmem:[#allocation38_spill] sm:$0xff] %v16186_v48  ;;  %19597 = vst [vmem:[#allocation88_spill] sm:$0xff] %v16192_v50  ;;  %v16200_v46 = vadd.f32 %v16091_v31, %v2889_v53  ;;  %v2894_v33 = vadd.f32 %v2893_v37, %v15803_v40  ;;  %4183 = vmatprep.mubr.f32.mxu0 %v19361_v29  ;;  %4382 = vmatprep.mubr.f32.mxu1 %v19361_v29  ;;  %v16214_v53 = vand.u32 4294901760, %v16183_v25 }
 0x2ef   :  { %19598 = vst [vmem:[#allocation50_spill] sm:$0xff] %v16195_v8  ;;  %v2895_v24 = vpop.f32.mrf.mxu0  ;;  %v3094_v44 = vpop.f32.mrf.mxu1  ;;  %4513 = vmatprep.subr.mxu0 %v15951_v39  ;;  %4656 = vmatprep.subr.mxu1 %v16169_v26  ;;  %19601 = vst [vmem:[#allocation31_spill] sm:$0xff] %v16207_v2  ;;  %v4678_v31 = vsub.f32 %v16146_v42, %v16180_v43  ;;  %v4684_v49 = vsub.f32 %v16157_v6, %v16192_v50  ;;  %v16225_v4 = vand.u32 4294901760, %v16195_v8  ;;  %v19606_v26 = vld [vmem:[#allocation43_spill] sm:$0xff] }
 0x2f0   :  { %19600 = vst [vmem:[#allocation97_spill] sm:$0xff] %v16200_v46  ;;  %19602 = vst [vmem:[#allocation99_spill] sm:$0xff] %v16209_v45  ;;  %v16217_v40 = vadd.f32 %v16114_v14, %v2894_v33  ;;  %v2896_v37 = vadd.f32 %v2895_v24, %v15810_v0  ;;  %4515 = vmatpush1.msra.mxu0 %v15956_v58  ;;  %4662 = vmatpush1.msra.mxu1 %v16171_v11 }
 0x2f1   :  { %19603 = vst [vmem:[#allocation47_spill] sm:$0xff] %v16214_v53  ;;  %19605 = vst [vmem:[#allocation15_spill] sm:$0xff] %v16225_v4  ;;  %v2900_v46 = vpop.f32.mrf.mxu0  ;;  %v3099_v48 = vpop.f32.mrf.mxu1  ;;  %4185 = vmatmul.mubr.f32.gmra.mxu0 %v19590_v32  ;;  %4384 = vmatmul.mubr.f32.gmra.mxu1 %v19606_v26  ;;  %v4690_v32 = vsub.f32 %v16183_v25, %v16214_v53 }
 0x2f2   :  { %19604 = vst [vmem:[#allocation22_spill] sm:$0xff] %v16217_v40  ;;  %v16230_v14 = vadd.f32 %v16135_v56, %v2896_v37  ;;  %v2901_v0 = vadd.f32 %v2900_v46, %v15814_v59  ;;  %4190 = vmatprep.mubr.f32.mxu0 %v19361_v29  ;;  %4389 = vmatprep.mubr.f32.mxu1 %v19361_v29  ;;  %v16237_v40 = vand.u32 4294901760, %v4678_v31  ;;  %v16246_v59 = vand.u32 4294901760, %v4684_v49  ;;  %v19611_v31 = vld [vmem:[#allocation51_spill] sm:$0xff] }
 0x2f3   :  { %v2902_v33 = vpop.f32.mrf.mxu0  ;;  %v3101_v24 = vpop.f32.mrf.mxu1  ;;  %4517 = vmatprep.subr.mxu0 %v15991_v5  ;;  %4668 = vmatprep.subr.mxu1 %v16207_v2  ;;  %v4696_v46 = vsub.f32 %v16195_v8, %v16225_v4 }
 0x2f4   :  { %19607 = vst [vmem:[#allocation20_spill] sm:$0xff] %v16230_v14  ;;  %19608 = vst [vmem:[#allocation35_spill] sm:$0xff] %v16237_v40  ;;  %v16241_v11 = vadd.f32 %v3085_v18, %v2901_v0  ;;  %v2903_v56 = vadd.f32 %v2902_v33, %v15821_v61  ;;  %4519 = vmatpush1.msra.mxu0 %v15999_v60  ;;  %4674 = vmatpush1.msra.mxu1 %v16209_v45  ;;  %v16259_v0 = vand.u32 4294901760, %v4690_v32 }
 0x2f5   :  { %19610 = vst [vmem:[#allocation19_spill] sm:$0xff] %v16246_v59  ;;  %v2907_v37 = vpop.f32.mrf.mxu0  ;;  %v3106_v14 = vpop.f32.mrf.mxu1  ;;  %4192 = vmatmul.mubr.f32.gmra.mxu0 %v19599_v3  ;;  %4391 = vmatmul.mubr.f32.gmra.mxu1 %v19611_v31 }
 0x2f6   :  { %19609 = vst [vmem:[#allocation26_spill] sm:$0xff] %v16241_v11  ;;  %v16252_v2 = vadd.f32 %v3087_v17, %v2903_v56  ;;  %v2908_v18 = vadd.f32 %v2907_v37, %v15824_v54  ;;  %4197 = vmatprep.mubr.f32.mxu0 %v19361_v29  ;;  %4396 = vmatprep.mubr.f32.mxu1 %v19361_v29  ;;  %19613 = vst [vmem:[#allocation89_spill] sm:$0xff] %v16259_v0  ;;  %v16266_v54 = vand.u32 4294901760, %v4696_v46  ;;  %v19616_v37 = vld [vmem:[#allocation60_spill] sm:$0xff] }
 0x2f7   :  { %v2909_v61 = vpop.f32.mrf.mxu0  ;;  %v3108_v49 = vpop.f32.mrf.mxu1  ;;  %4521 = vmatprep.subr.mxu0 %v16052_v51  ;;  %4680 = vmatprep.subr.mxu1 %v16237_v40 }
 0x2f8   :  { %19612 = vst [vmem:[#allocation27_spill] sm:$0xff] %v16252_v2  ;;  %v16261_v33 = vadd.f32 %v3092_v20, %v2908_v18  ;;  %v2910_v3 = vadd.f32 %v2909_v61, %v15831_v9  ;;  %4523 = vmatpush1.msra.mxu0 %v16054_v57  ;;  %4686 = vmatpush1.msra.mxu1 %v16246_v59  ;;  %19615 = vst [vmem:[#allocation91_spill] sm:$0xff] %v16266_v54  ;;  %v19619_v18 = vld [vmem:[#allocation66_spill] sm:$0xff] }
 0x2f9   :  { %v2914_v17 = vpop.f32.mrf.mxu0  ;;  %v3113_v56 = vpop.f32.mrf.mxu1  ;;  %4199 = vmatmul.mubr.f32.gmra.mxu0 %v19606_v26  ;;  %4398 = vmatmul.mubr.f32.gmra.mxu1 %v19616_v37 }
 0x2fa   :  { %19614 = vst [vmem:[#allocation28_spill] sm:$0xff] %v16261_v33  ;;  %v16270_v2 = vadd.f32 %v3094_v44, %v2910_v3  ;;  %v2915_v32 = vadd.f32 %v2914_v17, %v15834_v10  ;;  %4204 = vmatprep.mubr.f32.mxu0 %v19361_v29  ;;  %4403 = vmatprep.mubr.f32.mxu1 %v19361_v29 }
 0x2fb   :  { %v2916_v9 = vpop.f32.mrf.mxu0  ;;  %v3115_v20 = vpop.f32.mrf.mxu1  ;;  %4525 = vmatprep.subr.mxu0 %v16100_v21  ;;  %4692 = vmatprep.subr.mxu1 %v16259_v0 }
 0x2fc   :  { %19617 = vst [vmem:[#allocation43_spill] sm:$0xff] %v16270_v2  ;;  %v16277_v46 = vadd.f32 %v3099_v48, %v2915_v32  ;;  %v2917_v26 = vadd.f32 %v2916_v9, %v15841_v16  ;;  %4527 = vmatpush1.msra.mxu0 %v16106_v19  ;;  %4698 = vmatpush1.msra.mxu1 %v16266_v54 }
 0x2fd   :  { %v2921_v44 = vpop.f32.mrf.mxu0  ;;  %v3120_v10 = vpop.f32.mrf.mxu1  ;;  %4206 = vmatmul.mubr.f32.gmra.mxu0 %v19611_v31  ;;  %4405 = vmatmul.mubr.f32.gmra.mxu1 %v19619_v18 }
 0x2fe   :  { %19618 = vst [vmem:[#allocation51_spill] sm:$0xff] %v16277_v46  ;;  %v16284_v61 = vadd.f32 %v3101_v24, %v2917_v26  ;;  %v2922_v3 = vadd.f32 %v2921_v44, %v15844_v62  ;;  %4211 = vmatprep.mubr.f32.mxu0 %v19361_v29  ;;  %4410 = vmatprep.mubr.f32.mxu1 %v19361_v29  ;;  %v19621_v62 = vld [vmem:[#allocation76_spill] sm:$0xff] }
 0x2ff   :  { %v2923_v48 = vpop.f32.mrf.mxu0  ;;  %v3122_v16 = vpop.f32.mrf.mxu1  ;;  %4529 = vmatprep.subr.mxu0 %v16148_v15  ;;  %4876 = vmatprep.subr.mxu1 %v15718_v55 }
 0x300   :  { %19620 = vst [vmem:[#allocation60_spill] sm:$0xff] %v16284_v61  ;;  %v16291_v17 = vadd.f32 %v3106_v14, %v2922_v3  ;;  %v2924_v31 = vadd.f32 %v2923_v48, %v15851_v47  ;;  %4531 = vmatpush1.msra.mxu0 %v16159_v52 }
 0x301   :  { %v2928_v24 = vpop.f32.mrf.mxu0  ;;  %v3127_v32 = vpop.f32.mrf.mxu1  ;;  %4213 = vmatmul.mubr.f32.gmra.mxu0 %v19616_v37  ;;  %4412 = vmatmul.mubr.f32.gmra.mxu1 %v19621_v62 }
 0x302   :  { %v16297_v9 = vadd.f32 %v3108_v49, %v2924_v31  ;;  %v2929_v26 = vadd.f32 %v2928_v24, %v15854_v38  ;;  %4218 = vmatprep.mubr.f32.mxu0 %v19361_v29  ;;  %4417 = vmatprep.mubr.f32.mxu1 %v19361_v29  ;;  %v19623_v49 = vld [vmem:[#allocation82_spill] sm:$0xff] }
 0x303   :  { %v2930_v14 = vpop.f32.mrf.mxu0  ;;  %v3129_v44 = vpop.f32.mrf.mxu1  ;;  %4764 = vmatprep.subr.mxu0 %v15732_v22 }
 0x304   :  { %19622 = vst [vmem:[#allocation66_spill] sm:$0xff] %v16297_v9  ;;  %v16303_v47 = vadd.f32 %v3113_v56, %v2929_v26  ;;  %v2931_v3 = vadd.f32 %v2930_v14, %v15861_v13  ;;  %v19625_v26 = vld [vmem:[#allocation65_spill] sm:$0xff] }
 0x305   :  { %v2935_v48 = vpop.f32.mrf.mxu0  ;;  %v3134_v37 = vpop.f32.mrf.mxu1  ;;  %4220 = vmatmul.mubr.f32.gmra.mxu0 %v19619_v18  ;;  %4419 = vmatmul.mubr.f32.gmra.mxu1 %v19623_v49  ;;  %v19626_v18 = vld [vmem:[#allocation92_spill] sm:$0xff] }
 0x306   :  { %v16308_v31 = vadd.f32 %v3115_v20, %v2931_v3  ;;  %v2936_v38 = vadd.f32 %v2935_v48, %v15870_v1  ;;  %4225 = vmatprep.mubr.f32.mxu0 %v19361_v29  ;;  %4424 = vmatprep.mubr.f32.mxu1 %v19361_v29  ;;  %v19628_v3 = vld [vmem:[#allocation67_spill] sm:$0xff] }
 0x307   :  { %v2937_v24 = vpop.f32.mrf.mxu0  ;;  %v3136_v9 = vpop.f32.mrf.mxu1 }
 0x308   :  { %19624 = vst [vmem:[#allocation76_spill] sm:$0xff] %v16308_v31  ;;  %v16313_v56 = vadd.f32 %v3120_v10, %v2936_v38  ;;  %v2938_v13 = vadd.f32 %v2937_v24, %v19625_v26  ;;  %v19629_v38 = vld [vmem:[#allocation59_spill] sm:$0xff] }
 0x309   :  { %v2942_v14 = vpop.f32.mrf.mxu0  ;;  %v3141_v61 = vpop.f32.mrf.mxu1  ;;  %4227 = vmatmul.mubr.f32.gmra.mxu0 %v19621_v62  ;;  %4426 = vmatmul.mubr.f32.gmra.mxu1 %v19626_v18  ;;  %v19630_v62 = vld [vmem:[#allocation98_spill] sm:$0xff] }
 0x30a   :  { %v16318_v20 = vadd.f32 %v3122_v16, %v2938_v13  ;;  %v2943_v1 = vadd.f32 %v2942_v14, %v19628_v3  ;;  %4232 = vmatprep.mubr.f32.mxu0 %v19361_v29  ;;  %4431 = vmatprep.mubr.f32.mxu1 %v19361_v29  ;;  %v19632_v13 = vld [vmem:[#allocation68_spill] sm:$0xff] }
 0x30b   :  { %v2944_v48 = vpop.f32.mrf.mxu0  ;;  %v3143_v31 = vpop.f32.mrf.mxu1 }
 0x30c   :  { %19627 = vst [vmem:[#allocation82_spill] sm:$0xff] %v16318_v20  ;;  %v16323_v10 = vadd.f32 %v3127_v32, %v2943_v1  ;;  %v2945_v24 = vadd.f32 %v2944_v48, %v19629_v38  ;;  %v19633_v1 = vld [vmem:[#allocation14_spill] sm:$0xff] }
 0x30d   :  { %v2949_v26 = vpop.f32.mrf.mxu0  ;;  %v3148_v2 = vpop.f32.mrf.mxu1  ;;  %4234 = vmatmul.mubr.f32.gmra.mxu0 %v19623_v49  ;;  %4433 = vmatmul.mubr.f32.gmra.mxu1 %v19630_v62  ;;  %v19634_v49 = vld [vmem:[#allocation39_spill] sm:$0xff] }
 0x30e   :  { %v16328_v16 = vadd.f32 %v3129_v44, %v2945_v24  ;;  %v2950_v14 = vadd.f32 %v2949_v26, %v19632_v13  ;;  %4239 = vmatprep.mubr.f32.mxu0 %v19361_v29  ;;  %4438 = vmatprep.mubr.f32.mxu1 %v19361_v29  ;;  %v19636_v24 = vld [vmem:[#allocation79_spill] sm:$0xff] }
 0x30f   :  { %v2951_v3 = vpop.f32.mrf.mxu0  ;;  %v3150_v20 = vpop.f32.mrf.mxu1 }
 0x310   :  { %19631 = vst [vmem:[#allocation65_spill] sm:$0xff] %v16328_v16  ;;  %v16333_v32 = vadd.f32 %v3134_v37, %v2950_v14  ;;  %v2952_v48 = vadd.f32 %v2951_v3, %v19633_v1  ;;  %v19637_v14 = vld [vmem:[#allocation69_spill] sm:$0xff] }
 0x311   :  { %v2956_v38 = vpop.f32.mrf.mxu0  ;;  %v3155_v11 = vpop.f32.mrf.mxu1  ;;  %4241 = vmatmul.mubr.f32.gmra.mxu0 %v19626_v18  ;;  %4440 = vmatmul.mubr.f32.gmra.mxu1 %v19634_v49  ;;  %v19638_v18 = vld [vmem:[#allocation18_spill] sm:$0xff] }
 0x312   :  { %v16338_v44 = vadd.f32 %v3136_v9, %v2952_v48  ;;  %v2957_v26 = vadd.f32 %v2956_v38, %v19636_v24  ;;  %4246 = vmatprep.mubr.f32.mxu0 %v19361_v29  ;;  %4445 = vmatprep.mubr.f32.mxu1 %v19361_v29  ;;  %v19640_v48 = vld [vmem:[#allocation80_spill] sm:$0xff] }
 0x313   :  { %v2958_v13 = vpop.f32.mrf.mxu0  ;;  %v3157_v16 = vpop.f32.mrf.mxu1 }
 0x314   :  { %19635 = vst [vmem:[#allocation92_spill] sm:$0xff] %v16338_v44  ;;  %v16343_v37 = vadd.f32 %v3141_v61, %v2957_v26  ;;  %v2959_v3 = vadd.f32 %v2958_v13, %v19637_v14  ;;  %v19642_v26 = vld [vmem:[#allocation13_spill] sm:$0xff] }
 0x315   :  { %v2963_v1 = vpop.f32.mrf.mxu0  ;;  %v3162_v46 = vpop.f32.mrf.mxu1  ;;  %4248 = vmatmul.mubr.f32.gmra.mxu0 %v19630_v62  ;;  %4447 = vmatmul.mubr.f32.gmra.mxu1 %v19638_v18  ;;  %v19643_v62 = vld [vmem:[#allocation46_spill] sm:$0xff] }
 0x316   :  { %v16348_v9 = vadd.f32 %v3143_v31, %v2959_v3  ;;  %v2964_v38 = vadd.f32 %v2963_v1, %v19640_v48  ;;  %4253 = vmatprep.mubr.f32.mxu0 %v19361_v29  ;;  %4452 = vmatprep.mubr.f32.mxu1 %v19361_v29  ;;  %v19645_v3 = vld [vmem:[#allocation23_spill] sm:$0xff] }
 0x317   :  { %v2965_v24 = vpop.f32.mrf.mxu0  ;;  %v16353_v44 = vpop.f32.mrf.mxu1 }
 0x318   :  { %19639 = vst [vmem:[#allocation67_spill] sm:$0xff] %v16348_v9  ;;  %19641 = vst [vmem:[#allocation59_spill] sm:$0xff] %v16353_v44  ;;  %v16355_v61 = vadd.f32 %v3148_v2, %v2964_v38  ;;  %v2966_v13 = vadd.f32 %v2965_v24, %v19642_v26  ;;  %v19647_v38 = vld [vmem:[#allocation90_spill] sm:$0xff] }
 0x319   :  { %v2970_v14 = vpop.f32.mrf.mxu0  ;;  %v3169_v33 = vpop.f32.mrf.mxu1  ;;  %4255 = vmatmul.mubr.f32.gmra.mxu0 %v19634_v49  ;;  %4454 = vmatmul.mubr.f32.gmra.mxu1 %v19643_v62 }
 0x31a   :  { %v16360_v31 = vadd.f32 %v3150_v20, %v2966_v13  ;;  %v2971_v1 = vadd.f32 %v2970_v14, %v19645_v3  ;;  %4260 = vmatprep.mubr.f32.mxu0 %v19361_v29  ;;  %4731 = vmatprep.mubr.f32.mxu1 %v19361_v29 }
 0x31b   :  { %v2972_v48 = vpop.f32.mrf.mxu0  ;;  %v16365_v44 = vpop.f32.mrf.mxu1 }
 0x31c   :  { %19644 = vst [vmem:[#allocation98_spill] sm:$0xff] %v16360_v31  ;;  %19646 = vst [vmem:[#allocation68_spill] sm:$0xff] %v16365_v44  ;;  %v16367_v2 = vadd.f32 %v3155_v11, %v2971_v1  ;;  %v2973_v24 = vadd.f32 %v2972_v48, %v19647_v38 }
 0x31d   :  { %v2977_v26 = vpop.f32.mrf.mxu0  ;;  %v3538_v9 = vpop.f32.mrf.mxu1  ;;  %4262 = vmatmul.mubr.f32.gmra.mxu0 %v19638_v18  ;;  %4733 = vmatmul.mubr.f32.vlgmr.msra.gmra.mxu1 %v19361_v29 }
 0x31e   :  { %v16372_v20 = vadd.f32 %v3157_v16, %v2973_v24  ;;  %v2978_v49 = vadd.f32 %v2977_v26, %v16066_v35  ;;  %4267 = vmatprep.mubr.f32.mxu0 %v19361_v29  ;;  %4878 = vmatpush1.msra.mxu1 %v15879_v7  ;;  %v19651_v35 = vld [vmem:[#allocation33_spill] sm:$0xff]  ;;  %v19654_v26 = vld [vmem:[#allocation64_spill] sm:$0xff] }
 0x31f   :  { %v16377_v13 = vpop.f32.mrf.mxu0  ;;  %v16379_v11 = vpop.f32.mrf.mxu1  ;;  %4880 = vmatprep.subr.mxu1 %v15881_v41  ;;  %4738 = vmatprep.mubr.f32.mxu1 %v19361_v29 }
 0x320   :  { %19648 = vst [vmem:[#allocation14_spill] sm:$0xff] %v16372_v20  ;;  %19649 = vst [vmem:[#allocation39_spill] sm:$0xff] %v16377_v13  ;;  %v16383_v14 = vadd.f32 %v3162_v46, %v2978_v49  ;;  %4882 = vmatpush1.msra.mxu1 %v15902_v27  ;;  %v19655_v49 = vld [vmem:[#allocation24_spill] sm:$0xff]  ;;  %v19661_v13 = vld [vmem:[#allocation34_spill] sm:$0xff] }
 0x321   :  { %19650 = vst [vmem:[#allocation79_spill] sm:$0xff] %v16379_v11  ;;  %v2984_v16 = vpop.f32.mrf.mxu0  ;;  %v3545_v18 = vpop.f32.mrf.mxu1  ;;  %4269 = vmatmul.mubr.f32.gmra.mxu0 %v19643_v62  ;;  %4884 = vmatprep.subr.mxu1 %v15908_v30  ;;  %v19665_v20 = vld [vmem:[#allocation36_spill] sm:$0xff] }
 0x322   :  { %v2985_v3 = vadd.f32 %v2984_v16, %v19651_v35  ;;  %4564 = vmatprep.mubr.f32.mxu0 %v19361_v29  ;;  %4886 = vmatpush1.msra.mxu1 %v15940_v28  ;;  %v19658_v35 = vld [vmem:[#allocation54_spill] sm:$0xff] }
 0x323   :  { %v16391_v1 = vpop.f32.mrf.mxu0  ;;  %v16393_v48 = vpop.f32.mrf.mxu1  ;;  %4888 = vmatprep.subr.mxu1 %v15951_v39  ;;  %4740 = vmatmul.mubr.f32.gmra.mxu1 %v19361_v29 }
 0x324   :  { %19652 = vst [vmem:[#allocation69_spill] sm:$0xff] %v16391_v1  ;;  %19653 = vst [vmem:[#allocation18_spill] sm:$0xff] %v16393_v48  ;;  %v16397_v46 = vadd.f32 %v3169_v33, %v2985_v3  ;;  %4890 = vmatpush1.msra.mxu1 %v15956_v58  ;;  %4939 = vmatprep.mubr.f32.mxu1 %v19361_v29  ;;  %v19659_v3 = vld [vmem:[#allocation74_spill] sm:$0xff]  ;;  %v19660_v1 = vld [vmem:[#allocation21_spill] sm:$0xff] }
 0x325   :  { %v3261_v62 = vpop.f32.mrf.mxu0  ;;  %v3552_v38 = vpop.f32.mrf.mxu1  ;;  %4570 = vmatmul.mubr.f32.vlgmr.msra.gmra.mxu0 %v19361_v29  ;;  %4892 = vmatprep.subr.mxu1 %v15991_v5 }
 0x326   :  { %v16403_v24 = vadd.f32 %v3538_v9, %v3261_v62  ;;  %4767 = vmatpush1.msra.mxu0 %v19654_v26  ;;  %4894 = vmatpush1.msra.mxu1 %v15999_v60 }
 0x327   :  { %4770 = vmatprep.subr.mxu0 %v19655_v49  ;;  %v16408_v33 = vpop.f32.mrf.mxu0  ;;  %v16410_v16 = vpop.f32.mrf.mxu1  ;;  %4575 = vmatprep.mubr.f32.mxu0 %v19361_v29 }
 0x328   :  { %19656 = vst [vmem:[#allocation80_spill] sm:$0xff] %v16408_v33  ;;  %19657 = vst [vmem:[#allocation13_spill] sm:$0xff] %v16410_v16  ;;  %4773 = vmatpush1.msra.mxu0 %v19658_v35  ;;  %4896 = vmatprep.subr.mxu1 %v16052_v51  ;;  %v19664_v33 = vld [vmem:[#allocation44_spill] sm:$0xff] }
 0x329   :  { %4776 = vmatprep.subr.mxu0 %v19659_v3  ;;  %v3272_v9 = vpop.f32.mrf.mxu0  ;;  %v3559_v62 = vpop.f32.mrf.mxu1  ;;  %4581 = vmatmul.mubr.f32.gmra.mxu0 %v19361_v29  ;;  %v19666_v16 = vld [vmem:[#allocation40_spill] sm:$0xff] }
 0x32a   :  { %v16417_v44 = vadd.f32 %v3545_v18, %v3272_v9  ;;  %4779 = vmatpush1.msra.mxu0 %v19660_v1  ;;  %4898 = vmatpush1.msra.mxu1 %v16054_v57 }
 0x32b   :  { %4782 = vmatprep.subr.mxu0 %v19661_v13  ;;  %v16422_v48 = vpop.f32.mrf.mxu0  ;;  %v16424_v11 = vpop.f32.mrf.mxu1  ;;  %4900 = vmatprep.subr.mxu1 %v16100_v21 }
 0x32c   :  { %19662 = vst [vmem:[#allocation46_spill] sm:$0xff] %v16422_v48  ;;  %19663 = vst [vmem:[#allocation23_spill] sm:$0xff] %v16424_v11  ;;  %4785 = vmatpush1.msra.mxu0 %v19664_v33  ;;  %4902 = vmatpush1.msra.mxu1 %v16106_v19 }
 0x32d   :  { %4788 = vmatprep.subr.mxu0 %v19665_v20  ;;  %v3283_v18 = vpop.f32.mrf.mxu0  ;;  %v3566_v9 = vpop.f32.mrf.mxu1  ;;  %4842 = vmatprep.mubr.f32.mxu0 %v19361_v29  ;;  %v19684_v20 = vld [vmem:[#allocation70_spill] sm:$0xff] }
 0x32e   :  { %v16431_v31 = vadd.f32 %v3552_v38, %v3283_v18  ;;  %4791 = vmatpush1.msra.mxu0 %v19666_v16  ;;  %4904 = vmatprep.subr.mxu1 %v16148_v15 }
 0x32f   :  { %4794 = vmatprep.subr.mxu0 %v16095_v34  ;;  %v16436_v48 = vpop.f32.mrf.mxu0  ;;  %v16438_v11 = vpop.f32.mrf.mxu1  ;;  %4906 = vmatpush1.msra.mxu1 %v16159_v52  ;;  %v19678_v34 = vld [vmem:[#allocation32_spill] sm:$0xff] }
 0x330   :  { %19667 = vst [vmem:[#allocation90_spill] sm:$0xff] %v16436_v48  ;;  %19668 = vst [vmem:[#allocation33_spill] sm:$0xff] %v16438_v11  ;;  %4797 = vmatpush1.msra.mxu0 %v16098_v63  ;;  %5102 = vmatprep.subr.mxu1 %v15718_v55  ;;  %v19672_v63 = vld [vmem:[#allocation16_spill] sm:$0xff] }
 0x331   :  { %4800 = vmatprep.subr.mxu0 %v16146_v42  ;;  %v3294_v38 = vpop.f32.mrf.mxu0  ;;  %v3573_v18 = vpop.f32.mrf.mxu1  ;;  %4943 = vmatmul.mubr.f32.vlgmr.msra.gmra.mxu1 %v19361_v29 }
 0x332   :  { %v16445_v16 = vadd.f32 %v3559_v62, %v3294_v38  ;;  %4803 = vmatpush1.msra.mxu0 %v16157_v6  ;;  %5104 = vmatpush1.msra.mxu1 %v15879_v7  ;;  %v19671_v62 = vld [vmem:[#allocation37_spill] sm:$0xff] }
 0x333   :  { %4806 = vmatprep.subr.mxu0 %v16183_v25  ;;  %v16450_v48 = vpop.f32.mrf.mxu0  ;;  %v16452_v11 = vpop.f32.mrf.mxu1  ;;  %5106 = vmatprep.subr.mxu1 %v15881_v41 }
 0x334   :  { %19669 = vst [vmem:[#allocation64_spill] sm:$0xff] %v16450_v48  ;;  %19670 = vst [vmem:[#allocation24_spill] sm:$0xff] %v16452_v11  ;;  %4809 = vmatpush1.msra.mxu0 %v16195_v8  ;;  %5108 = vmatpush1.msra.mxu1 %v15902_v27  ;;  %v19673_v48 = vld [vmem:[#allocation42_spill] sm:$0xff]  ;;  %v19676_v8 = vld [vmem:[#allocation71_spill] sm:$0xff] }
 0x335   :  { %4845 = vmatmul.mubr.f32.vlgmr.msra.gmra.mxu0 %v19361_v29  ;;  %4977 = vmatprep.subr.mxu0 %v19671_v62  ;;  %v3305_v38 = vpop.f32.mrf.mxu0  ;;  %v3580_v6 = vpop.f32.mrf.mxu1 }
 0x336   :  { %v16459_v42 = vadd.f32 %v3566_v9, %v3305_v38  ;;  %4981 = vmatpush1.msra.mxu0 %v19672_v63  ;;  %4850 = vmatprep.mubr.f32.mxu0 %v19361_v29  ;;  %v19677_v9 = vld [vmem:[#allocation75_spill] sm:$0xff] }
 0x337   :  { %4985 = vmatprep.subr.mxu0 %v19673_v48  ;;  %v16464_v11 = vpop.f32.mrf.mxu0  ;;  %v16466_v25 = vpop.f32.mrf.mxu1  ;;  %4948 = vmatprep.mubr.f32.mxu1 %v19361_v29  ;;  %v19682_v48 = vld [vmem:[#allocation48_spill] sm:$0xff] }
 0x338   :  { %19674 = vst [vmem:[#allocation100_spill] sm:$0xff] %v16464_v11  ;;  %19675 = vst [vmem:[#allocation101_spill] sm:$0xff] %v16466_v25  ;;  %4989 = vmatpush1.msra.mxu0 %v19676_v8  ;;  %5110 = vmatprep.subr.mxu1 %v15908_v30  ;;  %v19679_v11 = vld [vmem:[#allocation84_spill] sm:$0xff] }
 0x339   :  { %4853 = vmatmul.mubr.f32.gmra.mxu0 %v19361_v29  ;;  %4993 = vmatprep.subr.mxu0 %v19677_v9  ;;  %v3316_v38 = vpop.f32.mrf.mxu0  ;;  %v3587_v63 = vpop.f32.mrf.mxu1  ;;  %v19683_v9 = vld [vmem:[#allocation61_spill] sm:$0xff] }
 0x33a   :  { %v16473_v62 = vadd.f32 %v3573_v18, %v3316_v38  ;;  %4997 = vmatpush1.msra.mxu0 %v19678_v34  ;;  %4952 = vmatmul.mubr.f32.gmra.mxu1 %v19361_v29 }
 0x33b   :  { %5001 = vmatprep.subr.mxu0 %v19679_v11  ;;  %5112 = vmatpush1.msra.mxu1 %v15940_v28  ;;  %v16479_v25 = vpop.f32.mrf.mxu0  ;;  %v16481_v8 = vpop.f32.mrf.mxu1 }
 0x33c   :  { %19680 = vst [vmem:[#allocation102_spill] sm:$0xff] %v16479_v25  ;;  %19681 = vst [vmem:[#allocation103_spill] sm:$0xff] %v16481_v8  ;;  %5005 = vmatpush1.msra.mxu0 %v19682_v48  ;;  %5114 = vmatprep.subr.mxu1 %v15951_v39 }
 0x33d   :  { %5009 = vmatprep.subr.mxu0 %v19683_v9  ;;  %5116 = vmatpush1.msra.mxu1 %v15956_v58  ;;  %v3327_v18 = vpop.f32.mrf.mxu0  ;;  %v3594_v38 = vpop.f32.mrf.mxu1  ;;  %v19701_v9 = vld [vmem:[#allocation95_spill] sm:$0xff] }
 0x33e   :  { %v16487_v34 = vadd.f32 %v3580_v6, %v3327_v18  ;;  %5013 = vmatpush1.msra.mxu0 %v19684_v20  ;;  %5118 = vmatprep.subr.mxu1 %v15991_v5 }
 0x33f   :  { %5017 = vmatprep.subr.mxu0 %v16140_v36  ;;  %5120 = vmatpush1.msra.mxu1 %v15999_v60  ;;  %v16493_v25 = vpop.f32.mrf.mxu0  ;;  %v16495_v8 = vpop.f32.mrf.mxu1 }
 0x340   :  { %19685 = vst [vmem:[#allocation104_spill] sm:$0xff] %v16493_v25  ;;  %19686 = vst [vmem:[#allocation105_spill] sm:$0xff] %v16495_v8  ;;  %5021 = vmatpush1.msra.mxu0 %v16143_v23  ;;  %5122 = vmatprep.subr.mxu1 %v16052_v51  ;;  %v19692_v23 = vld [vmem:[#allocation83_spill] sm:$0xff] }
 0x341   :  { %5025 = vmatprep.subr.mxu0 %v16180_v43  ;;  %5124 = vmatpush1.msra.mxu1 %v16054_v57  ;;  %v3338_v6 = vpop.f32.mrf.mxu0  ;;  %v3601_v18 = vpop.f32.mrf.mxu1 }
 0x342   :  { %v16501_v20 = vadd.f32 %v3587_v63, %v3338_v6  ;;  %5029 = vmatpush1.msra.mxu0 %v16192_v50  ;;  %5126 = vmatprep.subr.mxu1 %v16100_v21 }
 0x343   :  { %5033 = vmatprep.subr.mxu0 %v16214_v53  ;;  %5128 = vmatpush1.msra.mxu1 %v16106_v19  ;;  %v16507_v25 = vpop.f32.mrf.mxu0  ;;  %v16509_v8 = vpop.f32.mrf.mxu1 }
 0x344   :  { %19687 = vst [vmem:[#allocation106_spill] sm:$0xff] %v16507_v25  ;;  %19688 = vst [vmem:[#allocation107_spill] sm:$0xff] %v16509_v8  ;;  %5037 = vmatpush1.msra.mxu0 %v16225_v4  ;;  %5070 = vmatprep.mubr.f32.mxu0 %v19361_v29  ;;  %v19691_v4 = vld [vmem:[#allocation41_spill] sm:$0xff] }
 0x345   :  { %5130 = vmatprep.subr.mxu1 %v16148_v15  ;;  %5072 = vmatmul.mubr.f32.vlgmr.msra.gmra.mxu0 %v19361_v29  ;;  %v3349_v63 = vpop.f32.mrf.mxu0  ;;  %v3608_v6 = vpop.f32.mrf.mxu1 }
 0x346   :  { %5132 = vmatpush1.msra.mxu1 %v16159_v52  ;;  %5165 = vmatprep.mubr.f32.mxu1 %v19361_v29  ;;  %v16517_v53 = vadd.f32 %v3594_v38, %v3349_v63  ;;  %v19693_v63 = vld [vmem:[#allocation25_spill] sm:$0xff] }
 0x347   :  { %5167 = vmatmul.mubr.f32.vlgmr.msra.gmra.mxu1 %v19361_v29  ;;  %v16520_v25 = vpop.f32.mrf.mxu0  ;;  %v16522_v8 = vpop.f32.mrf.mxu1  ;;  %5077 = vmatprep.mubr.f32.mxu0 %v19361_v29 }
 0x348   :  { %19689 = vst [vmem:[#allocation108_spill] sm:$0xff] %v16520_v25  ;;  %19690 = vst [vmem:[#allocation109_spill] sm:$0xff] %v16522_v8  ;;  %5172 = vmatprep.mubr.f32.mxu1 %v19361_v29  ;;  %5385 = vmatprep.subr.mxu1 %v19691_v4  ;;  %v19696_v4 = vld [vmem:[#allocation93_spill] sm:$0xff] }
 0x349   :  { %5079 = vmatmul.mubr.f32.gmra.mxu0 %v19361_v29  ;;  %v3360_v50 = vpop.f32.mrf.mxu0  ;;  %v3615_v43 = vpop.f32.mrf.mxu1  ;;  %5391 = vmatpush1.msra.mxu1 %v19692_v23 }
 0x34a   :  { %v16529_v38 = vadd.f32 %v3601_v18, %v3360_v50  ;;  %5397 = vmatprep.subr.mxu1 %v19693_v63  ;;  %5278 = vmatprep.subr.mxu0 %v15718_v55  ;;  %v19697_v50 = vld [vmem:[#allocation53_spill] sm:$0xff] }
 0x34b   :  { %5174 = vmatmul.mubr.f32.gmra.mxu1 %v19361_v29  ;;  %v16534_v25 = vpop.f32.mrf.mxu0  ;;  %v16536_v8 = vpop.f32.mrf.mxu1  ;;  %5280 = vmatpush1.msra.mxu0 %v15879_v7  ;;  %v19698_v63 = vld [vmem:[#allocation29_spill] sm:$0xff] }
 0x34c   :  { %19694 = vst [vmem:[#allocation110_spill] sm:$0xff] %v16534_v25  ;;  %19695 = vst [vmem:[#allocation111_spill] sm:$0xff] %v16536_v8  ;;  %5403 = vmatpush1.msra.mxu1 %v19696_v4  ;;  %5282 = vmatprep.subr.mxu0 %v15881_v41 }
 0x34d   :  { %v3371_v36 = vpop.f32.mrf.mxu0  ;;  %v3622_v23 = vpop.f32.mrf.mxu1  ;;  %5409 = vmatprep.subr.mxu1 %v19697_v50  ;;  %5284 = vmatpush1.msra.mxu0 %v15902_v27 }
 0x34e   :  { %v16543_v18 = vadd.f32 %v3608_v6, %v3371_v36  ;;  %5415 = vmatpush1.msra.mxu1 %v19698_v63  ;;  %5286 = vmatprep.subr.mxu0 %v15908_v30  ;;  %v19702_v36 = vld [vmem:[#allocation55_spill] sm:$0xff]  ;;  %v19703_v63 = vld [vmem:[#allocation73_spill] sm:$0xff] }
 0x34f   :  { %v16547_v25 = vpop.f32.mrf.mxu0  ;;  %v16549_v8 = vpop.f32.mrf.mxu1  ;;  %5421 = vmatprep.subr.mxu1 %v19701_v9  ;;  %5288 = vmatpush1.msra.mxu0 %v15940_v28  ;;  %v19706_v9 = vld [vmem:[#allocation31_spill] sm:$0xff] }
 0x350   :  { %19699 = vst [vmem:[#allocation112_spill] sm:$0xff] %v16547_v25  ;;  %19700 = vst [vmem:[#allocation113_spill] sm:$0xff] %v16549_v8  ;;  %5427 = vmatpush1.msra.mxu1 %v16128_v12  ;;  %5290 = vmatprep.subr.mxu0 %v15951_v39 }
 0x351   :  { %v3382_v50 = vpop.f32.mrf.mxu0  ;;  %v3629_v4 = vpop.f32.mrf.mxu1  ;;  %5433 = vmatprep.subr.mxu1 %v19702_v36  ;;  %5292 = vmatpush1.msra.mxu0 %v15956_v58 }
 0x352   :  { %v16557_v6 = vadd.f32 %v3615_v43, %v3382_v50  ;;  %5439 = vmatpush1.msra.mxu1 %v19703_v63  ;;  %5294 = vmatprep.subr.mxu0 %v15991_v5 }
 0x353   :  { %v16561_v25 = vpop.f32.mrf.mxu0  ;;  %v16563_v8 = vpop.f32.mrf.mxu1  ;;  %5445 = vmatprep.subr.mxu1 %v19706_v9  ;;  %5508 = vmatprep.mubr.f32.mxu1 %v19361_v29 }
 0x354   :  { %19704 = vst [vmem:[#allocation114_spill] sm:$0xff] %v16561_v25  ;;  %19705 = vst [vmem:[#allocation115_spill] sm:$0xff] %v16563_v8  ;;  %5451 = vmatpush1.msra.mxu1 %v16209_v45  ;;  %5296 = vmatpush1.msra.mxu0 %v15999_v60 }
 0x355   :  { %v3393_v36 = vpop.f32.mrf.mxu0  ;;  %v3636_v12 = vpop.f32.mrf.mxu1  ;;  %5457 = vmatprep.subr.mxu1 %v16237_v40  ;;  %5298 = vmatprep.subr.mxu0 %v16052_v51 }
 0x356   :  { %v16571_v43 = vadd.f32 %v3622_v23, %v3393_v36  ;;  %5463 = vmatpush1.msra.mxu1 %v16246_v59  ;;  %5300 = vmatpush1.msra.mxu0 %v16054_v57 }
 0x357   :  { %v16575_v50 = vpop.f32.mrf.mxu0  ;;  %v16577_v25 = vpop.f32.mrf.mxu1  ;;  %5469 = vmatprep.subr.mxu1 %v16259_v0  ;;  %5302 = vmatprep.subr.mxu0 %v16100_v21 }
 0x358   :  { %19707 = vst [vmem:[#allocation116_spill] sm:$0xff] %v16575_v50  ;;  %5475 = vmatpush1.msra.mxu1 %v16266_v54  ;;  %5304 = vmatpush1.msra.mxu0 %v16106_v19 }
 0x359   :  { %v3404_v8 = vpop.f32.mrf.mxu0  ;;  %v3643_v40 = vpop.f32.mrf.mxu1  ;;  %5653 = vmatprep.subr.mxu1 %v15718_v55  ;;  %5306 = vmatprep.subr.mxu0 %v16148_v15 }
 0x35a   :  { %v16585_v23 = vadd.f32 %v3629_v4, %v3404_v8  ;;  %5308 = vmatpush1.msra.mxu0 %v16159_v52  ;;  %5341 = vmatprep.mubr.f32.mxu0 %v19361_v29 }
 0x35b   :  { %v16589_v36 = vpop.f32.mrf.mxu0  ;;  %v16591_v50 = vpop.f32.mrf.mxu1  ;;  %5541 = vmatprep.subr.mxu0 %v15732_v22 }
 0x35c   :  { %19708 = vst [vmem:[#allocation117_spill] sm:$0xff] %v16589_v36 }
 0x35d   :  { %v3415_v54 = vpop.f32.mrf.mxu0  ;;  %v3934_v0 = vpop.f32.mrf.mxu1 }
 0x35e   :  { %v16594_v59 = vadd.f32 %v3636_v12, %v3415_v54 }
 0x35f   :  { %v16596_v45 = vpop.f32.mrf.mxu0  ;;  %v16598_v9 = vpop.f32.mrf.mxu1 }
 0x360   :  { %19709 = vst [vmem:[#allocation118_spill] sm:$0xff] %v16598_v9 }
 0x361   :  { %v3426_v8 = vpop.f32.mrf.mxu0  ;;  %v3943_v4 = vpop.f32.mrf.mxu1 }
 0x362   :  { %v16600_v63 = vadd.f32 %v3643_v40, %v3426_v8 }
 0x363   :  { %v16602_v48 = vpop.f32.mrf.mxu0  ;;  %v16604_v11 = vpop.f32.mrf.mxu1 }
 0x364   :  { %19710 = vst [vmem:[#allocation119_spill] sm:$0xff] %v16604_v11 }
 0x365   :  { %v3732_v36 = vpop.f32.mrf.mxu0  ;;  %v3952_v55 = vpop.f32.mrf.mxu1 }
 0x366   :  { %v3733_v22 = vadd.f32 %v3732_v36, %v16403_v24 }
 0x367   :  { %v16607_v52 = vpop.f32.mrf.mxu0  ;;  %v16609_v12 = vpop.f32.mrf.mxu1 }
 0x368   :  { %19711 = vst [vmem:[#allocation120_spill] sm:$0xff] %v16607_v52  ;;  %19712 = vst [vmem:[#allocation121_spill] sm:$0xff] %v16609_v12  ;;  %v16611_v54 = vadd.f32 %v3934_v0, %v3733_v22 }
 0x369   :  { %v3740_v33 = vpop.f32.mrf.mxu0  ;;  %v3961_v9 = vpop.f32.mrf.mxu1 }
 0x36a   :  { %v3741_v15 = vadd.f32 %v3740_v33, %v16417_v44 }
 0x36b   :  { %v16614_v40 = vpop.f32.mrf.mxu0  ;;  %v16616_v8 = vpop.f32.mrf.mxu1 }
 0x36c   :  { %19713 = vst [vmem:[#allocation122_spill] sm:$0xff] %v16614_v40  ;;  %19714 = vst [vmem:[#allocation123_spill] sm:$0xff] %v16616_v8  ;;  %v16618_v13 = vadd.f32 %v3943_v4, %v3741_v15 }
 0x36d   :  { %v3748_v11 = vpop.f32.mrf.mxu0  ;;  %v3970_v19 = vpop.f32.mrf.mxu1 }
 0x36e   :  { %v3749_v24 = vadd.f32 %v3748_v11, %v16431_v31 }
 0x36f   :  { %v16621_v36 = vpop.f32.mrf.mxu0  ;;  %v16623_v52 = vpop.f32.mrf.mxu1 }
 0x370   :  { %19715 = vst [vmem:[#allocation124_spill] sm:$0xff] %v16621_v36  ;;  %19716 = vst [vmem:[#allocation125_spill] sm:$0xff] %v16623_v52  ;;  %v16625_v22 = vadd.f32 %v3952_v55, %v3749_v24 }
 0x371   :  { %v3756_v0 = vpop.f32.mrf.mxu0  ;;  %v3979_v12 = vpop.f32.mrf.mxu1 }
 0x372   :  { %v3757_v44 = vadd.f32 %v3756_v0, %v16445_v16 }
 0x373   :  { %v16628_v33 = vpop.f32.mrf.mxu0  ;;  %v16630_v40 = vpop.f32.mrf.mxu1 }
 0x374   :  { %19717 = vst [vmem:[#allocation126_spill] sm:$0xff] %v16628_v33  ;;  %19718 = vst [vmem:[#allocation127_spill] sm:$0xff] %v16630_v40  ;;  %v16632_v15 = vadd.f32 %v3961_v9, %v3757_v44 }
 0x375   :  { %v3764_v4 = vpop.f32.mrf.mxu0  ;;  %v3988_v8 = vpop.f32.mrf.mxu1 }
 0x376   :  { %v3765_v31 = vadd.f32 %v3764_v4, %v16459_v42 }
 0x377   :  { %v16635_v11 = vpop.f32.mrf.mxu0  ;;  %v16637_v36 = vpop.f32.mrf.mxu1 }
 0x378   :  { %19719 = vst [vmem:[#allocation128_spill] sm:$0xff] %v16635_v11  ;;  %19720 = vst [vmem:[#allocation129_spill] sm:$0xff] %v16637_v36  ;;  %v16639_v55 = vadd.f32 %v3970_v19, %v3765_v31 }
 0x379   :  { %v3772_v24 = vpop.f32.mrf.mxu0  ;;  %v3997_v52 = vpop.f32.mrf.mxu1 }
 0x37a   :  { %v3773_v16 = vadd.f32 %v3772_v24, %v16473_v62 }
 0x37b   :  { %v16642_v0 = vpop.f32.mrf.mxu0  ;;  %v16644_v33 = vpop.f32.mrf.mxu1 }
 0x37c   :  { %19721 = vst [vmem:[#allocation130_spill] sm:$0xff] %v16642_v0  ;;  %19722 = vst [vmem:[#allocation131_spill] sm:$0xff] %v16644_v33  ;;  %v16646_v9 = vadd.f32 %v3979_v12, %v3773_v16 }
 0x37d   :  { %v3780_v44 = vpop.f32.mrf.mxu0  ;;  %v4006_v40 = vpop.f32.mrf.mxu1 }
 0x37e   :  { %v3781_v42 = vadd.f32 %v3780_v44, %v16487_v34 }
 0x37f   :  { %v16649_v4 = vpop.f32.mrf.mxu0  ;;  %v16651_v11 = vpop.f32.mrf.mxu1 }
 0x380   :  { %19723 = vst [vmem:[#allocation132_spill] sm:$0xff] %v16649_v4  ;;  %19724 = vst [vmem:[#allocation133_spill] sm:$0xff] %v16651_v11  ;;  %v16653_v19 = vadd.f32 %v3988_v8, %v3781_v42 }
 0x381   :  { %v3788_v31 = vpop.f32.mrf.mxu0  ;;  %v4015_v36 = vpop.f32.mrf.mxu1 }
 0x382   :  { %v3789_v62 = vadd.f32 %v3788_v31, %v16501_v20 }
 0x383   :  { %v16656_v24 = vpop.f32.mrf.mxu0  ;;  %v16658_v0 = vpop.f32.mrf.mxu1 }
 0x384   :  { %19725 = vst [vmem:[#allocation134_spill] sm:$0xff] %v16656_v24  ;;  %19726 = vst [vmem:[#allocation135_spill] sm:$0xff] %v16658_v0  ;;  %v16660_v12 = vadd.f32 %v3997_v52, %v3789_v62 }
 0x385   :  { %v3796_v16 = vpop.f32.mrf.mxu0  ;;  %v4024_v33 = vpop.f32.mrf.mxu1 }
 0x386   :  { %v3797_v34 = vadd.f32 %v3796_v16, %v16517_v53 }
 0x387   :  { %v16663_v44 = vpop.f32.mrf.mxu0  ;;  %v16665_v4 = vpop.f32.mrf.mxu1 }
 0x388   :  { %19727 = vst [vmem:[#allocation136_spill] sm:$0xff] %v16663_v44  ;;  %19728 = vst [vmem:[#allocation137_spill] sm:$0xff] %v16665_v4  ;;  %v16667_v8 = vadd.f32 %v4006_v40, %v3797_v34 }
 0x389   :  { %v3804_v42 = vpop.f32.mrf.mxu0  ;;  %v4033_v11 = vpop.f32.mrf.mxu1 }
 0x38a   :  { %v3805_v20 = vadd.f32 %v3804_v42, %v16529_v38 }
 0x38b   :  { %v16670_v31 = vpop.f32.mrf.mxu0  ;;  %v16672_v24 = vpop.f32.mrf.mxu1 }
 0x38c   :  { %19729 = vst [vmem:[#allocation138_spill] sm:$0xff] %v16670_v31  ;;  %19730 = vst [vmem:[#allocation139_spill] sm:$0xff] %v16672_v24  ;;  %v16674_v52 = vadd.f32 %v4015_v36, %v3805_v20 }
 0x38d   :  { %v3812_v62 = vpop.f32.mrf.mxu0  ;;  %v4042_v0 = vpop.f32.mrf.mxu1 }
 0x38e   :  { %v3813_v53 = vadd.f32 %v3812_v62, %v16543_v18 }
 0x38f   :  { %v16677_v16 = vpop.f32.mrf.mxu0  ;;  %v16679_v44 = vpop.f32.mrf.mxu1 }
 0x390   :  { %19731 = vst [vmem:[#allocation140_spill] sm:$0xff] %v16677_v16  ;;  %19732 = vst [vmem:[#allocation141_spill] sm:$0xff] %v16679_v44  ;;  %v16681_v40 = vadd.f32 %v4024_v33, %v3813_v53 }
 0x391   :  { %v3820_v34 = vpop.f32.mrf.mxu0  ;;  %v4051_v4 = vpop.f32.mrf.mxu1 }
 0x392   :  { %v3821_v38 = vadd.f32 %v3820_v34, %v16557_v6 }
 0x393   :  { %v16684_v42 = vpop.f32.mrf.mxu0  ;;  %v16686_v31 = vpop.f32.mrf.mxu1 }
 0x394   :  { %19733 = vst [vmem:[#allocation142_spill] sm:$0xff] %v16684_v42  ;;  %19734 = vst [vmem:[#allocation143_spill] sm:$0xff] %v16686_v31  ;;  %v16688_v36 = vadd.f32 %v4033_v11, %v3821_v38 }
 0x395   :  { %v3828_v20 = vpop.f32.mrf.mxu0  ;;  %v4060_v24 = vpop.f32.mrf.mxu1 }
 0x396   :  { %v3829_v18 = vadd.f32 %v3828_v20, %v16571_v43 }
 0x397   :  { %v16691_v62 = vpop.f32.mrf.mxu0  ;;  %v16693_v16 = vpop.f32.mrf.mxu1 }
 0x398   :  { %19735 = vst [vmem:[#allocation144_spill] sm:$0xff] %v16691_v62  ;;  %v16695_v33 = vadd.f32 %v4042_v0, %v3829_v18 }
 0x399   :  { %v3836_v53 = vpop.f32.mrf.mxu0  ;;  %v4069_v44 = vpop.f32.mrf.mxu1 }
 0x39a   :  { %v3837_v6 = vadd.f32 %v3836_v53, %v16585_v23 }
 0x39b   :  { %v16698_v34 = vpop.f32.mrf.mxu0  ;;  %v16700_v42 = vpop.f32.mrf.mxu1 }
 0x39c   :  { %19736 = vst [vmem:[#allocation145_spill] sm:$0xff] %v16698_v34  ;;  %v16702_v11 = vadd.f32 %v4051_v4, %v3837_v6 }
 0x39d   :  { %v3844_v38 = vpop.f32.mrf.mxu0  ;;  %v4350_v31 = vpop.f32.mrf.mxu1 }
 0x39e   :  { %v3845_v43 = vadd.f32 %v3844_v38, %v16594_v59 }
 0x39f   :  { %v16705_v20 = vpop.f32.mrf.mxu0  ;;  %v16707_v62 = vpop.f32.mrf.mxu1 }
 0x3a0   :  { %19737 = vst [vmem:[#allocation146_spill] sm:$0xff] %v16707_v62  ;;  %v16709_v0 = vadd.f32 %v4060_v24, %v3845_v43 }
 0x3a1   :  { %v3852_v18 = vpop.f32.mrf.mxu0  ;;  %v4357_v1 = vpop.f32.mrf.mxu1 }
 0x3a2   :  { %v3853_v23 = vadd.f32 %v3852_v18, %v16600_v63 }
 0x3a3   :  { %v16712_v53 = vpop.f32.mrf.mxu0  ;;  %v16714_v34 = vpop.f32.mrf.mxu1 }
 0x3a4   :  { %19738 = vst [vmem:[#allocation147_spill] sm:$0xff] %v16714_v34  ;;  %v16716_v4 = vadd.f32 %v4069_v44, %v3853_v23 }
 0x3a5   :  { %v4165_v6 = vpop.f32.mrf.mxu0  ;;  %v4364_v21 = vpop.f32.mrf.mxu1 }
 0x3a6   :  { %v4166_v59 = vadd.f32 %v4165_v6, %v16611_v54 }
 0x3a7   :  { %v16719_v38 = vpop.f32.mrf.mxu0  ;;  %v16721_v3 = vpop.f32.mrf.mxu1 }
 0x3a8   :  { %19739 = vst [vmem:[#allocation148_spill] sm:$0xff] %v16719_v38  ;;  %19740 = vst [vmem:[#allocation149_spill] sm:$0xff] %v16721_v3  ;;  %v4351_v24 = vadd.f32 %v4350_v31, %v4166_v59 }
 0x3a9   :  { %v4172_v43 = vpop.f32.mrf.mxu0  ;;  %v4371_v62 = vpop.f32.mrf.mxu1 }
 0x3aa   :  { %v16724_v57 = vadd.f32 %v4351_v24, %v16383_v14  ;;  %v4173_v63 = vadd.f32 %v4172_v43, %v16618_v13 }
 0x3ab   :  { %v16727_v18 = vpop.f32.mrf.mxu0  ;;  %v16729_v44 = vpop.f32.mrf.mxu1 }
 0x3ac   :  { %19741 = vst [vmem:[#allocation150_spill] sm:$0xff] %v16724_v57  ;;  %19742 = vst [vmem:[#allocation151_spill] sm:$0xff] %v16727_v18  ;;  %v4358_v23 = vadd.f32 %v4357_v1, %v4173_v63 }
 0x3ad   :  { %19743 = vst [vmem:[#allocation152_spill] sm:$0xff] %v16729_v44  ;;  %v4179_v34 = vpop.f32.mrf.mxu0  ;;  %v4378_v35 = vpop.f32.mrf.mxu1 }
 0x3ae   :  { %v16732_v54 = vadd.f32 %v4358_v23, %v16397_v46  ;;  %v4180_v6 = vadd.f32 %v4179_v34, %v16625_v22 }
 0x3af   :  { %v16735_v31 = vpop.f32.mrf.mxu0  ;;  %v16737_v59 = vpop.f32.mrf.mxu1 }
 0x3b0   :  { %19744 = vst [vmem:[#allocation153_spill] sm:$0xff] %v16732_v54  ;;  %19745 = vst [vmem:[#allocation154_spill] sm:$0xff] %v16735_v31  ;;  %v4365_v14 = vadd.f32 %v4364_v21, %v4180_v6 }
 0x3b1   :  { %19746 = vst [vmem:[#allocation155_spill] sm:$0xff] %v16737_v59  ;;  %v4186_v24 = vpop.f32.mrf.mxu0  ;;  %v4385_v57 = vpop.f32.mrf.mxu1 }
 0x3b2   :  { %v16740_v13 = vadd.f32 %v4365_v14, %v16355_v61  ;;  %v4187_v43 = vadd.f32 %v4186_v24, %v16632_v15 }
 0x3b3   :  { %v16743_v1 = vpop.f32.mrf.mxu0  ;;  %v16745_v63 = vpop.f32.mrf.mxu1 }
 0x3b4   :  { %19747 = vst [vmem:[#allocation156_spill] sm:$0xff] %v16740_v13  ;;  %19748 = vst [vmem:[#allocation157_spill] sm:$0xff] %v16743_v1  ;;  %v4372_v46 = vadd.f32 %v4371_v62, %v4187_v43 }
 0x3b5   :  { %19749 = vst [vmem:[#allocation158_spill] sm:$0xff] %v16745_v63  ;;  %v4193_v23 = vpop.f32.mrf.mxu0  ;;  %v4392_v54 = vpop.f32.mrf.mxu1 }
 0x3b6   :  { %v16748_v22 = vadd.f32 %v4372_v46, %v16367_v2  ;;  %v4194_v34 = vadd.f32 %v4193_v23, %v16639_v55 }
 0x3b7   :  { %v16751_v21 = vpop.f32.mrf.mxu0  ;;  %v16753_v6 = vpop.f32.mrf.mxu1 }
 0x3b8   :  { %19750 = vst [vmem:[#allocation159_spill] sm:$0xff] %v16748_v22  ;;  %19751 = vst [vmem:[#allocation160_spill] sm:$0xff] %v16751_v21  ;;  %v4379_v61 = vadd.f32 %v4378_v35, %v4194_v34  ;;  %v19776_v21 = vld [vmem:[#allocation26_spill] sm:$0xff] }
 0x3b9   :  { %19752 = vst [vmem:[#allocation161_spill] sm:$0xff] %v16753_v6  ;;  %v4200_v14 = vpop.f32.mrf.mxu0  ;;  %v4399_v18 = vpop.f32.mrf.mxu1 }
 0x3ba   :  { %v16756_v15 = vadd.f32 %v4379_v61, %v16333_v32  ;;  %v4201_v24 = vadd.f32 %v4200_v14, %v16646_v9 }
 0x3bb   :  { %v16759_v62 = vpop.f32.mrf.mxu0  ;;  %v16761_v43 = vpop.f32.mrf.mxu1 }
 0x3bc   :  { %19753 = vst [vmem:[#allocation162_spill] sm:$0xff] %v16756_v15  ;;  %19754 = vst [vmem:[#allocation163_spill] sm:$0xff] %v16759_v62  ;;  %v4386_v2 = vadd.f32 %v4385_v57, %v4201_v24 }
 0x3bd   :  { %19755 = vst [vmem:[#allocation164_spill] sm:$0xff] %v16761_v43  ;;  %v4207_v46 = vpop.f32.mrf.mxu0  ;;  %v4406_v38 = vpop.f32.mrf.mxu1 }
 0x3be   :  { %v16764_v55 = vadd.f32 %v4386_v2, %v16343_v37  ;;  %v4208_v23 = vadd.f32 %v4207_v46, %v16653_v19 }
 0x3bf   :  { %v16767_v35 = vpop.f32.mrf.mxu0  ;;  %v16769_v34 = vpop.f32.mrf.mxu1 }
 0x3c0   :  { %19756 = vst [vmem:[#allocation165_spill] sm:$0xff] %v16764_v55  ;;  %19757 = vst [vmem:[#allocation166_spill] sm:$0xff] %v16767_v35  ;;  %v4393_v32 = vadd.f32 %v4392_v54, %v4208_v23 }
 0x3c1   :  { %19758 = vst [vmem:[#allocation167_spill] sm:$0xff] %v16769_v34  ;;  %v4214_v61 = vpop.f32.mrf.mxu0  ;;  %v4413_v22 = vpop.f32.mrf.mxu1  ;;  %v19814_v34 = vld [vmem:[#allocation88_spill] sm:$0xff] }
 0x3c2   :  { %v16772_v9 = vadd.f32 %v4393_v32, %v16313_v56  ;;  %v4215_v14 = vadd.f32 %v4214_v61, %v16660_v12 }
 0x3c3   :  { %v16775_v57 = vpop.f32.mrf.mxu0  ;;  %v16777_v24 = vpop.f32.mrf.mxu1 }
 0x3c4   :  { %19759 = vst [vmem:[#allocation168_spill] sm:$0xff] %v16772_v9  ;;  %19760 = vst [vmem:[#allocation169_spill] sm:$0xff] %v16775_v57  ;;  %v4400_v37 = vadd.f32 %v4399_v18, %v4215_v14 }
 0x3c5   :  { %19761 = vst [vmem:[#allocation170_spill] sm:$0xff] %v16777_v24  ;;  %v4221_v2 = vpop.f32.mrf.mxu0  ;;  %v4420_v13 = vpop.f32.mrf.mxu1 }
 0x3c6   :  { %v16780_v19 = vadd.f32 %v4400_v37, %v16323_v10  ;;  %v4222_v46 = vadd.f32 %v4221_v2, %v16667_v8 }
 0x3c7   :  { %v16783_v54 = vpop.f32.mrf.mxu0  ;;  %v16785_v23 = vpop.f32.mrf.mxu1 }
 0x3c8   :  { %19762 = vst [vmem:[#allocation171_spill] sm:$0xff] %v16780_v19  ;;  %19763 = vst [vmem:[#allocation172_spill] sm:$0xff] %v16783_v54  ;;  %v4407_v56 = vadd.f32 %v4406_v38, %v4222_v46  ;;  %v19815_v54 = vld [vmem:[#allocation83_spill] sm:$0xff] }
 0x3c9   :  { %19764 = vst [vmem:[#allocation173_spill] sm:$0xff] %v16785_v23  ;;  %v4228_v32 = vpop.f32.mrf.mxu0  ;;  %v4427_v44 = vpop.f32.mrf.mxu1  ;;  %v19820_v23 = vld [vmem:[#allocation53_spill] sm:$0xff] }
 0x3ca   :  { %v16788_v12 = vadd.f32 %v4407_v56, %v16291_v17  ;;  %v4229_v61 = vadd.f32 %v4228_v32, %v16674_v52  ;;  %v19770_v52 = vld [vmem:[#allocation28_spill] sm:$0xff] }
 0x3cb   :  { %v16791_v18 = vpop.f32.mrf.mxu0  ;;  %v16793_v14 = vpop.f32.mrf.mxu1 }
 0x3cc   :  { %19765 = vst [vmem:[#allocation174_spill] sm:$0xff] %v16788_v12  ;;  %19766 = vst [vmem:[#allocation175_spill] sm:$0xff] %v16791_v18  ;;  %v4414_v10 = vadd.f32 %v4413_v22, %v4229_v61 }
 0x3cd   :  { %19767 = vst [vmem:[#allocation176_spill] sm:$0xff] %v16793_v14  ;;  %v4235_v37 = vpop.f32.mrf.mxu0  ;;  %v4434_v1 = vpop.f32.mrf.mxu1  ;;  %v19818_v14 = vld [vmem:[#allocation15_spill] sm:$0xff] }
 0x3ce   :  { %v16796_v8 = vadd.f32 %v4414_v10, %v16303_v47  ;;  %v4236_v2 = vadd.f32 %v4235_v37, %v16681_v40  ;;  %v19773_v40 = vld [vmem:[#allocation51_spill] sm:$0xff] }
 0x3cf   :  { %v16799_v38 = vpop.f32.mrf.mxu0  ;;  %v16801_v46 = vpop.f32.mrf.mxu1 }
 0x3d0   :  { %19768 = vst [vmem:[#allocation177_spill] sm:$0xff] %v16796_v8  ;;  %19769 = vst [vmem:[#allocation178_spill] sm:$0xff] %v16799_v38  ;;  %v4421_v17 = vadd.f32 %v4420_v13, %v4236_v2  ;;  %v19821_v38 = vld [vmem:[#allocation29_spill] sm:$0xff] }
 0x3d1   :  { %v4242_v56 = vpop.f32.mrf.mxu0  ;;  %v4441_v3 = vpop.f32.mrf.mxu1 }
 0x3d2   :  { %v16804_v32 = vadd.f32 %v4421_v17, %v19770_v52  ;;  %v4243_v31 = vadd.f32 %v4242_v56, %v16688_v36  ;;  %v19775_v52 = vld [vmem:[#allocation22_spill] sm:$0xff] }
 0x3d3   :  { %v16807_v22 = vpop.f32.mrf.mxu0  ;;  %v16809_v61 = vpop.f32.mrf.mxu1 }
 0x3d4   :  { %19771 = vst [vmem:[#allocation28_spill] sm:$0xff] %v16804_v32  ;;  %19772 = vst [vmem:[#allocation179_spill] sm:$0xff] %v16807_v22  ;;  %v4428_v47 = vadd.f32 %v4427_v44, %v4243_v31  ;;  %v19817_v32 = vld [vmem:[#allocation25_spill] sm:$0xff] }
 0x3d5   :  { %v4249_v10 = vpop.f32.mrf.mxu0  ;;  %v4448_v55 = vpop.f32.mrf.mxu1  ;;  %v19819_v22 = vld [vmem:[#allocation93_spill] sm:$0xff] }
 0x3d6   :  { %v16812_v37 = vadd.f32 %v4428_v47, %v19773_v40  ;;  %v4250_v15 = vadd.f32 %v4249_v10, %v16695_v33 }
 0x3d7   :  { %v16815_v13 = vpop.f32.mrf.mxu0  ;;  %v4450_v63 = vpop.f32.mrf.mxu1 }
 0x3d8   :  { %19774 = vst [vmem:[#allocation51_spill] sm:$0xff] %v16812_v37  ;;  %v4435_v2 = vadd.f32 %v4434_v1, %v4250_v15  ;;  %v19816_v37 = vld [vmem:[#allocation47_spill] sm:$0xff] }
 0x3d9   :  { %v4256_v17 = vpop.f32.mrf.mxu0  ;;  %v4455_v31 = vpop.f32.mrf.mxu1 }
 0x3da   :  { %v16818_v62 = vadd.f32 %v4435_v2, %v19775_v52  ;;  %v4257_v36 = vadd.f32 %v4256_v17, %v16702_v11  ;;  %v19777_v2 = vld [vmem:[#allocation78_spill] sm:$0xff] }
 0x3db   :  { %v16821_v56 = vpop.f32.mrf.mxu0  ;;  %v4457_v1 = vpop.f32.mrf.mxu1 }
 0x3dc   :  { %v4442_v44 = vadd.f32 %v4441_v3, %v4257_v36  ;;  %v19778_v36 = vld [vmem:[#allocation38_spill] sm:$0xff] }
 0x3dd   :  { %v4263_v59 = vpop.f32.mrf.mxu0  ;;  %v4734_v11 = vpop.f32.mrf.mxu1 }
 0x3de   :  { %v16824_v47 = vadd.f32 %v4442_v44, %v19776_v21  ;;  %v4264_v33 = vadd.f32 %v4263_v59, %v16709_v0 }
 0x3df   :  { %v4265_v10 = vpop.f32.mrf.mxu0  ;;  %v4736_v21 = vpop.f32.mrf.mxu1 }
 0x3e0   :  { %v4449_v40 = vadd.f32 %v4448_v55, %v4264_v33 }
 0x3e1   :  { %v4270_v15 = vpop.f32.mrf.mxu0 }
 0x3e2   :  { %v4271_v19 = vadd.f32 %v4270_v15, %v16716_v4  ;;  %v4476_v52 = vadd.f32 %v4449_v40, %v19777_v2 }
 0x3e3   :  { %v4272_v9 = vpop.f32.mrf.mxu0  ;;  %v4741_v35 = vpop.f32.mrf.mxu1 }
 0x3e4   :  { %v4456_v17 = vadd.f32 %v4455_v31, %v4271_v19  ;;  %v3639_v19 = vadd.f32 %v16577_v25, %v16596_v45 }
 0x3e5   :  { %v4571_v43 = vpop.f32.mrf.mxu0  ;;  %v4743_v59 = vpop.f32.mrf.mxu1 }
 0x3e6   :  { %v4735_v3 = vadd.f32 %v4734_v11, %v4571_v43  ;;  %v4478_v57 = vadd.f32 %v4456_v17, %v19778_v36  ;;  %v3847_v11 = vadd.f32 %v16705_v20, %v3639_v19 }
 0x3e7   :  { %v4573_v6 = vpop.f32.mrf.mxu0 }
 0x3e9   :  { %v4582_v44 = vpop.f32.mrf.mxu0 }
 0x3ea   :  { %v4742_v0 = vadd.f32 %v4741_v35, %v4582_v44  ;;  %v3646_v35 = vadd.f32 %v16591_v50, %v16602_v48  ;;  %v4063_v44 = vadd.f32 %v16693_v16, %v3847_v11  ;;  %v19779_v16 = vld [vmem:[#allocation87_spill] sm:$0xff] }
 0x3eb   :  { %v4584_v55 = vpop.f32.mrf.mxu0 }
 0x3ec   :  { %v3855_v36 = vadd.f32 %v16712_v53, %v3646_v35  ;;  %v4744_v25 = vadd.f32 %v4743_v59, %v4584_v55 }
 0x3f1   :  { %v4944_v33 = vpop.f32.mrf.mxu1 }
 0x3f3   :  { %v4946_v4 = vpop.f32.mrf.mxu1 }
 0x3f5   :  { %v4846_v8 = vpop.f32.mrf.mxu0 }
 0x3f6   :  { %v4847_v12 = vadd.f32 %v4846_v8, %v4735_v3  ;;  %v4737_v8 = vadd.f32 %v4736_v21, %v4573_v6  ;;  %v4266_v3 = vadd.f32 %v4265_v10, %v4063_v44  ;;  %v19780_v44 = vld [vmem:[#allocation97_spill] sm:$0xff] }
 0x3f7   :  { %v4848_v15 = vpop.f32.mrf.mxu0 }
 0x3f8   :  { %v4945_v40 = vadd.f32 %v4944_v33, %v4847_v12  ;;  %v4849_v24 = vadd.f32 %v4848_v15, %v4737_v8  ;;  %v4072_v12 = vadd.f32 %v16700_v42, %v3855_v36  ;;  %v4451_v45 = vadd.f32 %v4450_v63, %v4266_v3 }
 0x3f9   :  { %v4854_v31 = vpop.f32.mrf.mxu0 }
 0x3fa   :  { %v4855_v43 = vadd.f32 %v4854_v31, %v4742_v0  ;;  %v4953_v2 = vpop.f32.mrf.mxu1  ;;  %v4273_v0 = vadd.f32 %v4272_v9, %v4072_v12  ;;  %v4947_v20 = vadd.f32 %v4946_v4, %v4849_v24  ;;  %v4477_v6 = vadd.f32 %v4451_v45, %v19779_v16 }
 0x3fb   :  { %v4856_v33 = vpop.f32.mrf.mxu0 }
 0x3fc   :  { %v4954_v17 = vadd.f32 %v4953_v2, %v4855_v43  ;;  %v4955_v31 = vpop.f32.mrf.mxu1  ;;  %v4857_v19 = vadd.f32 %v4856_v33, %v4744_v25  ;;  %v4458_v35 = vadd.f32 %v4457_v1, %v4273_v0 }
 0x3fe   :  { %v4956_v15 = vadd.f32 %v4955_v31, %v4857_v19  ;;  %v4479_v8 = vadd.f32 %v4458_v35, %v19780_v44 }
 0x405   :  { %v5073_v18 = vpop.f32.mrf.mxu0 }
 0x406   :  { %v5074_v43 = vadd.f32 %v5073_v18, %v4945_v40 }
 0x407   :  { %v5168_v2 = vpop.f32.mrf.mxu1  ;;  %v5075_v48 = vpop.f32.mrf.mxu0 }
 0x408   :  { %v5169_v50 = vadd.f32 %v5168_v2, %v5074_v43  ;;  %v5076_v53 = vadd.f32 %v5075_v48, %v4947_v20 }
 0x409   :  { %v5170_v10 = vpop.f32.mrf.mxu1  ;;  %v5080_v21 = vpop.f32.mrf.mxu0 }
 0x40a   :  { %v5180_v42 = vadd.f32 %v5169_v50, %v4476_v52  ;;  %v5171_v11 = vadd.f32 %v5170_v10, %v5076_v53  ;;  %v5081_v59 = vadd.f32 %v5080_v21, %v4954_v17 }
 0x40b   :  { %v5082_v63 = vpop.f32.mrf.mxu0  ;;  %v5175_v9 = vpop.f32.mrf.mxu1 }
 0x40c   :  { %v5181_v55 = vadd.f32 %v5171_v11, %v4477_v6  ;;  %v5083_v36 = vadd.f32 %v5082_v63, %v4956_v15  ;;  %v5176_v24 = vadd.f32 %v5175_v9, %v5081_v59  ;;  %v12165_v43 = vmul.f32 -1.442695, %v5180_v42 }
 0x40d   :  { %v5177_v4 = vpop.f32.mrf.mxu1 }
 0x40e   :  { %v12166_v18 = vmul.f32 -1.442695, %v5181_v55  ;;  %v5182_v40 = vadd.f32 %v5176_v24, %v4478_v57  ;;  %v5178_v3 = vadd.f32 %v5177_v4, %v5083_v36 }
 0x410   :  { %13086 = vpow2.f32 %v12166_v18  ;;  %v5183_v1 = vadd.f32 %v5178_v3, %v4479_v8  ;;  %v12167_v2 = vmul.f32 -1.442695, %v5182_v40 }
 0x412   :  { %v12168_v12 = vmul.f32 -1.442695, %v5183_v1 }
 0x414   :  { %13088 = vpow2.f32 %v12168_v12 }
 0x41d   :  { %v13087_v33 = vpop.eup %13086 }
 0x41e   :  { %v5197_v25 = vadd.f32 1.0, %v13087_v33 }
 0x420   :  { %13090 = vrcp.f32 %v5197_v25 }
 0x421   :  { %v13089_v52 = vpop.eup %13088 }
 0x422   :  { %v5199_v17 = vadd.f32 1.0, %v13089_v52 }
 0x424   :  { %13092 = vrcp.f32 %v5199_v17 }
 0x425   :  { %13094 = vpow2.f32 %v12165_v43  ;;  %v19782_v43 = vld [vmem:[#allocation45_spill] sm:$0xff] }
 0x426   :  { %13096 = vpow2.f32 %v12167_v2  ;;  %v19783_v2 = vld [vmem:[#allocation74_spill] sm:$0xff] }
 0x42d   :  { %v13091_v45 = vpop.eup %13090 }
 0x42e   :  { %v5208_v0 = vmul.f32 2.0, %v13091_v45 }
 0x430   :  { %v12169_v31 = vadd.f32 -1.0, %v5208_v0 }
 0x431   :  { %v13093_v20 = vpop.eup %13092 }
 0x432   :  { %5216 = vrot.lane.b32.xlu0 %v12169_v31, %s13401_s5  ;;  %v5209_v57 = vmul.f32 2.0, %v13093_v20  ;;  %v13095_v48 = vpop.eup %13094 }
 0x433   :  { %v5196_v50 = vadd.f32 1.0, %v13095_v48  ;;  %v13097_v53 = vpop.eup %13096  ;;  %v19784_v48 = vld [vmem:[#allocation86_spill] sm:$0xff] }
 0x434   :  { %v12170_v19 = vadd.f32 -1.0, %v5209_v57  ;;  %v5198_v35 = vadd.f32 1.0, %v13097_v53  ;;  %v19786_v53 = vld [vmem:[#allocation56_spill] sm:$0xff] }
 0x435   :  { %13098 = vrcp.f32 %v5196_v50  ;;  %v19785_v50 = vld [vmem:[#allocation21_spill] sm:$0xff] }
 0x436   :  { %5218 = vrot.lane.b32.xlu0 %v12170_v19, %s13401_s5  ;;  %13100 = vrcp.f32 %v5198_v35  ;;  %v19781_v19 = vld [vmem:[#allocation54_spill] sm:$0xff] }
 0x437   :  { %v19787_v35 = vld [vmem:[#allocation34_spill] sm:$0xff] }
 0x442   :  { %v13099_v16 = vpop.eup %13098 }
 0x443   :  { %v13101_v21 = vpop.eup %13100  ;;  %v5212_v42 = vmul.f32 0.0, %v13099_v16 }
 0x444   :  { %v5213_v9 = vmul.f32 0.0, %v13101_v21 }
 0x4a4   :  { %v5217_v6 = vpop.permute.xlu0 %5216 }
 0x4a5   :  { %v5222_v10 = vmul.f32 %v13099_v16, %v5217_v6  ;;  %v19788_v16 = vld [vmem:[#allocation57_spill] sm:$0xff]  ;;  %v19789_v6 = vld [vmem:[#allocation44_spill] sm:$0xff] }
 0x4a7   :  { %5226 = vrot.lane.b32.xlu1 %v5222_v10, %s13401_s5  ;;  %v19790_v10 = vld [vmem:[#allocation63_spill] sm:$0xff] }
 0x4a8   :  { %v5219_v15 = vpop.permute.xlu0 %5218 }
 0x4a9   :  { %v5223_v11 = vmul.f32 %v13101_v21, %v5219_v15  ;;  %v19791_v21 = vld [vmem:[#allocation36_spill] sm:$0xff]  ;;  %v19792_v15 = vld [vmem:[#allocation58_spill] sm:$0xff] }
 0x4ab   :  { %5228 = vrot.lane.b32.xlu1 %v5223_v11, %s13401_s5  ;;  %v19793_v11 = vld [vmem:[#allocation40_spill] sm:$0xff] }
 0x519   :  { %v5227_v59 = vpop.permute.xlu1 %5226 }
 0x51a   :  { %v16844_v63 = vadd.f32 %v5227_v59, %v5212_v42  ;;  %v19794_v42 = vld [vmem:[#allocation85_spill] sm:$0xff]  ;;  %v19795_v59 = vld [vmem:[#allocation94_spill] sm:$0xff] }
 0x51c   :  { %13102 = vtanh.f32 %v16844_v63 }
 0x51d   :  { %v5229_v55 = vpop.permute.xlu1 %5228 }
 0x51e   :  { %v16847_v36 = vadd.f32 %v5229_v55, %v5213_v9  ;;  %v19796_v9 = vld [vmem:[#allocation52_spill] sm:$0xff]  ;;  %v19797_v55 = vld [vmem:[#allocation30_spill] sm:$0xff] }
 0x520   :  { %13104 = vtanh.f32 %v16847_v36 }
 0x529   :  { %v13103_v24 = vpop.eup %13102 }
 0x52a   :  { %5238 = vrot.lane.b32.xlu0 %v13103_v24, %s13401_s5  ;;  %v19798_v24 = vld [vmem:[#allocation81_spill] sm:$0xff] }
 0x52d   :  { %v13105_v4 = vpop.eup %13104 }
 0x52e   :  { %5240 = vrot.lane.b32.xlu1 %v13105_v4, %s13401_s5  ;;  %v19799_v4 = vld [vmem:[#allocation50_spill] sm:$0xff] }
 0x59c   :  { %v5239_v18 = vpop.permute.xlu0 %5238 }
 0x59d   :  { %v5244_v40 = vmul.f32 %v13091_v45, %v5239_v18  ;;  %v19800_v18 = vld [vmem:[#allocation37_spill] sm:$0xff] }
 0x59f   :  { %5246 = vst.msk [vmem:[#allocation2] sm:$0xff] %vm1847_vm0, %v5244_v40  ;;  %v5256_v44 = vsel %vm4480_vm1, %v5244_v40, 0 }
 0x5a0   :  { %5249 = vst.msk [vmem:[#allocation2 + $0x70] sm:$0xff] %vm5248_vm2, %v5244_v40  ;;  %v16855_v8 = vand.u32 4294901760, %v5256_v44  ;;  %v5241_v3 = vpop.permute.xlu1 %5240  ;;  %v19801_v40 = vld [vmem:[#allocation16_spill] sm:$0xff] }
 0x5a1   :  { %v5245_v1 = vmul.f32 %v13093_v20, %v5241_v3  ;;  %v19803_v3 = vld [vmem:[#allocation71_spill] sm:$0xff] }
 0x5a2   :  { %v5343_v12 = vsub.f32 %v5256_v44, %v16855_v8  ;;  %5510 = vmatmul.mubr.f32.vlgmr.msra.gmra.mxu1 %v16855_v8  ;;  %v19802_v44 = vld [vmem:[#allocation42_spill] sm:$0xff] }
 0x5a3   :  { %5247 = vst.msk [vmem:[#allocation2 + $0x8] sm:$0xff] %vm1847_vm0, %v5245_v1  ;;  %v5259_v33 = vsel %vm4480_vm1, %v5245_v1, 0  ;;  %5655 = vmatpush1.msra.mxu1 %v15879_v7  ;;  %5515 = vmatprep.mubr.f32.mxu1 %v19361_v29 }
 0x5a4   :  { %5250 = vst.msk [vmem:[#allocation2 + $0x78] sm:$0xff] %vm5248_vm2, %v5245_v1  ;;  %v5344_v25 = vand.u32 4294901760, %v5343_v12  ;;  %v16864_v52 = vand.u32 4294901760, %v5259_v33  ;;  %5657 = vmatprep.subr.mxu1 %v15881_v41  ;;  %v19804_v1 = vld [vmem:[#allocation75_spill] sm:$0xff] }
 0x5a5   :  { %5659 = vmatpush1.msra.mxu1 %v15902_v27 }
 0x5a6   :  { %v5345_v17 = vsub.f32 %v5343_v12, %v5344_v25  ;;  %v5354_v45 = vsub.f32 %v5259_v33, %v16864_v52  ;;  %5661 = vmatprep.subr.mxu1 %v15908_v30  ;;  %5517 = vmatmul.mubr.f32.gmra.mxu1 %v16864_v52  ;;  %v19806_v33 = vld [vmem:[#allocation84_spill] sm:$0xff] }
 0x5a7   :  { %5663 = vmatpush1.msra.mxu1 %v15940_v28  ;;  %5716 = vmatprep.mubr.f32.mxu1 %v19361_v29 }
 0x5a8   :  { %v5346_v0 = vand.u32 4294901760, %v5345_v17  ;;  %5665 = vmatprep.subr.mxu1 %v15951_v39  ;;  %v5355_v31 = vand.u32 4294901760, %v5354_v45  ;;  %v19808_v17 = vld [vmem:[#allocation61_spill] sm:$0xff] }
 0x5a9   :  { %5667 = vmatpush1.msra.mxu1 %v15956_v58 }
 0x5aa   :  { %5669 = vmatprep.subr.mxu1 %v15991_v5  ;;  %5347 = vmatmul.mubr.f32.vlgmr.msra.gmra.mxu0 %v5346_v0  ;;  %v5356_v20 = vsub.f32 %v5354_v45, %v5355_v31  ;;  %v19810_v0 = vld [vmem:[#allocation49_spill] sm:$0xff] }
 0x5ab   :  { %5544 = vmatpush1.msra.mxu0 %v19654_v26  ;;  %5671 = vmatpush1.msra.mxu1 %v15999_v60 }
 0x5ac   :  { %5547 = vmatprep.subr.mxu0 %v19655_v49  ;;  %5673 = vmatprep.subr.mxu1 %v16052_v51  ;;  %v5357_v57 = vand.u32 4294901760, %v5356_v20  ;;  %v19812_v20 = vld [vmem:[#allocation41_spill] sm:$0xff] }
 0x5ad   :  { %5550 = vmatpush1.msra.mxu0 %v19781_v19  ;;  %5675 = vmatpush1.msra.mxu1 %v19782_v43 }
 0x5ae   :  { %5352 = vmatprep.mubr.f32.mxu0 %v19361_v29  ;;  %5553 = vmatprep.subr.mxu0 %v19783_v2 }
 0x5af   :  { %5677 = vmatprep.subr.mxu1 %v19784_v48  ;;  %5358 = vmatmul.mubr.f32.gmra.mxu0 %v5357_v57  ;;  %v19813_v57 = vld [vmem:[#allocation96_spill] sm:$0xff] }
 0x5b0   :  { %5556 = vmatpush1.msra.mxu0 %v19785_v50  ;;  %5679 = vmatpush1.msra.mxu1 %v19786_v53 }
 0x5b1   :  { %5559 = vmatprep.subr.mxu0 %v19787_v35  ;;  %5681 = vmatprep.subr.mxu1 %v19788_v16 }
 0x5b2   :  { %5562 = vmatpush1.msra.mxu0 %v19789_v6  ;;  %5683 = vmatpush1.msra.mxu1 %v19790_v10 }
 0x5b3   :  { %5565 = vmatprep.subr.mxu0 %v19791_v21  ;;  %5720 = vmatmul.mubr.f32.vlgmr.msra.gmra.mxu1 %v5344_v25  ;;  %v19807_v25 = vld [vmem:[#allocation48_spill] sm:$0xff] }
 0x5b4   :  { %5879 = vmatprep.subr.mxu1 %v19792_v15  ;;  %5568 = vmatpush1.msra.mxu0 %v19793_v11 }
 0x5b5   :  { %5881 = vmatpush1.msra.mxu1 %v15879_v7  ;;  %5571 = vmatprep.subr.mxu0 %v19794_v42  ;;  %v19840_v42 = vld [vmem:[#allocation143_spill] sm:$0xff] }
 0x5b6   :  { %5883 = vmatprep.subr.mxu1 %v15881_v41  ;;  %5574 = vmatpush1.msra.mxu0 %v19795_v59 }
 0x5b7   :  { %5725 = vmatprep.mubr.f32.mxu1 %v19361_v29  ;;  %5885 = vmatpush1.msra.mxu1 %v15902_v27 }
 0x5b8   :  { %5577 = vmatprep.subr.mxu0 %v19796_v9  ;;  %5729 = vmatmul.mubr.f32.gmra.mxu1 %v5355_v31  ;;  %v19811_v31 = vld [vmem:[#allocation72_spill] sm:$0xff] }
 0x5b9   :  { %5887 = vmatprep.subr.mxu1 %v15908_v30  ;;  %5580 = vmatpush1.msra.mxu0 %v19797_v55  ;;  %v19839_v55 = vld [vmem:[#allocation141_spill] sm:$0xff] }
 0x5ba   :  { %5889 = vmatpush1.msra.mxu1 %v15940_v28  ;;  %5583 = vmatprep.subr.mxu0 %v19798_v24 }
 0x5bb   :  { %5891 = vmatprep.subr.mxu1 %v15951_v39  ;;  %5586 = vmatpush1.msra.mxu0 %v19799_v4  ;;  %v19837_v4 = vld [vmem:[#allocation115_spill] sm:$0xff] }
 0x5bc   :  { %5619 = vmatprep.mubr.f32.mxu0 %v19361_v29  ;;  %5893 = vmatpush1.msra.mxu1 %v15956_v58 }
 0x5bd   :  { %5622 = vmatmul.mubr.f32.vlgmr.msra.gmra.mxu0 %v5343_v12  ;;  %5754 = vmatprep.subr.mxu0 %v19800_v18  ;;  %v19805_v12 = vld [vmem:[#allocation32_spill] sm:$0xff]  ;;  %v19836_v18 = vld [vmem:[#allocation117_spill] sm:$0xff] }
 0x5be   :  { %5895 = vmatprep.subr.mxu1 %v15991_v5  ;;  %5758 = vmatpush1.msra.mxu0 %v19801_v40  ;;  %v19835_v40 = vld [vmem:[#allocation144_spill] sm:$0xff] }
 0x5bf   :  { %5897 = vmatpush1.msra.mxu1 %v15999_v60  ;;  %5762 = vmatprep.subr.mxu0 %v19802_v44 }
 0x5c0   :  { %5899 = vmatprep.subr.mxu1 %v16052_v51  ;;  %5627 = vmatprep.mubr.f32.mxu0 %v19361_v29 }
 0x5c1   :  { %5766 = vmatpush1.msra.mxu0 %v19803_v3  ;;  %5901 = vmatpush1.msra.mxu1 %v19782_v43 }
 0x5c2   :  { %5630 = vmatmul.mubr.f32.gmra.mxu0 %v5354_v45  ;;  %5770 = vmatprep.subr.mxu0 %v19804_v1  ;;  %v19809_v45 = vld [vmem:[#allocation70_spill] sm:$0xff]  ;;  %v19834_v1 = vld [vmem:[#allocation113_spill] sm:$0xff] }
 0x5c3   :  { %5903 = vmatprep.subr.mxu1 %v19784_v48  ;;  %5774 = vmatpush1.msra.mxu0 %v19805_v12  ;;  %v19833_v12 = vld [vmem:[#allocation116_spill] sm:$0xff] }
 0x5c4   :  { %5905 = vmatpush1.msra.mxu1 %v19786_v53  ;;  %5778 = vmatprep.subr.mxu0 %v19806_v33 }
 0x5c5   :  { %5907 = vmatprep.subr.mxu1 %v19788_v16  ;;  %5782 = vmatpush1.msra.mxu0 %v19807_v25 }
 0x5c6   :  { %5909 = vmatpush1.msra.mxu1 %v19790_v10  ;;  %5942 = vmatprep.mubr.f32.mxu1 %v19361_v29 }
 0x5c7   :  { %5786 = vmatprep.subr.mxu0 %v19808_v17  ;;  %5944 = vmatmul.mubr.f32.vlgmr.msra.gmra.mxu1 %v16855_v8 }
 0x5c8   :  { %5790 = vmatpush1.msra.mxu0 %v19809_v45  ;;  %5949 = vmatprep.mubr.f32.mxu1 %v19361_v29 }
 0x5c9   :  { %5794 = vmatprep.subr.mxu0 %v19810_v0  ;;  %5847 = vmatprep.mubr.f32.mxu0 %v19361_v29 }
 0x5ca   :  { %5798 = vmatpush1.msra.mxu0 %v19811_v31  ;;  %6161 = vmatprep.subr.mxu1 %v19812_v20 }
 0x5cb   :  { %5802 = vmatprep.subr.mxu0 %v19813_v57  ;;  %5951 = vmatmul.mubr.f32.gmra.mxu1 %v16864_v52  ;;  %v19822_v57 = vld [vmem:[#allocation95_spill] sm:$0xff] }
 0x5cc   :  { %5806 = vmatpush1.msra.mxu0 %v19814_v34  ;;  %6167 = vmatpush1.msra.mxu1 %v19815_v54  ;;  %v19823_v54 = vld [vmem:[#allocation62_spill] sm:$0xff] }
 0x5cd   :  { %5810 = vmatprep.subr.mxu0 %v19816_v37  ;;  %6173 = vmatprep.subr.mxu1 %v19817_v32 }
 0x5ce   :  { %5814 = vmatpush1.msra.mxu0 %v19818_v14  ;;  %6179 = vmatpush1.msra.mxu1 %v19819_v22  ;;  %v19824_v14 = vld [vmem:[#allocation55_spill] sm:$0xff]  ;;  %v19825_v22 = vld [vmem:[#allocation73_spill] sm:$0xff] }
 0x5cf   :  { %5849 = vmatmul.mubr.f32.vlgmr.msra.gmra.mxu0 %v16855_v8  ;;  %6185 = vmatprep.subr.mxu1 %v19820_v23  ;;  %v19826_v8 = vld [vmem:[#allocation31_spill] sm:$0xff] }
 0x5d0   :  { %5854 = vmatprep.mubr.f32.mxu0 %v19361_v29  ;;  %6191 = vmatpush1.msra.mxu1 %v19821_v38  ;;  %v19827_v38 = vld [vmem:[#allocation99_spill] sm:$0xff] }
 0x5d1   :  { %6197 = vmatprep.subr.mxu1 %v19822_v57  ;;  %6054 = vmatprep.subr.mxu0 %v19792_v15  ;;  %v19828_v57 = vld [vmem:[#allocation35_spill] sm:$0xff] }
 0x5d2   :  { %6203 = vmatpush1.msra.mxu1 %v19823_v54  ;;  %6056 = vmatpush1.msra.mxu0 %v15879_v7  ;;  %v19829_v54 = vld [vmem:[#allocation19_spill] sm:$0xff] }
 0x5d3   :  { %5856 = vmatmul.mubr.f32.gmra.mxu0 %v16864_v52  ;;  %6209 = vmatprep.subr.mxu1 %v19824_v14  ;;  %v19830_v52 = vld [vmem:[#allocation89_spill] sm:$0xff] }
 0x5d4   :  { %6215 = vmatpush1.msra.mxu1 %v19825_v22  ;;  %6058 = vmatprep.subr.mxu0 %v15881_v41  ;;  %v19831_v22 = vld [vmem:[#allocation91_spill] sm:$0xff] }
 0x5d5   :  { %6221 = vmatprep.subr.mxu1 %v19826_v8  ;;  %6060 = vmatpush1.msra.mxu0 %v15902_v27 }
 0x5d6   :  { %6227 = vmatpush1.msra.mxu1 %v19827_v38  ;;  %6062 = vmatprep.subr.mxu0 %v15908_v30 }
 0x5d7   :  { %6233 = vmatprep.subr.mxu1 %v19828_v57  ;;  %6064 = vmatpush1.msra.mxu0 %v15940_v28 }
 0x5d8   :  { %6239 = vmatpush1.msra.mxu1 %v19829_v54  ;;  %6066 = vmatprep.subr.mxu0 %v15951_v39 }
 0x5d9   :  { %6245 = vmatprep.subr.mxu1 %v19830_v52  ;;  %6068 = vmatpush1.msra.mxu0 %v15956_v58 }
 0x5da   :  { %6251 = vmatpush1.msra.mxu1 %v19831_v22  ;;  %6070 = vmatprep.subr.mxu0 %v15991_v5  ;;  %v19832_v22 = vld [vmem:[#allocation12_spill] sm:$0xff] }
 0x5db   :  { %6284 = vmatprep.mubr.f32.mxu1 %v19361_v29  ;;  %6429 = vmatprep.subr.mxu1 %v19792_v15 }
 0x5dc   :  { %6072 = vmatpush1.msra.mxu0 %v15999_v60  ;;  %6117 = vmatprep.mubr.f32.mxu0 %v19361_v29 }
 0x5dd   :  { %6074 = vmatprep.subr.mxu0 %v16052_v51 }
 0x5de   :  { %6076 = vmatpush1.msra.mxu0 %v19782_v43 }
 0x5df   :  { %6078 = vmatprep.subr.mxu0 %v19784_v48 }
 0x5e0   :  { %6080 = vmatpush1.msra.mxu0 %v19786_v53 }
 0x5e1   :  { %6082 = vmatprep.subr.mxu0 %v19788_v16 }
 0x5e2   :  { %6084 = vmatpush1.msra.mxu0 %v19790_v10 }
 0x5e3   :  { %6317 = vmatprep.subr.mxu0 %v19832_v22  ;;  %v3625_v22 = vadd.f32 %v19834_v1, %v19833_v12 }
 0x662   :  { %v5511_v52 = vpop.f32.mrf.mxu1 }
 0x664   :  { %v5513_v57 = vpop.f32.mrf.mxu1 }
 0x666   :  { %v5518_v14 = vpop.f32.mrf.mxu1 }
 0x668   :  { %v5520_v37 = vpop.f32.mrf.mxu1 }
 0x66a   :  { %v5348_v54 = vpop.f32.mrf.mxu0 }
 0x66b   :  { %v5512_v38 = vadd.f32 %v5511_v52, %v5348_v54  ;;  %v3831_v54 = vadd.f32 %v19835_v40, %v3625_v22 }
 0x66c   :  { %v5350_v8 = vpop.f32.mrf.mxu0 }
 0x66d   :  { %v4045_v9 = vadd.f32 %v19839_v55, %v3831_v54 }
 0x66f   :  { %v5359_v23 = vpop.f32.mrf.mxu0 }
 0x670   :  { %v5519_v32 = vadd.f32 %v5518_v14, %v5359_v23  ;;  %v3632_v23 = vadd.f32 %v19837_v4, %v19836_v18  ;;  %v19838_v14 = vld [vmem:[#allocation145_spill] sm:$0xff] }
 0x671   :  { %v5361_v34 = vpop.f32.mrf.mxu0 }
 0x672   :  { %v3839_v24 = vadd.f32 %v19838_v14, %v3632_v23  ;;  %v5521_v12 = vadd.f32 %v5520_v37, %v5361_v34 }
 0x673   :  { %v5721_v20 = vpop.f32.mrf.mxu1 }
 0x674   :  { %v4054_v1 = vadd.f32 %v19840_v42, %v3839_v24 }
 0x675   :  { %v5723_v17 = vpop.f32.mrf.mxu1 }
 0x676   :  { %v4259_v40 = vadd.f32 %v16821_v56, %v4054_v1 }
 0x678   :  { %v5730_v44 = vpop.f32.mrf.mxu1 }
 0x67d   :  { %v5623_v31 = vpop.f32.mrf.mxu0 }
 0x67e   :  { %v5624_v0 = vadd.f32 %v5623_v31, %v5512_v38  ;;  %v5732_v38 = vpop.f32.mrf.mxu1  ;;  %v5514_v31 = vadd.f32 %v5513_v57, %v5350_v8  ;;  %v19841_v8 = vld [vmem:[#allocation20_spill] sm:$0xff] }
 0x67f   :  { %v5625_v45 = vpop.f32.mrf.mxu0 }
 0x680   :  { %v5722_v25 = vadd.f32 %v5721_v20, %v5624_v0  ;;  %v4252_v0 = vadd.f32 %v16815_v13, %v4045_v9  ;;  %v5626_v59 = vadd.f32 %v5625_v45, %v5514_v31  ;;  %v4444_v9 = vadd.f32 %v16809_v61, %v4259_v40 }
 0x682   :  { %v5631_v33 = vpop.f32.mrf.mxu0  ;;  %v4437_v22 = vadd.f32 %v16801_v46, %v4252_v0 }
 0x683   :  { %v5632_v3 = vadd.f32 %v5631_v33, %v5519_v32  ;;  %v5724_v33 = vadd.f32 %v5723_v17, %v5626_v59  ;;  %v19842_v59 = vld [vmem:[#allocation27_spill] sm:$0xff] }
 0x684   :  { %v5633_v32 = vpop.f32.mrf.mxu0  ;;  %v5252_v13 = vadd.f32 %v4437_v22, %v19841_v8  ;;  %v5254_v17 = vadd.f32 %v4444_v9, %v19842_v59 }
 0x685   :  { %v5731_v52 = vadd.f32 %v5730_v44, %v5632_v3  ;;  %v5634_v18 = vadd.f32 %v5633_v32, %v5521_v12 }
 0x687   :  { %v5945_v20 = vpop.f32.mrf.mxu1  ;;  %v5733_v24 = vadd.f32 %v5732_v38, %v5634_v18 }
 0x689   :  { %v5947_v44 = vpop.f32.mrf.mxu1 }
 0x68b   :  { %v5952_v45 = vpop.f32.mrf.mxu1 }
 0x68f   :  { %v5850_v4 = vpop.f32.mrf.mxu0 }
 0x690   :  { %v5851_v3 = vadd.f32 %v5850_v4, %v5722_v25  ;;  %v5954_v25 = vpop.f32.mrf.mxu1 }
 0x691   :  { %v5852_v55 = vpop.f32.mrf.mxu0 }
 0x692   :  { %v5946_v54 = vadd.f32 %v5945_v20, %v5851_v3  ;;  %v5853_v57 = vadd.f32 %v5852_v55, %v5724_v33 }
 0x693   :  { %v5857_v42 = vpop.f32.mrf.mxu0 }
 0x694   :  { %v5957_v34 = vadd.f32 %v5946_v54, %v16818_v62  ;;  %v5948_v37 = vadd.f32 %v5947_v44, %v5853_v57  ;;  %v5858_v46 = vadd.f32 %v5857_v42, %v5731_v52 }
 0x695   :  { %v5859_v56 = vpop.f32.mrf.mxu0 }
 0x696   :  { %v5958_v23 = vadd.f32 %v5948_v37, %v5252_v13  ;;  %v5953_v14 = vadd.f32 %v5952_v45, %v5858_v46  ;;  %v5860_v31 = vadd.f32 %v5859_v56, %v5733_v24 }
 0x698   :  { %v12172_v0 = vmul.f32 -1.442695, %v5958_v23  ;;  %v5959_v20 = vadd.f32 %v5953_v14, %v16824_v47  ;;  %v5955_v1 = vadd.f32 %v5954_v25, %v5860_v31  ;;  %v12171_v47 = vmul.f32 -1.442695, %v5957_v34 }
 0x69a   :  { %13106 = vpow2.f32 %v12172_v0  ;;  %v5960_v61 = vadd.f32 %v5955_v1, %v5254_v17  ;;  %v12173_v33 = vmul.f32 -1.442695, %v5959_v20 }
 0x69c   :  { %v12174_v32 = vmul.f32 -1.442695, %v5960_v61 }
 0x69e   :  { %13108 = vpow2.f32 %v12174_v32 }
 0x6a7   :  { %v13107_v12 = vpop.eup %13106 }
 0x6a8   :  { %v5974_v62 = vadd.f32 1.0, %v13107_v12 }
 0x6aa   :  { %13110 = vrcp.f32 %v5974_v62 }
 0x6ab   :  { %v13109_v52 = vpop.eup %13108 }
 0x6ac   :  { %v5976_v38 = vadd.f32 1.0, %v13109_v52 }
 0x6ae   :  { %13112 = vrcp.f32 %v5976_v38 }
 0x6af   :  { %13114 = vpow2.f32 %v12171_v47  ;;  %v19845_v47 = vld [vmem:[#allocation52_spill] sm:$0xff] }
 0x6b0   :  { %13116 = vpow2.f32 %v12173_v33  ;;  %v19846_v33 = vld [vmem:[#allocation30_spill] sm:$0xff] }
 0x6b7   :  { %v13111_v22 = vpop.eup %13110 }
 0x6b8   :  { %v5985_v40 = vmul.f32 2.0, %v13111_v22 }
 0x6ba   :  { %v12175_v44 = vadd.f32 -1.0, %v5985_v40 }
 0x6bb   :  { %v13113_v4 = vpop.eup %13112 }
 0x6bc   :  { %5993 = vrot.lane.b32.xlu0 %v12175_v44, %s13401_s5  ;;  %v5986_v18 = vmul.f32 2.0, %v13113_v4  ;;  %v13115_v55 = vpop.eup %13114 }
 0x6bd   :  { %v5973_v54 = vadd.f32 1.0, %v13115_v55  ;;  %v13117_v57 = vpop.eup %13116  ;;  %v19847_v55 = vld [vmem:[#allocation81_spill] sm:$0xff] }
 0x6be   :  { %v12176_v3 = vadd.f32 -1.0, %v5986_v18  ;;  %v5975_v8 = vadd.f32 1.0, %v13117_v57  ;;  %v19843_v18 = vld [vmem:[#allocation85_spill] sm:$0xff] }
 0x6bf   :  { %13118 = vrcp.f32 %v5973_v54  ;;  %v19848_v54 = vld [vmem:[#allocation50_spill] sm:$0xff]  ;;  %v19849_v57 = vld [vmem:[#allocation37_spill] sm:$0xff] }
 0x6c0   :  { %5995 = vrot.lane.b32.xlu1 %v12176_v3, %s13401_s5  ;;  %13120 = vrcp.f32 %v5975_v8  ;;  %v19844_v3 = vld [vmem:[#allocation94_spill] sm:$0xff]  ;;  %v19850_v8 = vld [vmem:[#allocation16_spill] sm:$0xff] }
 0x6cc   :  { %v13119_v13 = vpop.eup %13118 }
 0x6cd   :  { %v13121_v42 = vpop.eup %13120  ;;  %v5989_v34 = vmul.f32 %v13119_v13, %v16844_v63 }
 0x6ce   :  { %v5990_v23 = vmul.f32 %v13121_v42, %v16847_v36 }
 0x72e   :  { %v5994_v9 = vpop.permute.xlu0 %5993 }
 0x72f   :  { %v5999_v45 = vmul.f32 %v13119_v13, %v5994_v9  ;;  %v19851_v13 = vld [vmem:[#allocation42_spill] sm:$0xff]  ;;  %v19852_v9 = vld [vmem:[#allocation71_spill] sm:$0xff] }
 0x731   :  { %6003 = vrot.lane.b32.xlu0 %v5999_v45, %s13401_s5  ;;  %v19853_v45 = vld [vmem:[#allocation75_spill] sm:$0xff] }
 0x732   :  { %v5996_v37 = vpop.permute.xlu1 %5995 }
 0x733   :  { %v6000_v46 = vmul.f32 %v13121_v42, %v5996_v37  ;;  %v19854_v42 = vld [vmem:[#allocation32_spill] sm:$0xff] }
 0x734   :  { %v19855_v37 = vld [vmem:[#allocation84_spill] sm:$0xff] }
 0x735   :  { %6005 = vrot.lane.b32.xlu1 %v6000_v46, %s13401_s5  ;;  %v19856_v46 = vld [vmem:[#allocation48_spill] sm:$0xff] }
 0x7a3   :  { %v6004_v24 = vpop.permute.xlu0 %6003 }
 0x7a4   :  { %v16999_v56 = vadd.f32 %v6004_v24, %v5989_v34  ;;  %v19857_v34 = vld [vmem:[#allocation61_spill] sm:$0xff]  ;;  %v19858_v24 = vld [vmem:[#allocation70_spill] sm:$0xff] }
 0x7a6   :  { %13122 = vtanh.f32 %v16999_v56 }
 0x7a7   :  { %v6006_v14 = vpop.permute.xlu1 %6005 }
 0x7a8   :  { %v17003_v31 = vadd.f32 %v6006_v14, %v5990_v23  ;;  %v19859_v23 = vld [vmem:[#allocation49_spill] sm:$0xff]  ;;  %v19860_v14 = vld [vmem:[#allocation72_spill] sm:$0xff] }
 0x7aa   :  { %13124 = vtanh.f32 %v17003_v31 }
 0x7b3   :  { %v13123_v25 = vpop.eup %13122 }
 0x7b4   :  { %6015 = vrot.lane.b32.xlu0 %v13123_v25, %s13401_s5  ;;  %v19861_v25 = vld [vmem:[#allocation41_spill] sm:$0xff] }
 0x7b7   :  { %v13125_v59 = vpop.eup %13124 }
 0x7b8   :  { %6017 = vrot.lane.b32.xlu1 %v13125_v59, %s13401_s5  ;;  %v19862_v59 = vld [vmem:[#allocation96_spill] sm:$0xff] }
 0x826   :  { %v6016_v17 = vpop.permute.xlu0 %6015 }
 0x827   :  { %v6021_v63 = vmul.f32 %v13111_v22, %v6016_v17  ;;  %v19863_v17 = vld [vmem:[#allocation88_spill] sm:$0xff] }
 0x829   :  { %6023 = vst.msk [vmem:[#allocation2 + $0x10] sm:$0xff] %vm1847_vm0, %v6021_v63  ;;  %v6032_v0 = vsel %vm4480_vm1, %v6021_v63, 0 }
 0x82a   :  { %6025 = vst.msk [vmem:[#allocation2 + $0x60] sm:$0xff] %vm5248_vm2, %v6021_v63  ;;  %v17011_v36 = vand.u32 4294901760, %v6032_v0  ;;  %v6018_v20 = vpop.permute.xlu1 %6017  ;;  %v19864_v63 = vld [vmem:[#allocation83_spill] sm:$0xff] }
 0x82b   :  { %v6022_v1 = vmul.f32 %v13113_v4, %v6018_v20  ;;  %v19866_v20 = vld [vmem:[#allocation25_spill] sm:$0xff] }
 0x82c   :  { %v6119_v61 = vsub.f32 %v6032_v0, %v17011_v36  ;;  %6286 = vmatmul.mubr.f32.vlgmr.msra.gmra.mxu1 %v17011_v36  ;;  %v19865_v0 = vld [vmem:[#allocation47_spill] sm:$0xff] }
 0x82d   :  { %6024 = vst.msk [vmem:[#allocation2 + $0x18] sm:$0xff] %vm1847_vm0, %v6022_v1  ;;  %v6035_v32 = vsel %vm4480_vm1, %v6022_v1, 0  ;;  %6431 = vmatpush1.msra.mxu1 %v15879_v7  ;;  %6291 = vmatprep.mubr.f32.mxu1 %v19361_v29 }
 0x82e   :  { %6026 = vst.msk [vmem:[#allocation2 + $0x68] sm:$0xff] %vm5248_vm2, %v6022_v1  ;;  %v6120_v12 = vand.u32 4294901760, %v6119_v61  ;;  %v17020_v62 = vand.u32 4294901760, %v6035_v32  ;;  %6433 = vmatprep.subr.mxu1 %v15881_v41  ;;  %v19867_v1 = vld [vmem:[#allocation15_spill] sm:$0xff] }
 0x82f   :  { %6435 = vmatpush1.msra.mxu1 %v15902_v27 }
 0x830   :  { %v6121_v52 = vsub.f32 %v6119_v61, %v6120_v12  ;;  %v6130_v38 = vsub.f32 %v6035_v32, %v17020_v62  ;;  %6437 = vmatprep.subr.mxu1 %v15908_v30  ;;  %6293 = vmatmul.mubr.f32.gmra.mxu1 %v17020_v62  ;;  %v19869_v32 = vld [vmem:[#allocation53_spill] sm:$0xff] }
 0x831   :  { %6439 = vmatpush1.msra.mxu1 %v15940_v28  ;;  %6492 = vmatprep.mubr.f32.mxu1 %v19361_v29 }
 0x832   :  { %v6122_v22 = vand.u32 4294901760, %v6121_v52  ;;  %6441 = vmatprep.subr.mxu1 %v15951_v39  ;;  %v6131_v40 = vand.u32 4294901760, %v6130_v38  ;;  %v19871_v52 = vld [vmem:[#allocation95_spill] sm:$0xff] }
 0x833   :  { %6443 = vmatpush1.msra.mxu1 %v15956_v58 }
 0x834   :  { %6445 = vmatprep.subr.mxu1 %v15991_v5  ;;  %6123 = vmatmul.mubr.f32.vlgmr.msra.gmra.mxu0 %v6122_v22  ;;  %v6132_v44 = vsub.f32 %v6130_v38, %v6131_v40  ;;  %v19873_v22 = vld [vmem:[#allocation55_spill] sm:$0xff] }
 0x835   :  { %6320 = vmatpush1.msra.mxu0 %v19654_v26  ;;  %6447 = vmatpush1.msra.mxu1 %v15999_v60 }
 0x836   :  { %6323 = vmatprep.subr.mxu0 %v19655_v49  ;;  %6449 = vmatprep.subr.mxu1 %v16052_v51  ;;  %v6133_v4 = vand.u32 4294901760, %v6132_v44  ;;  %v19876_v44 = vld [vmem:[#allocation99_spill] sm:$0xff] }
 0x837   :  { %6326 = vmatpush1.msra.mxu0 %v19781_v19  ;;  %6451 = vmatpush1.msra.mxu1 %v19782_v43 }
 0x838   :  { %6128 = vmatprep.mubr.f32.mxu0 %v19361_v29  ;;  %6329 = vmatprep.subr.mxu0 %v19783_v2 }
 0x839   :  { %6453 = vmatprep.subr.mxu1 %v19784_v48  ;;  %6134 = vmatmul.mubr.f32.gmra.mxu0 %v6133_v4  ;;  %v19877_v4 = vld [vmem:[#allocation35_spill] sm:$0xff] }
 0x83a   :  { %6332 = vmatpush1.msra.mxu0 %v19785_v50  ;;  %6455 = vmatpush1.msra.mxu1 %v19786_v53 }
 0x83b   :  { %6335 = vmatprep.subr.mxu0 %v19787_v35  ;;  %6457 = vmatprep.subr.mxu1 %v19788_v16 }
 0x83c   :  { %6338 = vmatpush1.msra.mxu0 %v19789_v6  ;;  %6459 = vmatpush1.msra.mxu1 %v19790_v10 }
 0x83d   :  { %6341 = vmatprep.subr.mxu0 %v19791_v21  ;;  %6496 = vmatmul.mubr.f32.vlgmr.msra.gmra.mxu1 %v6120_v12  ;;  %v19870_v12 = vld [vmem:[#allocation29_spill] sm:$0xff] }
 0x83e   :  { %6655 = vmatprep.subr.mxu1 %v19792_v15  ;;  %6344 = vmatpush1.msra.mxu0 %v19793_v11 }
 0x83f   :  { %6657 = vmatpush1.msra.mxu1 %v15879_v7  ;;  %6347 = vmatprep.subr.mxu0 %v19843_v18 }
 0x840   :  { %6659 = vmatprep.subr.mxu1 %v15881_v41  ;;  %6350 = vmatpush1.msra.mxu0 %v19844_v3 }
 0x841   :  { %6501 = vmatprep.mubr.f32.mxu1 %v19361_v29  ;;  %6661 = vmatpush1.msra.mxu1 %v15902_v27 }
 0x842   :  { %6353 = vmatprep.subr.mxu0 %v19845_v47  ;;  %6505 = vmatmul.mubr.f32.gmra.mxu1 %v6131_v40  ;;  %v19874_v40 = vld [vmem:[#allocation73_spill] sm:$0xff] }
 0x843   :  { %6663 = vmatprep.subr.mxu1 %v15908_v30  ;;  %6356 = vmatpush1.msra.mxu0 %v19846_v33 }
 0x844   :  { %6665 = vmatpush1.msra.mxu1 %v15940_v28  ;;  %6359 = vmatprep.subr.mxu0 %v19847_v55 }
 0x845   :  { %6667 = vmatprep.subr.mxu1 %v15951_v39  ;;  %6362 = vmatpush1.msra.mxu0 %v19848_v54  ;;  %v19890_v54 = vld [vmem:[#allocation139_spill] sm:$0xff] }
 0x846   :  { %6395 = vmatprep.mubr.f32.mxu0 %v19361_v29  ;;  %6669 = vmatpush1.msra.mxu1 %v15956_v58 }
 0x847   :  { %6398 = vmatmul.mubr.f32.vlgmr.msra.gmra.mxu0 %v6119_v61  ;;  %6530 = vmatprep.subr.mxu0 %v19849_v57  ;;  %v19868_v61 = vld [vmem:[#allocation93_spill] sm:$0xff] }
 0x848   :  { %6671 = vmatprep.subr.mxu1 %v15991_v5  ;;  %6534 = vmatpush1.msra.mxu0 %v19850_v8  ;;  %v19889_v8 = vld [vmem:[#allocation178_spill] sm:$0xff] }
 0x849   :  { %6673 = vmatpush1.msra.mxu1 %v15999_v60  ;;  %6538 = vmatprep.subr.mxu0 %v19851_v13 }
 0x84a   :  { %6675 = vmatprep.subr.mxu1 %v16052_v51  ;;  %6403 = vmatprep.mubr.f32.mxu0 %v19361_v29 }
 0x84b   :  { %6542 = vmatpush1.msra.mxu0 %v19852_v9  ;;  %6677 = vmatpush1.msra.mxu1 %v19782_v43  ;;  %v19888_v9 = vld [vmem:[#allocation137_spill] sm:$0xff] }
 0x84c   :  { %6406 = vmatmul.mubr.f32.gmra.mxu0 %v6130_v38  ;;  %6546 = vmatprep.subr.mxu0 %v19853_v45  ;;  %v19872_v38 = vld [vmem:[#allocation62_spill] sm:$0xff] }
 0x84d   :  { %6679 = vmatprep.subr.mxu1 %v19784_v48  ;;  %6550 = vmatpush1.msra.mxu0 %v19854_v42  ;;  %v19886_v42 = vld [vmem:[#allocation111_spill] sm:$0xff] }
 0x84e   :  { %6681 = vmatpush1.msra.mxu1 %v19786_v53  ;;  %6554 = vmatprep.subr.mxu0 %v19855_v37  ;;  %v19885_v37 = vld [vmem:[#allocation114_spill] sm:$0xff] }
 0x84f   :  { %6683 = vmatprep.subr.mxu1 %v19788_v16  ;;  %6558 = vmatpush1.msra.mxu0 %v19856_v46  ;;  %v19884_v46 = vld [vmem:[#allocation140_spill] sm:$0xff] }
 0x850   :  { %6685 = vmatpush1.msra.mxu1 %v19790_v10  ;;  %6718 = vmatprep.mubr.f32.mxu1 %v19361_v29 }
 0x851   :  { %6562 = vmatprep.subr.mxu0 %v19857_v34  ;;  %6720 = vmatmul.mubr.f32.vlgmr.msra.gmra.mxu1 %v17011_v36 }
 0x852   :  { %6566 = vmatpush1.msra.mxu0 %v19858_v24  ;;  %6725 = vmatprep.mubr.f32.mxu1 %v19361_v29 }
 0x853   :  { %6570 = vmatprep.subr.mxu0 %v19859_v23  ;;  %6623 = vmatprep.mubr.f32.mxu0 %v19361_v29  ;;  %v19883_v23 = vld [vmem:[#allocation109_spill] sm:$0xff] }
 0x854   :  { %6574 = vmatpush1.msra.mxu0 %v19860_v14  ;;  %6937 = vmatprep.subr.mxu1 %v19861_v25  ;;  %v19882_v14 = vld [vmem:[#allocation112_spill] sm:$0xff] }
 0x855   :  { %6578 = vmatprep.subr.mxu0 %v19862_v59  ;;  %6727 = vmatmul.mubr.f32.gmra.mxu1 %v17020_v62 }
 0x856   :  { %6582 = vmatpush1.msra.mxu0 %v19863_v17  ;;  %6943 = vmatpush1.msra.mxu1 %v19864_v63 }
 0x857   :  { %6586 = vmatprep.subr.mxu0 %v19865_v0  ;;  %6949 = vmatprep.subr.mxu1 %v19866_v20 }
 0x858   :  { %6590 = vmatpush1.msra.mxu0 %v19867_v1  ;;  %6955 = vmatpush1.msra.mxu1 %v19868_v61 }
 0x859   :  { %6625 = vmatmul.mubr.f32.vlgmr.msra.gmra.mxu0 %v17011_v36  ;;  %6961 = vmatprep.subr.mxu1 %v19869_v32  ;;  %v19875_v36 = vld [vmem:[#allocation31_spill] sm:$0xff] }
 0x85a   :  { %6630 = vmatprep.mubr.f32.mxu0 %v19361_v29  ;;  %6967 = vmatpush1.msra.mxu1 %v19870_v12 }
 0x85b   :  { %6973 = vmatprep.subr.mxu1 %v19871_v52  ;;  %6830 = vmatprep.subr.mxu0 %v19792_v15 }
 0x85c   :  { %6979 = vmatpush1.msra.mxu1 %v19872_v38  ;;  %6832 = vmatpush1.msra.mxu0 %v15879_v7  ;;  %v19878_v38 = vld [vmem:[#allocation19_spill] sm:$0xff] }
 0x85d   :  { %6632 = vmatmul.mubr.f32.gmra.mxu0 %v17020_v62  ;;  %6985 = vmatprep.subr.mxu1 %v19873_v22  ;;  %v19879_v62 = vld [vmem:[#allocation89_spill] sm:$0xff] }
 0x85e   :  { %6991 = vmatpush1.msra.mxu1 %v19874_v40  ;;  %6834 = vmatprep.subr.mxu0 %v15881_v41  ;;  %v19880_v40 = vld [vmem:[#allocation91_spill] sm:$0xff] }
 0x85f   :  { %6997 = vmatprep.subr.mxu1 %v19875_v36  ;;  %6836 = vmatpush1.msra.mxu0 %v15902_v27 }
 0x860   :  { %7003 = vmatpush1.msra.mxu1 %v19876_v44  ;;  %6838 = vmatprep.subr.mxu0 %v15908_v30 }
 0x861   :  { %7009 = vmatprep.subr.mxu1 %v19877_v4  ;;  %6840 = vmatpush1.msra.mxu0 %v15940_v28 }
 0x862   :  { %7015 = vmatpush1.msra.mxu1 %v19878_v38  ;;  %6842 = vmatprep.subr.mxu0 %v15951_v39 }
 0x863   :  { %7021 = vmatprep.subr.mxu1 %v19879_v62  ;;  %6844 = vmatpush1.msra.mxu0 %v15956_v58 }
 0x864   :  { %7027 = vmatpush1.msra.mxu1 %v19880_v40  ;;  %6846 = vmatprep.subr.mxu0 %v15991_v5  ;;  %v19881_v40 = vld [vmem:[#allocation12_spill] sm:$0xff] }
 0x865   :  { %7060 = vmatprep.mubr.f32.mxu1 %v19361_v29  ;;  %7205 = vmatprep.subr.mxu1 %v19792_v15 }
 0x866   :  { %6848 = vmatpush1.msra.mxu0 %v15999_v60  ;;  %6893 = vmatprep.mubr.f32.mxu0 %v19361_v29 }
 0x867   :  { %6850 = vmatprep.subr.mxu0 %v16052_v51 }
 0x868   :  { %6852 = vmatpush1.msra.mxu0 %v19782_v43 }
 0x869   :  { %6854 = vmatprep.subr.mxu0 %v19784_v48 }
 0x86a   :  { %6856 = vmatpush1.msra.mxu0 %v19786_v53 }
 0x86b   :  { %6858 = vmatprep.subr.mxu0 %v19788_v16 }
 0x86c   :  { %6860 = vmatpush1.msra.mxu0 %v19790_v10 }
 0x86d   :  { %7093 = vmatprep.subr.mxu0 %v19881_v40  ;;  %v3611_v40 = vadd.f32 %v19883_v23, %v19882_v14 }
 0x8ec   :  { %v6287_v62 = vpop.f32.mrf.mxu1 }
 0x8ee   :  { %v6289_v4 = vpop.f32.mrf.mxu1 }
 0x8f0   :  { %v6294_v22 = vpop.f32.mrf.mxu1 }
 0x8f2   :  { %v6296_v32 = vpop.f32.mrf.mxu1 }
 0x8f4   :  { %v6124_v38 = vpop.f32.mrf.mxu0 }
 0x8f5   :  { %v6288_v44 = vadd.f32 %v6287_v62, %v6124_v38  ;;  %v3815_v38 = vadd.f32 %v19884_v46, %v3611_v40 }
 0x8f6   :  { %v6126_v36 = vpop.f32.mrf.mxu0 }
 0x8f7   :  { %v4027_v13 = vadd.f32 %v19888_v9, %v3815_v38 }
 0x8f9   :  { %v6135_v52 = vpop.f32.mrf.mxu0 }
 0x8fa   :  { %v6295_v12 = vadd.f32 %v6294_v22, %v6135_v52  ;;  %v3618_v52 = vadd.f32 %v19886_v42, %v19885_v37  ;;  %v19887_v22 = vld [vmem:[#allocation142_spill] sm:$0xff] }
 0x8fb   :  { %v6137_v61 = vpop.f32.mrf.mxu0 }
 0x8fc   :  { %v3823_v45 = vadd.f32 %v19887_v22, %v3618_v52 }
 0x8fd   :  { %v6497_v1 = vpop.f32.mrf.mxu1 }
 0x8fe   :  { %v4036_v23 = vadd.f32 %v19890_v54, %v3823_v45  ;;  %v19895_v45 = vld [vmem:[#allocation28_spill] sm:$0xff] }
 0x8ff   :  { %v6499_v17 = vpop.f32.mrf.mxu1 }
 0x902   :  { %v6506_v34 = vpop.f32.mrf.mxu1 }
 0x907   :  { %v6399_v20 = vpop.f32.mrf.mxu0 }
 0x908   :  { %v6400_v0 = vadd.f32 %v6399_v20, %v6288_v44  ;;  %v6508_v20 = vpop.f32.mrf.mxu1  ;;  %v6290_v44 = vadd.f32 %v6289_v4, %v6126_v36  ;;  %v19893_v4 = vld [vmem:[#allocation43_spill] sm:$0xff] }
 0x909   :  { %v6401_v63 = vpop.f32.mrf.mxu0 }
 0x90a   :  { %v6498_v59 = vadd.f32 %v6497_v1, %v6400_v0  ;;  %v4238_v0 = vadd.f32 %v19889_v8, %v4027_v13  ;;  %v6402_v57 = vadd.f32 %v6401_v63, %v6290_v44  ;;  %v19894_v13 = vld [vmem:[#allocation176_spill] sm:$0xff] }
 0x90c   :  { %v6407_v25 = vpop.f32.mrf.mxu0  ;;  %v6500_v22 = vadd.f32 %v6499_v17, %v6402_v57  ;;  %v19896_v57 = vld [vmem:[#allocation60_spill] sm:$0xff] }
 0x90d   :  { %v6408_v24 = vadd.f32 %v6407_v25, %v6295_v12  ;;  %v6297_v25 = vadd.f32 %v6296_v32, %v6137_v61  ;;  %v19891_v12 = vld [vmem:[#allocation173_spill] sm:$0xff] }
 0x90e   :  { %v6409_v14 = vpop.f32.mrf.mxu0  ;;  %v4423_v46 = vadd.f32 %v19891_v12, %v4238_v0 }
 0x90f   :  { %v6507_v62 = vadd.f32 %v6506_v34, %v6408_v24  ;;  %v19892_v34 = vld [vmem:[#allocation179_spill] sm:$0xff]  ;;  %v6410_v37 = vadd.f32 %v6409_v14, %v6297_v25 }
 0x910   :  { %v4245_v24 = vadd.f32 %v19892_v34, %v4036_v23  ;;  %v6028_v8 = vadd.f32 %v4423_v46, %v19893_v4  ;;  %v19897_v25 = vld [vmem:[#allocation51_spill] sm:$0xff] }
 0x911   :  { %v6721_v1 = vpop.f32.mrf.mxu1  ;;  %v6509_v12 = vadd.f32 %v6508_v20, %v6410_v37 }
 0x912   :  { %v4430_v63 = vadd.f32 %v19894_v13, %v4245_v24 }
 0x913   :  { %v6723_v40 = vpop.f32.mrf.mxu1 }
 0x914   :  { %v6030_v17 = vadd.f32 %v4430_v63, %v19896_v57 }
 0x915   :  { %v6728_v44 = vpop.f32.mrf.mxu1 }
 0x919   :  { %v6626_v42 = vpop.f32.mrf.mxu0 }
 0x91a   :  { %v6627_v52 = vadd.f32 %v6626_v42, %v6498_v59  ;;  %v6730_v59 = vpop.f32.mrf.mxu1 }
 0x91b   :  { %v6628_v9 = vpop.f32.mrf.mxu0 }
 0x91c   :  { %v6722_v38 = vadd.f32 %v6721_v1, %v6627_v52  ;;  %v6629_v36 = vadd.f32 %v6628_v9, %v6500_v22 }
 0x91d   :  { %v6633_v54 = vpop.f32.mrf.mxu0 }
 0x91e   :  { %v6733_v61 = vadd.f32 %v6722_v38, %v19895_v45  ;;  %v6724_v32 = vadd.f32 %v6723_v40, %v6629_v36  ;;  %v6634_v0 = vadd.f32 %v6633_v54, %v6507_v62 }
 0x91f   :  { %v6635_v23 = vpop.f32.mrf.mxu0 }
 0x920   :  { %v6734_v34 = vadd.f32 %v6724_v32, %v6028_v8  ;;  %v6729_v55 = vadd.f32 %v6728_v44, %v6634_v0  ;;  %v6636_v14 = vadd.f32 %v6635_v23, %v6509_v12 }
 0x922   :  { %v12178_v1 = vmul.f32 -1.442695, %v6734_v34  ;;  %v6735_v42 = vadd.f32 %v6729_v55, %v19897_v25  ;;  %v6731_v46 = vadd.f32 %v6730_v59, %v6636_v14  ;;  %v12177_v55 = vmul.f32 -1.442695, %v6733_v61 }
 0x924   :  { %13126 = vpow2.f32 %v12178_v1  ;;  %v6736_v24 = vadd.f32 %v6731_v46, %v6030_v17  ;;  %v12179_v13 = vmul.f32 -1.442695, %v6735_v42 }
 0x926   :  { %v12180_v52 = vmul.f32 -1.442695, %v6736_v24 }
 0x928   :  { %13128 = vpow2.f32 %v12180_v52 }
 0x931   :  { %v13127_v22 = vpop.eup %13126 }
 0x932   :  { %v6750_v9 = vadd.f32 1.0, %v13127_v22 }
 0x934   :  { %13130 = vrcp.f32 %v6750_v9 }
 0x935   :  { %v13129_v62 = vpop.eup %13128 }
 0x936   :  { %v6752_v20 = vadd.f32 1.0, %v13129_v62 }
 0x938   :  { %13132 = vrcp.f32 %v6752_v20 }
 0x939   :  { %13134 = vpow2.f32 %v12177_v55 }
 0x93a   :  { %13136 = vpow2.f32 %v12179_v13 }
 0x941   :  { %v13131_v40 = vpop.eup %13130 }
 0x942   :  { %v6761_v37 = vmul.f32 2.0, %v13131_v40 }
 0x944   :  { %v12181_v38 = vadd.f32 -1.0, %v6761_v37 }
 0x945   :  { %v13133_v36 = vpop.eup %13132 }
 0x946   :  { %6769 = vrot.lane.b32.xlu0 %v12181_v38, %s13401_s5  ;;  %v6762_v4 = vmul.f32 2.0, %v13133_v36  ;;  %v13135_v63 = vpop.eup %13134 }
 0x947   :  { %v6749_v44 = vadd.f32 1.0, %v13135_v63  ;;  %v13137_v54 = vpop.eup %13136  ;;  %v19898_v63 = vld [vmem:[#allocation81_spill] sm:$0xff] }
 0x948   :  { %v12182_v8 = vadd.f32 -1.0, %v6762_v4  ;;  %v6751_v45 = vadd.f32 1.0, %v13137_v54  ;;  %v19900_v54 = vld [vmem:[#allocation37_spill] sm:$0xff] }
 0x949   :  { %13138 = vrcp.f32 %v6749_v44  ;;  %v19899_v44 = vld [vmem:[#allocation50_spill] sm:$0xff] }
 0x94a   :  { %6771 = vrot.lane.b32.xlu1 %v12182_v8, %s13401_s5  ;;  %13140 = vrcp.f32 %v6751_v45  ;;  %v19901_v45 = vld [vmem:[#allocation16_spill] sm:$0xff] }
 0x956   :  { %v13139_v32 = vpop.eup %13138 }
 0x957   :  { %v13141_v23 = vpop.eup %13140  ;;  %v6765_v61 = vmul.f32 %v13139_v32, %v16999_v56 }
 0x958   :  { %v6766_v17 = vmul.f32 %v13141_v23, %v17003_v31 }
 0x9b8   :  { %v6770_v0 = vpop.permute.xlu0 %6769 }
 0x9b9   :  { %v6775_v12 = vmul.f32 %v13139_v32, %v6770_v0  ;;  %v19902_v32 = vld [vmem:[#allocation42_spill] sm:$0xff]  ;;  %v19903_v0 = vld [vmem:[#allocation71_spill] sm:$0xff] }
 0x9bb   :  { %6779 = vrot.lane.b32.xlu0 %v6775_v12, %s13401_s5  ;;  %v19904_v12 = vld [vmem:[#allocation75_spill] sm:$0xff] }
 0x9bc   :  { %v6772_v34 = vpop.permute.xlu1 %6771 }
 0x9bd   :  { %v6776_v14 = vmul.f32 %v13141_v23, %v6772_v34  ;;  %v19905_v23 = vld [vmem:[#allocation32_spill] sm:$0xff] }
 0x9be   :  { %v19906_v34 = vld [vmem:[#allocation84_spill] sm:$0xff] }
 0x9bf   :  { %6781 = vrot.lane.b32.xlu1 %v6776_v14, %s13401_s5  ;;  %v19907_v14 = vld [vmem:[#allocation48_spill] sm:$0xff] }
 0xa2d   :  { %v6780_v59 = vpop.permute.xlu0 %6779 }
 0xa2e   :  { %v17155_v57 = vadd.f32 %v6780_v59, %v6765_v61  ;;  %v19908_v61 = vld [vmem:[#allocation61_spill] sm:$0xff]  ;;  %v19909_v59 = vld [vmem:[#allocation70_spill] sm:$0xff] }
 0xa30   :  { %13142 = vtanh.f32 %v17155_v57 }
 0xa31   :  { %v6782_v1 = vpop.permute.xlu1 %6781 }
 0xa32   :  { %v17159_v25 = vadd.f32 %v6782_v1, %v6766_v17  ;;  %v19910_v17 = vld [vmem:[#allocation49_spill] sm:$0xff]  ;;  %v19911_v1 = vld [vmem:[#allocation72_spill] sm:$0xff] }
 0xa34   :  { %13144 = vtanh.f32 %v17159_v25 }
 0xa3d   :  { %v13143_v42 = vpop.eup %13142 }
 0xa3e   :  { %6791 = vrot.lane.b32.xlu0 %v13143_v42, %s13401_s5  ;;  %v19912_v42 = vld [vmem:[#allocation41_spill] sm:$0xff] }
 0xa41   :  { %v13145_v46 = vpop.eup %13144 }
 0xa42   :  { %6793 = vrot.lane.b32.xlu1 %v13145_v46, %s13401_s5  ;;  %v19913_v46 = vld [vmem:[#allocation96_spill] sm:$0xff] }
 0xab0   :  { %v6792_v24 = vpop.permute.xlu0 %6791 }
 0xab1   :  { %v6797_v56 = vmul.f32 %v13131_v40, %v6792_v24  ;;  %v19914_v24 = vld [vmem:[#allocation88_spill] sm:$0xff] }
 0xab3   :  { %6799 = vst.msk [vmem:[#allocation2 + $0x20] sm:$0xff] %vm1847_vm0, %v6797_v56  ;;  %v6808_v52 = vsel %vm4480_vm1, %v6797_v56, 0 }
 0xab4   :  { %6801 = vst.msk [vmem:[#allocation2 + $0x50] sm:$0xff] %vm5248_vm2, %v6797_v56  ;;  %v17167_v31 = vand.u32 4294901760, %v6808_v52  ;;  %v6794_v22 = vpop.permute.xlu1 %6793  ;;  %v19915_v56 = vld [vmem:[#allocation83_spill] sm:$0xff] }
 0xab5   :  { %v6798_v9 = vmul.f32 %v13133_v36, %v6794_v22  ;;  %v19917_v22 = vld [vmem:[#allocation25_spill] sm:$0xff] }
 0xab6   :  { %v6895_v62 = vsub.f32 %v6808_v52, %v17167_v31  ;;  %7062 = vmatmul.mubr.f32.vlgmr.msra.gmra.mxu1 %v17167_v31  ;;  %v19916_v52 = vld [vmem:[#allocation47_spill] sm:$0xff] }
 0xab7   :  { %6800 = vst.msk [vmem:[#allocation2 + $0x28] sm:$0xff] %vm1847_vm0, %v6798_v9  ;;  %v6811_v20 = vsel %vm4480_vm1, %v6798_v9, 0  ;;  %7207 = vmatpush1.msra.mxu1 %v15879_v7  ;;  %7067 = vmatprep.mubr.f32.mxu1 %v19361_v29 }
 0xab8   :  { %6802 = vst.msk [vmem:[#allocation2 + $0x58] sm:$0xff] %vm5248_vm2, %v6798_v9  ;;  %v6896_v40 = vand.u32 4294901760, %v6895_v62  ;;  %v17176_v37 = vand.u32 4294901760, %v6811_v20  ;;  %7209 = vmatprep.subr.mxu1 %v15881_v41  ;;  %v19918_v9 = vld [vmem:[#allocation15_spill] sm:$0xff] }
 0xab9   :  { %7211 = vmatpush1.msra.mxu1 %v15902_v27 }
 0xaba   :  { %v6897_v38 = vsub.f32 %v6895_v62, %v6896_v40  ;;  %v6906_v36 = vsub.f32 %v6811_v20, %v17176_v37  ;;  %7213 = vmatprep.subr.mxu1 %v15908_v30  ;;  %7069 = vmatmul.mubr.f32.gmra.mxu1 %v17176_v37  ;;  %v19920_v20 = vld [vmem:[#allocation53_spill] sm:$0xff] }
 0xabb   :  { %7215 = vmatpush1.msra.mxu1 %v15940_v28  ;;  %7268 = vmatprep.mubr.f32.mxu1 %v19361_v29 }
 0xabc   :  { %v6898_v4 = vand.u32 4294901760, %v6897_v38  ;;  %7217 = vmatprep.subr.mxu1 %v15951_v39  ;;  %v6907_v8 = vand.u32 4294901760, %v6906_v36  ;;  %v19922_v38 = vld [vmem:[#allocation95_spill] sm:$0xff] }
 0xabd   :  { %7219 = vmatpush1.msra.mxu1 %v15956_v58 }
 0xabe   :  { %7221 = vmatprep.subr.mxu1 %v15991_v5  ;;  %6899 = vmatmul.mubr.f32.vlgmr.msra.gmra.mxu0 %v6898_v4  ;;  %v6908_v55 = vsub.f32 %v6906_v36, %v6907_v8  ;;  %v19924_v4 = vld [vmem:[#allocation55_spill] sm:$0xff] }
 0xabf   :  { %7096 = vmatpush1.msra.mxu0 %v19654_v26  ;;  %7223 = vmatpush1.msra.mxu1 %v15999_v60 }
 0xac0   :  { %7099 = vmatprep.subr.mxu0 %v19655_v49  ;;  %7225 = vmatprep.subr.mxu1 %v16052_v51  ;;  %v6909_v13 = vand.u32 4294901760, %v6908_v55  ;;  %v19927_v55 = vld [vmem:[#allocation99_spill] sm:$0xff] }
 0xac1   :  { %7102 = vmatpush1.msra.mxu0 %v19781_v19  ;;  %7227 = vmatpush1.msra.mxu1 %v19782_v43 }
 0xac2   :  { %6904 = vmatprep.mubr.f32.mxu0 %v19361_v29  ;;  %7105 = vmatprep.subr.mxu0 %v19783_v2 }
 0xac3   :  { %7229 = vmatprep.subr.mxu1 %v19784_v48  ;;  %6910 = vmatmul.mubr.f32.gmra.mxu0 %v6909_v13  ;;  %v19928_v13 = vld [vmem:[#allocation35_spill] sm:$0xff] }
 0xac4   :  { %7108 = vmatpush1.msra.mxu0 %v19785_v50  ;;  %7231 = vmatpush1.msra.mxu1 %v19786_v53 }
 0xac5   :  { %7111 = vmatprep.subr.mxu0 %v19787_v35  ;;  %7233 = vmatprep.subr.mxu1 %v19788_v16 }
 0xac6   :  { %7114 = vmatpush1.msra.mxu0 %v19789_v6  ;;  %7235 = vmatpush1.msra.mxu1 %v19790_v10 }
 0xac7   :  { %7117 = vmatprep.subr.mxu0 %v19791_v21  ;;  %7272 = vmatmul.mubr.f32.vlgmr.msra.gmra.mxu1 %v6896_v40  ;;  %v19921_v40 = vld [vmem:[#allocation29_spill] sm:$0xff] }
 0xac8   :  { %7431 = vmatprep.subr.mxu1 %v19792_v15  ;;  %7120 = vmatpush1.msra.mxu0 %v19793_v11 }
 0xac9   :  { %7433 = vmatpush1.msra.mxu1 %v15879_v7  ;;  %7123 = vmatprep.subr.mxu0 %v19843_v18 }
 0xaca   :  { %7435 = vmatprep.subr.mxu1 %v15881_v41  ;;  %7126 = vmatpush1.msra.mxu0 %v19844_v3 }
 0xacb   :  { %7277 = vmatprep.mubr.f32.mxu1 %v19361_v29  ;;  %7437 = vmatpush1.msra.mxu1 %v15902_v27 }
 0xacc   :  { %7129 = vmatprep.subr.mxu0 %v19845_v47  ;;  %7281 = vmatmul.mubr.f32.gmra.mxu1 %v6907_v8  ;;  %v19925_v8 = vld [vmem:[#allocation73_spill] sm:$0xff] }
 0xacd   :  { %7439 = vmatprep.subr.mxu1 %v15908_v30  ;;  %7132 = vmatpush1.msra.mxu0 %v19846_v33 }
 0xace   :  { %7441 = vmatpush1.msra.mxu1 %v15940_v28  ;;  %7135 = vmatprep.subr.mxu0 %v19898_v63 }
 0xacf   :  { %7443 = vmatprep.subr.mxu1 %v15951_v39  ;;  %7138 = vmatpush1.msra.mxu0 %v19899_v44  ;;  %v19941_v44 = vld [vmem:[#allocation135_spill] sm:$0xff] }
 0xad0   :  { %7171 = vmatprep.mubr.f32.mxu0 %v19361_v29  ;;  %7445 = vmatpush1.msra.mxu1 %v15956_v58 }
 0xad1   :  { %7174 = vmatmul.mubr.f32.vlgmr.msra.gmra.mxu0 %v6895_v62  ;;  %7306 = vmatprep.subr.mxu0 %v19900_v54  ;;  %v19919_v62 = vld [vmem:[#allocation93_spill] sm:$0xff] }
 0xad2   :  { %7447 = vmatprep.subr.mxu1 %v15991_v5  ;;  %7310 = vmatpush1.msra.mxu0 %v19901_v45  ;;  %v19940_v45 = vld [vmem:[#allocation172_spill] sm:$0xff] }
 0xad3   :  { %7449 = vmatpush1.msra.mxu1 %v15999_v60  ;;  %7314 = vmatprep.subr.mxu0 %v19902_v32 }
 0xad4   :  { %7451 = vmatprep.subr.mxu1 %v16052_v51  ;;  %7179 = vmatprep.mubr.f32.mxu0 %v19361_v29 }
 0xad5   :  { %7318 = vmatpush1.msra.mxu0 %v19903_v0  ;;  %7453 = vmatpush1.msra.mxu1 %v19782_v43  ;;  %v19939_v0 = vld [vmem:[#allocation133_spill] sm:$0xff] }
 0xad6   :  { %7182 = vmatmul.mubr.f32.gmra.mxu0 %v6906_v36  ;;  %7322 = vmatprep.subr.mxu0 %v19904_v12  ;;  %v19923_v36 = vld [vmem:[#allocation62_spill] sm:$0xff] }
 0xad7   :  { %7455 = vmatprep.subr.mxu1 %v19784_v48  ;;  %7326 = vmatpush1.msra.mxu0 %v19905_v23  ;;  %v19937_v23 = vld [vmem:[#allocation107_spill] sm:$0xff] }
 0xad8   :  { %7457 = vmatpush1.msra.mxu1 %v19786_v53  ;;  %7330 = vmatprep.subr.mxu0 %v19906_v34  ;;  %v19936_v34 = vld [vmem:[#allocation110_spill] sm:$0xff] }
 0xad9   :  { %7459 = vmatprep.subr.mxu1 %v19788_v16  ;;  %7334 = vmatpush1.msra.mxu0 %v19907_v14  ;;  %v19935_v14 = vld [vmem:[#allocation136_spill] sm:$0xff] }
 0xada   :  { %7461 = vmatpush1.msra.mxu1 %v19790_v10  ;;  %7494 = vmatprep.mubr.f32.mxu1 %v19361_v29 }
 0xadb   :  { %7338 = vmatprep.subr.mxu0 %v19908_v61  ;;  %7496 = vmatmul.mubr.f32.vlgmr.msra.gmra.mxu1 %v17167_v31 }
 0xadc   :  { %7342 = vmatpush1.msra.mxu0 %v19909_v59  ;;  %7501 = vmatprep.mubr.f32.mxu1 %v19361_v29 }
 0xadd   :  { %7346 = vmatprep.subr.mxu0 %v19910_v17  ;;  %7399 = vmatprep.mubr.f32.mxu0 %v19361_v29  ;;  %v19934_v17 = vld [vmem:[#allocation105_spill] sm:$0xff] }
 0xade   :  { %7350 = vmatpush1.msra.mxu0 %v19911_v1  ;;  %7713 = vmatprep.subr.mxu1 %v19912_v42  ;;  %v19933_v1 = vld [vmem:[#allocation108_spill] sm:$0xff] }
 0xadf   :  { %7354 = vmatprep.subr.mxu0 %v19913_v46  ;;  %7503 = vmatmul.mubr.f32.gmra.mxu1 %v17176_v37 }
 0xae0   :  { %7358 = vmatpush1.msra.mxu0 %v19914_v24  ;;  %7719 = vmatpush1.msra.mxu1 %v19915_v56 }
 0xae1   :  { %7362 = vmatprep.subr.mxu0 %v19916_v52  ;;  %7725 = vmatprep.subr.mxu1 %v19917_v22 }
 0xae2   :  { %7366 = vmatpush1.msra.mxu0 %v19918_v9  ;;  %7731 = vmatpush1.msra.mxu1 %v19919_v62 }
 0xae3   :  { %7401 = vmatmul.mubr.f32.vlgmr.msra.gmra.mxu0 %v17167_v31  ;;  %7737 = vmatprep.subr.mxu1 %v19920_v20  ;;  %v19926_v31 = vld [vmem:[#allocation31_spill] sm:$0xff] }
 0xae4   :  { %7406 = vmatprep.mubr.f32.mxu0 %v19361_v29  ;;  %7743 = vmatpush1.msra.mxu1 %v19921_v40 }
 0xae5   :  { %7749 = vmatprep.subr.mxu1 %v19922_v38  ;;  %7606 = vmatprep.subr.mxu0 %v19792_v15 }
 0xae6   :  { %7755 = vmatpush1.msra.mxu1 %v19923_v36  ;;  %7608 = vmatpush1.msra.mxu0 %v15879_v7  ;;  %v19929_v36 = vld [vmem:[#allocation19_spill] sm:$0xff] }
 0xae7   :  { %7408 = vmatmul.mubr.f32.gmra.mxu0 %v17176_v37  ;;  %7761 = vmatprep.subr.mxu1 %v19924_v4  ;;  %v19930_v37 = vld [vmem:[#allocation89_spill] sm:$0xff] }
 0xae8   :  { %7767 = vmatpush1.msra.mxu1 %v19925_v8  ;;  %7610 = vmatprep.subr.mxu0 %v15881_v41  ;;  %v19931_v8 = vld [vmem:[#allocation91_spill] sm:$0xff] }
 0xae9   :  { %7773 = vmatprep.subr.mxu1 %v19926_v31  ;;  %7612 = vmatpush1.msra.mxu0 %v15902_v27 }
 0xaea   :  { %7779 = vmatpush1.msra.mxu1 %v19927_v55  ;;  %7614 = vmatprep.subr.mxu0 %v15908_v30 }
 0xaeb   :  { %7785 = vmatprep.subr.mxu1 %v19928_v13  ;;  %7616 = vmatpush1.msra.mxu0 %v15940_v28 }
 0xaec   :  { %7791 = vmatpush1.msra.mxu1 %v19929_v36  ;;  %7618 = vmatprep.subr.mxu0 %v15951_v39 }
 0xaed   :  { %7797 = vmatprep.subr.mxu1 %v19930_v37  ;;  %7620 = vmatpush1.msra.mxu0 %v15956_v58 }
 0xaee   :  { %7803 = vmatpush1.msra.mxu1 %v19931_v8  ;;  %7622 = vmatprep.subr.mxu0 %v15991_v5  ;;  %v19932_v8 = vld [vmem:[#allocation12_spill] sm:$0xff] }
 0xaef   :  { %7836 = vmatprep.mubr.f32.mxu1 %v19361_v29  ;;  %7981 = vmatprep.subr.mxu1 %v19792_v15 }
 0xaf0   :  { %7624 = vmatpush1.msra.mxu0 %v15999_v60  ;;  %7669 = vmatprep.mubr.f32.mxu0 %v19361_v29 }
 0xaf1   :  { %7626 = vmatprep.subr.mxu0 %v16052_v51 }
 0xaf2   :  { %7628 = vmatpush1.msra.mxu0 %v19782_v43 }
 0xaf3   :  { %7630 = vmatprep.subr.mxu0 %v19784_v48 }
 0xaf4   :  { %7632 = vmatpush1.msra.mxu0 %v19786_v53 }
 0xaf5   :  { %7634 = vmatprep.subr.mxu0 %v19788_v16 }
 0xaf6   :  { %7636 = vmatpush1.msra.mxu0 %v19790_v10 }
 0xaf7   :  { %7869 = vmatprep.subr.mxu0 %v19932_v8  ;;  %v3597_v8 = vadd.f32 %v19934_v17, %v19933_v1 }
 0xb76   :  { %v7063_v37 = vpop.f32.mrf.mxu1 }
 0xb78   :  { %v7065_v13 = vpop.f32.mrf.mxu1 }
 0xb7a   :  { %v7070_v4 = vpop.f32.mrf.mxu1 }
 0xb7c   :  { %v7072_v20 = vpop.f32.mrf.mxu1 }
 0xb7e   :  { %v6900_v36 = vpop.f32.mrf.mxu0 }
 0xb7f   :  { %v7064_v55 = vadd.f32 %v7063_v37, %v6900_v36  ;;  %v3799_v36 = vadd.f32 %v19935_v14, %v3597_v8 }
 0xb80   :  { %v6902_v31 = vpop.f32.mrf.mxu0 }
 0xb81   :  { %v4009_v32 = vadd.f32 %v19939_v0, %v3799_v36 }
 0xb83   :  { %v6911_v38 = vpop.f32.mrf.mxu0 }
 0xb84   :  { %v7071_v40 = vadd.f32 %v7070_v4, %v6911_v38  ;;  %v3604_v38 = vadd.f32 %v19937_v23, %v19936_v34  ;;  %v19938_v4 = vld [vmem:[#allocation138_spill] sm:$0xff] }
 0xb85   :  { %v6913_v62 = vpop.f32.mrf.mxu0 }
 0xb86   :  { %v3807_v12 = vadd.f32 %v19938_v4, %v3604_v38 }
 0xb87   :  { %v7273_v9 = vpop.f32.mrf.mxu1 }
 0xb88   :  { %v4018_v17 = vadd.f32 %v19941_v44, %v3807_v12  ;;  %v19946_v12 = vld [vmem:[#allocation174_spill] sm:$0xff] }
 0xb89   :  { %v7275_v24 = vpop.f32.mrf.mxu1 }
 0xb8c   :  { %v7282_v61 = vpop.f32.mrf.mxu1 }
 0xb91   :  { %v7175_v22 = vpop.f32.mrf.mxu0 }
 0xb92   :  { %v7176_v52 = vadd.f32 %v7175_v22, %v7064_v55  ;;  %v7284_v22 = vpop.f32.mrf.mxu1  ;;  %v7066_v55 = vadd.f32 %v7065_v13, %v6902_v31  ;;  %v19944_v13 = vld [vmem:[#allocation66_spill] sm:$0xff] }
 0xb93   :  { %v7177_v56 = vpop.f32.mrf.mxu0 }
 0xb94   :  { %v7274_v46 = vadd.f32 %v7273_v9, %v7176_v52  ;;  %v4224_v52 = vadd.f32 %v19940_v45, %v4009_v32  ;;  %v7178_v54 = vadd.f32 %v7177_v56, %v7066_v55  ;;  %v19945_v32 = vld [vmem:[#allocation170_spill] sm:$0xff] }
 0xb96   :  { %v7183_v42 = vpop.f32.mrf.mxu0  ;;  %v7276_v4 = vadd.f32 %v7275_v24, %v7178_v54  ;;  %v19947_v54 = vld [vmem:[#allocation76_spill] sm:$0xff] }
 0xb97   :  { %v7184_v59 = vadd.f32 %v7183_v42, %v7071_v40  ;;  %v7073_v42 = vadd.f32 %v7072_v20, %v6913_v62  ;;  %v19942_v40 = vld [vmem:[#allocation167_spill] sm:$0xff] }
 0xb98   :  { %v7185_v1 = vpop.f32.mrf.mxu0  ;;  %v4409_v14 = vadd.f32 %v19942_v40, %v4224_v52 }
 0xb99   :  { %v7283_v37 = vadd.f32 %v7282_v61, %v7184_v59  ;;  %v19943_v61 = vld [vmem:[#allocation175_spill] sm:$0xff]  ;;  %v7186_v34 = vadd.f32 %v7185_v1, %v7073_v42  ;;  %v19948_v42 = vld [vmem:[#allocation177_spill] sm:$0xff] }
 0xb9a   :  { %v4231_v59 = vadd.f32 %v19943_v61, %v4018_v17  ;;  %v6804_v45 = vadd.f32 %v4409_v14, %v19944_v13 }
 0xb9b   :  { %v7497_v9 = vpop.f32.mrf.mxu1  ;;  %v7285_v40 = vadd.f32 %v7284_v22, %v7186_v34 }
 0xb9c   :  { %v4416_v56 = vadd.f32 %v19945_v32, %v4231_v59 }
 0xb9d   :  { %v7499_v8 = vpop.f32.mrf.mxu1 }
 0xb9e   :  { %v6806_v24 = vadd.f32 %v4416_v56, %v19947_v54 }
 0xb9f   :  { %v7504_v55 = vpop.f32.mrf.mxu1 }
 0xba3   :  { %v7402_v23 = vpop.f32.mrf.mxu0 }
 0xba4   :  { %v7403_v38 = vadd.f32 %v7402_v23, %v7274_v46  ;;  %v7506_v46 = vpop.f32.mrf.mxu1 }
 0xba5   :  { %v7404_v0 = vpop.f32.mrf.mxu0 }
 0xba6   :  { %v7498_v36 = vadd.f32 %v7497_v9, %v7403_v38  ;;  %v7405_v31 = vadd.f32 %v7404_v0, %v7276_v4 }
 0xba7   :  { %v7409_v44 = vpop.f32.mrf.mxu0 }
 0xba8   :  { %v7509_v62 = vadd.f32 %v7498_v36, %v19946_v12  ;;  %v7500_v20 = vadd.f32 %v7499_v8, %v7405_v31  ;;  %v7410_v52 = vadd.f32 %v7409_v44, %v7283_v37 }
 0xba9   :  { %v7411_v17 = vpop.f32.mrf.mxu0 }
 0xbaa   :  { %v7510_v61 = vadd.f32 %v7500_v20, %v6804_v45  ;;  %v7505_v63 = vadd.f32 %v7504_v55, %v7410_v52  ;;  %v7412_v1 = vadd.f32 %v7411_v17, %v7285_v40 }
 0xbac   :  { %v12184_v9 = vmul.f32 -1.442695, %v7510_v61  ;;  %v7511_v23 = vadd.f32 %v7505_v63, %v19948_v42  ;;  %v7507_v14 = vadd.f32 %v7506_v46, %v7412_v1  ;;  %v12183_v63 = vmul.f32 -1.442695, %v7509_v62 }
 0xbae   :  { %13146 = vpow2.f32 %v12184_v9  ;;  %v7512_v59 = vadd.f32 %v7507_v14, %v6806_v24  ;;  %v12185_v32 = vmul.f32 -1.442695, %v7511_v23 }
 0xbb0   :  { %v12186_v38 = vmul.f32 -1.442695, %v7512_v59 }
 0xbb2   :  { %13148 = vpow2.f32 %v12186_v38 }
 0xbbb   :  { %v13147_v4 = vpop.eup %13146 }
 0xbbc   :  { %v7526_v0 = vadd.f32 1.0, %v13147_v4 }
 0xbbe   :  { %13150 = vrcp.f32 %v7526_v0 }
 0xbbf   :  { %v13149_v37 = vpop.eup %13148 }
 0xbc0   :  { %v7528_v22 = vadd.f32 1.0, %v13149_v37 }
 0xbc2   :  { %13152 = vrcp.f32 %v7528_v22 }
 0xbc3   :  { %13154 = vpow2.f32 %v12183_v63 }
 0xbc4   :  { %13156 = vpow2.f32 %v12185_v32 }
 0xbcb   :  { %v13151_v8 = vpop.eup %13150 }
 0xbcc   :  { %v7537_v34 = vmul.f32 2.0, %v13151_v8 }
 0xbce   :  { %v12187_v36 = vadd.f32 -1.0, %v7537_v34 }
 0xbcf   :  { %v13153_v31 = vpop.eup %13152 }
 0xbd0   :  { %7545 = vrot.lane.b32.xlu0 %v12187_v36, %s13401_s5  ;;  %v7538_v13 = vmul.f32 2.0, %v13153_v31  ;;  %v13155_v56 = vpop.eup %13154 }
 0xbd1   :  { %v7525_v55 = vadd.f32 1.0, %v13155_v56  ;;  %v13157_v44 = vpop.eup %13156  ;;  %v19949_v56 = vld [vmem:[#allocation81_spill] sm:$0xff] }
 0xbd2   :  { %v12188_v45 = vadd.f32 -1.0, %v7538_v13  ;;  %v7527_v12 = vadd.f32 1.0, %v13157_v44  ;;  %v19951_v44 = vld [vmem:[#allocation37_spill] sm:$0xff] }
 0xbd3   :  { %13158 = vrcp.f32 %v7525_v55  ;;  %v19950_v55 = vld [vmem:[#allocation50_spill] sm:$0xff] }
 0xbd4   :  { %7547 = vrot.lane.b32.xlu1 %v12188_v45, %s13401_s5  ;;  %13160 = vrcp.f32 %v7527_v12  ;;  %v19952_v12 = vld [vmem:[#allocation16_spill] sm:$0xff] }
 0xbe0   :  { %v13159_v20 = vpop.eup %13158 }
 0xbe1   :  { %v13161_v17 = vpop.eup %13160  ;;  %v7541_v62 = vmul.f32 %v13159_v20, %v17155_v57 }
 0xbe2   :  { %v7542_v24 = vmul.f32 %v13161_v17, %v17159_v25 }
 0xc42   :  { %v7546_v52 = vpop.permute.xlu0 %7545 }
 0xc43   :  { %v7551_v40 = vmul.f32 %v13159_v20, %v7546_v52  ;;  %v19953_v20 = vld [vmem:[#allocation42_spill] sm:$0xff]  ;;  %v19954_v52 = vld [vmem:[#allocation71_spill] sm:$0xff] }
 0xc45   :  { %7555 = vrot.lane.b32.xlu0 %v7551_v40, %s13401_s5  ;;  %v19955_v40 = vld [vmem:[#allocation75_spill] sm:$0xff] }
 0xc46   :  { %v7548_v61 = vpop.permute.xlu1 %7547 }
 0xc47   :  { %v7552_v1 = vmul.f32 %v13161_v17, %v7548_v61  ;;  %v19956_v17 = vld [vmem:[#allocation32_spill] sm:$0xff] }
 0xc48   :  { %v19957_v61 = vld [vmem:[#allocation84_spill] sm:$0xff] }
 0xc49   :  { %7557 = vrot.lane.b32.xlu1 %v7552_v1, %s13401_s5  ;;  %v19958_v1 = vld [vmem:[#allocation48_spill] sm:$0xff] }
 0xcb7   :  { %v7556_v46 = vpop.permute.xlu0 %7555 }
 0xcb8   :  { %v17311_v54 = vadd.f32 %v7556_v46, %v7541_v62  ;;  %v19959_v62 = vld [vmem:[#allocation61_spill] sm:$0xff]  ;;  %v19960_v46 = vld [vmem:[#allocation70_spill] sm:$0xff] }
 0xcba   :  { %13162 = vtanh.f32 %v17311_v54 }
 0xcbb   :  { %v7558_v9 = vpop.permute.xlu1 %7557 }
 0xcbc   :  { %v17315_v42 = vadd.f32 %v7558_v9, %v7542_v24  ;;  %v19961_v24 = vld [vmem:[#allocation49_spill] sm:$0xff]  ;;  %v19962_v9 = vld [vmem:[#allocation72_spill] sm:$0xff] }
 0xcbe   :  { %13164 = vtanh.f32 %v17315_v42 }
 0xcc7   :  { %v13163_v23 = vpop.eup %13162 }
 0xcc8   :  { %7567 = vrot.lane.b32.xlu0 %v13163_v23, %s13401_s5  ;;  %v19963_v23 = vld [vmem:[#allocation41_spill] sm:$0xff] }
 0xccb   :  { %v13165_v14 = vpop.eup %13164 }
 0xccc   :  { %7569 = vrot.lane.b32.xlu1 %v13165_v14, %s13401_s5  ;;  %v19964_v14 = vld [vmem:[#allocation96_spill] sm:$0xff] }
 0xd3a   :  { %v7568_v59 = vpop.permute.xlu0 %7567 }
 0xd3b   :  { %v7573_v57 = vmul.f32 %v13151_v8, %v7568_v59  ;;  %v19965_v59 = vld [vmem:[#allocation88_spill] sm:$0xff] }
 0xd3d   :  { %7575 = vst.msk [vmem:[#allocation2 + $0x30] sm:$0xff] %vm1847_vm0, %v7573_v57  ;;  %v7584_v38 = vsel %vm4480_vm1, %v7573_v57, 0 }
 0xd3e   :  { %7577 = vst.msk [vmem:[#allocation2 + $0x40] sm:$0xff] %vm5248_vm2, %v7573_v57  ;;  %v17323_v25 = vand.u32 4294901760, %v7584_v38  ;;  %v7570_v4 = vpop.permute.xlu1 %7569  ;;  %v19966_v57 = vld [vmem:[#allocation83_spill] sm:$0xff] }
 0xd3f   :  { %v7574_v0 = vmul.f32 %v13153_v31, %v7570_v4  ;;  %v19968_v4 = vld [vmem:[#allocation25_spill] sm:$0xff] }
 0xd40   :  { %v7671_v37 = vsub.f32 %v7584_v38, %v17323_v25  ;;  %7838 = vmatmul.mubr.f32.vlgmr.msra.gmra.mxu1 %v17323_v25  ;;  %v19967_v38 = vld [vmem:[#allocation47_spill] sm:$0xff] }
 0xd41   :  { %7576 = vst.msk [vmem:[#allocation2 + $0x38] sm:$0xff] %vm1847_vm0, %v7574_v0  ;;  %v7587_v22 = vsel %vm4480_vm1, %v7574_v0, 0  ;;  %7983 = vmatpush1.msra.mxu1 %v15879_v7  ;;  %7843 = vmatprep.mubr.f32.mxu1 %v19361_v29 }
 0xd42   :  { %7578 = vst.msk [vmem:[#allocation2 + $0x48] sm:$0xff] %vm5248_vm2, %v7574_v0  ;;  %v7672_v8 = vand.u32 4294901760, %v7671_v37  ;;  %v17332_v34 = vand.u32 4294901760, %v7587_v22  ;;  %7985 = vmatprep.subr.mxu1 %v15881_v41  ;;  %v19969_v0 = vld [vmem:[#allocation15_spill] sm:$0xff] }
 0xd43   :  { %7987 = vmatpush1.msra.mxu1 %v15902_v27 }
 0xd44   :  { %v7673_v36 = vsub.f32 %v7671_v37, %v7672_v8  ;;  %v7682_v31 = vsub.f32 %v7587_v22, %v17332_v34  ;;  %7989 = vmatprep.subr.mxu1 %v15908_v30  ;;  %7845 = vmatmul.mubr.f32.gmra.mxu1 %v17332_v34  ;;  %v19971_v22 = vld [vmem:[#allocation53_spill] sm:$0xff] }
 0xd45   :  { %7991 = vmatpush1.msra.mxu1 %v15940_v28  ;;  %8044 = vmatprep.mubr.f32.mxu1 %v19361_v29 }
 0xd46   :  { %v7674_v13 = vand.u32 4294901760, %v7673_v36  ;;  %7993 = vmatprep.subr.mxu1 %v15951_v39  ;;  %v7683_v45 = vand.u32 4294901760, %v7682_v31  ;;  %v19973_v36 = vld [vmem:[#allocation95_spill] sm:$0xff] }
 0xd47   :  { %7995 = vmatpush1.msra.mxu1 %v15956_v58 }
 0xd48   :  { %7997 = vmatprep.subr.mxu1 %v15991_v5  ;;  %7675 = vmatmul.mubr.f32.vlgmr.msra.gmra.mxu0 %v7674_v13  ;;  %v7684_v63 = vsub.f32 %v7682_v31, %v7683_v45  ;;  %v19975_v13 = vld [vmem:[#allocation55_spill] sm:$0xff] }
 0xd49   :  { %7872 = vmatpush1.msra.mxu0 %v19654_v26  ;;  %7999 = vmatpush1.msra.mxu1 %v15999_v60 }
 0xd4a   :  { %7875 = vmatprep.subr.mxu0 %v19655_v49  ;;  %8001 = vmatprep.subr.mxu1 %v16052_v51  ;;  %v7685_v32 = vand.u32 4294901760, %v7684_v63  ;;  %v19978_v63 = vld [vmem:[#allocation99_spill] sm:$0xff] }
 0xd4b   :  { %7878 = vmatpush1.msra.mxu0 %v19781_v19  ;;  %8003 = vmatpush1.msra.mxu1 %v19782_v43 }
 0xd4c   :  { %7680 = vmatprep.mubr.f32.mxu0 %v19361_v29  ;;  %7881 = vmatprep.subr.mxu0 %v19783_v2 }
 0xd4d   :  { %8005 = vmatprep.subr.mxu1 %v19784_v48  ;;  %7686 = vmatmul.mubr.f32.gmra.mxu0 %v7685_v32  ;;  %v19979_v32 = vld [vmem:[#allocation35_spill] sm:$0xff] }
 0xd4e   :  { %7884 = vmatpush1.msra.mxu0 %v19785_v50  ;;  %8007 = vmatpush1.msra.mxu1 %v19786_v53 }
 0xd4f   :  { %7887 = vmatprep.subr.mxu0 %v19787_v35  ;;  %8009 = vmatprep.subr.mxu1 %v19788_v16 }
 0xd50   :  { %7890 = vmatpush1.msra.mxu0 %v19789_v6  ;;  %8011 = vmatpush1.msra.mxu1 %v19790_v10 }
 0xd51   :  { %7893 = vmatprep.subr.mxu0 %v19791_v21  ;;  %8048 = vmatmul.mubr.f32.vlgmr.msra.gmra.mxu1 %v7672_v8  ;;  %v19972_v8 = vld [vmem:[#allocation29_spill] sm:$0xff] }
 0xd52   :  { %8207 = vmatprep.subr.mxu1 %v19792_v15  ;;  %7896 = vmatpush1.msra.mxu0 %v19793_v11 }
 0xd53   :  { %8209 = vmatpush1.msra.mxu1 %v15879_v7  ;;  %7899 = vmatprep.subr.mxu0 %v19843_v18 }
 0xd54   :  { %8211 = vmatprep.subr.mxu1 %v15881_v41  ;;  %7902 = vmatpush1.msra.mxu0 %v19844_v3 }
 0xd55   :  { %8053 = vmatprep.mubr.f32.mxu1 %v19361_v29  ;;  %8213 = vmatpush1.msra.mxu1 %v15902_v27 }
 0xd56   :  { %7905 = vmatprep.subr.mxu0 %v19845_v47  ;;  %8057 = vmatmul.mubr.f32.gmra.mxu1 %v7683_v45  ;;  %v19976_v45 = vld [vmem:[#allocation73_spill] sm:$0xff] }
 0xd57   :  { %8215 = vmatprep.subr.mxu1 %v15908_v30  ;;  %7908 = vmatpush1.msra.mxu0 %v19846_v33 }
 0xd58   :  { %8217 = vmatpush1.msra.mxu1 %v15940_v28  ;;  %7911 = vmatprep.subr.mxu0 %v19949_v56 }
 0xd59   :  { %8219 = vmatprep.subr.mxu1 %v15951_v39  ;;  %7914 = vmatpush1.msra.mxu0 %v19950_v55  ;;  %v19992_v55 = vld [vmem:[#allocation131_spill] sm:$0xff] }
 0xd5a   :  { %7947 = vmatprep.mubr.f32.mxu0 %v19361_v29  ;;  %8221 = vmatpush1.msra.mxu1 %v15956_v58 }
 0xd5b   :  { %7950 = vmatmul.mubr.f32.vlgmr.msra.gmra.mxu0 %v7671_v37  ;;  %8082 = vmatprep.subr.mxu0 %v19951_v44  ;;  %v19970_v37 = vld [vmem:[#allocation93_spill] sm:$0xff] }
 0xd5c   :  { %8223 = vmatprep.subr.mxu1 %v15991_v5  ;;  %8086 = vmatpush1.msra.mxu0 %v19952_v12  ;;  %v19991_v12 = vld [vmem:[#allocation166_spill] sm:$0xff] }
 0xd5d   :  { %8225 = vmatpush1.msra.mxu1 %v15999_v60  ;;  %8090 = vmatprep.subr.mxu0 %v19953_v20 }
 0xd5e   :  { %8227 = vmatprep.subr.mxu1 %v16052_v51  ;;  %7955 = vmatprep.mubr.f32.mxu0 %v19361_v29 }
 0xd5f   :  { %8094 = vmatpush1.msra.mxu0 %v19954_v52  ;;  %8229 = vmatpush1.msra.mxu1 %v19782_v43  ;;  %v19990_v52 = vld [vmem:[#allocation129_spill] sm:$0xff] }
 0xd60   :  { %7958 = vmatmul.mubr.f32.gmra.mxu0 %v7682_v31  ;;  %8098 = vmatprep.subr.mxu0 %v19955_v40  ;;  %v19974_v31 = vld [vmem:[#allocation62_spill] sm:$0xff] }
 0xd61   :  { %8231 = vmatprep.subr.mxu1 %v19784_v48  ;;  %8102 = vmatpush1.msra.mxu0 %v19956_v17  ;;  %v19988_v17 = vld [vmem:[#allocation103_spill] sm:$0xff] }
 0xd62   :  { %8233 = vmatpush1.msra.mxu1 %v19786_v53  ;;  %8106 = vmatprep.subr.mxu0 %v19957_v61  ;;  %v19987_v61 = vld [vmem:[#allocation106_spill] sm:$0xff] }
 0xd63   :  { %8235 = vmatprep.subr.mxu1 %v19788_v16  ;;  %8110 = vmatpush1.msra.mxu0 %v19958_v1  ;;  %v19986_v1 = vld [vmem:[#allocation132_spill] sm:$0xff] }
 0xd64   :  { %8237 = vmatpush1.msra.mxu1 %v19790_v10  ;;  %8270 = vmatprep.mubr.f32.mxu1 %v19361_v29 }
 0xd65   :  { %8114 = vmatprep.subr.mxu0 %v19959_v62  ;;  %8272 = vmatmul.mubr.f32.vlgmr.msra.gmra.mxu1 %v17323_v25 }
 0xd66   :  { %8118 = vmatpush1.msra.mxu0 %v19960_v46  ;;  %8277 = vmatprep.mubr.f32.mxu1 %v19361_v29 }
 0xd67   :  { %8122 = vmatprep.subr.mxu0 %v19961_v24  ;;  %8175 = vmatprep.mubr.f32.mxu0 %v19361_v29  ;;  %v19985_v24 = vld [vmem:[#allocation101_spill] sm:$0xff] }
 0xd68   :  { %8126 = vmatpush1.msra.mxu0 %v19962_v9  ;;  %8489 = vmatprep.subr.mxu1 %v19963_v23  ;;  %v19984_v9 = vld [vmem:[#allocation104_spill] sm:$0xff] }
 0xd69   :  { %8130 = vmatprep.subr.mxu0 %v19964_v14  ;;  %8279 = vmatmul.mubr.f32.gmra.mxu1 %v17332_v34 }
 0xd6a   :  { %8134 = vmatpush1.msra.mxu0 %v19965_v59  ;;  %8495 = vmatpush1.msra.mxu1 %v19966_v57 }
 0xd6b   :  { %8138 = vmatprep.subr.mxu0 %v19967_v38  ;;  %8501 = vmatprep.subr.mxu1 %v19968_v4 }
 0xd6c   :  { %8142 = vmatpush1.msra.mxu0 %v19969_v0  ;;  %8507 = vmatpush1.msra.mxu1 %v19970_v37 }
 0xd6d   :  { %8177 = vmatmul.mubr.f32.vlgmr.msra.gmra.mxu0 %v17323_v25  ;;  %8513 = vmatprep.subr.mxu1 %v19971_v22  ;;  %v19977_v25 = vld [vmem:[#allocation31_spill] sm:$0xff] }
 0xd6e   :  { %8182 = vmatprep.mubr.f32.mxu0 %v19361_v29  ;;  %8519 = vmatpush1.msra.mxu1 %v19972_v8 }
 0xd6f   :  { %8525 = vmatprep.subr.mxu1 %v19973_v36  ;;  %8382 = vmatprep.subr.mxu0 %v19792_v15 }
 0xd70   :  { %8531 = vmatpush1.msra.mxu1 %v19974_v31  ;;  %8384 = vmatpush1.msra.mxu0 %v15879_v7  ;;  %v19980_v31 = vld [vmem:[#allocation19_spill] sm:$0xff] }
 0xd71   :  { %8184 = vmatmul.mubr.f32.gmra.mxu0 %v17332_v34  ;;  %8537 = vmatprep.subr.mxu1 %v19975_v13  ;;  %v19981_v34 = vld [vmem:[#allocation89_spill] sm:$0xff] }
 0xd72   :  { %8543 = vmatpush1.msra.mxu1 %v19976_v45  ;;  %8386 = vmatprep.subr.mxu0 %v15881_v41  ;;  %v19982_v45 = vld [vmem:[#allocation91_spill] sm:$0xff] }
 0xd73   :  { %8549 = vmatprep.subr.mxu1 %v19977_v25  ;;  %8388 = vmatpush1.msra.mxu0 %v15902_v27 }
 0xd74   :  { %8555 = vmatpush1.msra.mxu1 %v19978_v63  ;;  %8390 = vmatprep.subr.mxu0 %v15908_v30 }
 0xd75   :  { %8561 = vmatprep.subr.mxu1 %v19979_v32  ;;  %8392 = vmatpush1.msra.mxu0 %v15940_v28 }
 0xd76   :  { %8567 = vmatpush1.msra.mxu1 %v19980_v31  ;;  %8394 = vmatprep.subr.mxu0 %v15951_v39 }
 0xd77   :  { %8573 = vmatprep.subr.mxu1 %v19981_v34  ;;  %8396 = vmatpush1.msra.mxu0 %v15956_v58 }
 0xd78   :  { %8579 = vmatpush1.msra.mxu1 %v19982_v45  ;;  %8398 = vmatprep.subr.mxu0 %v15991_v5  ;;  %v19983_v45 = vld [vmem:[#allocation12_spill] sm:$0xff] }
 0xd79   :  { %8612 = vmatprep.mubr.f32.mxu1 %v19361_v29  ;;  %8757 = vmatprep.subr.mxu1 %v19792_v15 }
 0xd7a   :  { %8400 = vmatpush1.msra.mxu0 %v15999_v60  ;;  %8445 = vmatprep.mubr.f32.mxu0 %v19361_v29 }
 0xd7b   :  { %8402 = vmatprep.subr.mxu0 %v16052_v51 }
 0xd7c   :  { %8404 = vmatpush1.msra.mxu0 %v19782_v43 }
 0xd7d   :  { %8406 = vmatprep.subr.mxu0 %v19784_v48 }
 0xd7e   :  { %8408 = vmatpush1.msra.mxu0 %v19786_v53 }
 0xd7f   :  { %8410 = vmatprep.subr.mxu0 %v19788_v16 }
 0xd80   :  { %8412 = vmatpush1.msra.mxu0 %v19790_v10 }
 0xd81   :  { %8645 = vmatprep.subr.mxu0 %v19983_v45  ;;  %v3583_v45 = vadd.f32 %v19985_v24, %v19984_v9 }
 0xe00   :  { %v7839_v34 = vpop.f32.mrf.mxu1 }
 0xe02   :  { %v7841_v32 = vpop.f32.mrf.mxu1 }
 0xe04   :  { %v7846_v13 = vpop.f32.mrf.mxu1 }
 0xe06   :  { %v7848_v22 = vpop.f32.mrf.mxu1 }
 0xe08   :  { %v7676_v31 = vpop.f32.mrf.mxu0 }
 0xe09   :  { %v7840_v63 = vadd.f32 %v7839_v34, %v7676_v31  ;;  %v3783_v31 = vadd.f32 %v19986_v1, %v3583_v45 }
 0xe0a   :  { %v7678_v25 = vpop.f32.mrf.mxu0 }
 0xe0b   :  { %v3991_v20 = vadd.f32 %v19990_v52, %v3783_v31 }
 0xe0d   :  { %v7687_v36 = vpop.f32.mrf.mxu0 }
 0xe0e   :  { %v7847_v8 = vadd.f32 %v7846_v13, %v7687_v36  ;;  %v3590_v36 = vadd.f32 %v19988_v17, %v19987_v61  ;;  %v19989_v13 = vld [vmem:[#allocation134_spill] sm:$0xff] }
 0xe0f   :  { %v7689_v37 = vpop.f32.mrf.mxu0 }
 0xe10   :  { %v3791_v40 = vadd.f32 %v19989_v13, %v3590_v36 }
 0xe11   :  { %v8049_v0 = vpop.f32.mrf.mxu1 }
 0xe12   :  { %v4000_v24 = vadd.f32 %v19992_v55, %v3791_v40  ;;  %v19997_v40 = vld [vmem:[#allocation168_spill] sm:$0xff] }
 0xe13   :  { %v8051_v59 = vpop.f32.mrf.mxu1 }
 0xe16   :  { %v8058_v62 = vpop.f32.mrf.mxu1 }
 0xe1b   :  { %v7951_v4 = vpop.f32.mrf.mxu0 }
 0xe1c   :  { %v7952_v38 = vadd.f32 %v7951_v4, %v7840_v63  ;;  %v8060_v4 = vpop.f32.mrf.mxu1  ;;  %v7842_v63 = vadd.f32 %v7841_v32, %v7678_v25  ;;  %v19995_v32 = vld [vmem:[#allocation82_spill] sm:$0xff] }
 0xe1d   :  { %v7953_v57 = vpop.f32.mrf.mxu0 }
 0xe1e   :  { %v8050_v14 = vadd.f32 %v8049_v0, %v7952_v38  ;;  %v4210_v38 = vadd.f32 %v19991_v12, %v3991_v20  ;;  %v7954_v44 = vadd.f32 %v7953_v57, %v7842_v63  ;;  %v19996_v20 = vld [vmem:[#allocation164_spill] sm:$0xff] }
 0xe20   :  { %v7959_v23 = vpop.f32.mrf.mxu0  ;;  %v8052_v13 = vadd.f32 %v8051_v59, %v7954_v44  ;;  %v19998_v44 = vld [vmem:[#allocation65_spill] sm:$0xff] }
 0xe21   :  { %v7960_v46 = vadd.f32 %v7959_v23, %v7847_v8  ;;  %v7849_v23 = vadd.f32 %v7848_v22, %v7689_v37  ;;  %v19993_v8 = vld [vmem:[#allocation161_spill] sm:$0xff] }
 0xe22   :  { %v7961_v9 = vpop.f32.mrf.mxu0  ;;  %v4395_v1 = vadd.f32 %v19993_v8, %v4210_v38 }
 0xe23   :  { %v8059_v34 = vadd.f32 %v8058_v62, %v7960_v46  ;;  %v19994_v62 = vld [vmem:[#allocation169_spill] sm:$0xff]  ;;  %v7962_v61 = vadd.f32 %v7961_v9, %v7849_v23  ;;  %v19999_v23 = vld [vmem:[#allocation171_spill] sm:$0xff] }
 0xe24   :  { %v4217_v46 = vadd.f32 %v19994_v62, %v4000_v24  ;;  %v7580_v12 = vadd.f32 %v4395_v1, %v19995_v32 }
 0xe25   :  { %v8273_v0 = vpop.f32.mrf.mxu1  ;;  %v8061_v8 = vadd.f32 %v8060_v4, %v7962_v61 }
 0xe26   :  { %v4402_v57 = vadd.f32 %v19996_v20, %v4217_v46 }
 0xe27   :  { %v8275_v45 = vpop.f32.mrf.mxu1 }
 0xe28   :  { %v7582_v59 = vadd.f32 %v4402_v57, %v19998_v44 }
 0xe29   :  { %v8280_v63 = vpop.f32.mrf.mxu1 }
 0xe2d   :  { %v8178_v17 = vpop.f32.mrf.mxu0 }
 0xe2e   :  { %v8179_v36 = vadd.f32 %v8178_v17, %v8050_v14  ;;  %v8282_v14 = vpop.f32.mrf.mxu1 }
 0xe2f   :  { %v8180_v52 = vpop.f32.mrf.mxu0 }
 0xe30   :  { %v8274_v31 = vadd.f32 %v8273_v0, %v8179_v36  ;;  %v8181_v25 = vadd.f32 %v8180_v52, %v8052_v13 }
 0xe31   :  { %v8185_v55 = vpop.f32.mrf.mxu0 }
 0xe32   :  { %v8285_v37 = vadd.f32 %v8274_v31, %v19997_v40  ;;  %v8276_v22 = vadd.f32 %v8275_v45, %v8181_v25  ;;  %v8186_v38 = vadd.f32 %v8185_v55, %v8059_v34 }
 0xe33   :  { %v8187_v24 = vpop.f32.mrf.mxu0 }
 0xe34   :  { %v8286_v62 = vadd.f32 %v8276_v22, %v7580_v12  ;;  %v8281_v56 = vadd.f32 %v8280_v63, %v8186_v38  ;;  %v8188_v9 = vadd.f32 %v8187_v24, %v8061_v8 }
 0xe36   :  { %v12190_v0 = vmul.f32 -1.442695, %v8286_v62  ;;  %v8287_v17 = vadd.f32 %v8281_v56, %v19999_v23  ;;  %v8283_v1 = vadd.f32 %v8282_v14, %v8188_v9  ;;  %v12189_v56 = vmul.f32 -1.442695, %v8285_v37 }
 0xe38   :  { %13166 = vpow2.f32 %v12190_v0  ;;  %v8288_v46 = vadd.f32 %v8283_v1, %v7582_v59  ;;  %v12191_v20 = vmul.f32 -1.442695, %v8287_v17 }
 0xe3a   :  { %v12192_v36 = vmul.f32 -1.442695, %v8288_v46 }
 0xe3c   :  { %13168 = vpow2.f32 %v12192_v36 }
 0xe45   :  { %v13167_v13 = vpop.eup %13166 }
 0xe46   :  { %v8302_v52 = vadd.f32 1.0, %v13167_v13 }
 0xe48   :  { %13170 = vrcp.f32 %v8302_v52 }
 0xe49   :  { %v13169_v34 = vpop.eup %13168 }
 0xe4a   :  { %v8304_v4 = vadd.f32 1.0, %v13169_v34 }
 0xe4c   :  { %13172 = vrcp.f32 %v8304_v4 }
 0xe4d   :  { %13174 = vpow2.f32 %v12189_v56 }
 0xe4e   :  { %13176 = vpow2.f32 %v12191_v20 }
 0xe55   :  { %v13171_v45 = vpop.eup %13170 }
 0xe56   :  { %v8313_v61 = vmul.f32 2.0, %v13171_v45 }
 0xe58   :  { %v12193_v31 = vadd.f32 -1.0, %v8313_v61 }
 0xe59   :  { %v13173_v25 = vpop.eup %13172 }
 0xe5a   :  { %8321 = vrot.lane.b32.xlu0 %v12193_v31, %s13401_s5  ;;  %v8314_v32 = vmul.f32 2.0, %v13173_v25  ;;  %v13175_v57 = vpop.eup %13174 }
 0xe5b   :  { %v8301_v63 = vadd.f32 1.0, %v13175_v57  ;;  %v13177_v55 = vpop.eup %13176  ;;  %v20000_v57 = vld [vmem:[#allocation81_spill] sm:$0xff] }
 0xe5c   :  { %v12194_v12 = vadd.f32 -1.0, %v8314_v32  ;;  %v8303_v40 = vadd.f32 1.0, %v13177_v55  ;;  %v20002_v55 = vld [vmem:[#allocation37_spill] sm:$0xff] }
 0xe5d   :  { %13178 = vrcp.f32 %v8301_v63  ;;  %v20001_v63 = vld [vmem:[#allocation50_spill] sm:$0xff] }
 0xe5e   :  { %8323 = vrot.lane.b32.xlu1 %v12194_v12, %s13401_s5  ;;  %13180 = vrcp.f32 %v8303_v40  ;;  %v20003_v40 = vld [vmem:[#allocation16_spill] sm:$0xff] }
 0xe6a   :  { %v13179_v22 = vpop.eup %13178 }
 0xe6b   :  { %v13181_v24 = vpop.eup %13180  ;;  %v8317_v37 = vmul.f32 %v13179_v22, %v17311_v54 }
 0xe6c   :  { %v8318_v59 = vmul.f32 %v13181_v24, %v17315_v42 }
 0xecc   :  { %v8322_v38 = vpop.permute.xlu0 %8321 }
 0xecd   :  { %v8327_v8 = vmul.f32 %v13179_v22, %v8322_v38  ;;  %v20004_v22 = vld [vmem:[#allocation42_spill] sm:$0xff]  ;;  %v20005_v38 = vld [vmem:[#allocation71_spill] sm:$0xff] }
 0xecf   :  { %8331 = vrot.lane.b32.xlu0 %v8327_v8, %s13401_s5  ;;  %v20006_v8 = vld [vmem:[#allocation75_spill] sm:$0xff] }
 0xed0   :  { %v8324_v62 = vpop.permute.xlu1 %8323 }
 0xed1   :  { %v8328_v9 = vmul.f32 %v13181_v24, %v8324_v62  ;;  %v20007_v24 = vld [vmem:[#allocation32_spill] sm:$0xff] }
 0xed2   :  { %v20008_v62 = vld [vmem:[#allocation84_spill] sm:$0xff] }
 0xed3   :  { %8333 = vrot.lane.b32.xlu1 %v8328_v9, %s13401_s5  ;;  %v20009_v9 = vld [vmem:[#allocation48_spill] sm:$0xff] }
 0xf41   :  { %v8332_v14 = vpop.permute.xlu0 %8331 }
 0xf42   :  { %v17467_v44 = vadd.f32 %v8332_v14, %v8317_v37  ;;  %v20010_v37 = vld [vmem:[#allocation61_spill] sm:$0xff]  ;;  %v20011_v14 = vld [vmem:[#allocation70_spill] sm:$0xff] }
 0xf44   :  { %13182 = vtanh.f32 %v17467_v44 }
 0xf45   :  { %v8334_v0 = vpop.permute.xlu1 %8333 }
 0xf46   :  { %v17471_v23 = vadd.f32 %v8334_v0, %v8318_v59  ;;  %v20012_v59 = vld [vmem:[#allocation49_spill] sm:$0xff]  ;;  %v20013_v0 = vld [vmem:[#allocation72_spill] sm:$0xff] }
 0xf48   :  { %13184 = vtanh.f32 %v17471_v23 }
 0xf51   :  { %v13183_v17 = vpop.eup %13182 }
 0xf52   :  { %8343 = vrot.lane.b32.xlu0 %v13183_v17, %s13401_s5  ;;  %v20014_v17 = vld [vmem:[#allocation41_spill] sm:$0xff] }
 0xf55   :  { %v13185_v1 = vpop.eup %13184 }
 0xf56   :  { %8345 = vrot.lane.b32.xlu1 %v13185_v1, %s13401_s5  ;;  %v20015_v1 = vld [vmem:[#allocation96_spill] sm:$0xff] }
 0xfc4   :  { %v8344_v46 = vpop.permute.xlu0 %8343 }
 0xfc5   :  { %v8349_v54 = vmul.f32 %v13171_v45, %v8344_v46  ;;  %v20016_v46 = vld [vmem:[#allocation88_spill] sm:$0xff] }
 0xfc7   :  { %8351 = vst.msk [vmem:[#allocation2 + $0x40] sm:$0xff] %vm1847_vm0, %v8349_v54  ;;  %v8360_v36 = vsel %vm4480_vm1, %v8349_v54, 0 }
 0xfc8   :  { %8353 = vst.msk [vmem:[#allocation2 + $0x30] sm:$0xff] %vm5248_vm2, %v8349_v54  ;;  %v17479_v42 = vand.u32 4294901760, %v8360_v36  ;;  %v8346_v13 = vpop.permute.xlu1 %8345  ;;  %v20017_v54 = vld [vmem:[#allocation83_spill] sm:$0xff] }
 0xfc9   :  { %v8350_v52 = vmul.f32 %v13173_v25, %v8346_v13  ;;  %v20019_v13 = vld [vmem:[#allocation25_spill] sm:$0xff] }
 0xfca   :  { %v8447_v34 = vsub.f32 %v8360_v36, %v17479_v42  ;;  %8614 = vmatmul.mubr.f32.vlgmr.msra.gmra.mxu1 %v17479_v42  ;;  %v20018_v36 = vld [vmem:[#allocation47_spill] sm:$0xff] }
 0xfcb   :  { %8352 = vst.msk [vmem:[#allocation2 + $0x48] sm:$0xff] %vm1847_vm0, %v8350_v52  ;;  %v8363_v4 = vsel %vm4480_vm1, %v8350_v52, 0  ;;  %8759 = vmatpush1.msra.mxu1 %v15879_v7  ;;  %8619 = vmatprep.mubr.f32.mxu1 %v19361_v29 }
 0xfcc   :  { %8354 = vst.msk [vmem:[#allocation2 + $0x38] sm:$0xff] %vm5248_vm2, %v8350_v52  ;;  %v8448_v45 = vand.u32 4294901760, %v8447_v34  ;;  %v17488_v61 = vand.u32 4294901760, %v8363_v4  ;;  %8761 = vmatprep.subr.mxu1 %v15881_v41  ;;  %v20020_v52 = vld [vmem:[#allocation15_spill] sm:$0xff] }
 0xfcd   :  { %8763 = vmatpush1.msra.mxu1 %v15902_v27 }
 0xfce   :  { %v8449_v31 = vsub.f32 %v8447_v34, %v8448_v45  ;;  %v8458_v25 = vsub.f32 %v8363_v4, %v17488_v61  ;;  %8765 = vmatprep.subr.mxu1 %v15908_v30  ;;  %8621 = vmatmul.mubr.f32.gmra.mxu1 %v17488_v61  ;;  %v20022_v4 = vld [vmem:[#allocation53_spill] sm:$0xff] }
 0xfcf   :  { %8767 = vmatpush1.msra.mxu1 %v15940_v28  ;;  %8820 = vmatprep.mubr.f32.mxu1 %v19361_v29 }
 0xfd0   :  { %v8450_v32 = vand.u32 4294901760, %v8449_v31  ;;  %8769 = vmatprep.subr.mxu1 %v15951_v39  ;;  %v8459_v12 = vand.u32 4294901760, %v8458_v25  ;;  %v20024_v31 = vld [vmem:[#allocation95_spill] sm:$0xff] }
 0xfd1   :  { %8771 = vmatpush1.msra.mxu1 %v15956_v58 }
 0xfd2   :  { %8773 = vmatprep.subr.mxu1 %v15991_v5  ;;  %8451 = vmatmul.mubr.f32.vlgmr.msra.gmra.mxu0 %v8450_v32  ;;  %v8460_v56 = vsub.f32 %v8458_v25, %v8459_v12  ;;  %v20026_v32 = vld [vmem:[#allocation55_spill] sm:$0xff] }
 0xfd3   :  { %8648 = vmatpush1.msra.mxu0 %v19654_v26  ;;  %8775 = vmatpush1.msra.mxu1 %v15999_v60 }
 0xfd4   :  { %8651 = vmatprep.subr.mxu0 %v19655_v49  ;;  %8777 = vmatprep.subr.mxu1 %v16052_v51  ;;  %v8461_v20 = vand.u32 4294901760, %v8460_v56  ;;  %v20029_v56 = vld [vmem:[#allocation99_spill] sm:$0xff] }
 0xfd5   :  { %8654 = vmatpush1.msra.mxu0 %v19781_v19  ;;  %8779 = vmatpush1.msra.mxu1 %v19782_v43 }
 0xfd6   :  { %8456 = vmatprep.mubr.f32.mxu0 %v19361_v29  ;;  %8657 = vmatprep.subr.mxu0 %v19783_v2 }
 0xfd7   :  { %8781 = vmatprep.subr.mxu1 %v19784_v48  ;;  %8462 = vmatmul.mubr.f32.gmra.mxu0 %v8461_v20  ;;  %v20030_v20 = vld [vmem:[#allocation35_spill] sm:$0xff] }
 0xfd8   :  { %8660 = vmatpush1.msra.mxu0 %v19785_v50  ;;  %8783 = vmatpush1.msra.mxu1 %v19786_v53 }
 0xfd9   :  { %8663 = vmatprep.subr.mxu0 %v19787_v35  ;;  %8785 = vmatprep.subr.mxu1 %v19788_v16 }
 0xfda   :  { %8666 = vmatpush1.msra.mxu0 %v19789_v6  ;;  %8787 = vmatpush1.msra.mxu1 %v19790_v10 }
 0xfdb   :  { %8669 = vmatprep.subr.mxu0 %v19791_v21  ;;  %8824 = vmatmul.mubr.f32.vlgmr.msra.gmra.mxu1 %v8448_v45  ;;  %v20023_v45 = vld [vmem:[#allocation29_spill] sm:$0xff] }
 0xfdc   :  { %8983 = vmatprep.subr.mxu1 %v19792_v15  ;;  %8672 = vmatpush1.msra.mxu0 %v19793_v11 }
 0xfdd   :  { %8985 = vmatpush1.msra.mxu1 %v15879_v7  ;;  %8675 = vmatprep.subr.mxu0 %v19843_v18 }
 0xfde   :  { %8987 = vmatprep.subr.mxu1 %v15881_v41  ;;  %8678 = vmatpush1.msra.mxu0 %v19844_v3 }
 0xfdf   :  { %8829 = vmatprep.mubr.f32.mxu1 %v19361_v29  ;;  %8989 = vmatpush1.msra.mxu1 %v15902_v27 }
 0xfe0   :  { %8681 = vmatprep.subr.mxu0 %v19845_v47  ;;  %8833 = vmatmul.mubr.f32.gmra.mxu1 %v8459_v12  ;;  %v20027_v12 = vld [vmem:[#allocation73_spill] sm:$0xff] }
 0xfe1   :  { %8991 = vmatprep.subr.mxu1 %v15908_v30  ;;  %8684 = vmatpush1.msra.mxu0 %v19846_v33 }
 0xfe2   :  { %8993 = vmatpush1.msra.mxu1 %v15940_v28  ;;  %8687 = vmatprep.subr.mxu0 %v20000_v57 }
 0xfe3   :  { %8995 = vmatprep.subr.mxu1 %v15951_v39  ;;  %8690 = vmatpush1.msra.mxu0 %v20001_v63  ;;  %v20043_v63 = vld [vmem:[#allocation127_spill] sm:$0xff] }
 0xfe4   :  { %8723 = vmatprep.mubr.f32.mxu0 %v19361_v29  ;;  %8997 = vmatpush1.msra.mxu1 %v15956_v58 }
 0xfe5   :  { %8726 = vmatmul.mubr.f32.vlgmr.msra.gmra.mxu0 %v8447_v34  ;;  %8858 = vmatprep.subr.mxu0 %v20002_v55  ;;  %v20021_v34 = vld [vmem:[#allocation93_spill] sm:$0xff] }
 0xfe6   :  { %8999 = vmatprep.subr.mxu1 %v15991_v5  ;;  %8862 = vmatpush1.msra.mxu0 %v20003_v40  ;;  %v20042_v40 = vld [vmem:[#allocation160_spill] sm:$0xff] }
 0xfe7   :  { %9001 = vmatpush1.msra.mxu1 %v15999_v60  ;;  %8866 = vmatprep.subr.mxu0 %v20004_v22 }
 0xfe8   :  { %9003 = vmatprep.subr.mxu1 %v16052_v51  ;;  %8731 = vmatprep.mubr.f32.mxu0 %v19361_v29 }
 0xfe9   :  { %8870 = vmatpush1.msra.mxu0 %v20005_v38  ;;  %9005 = vmatpush1.msra.mxu1 %v19782_v43  ;;  %v20041_v38 = vld [vmem:[#allocation125_spill] sm:$0xff] }
 0xfea   :  { %8734 = vmatmul.mubr.f32.gmra.mxu0 %v8458_v25  ;;  %8874 = vmatprep.subr.mxu0 %v20006_v8  ;;  %v20025_v25 = vld [vmem:[#allocation62_spill] sm:$0xff] }
 0xfeb   :  { %9007 = vmatprep.subr.mxu1 %v19784_v48  ;;  %8878 = vmatpush1.msra.mxu0 %v20007_v24  ;;  %v20039_v24 = vld [vmem:[#allocation24_spill] sm:$0xff] }
 0xfec   :  { %9009 = vmatpush1.msra.mxu1 %v19786_v53  ;;  %8882 = vmatprep.subr.mxu0 %v20008_v62  ;;  %v20038_v62 = vld [vmem:[#allocation102_spill] sm:$0xff] }
 0xfed   :  { %9011 = vmatprep.subr.mxu1 %v19788_v16  ;;  %8886 = vmatpush1.msra.mxu0 %v20009_v9  ;;  %v20037_v9 = vld [vmem:[#allocation128_spill] sm:$0xff] }
 0xfee   :  { %9013 = vmatpush1.msra.mxu1 %v19790_v10  ;;  %9046 = vmatprep.mubr.f32.mxu1 %v19361_v29 }
 0xfef   :  { %8890 = vmatprep.subr.mxu0 %v20010_v37  ;;  %9048 = vmatmul.mubr.f32.vlgmr.msra.gmra.mxu1 %v17479_v42 }
 0xff0   :  { %8894 = vmatpush1.msra.mxu0 %v20011_v14  ;;  %9053 = vmatprep.mubr.f32.mxu1 %v19361_v29 }
 0xff1   :  { %8898 = vmatprep.subr.mxu0 %v20012_v59  ;;  %8951 = vmatprep.mubr.f32.mxu0 %v19361_v29  ;;  %v20036_v59 = vld [vmem:[#allocation33_spill] sm:$0xff] }
 0xff2   :  { %8902 = vmatpush1.msra.mxu0 %v20013_v0  ;;  %9265 = vmatprep.subr.mxu1 %v20014_v17  ;;  %v20035_v0 = vld [vmem:[#allocation100_spill] sm:$0xff] }
 0xff3   :  { %8906 = vmatprep.subr.mxu0 %v20015_v1  ;;  %9055 = vmatmul.mubr.f32.gmra.mxu1 %v17488_v61 }
 0xff4   :  { %8910 = vmatpush1.msra.mxu0 %v20016_v46  ;;  %9271 = vmatpush1.msra.mxu1 %v20017_v54 }
 0xff5   :  { %8914 = vmatprep.subr.mxu0 %v20018_v36  ;;  %9277 = vmatprep.subr.mxu1 %v20019_v13 }
 0xff6   :  { %8918 = vmatpush1.msra.mxu0 %v20020_v52  ;;  %9283 = vmatpush1.msra.mxu1 %v20021_v34 }
 0xff7   :  { %8953 = vmatmul.mubr.f32.vlgmr.msra.gmra.mxu0 %v17479_v42  ;;  %9289 = vmatprep.subr.mxu1 %v20022_v4  ;;  %v20028_v42 = vld [vmem:[#allocation31_spill] sm:$0xff] }
 0xff8   :  { %8958 = vmatprep.mubr.f32.mxu0 %v19361_v29  ;;  %9295 = vmatpush1.msra.mxu1 %v20023_v45 }
 0xff9   :  { %9301 = vmatprep.subr.mxu1 %v20024_v31  ;;  %9158 = vmatprep.subr.mxu0 %v19792_v15 }
 0xffa   :  { %9307 = vmatpush1.msra.mxu1 %v20025_v25  ;;  %9160 = vmatpush1.msra.mxu0 %v15879_v7  ;;  %v20031_v25 = vld [vmem:[#allocation19_spill] sm:$0xff] }
 0xffb   :  { %8960 = vmatmul.mubr.f32.gmra.mxu0 %v17488_v61  ;;  %9313 = vmatprep.subr.mxu1 %v20026_v32  ;;  %v20032_v61 = vld [vmem:[#allocation89_spill] sm:$0xff] }
 0xffc   :  { %9319 = vmatpush1.msra.mxu1 %v20027_v12  ;;  %9162 = vmatprep.subr.mxu0 %v15881_v41  ;;  %v20033_v12 = vld [vmem:[#allocation91_spill] sm:$0xff] }
 0xffd   :  { %9325 = vmatprep.subr.mxu1 %v20028_v42  ;;  %9164 = vmatpush1.msra.mxu0 %v15902_v27 }
 0xffe   :  { %9331 = vmatpush1.msra.mxu1 %v20029_v56  ;;  %9166 = vmatprep.subr.mxu0 %v15908_v30 }
 0xfff   :  { %9337 = vmatprep.subr.mxu1 %v20030_v20  ;;  %9168 = vmatpush1.msra.mxu0 %v15940_v28 }
0x1000   :  { %9343 = vmatpush1.msra.mxu1 %v20031_v25  ;;  %9170 = vmatprep.subr.mxu0 %v15951_v39 }
0x1001   :  { %9349 = vmatprep.subr.mxu1 %v20032_v61  ;;  %9172 = vmatpush1.msra.mxu0 %v15956_v58 }
0x1002   :  { %9355 = vmatpush1.msra.mxu1 %v20033_v12  ;;  %9174 = vmatprep.subr.mxu0 %v15991_v5  ;;  %v20034_v12 = vld [vmem:[#allocation12_spill] sm:$0xff] }
0x1003   :  { %9388 = vmatprep.mubr.f32.mxu1 %v19361_v29  ;;  %9533 = vmatprep.subr.mxu1 %v19792_v15 }
0x1004   :  { %9176 = vmatpush1.msra.mxu0 %v15999_v60  ;;  %9221 = vmatprep.mubr.f32.mxu0 %v19361_v29 }
0x1005   :  { %9178 = vmatprep.subr.mxu0 %v16052_v51 }
0x1006   :  { %9180 = vmatpush1.msra.mxu0 %v19782_v43 }
0x1007   :  { %9182 = vmatprep.subr.mxu0 %v19784_v48 }
0x1008   :  { %9184 = vmatpush1.msra.mxu0 %v19786_v53 }
0x1009   :  { %9186 = vmatprep.subr.mxu0 %v19788_v16 }
0x100a   :  { %9188 = vmatpush1.msra.mxu0 %v19790_v10 }
0x100b   :  { %9421 = vmatprep.subr.mxu0 %v20034_v12  ;;  %v3569_v12 = vadd.f32 %v20036_v59, %v20035_v0 }
0x108a   :  { %v8615_v61 = vpop.f32.mrf.mxu1 }
0x108c   :  { %v8617_v20 = vpop.f32.mrf.mxu1 }
0x108e   :  { %v8622_v32 = vpop.f32.mrf.mxu1 }
0x1090   :  { %v8624_v4 = vpop.f32.mrf.mxu1 }
0x1092   :  { %v8452_v25 = vpop.f32.mrf.mxu0 }
0x1093   :  { %v8616_v56 = vadd.f32 %v8615_v61, %v8452_v25  ;;  %v3767_v25 = vadd.f32 %v20037_v9, %v3569_v12 }
0x1094   :  { %v8454_v42 = vpop.f32.mrf.mxu0 }
0x1095   :  { %v3973_v22 = vadd.f32 %v20041_v38, %v3767_v25 }
0x1097   :  { %v8463_v31 = vpop.f32.mrf.mxu0 }
0x1098   :  { %v8623_v45 = vadd.f32 %v8622_v32, %v8463_v31  ;;  %v3576_v31 = vadd.f32 %v20039_v24, %v20038_v62  ;;  %v20040_v32 = vld [vmem:[#allocation130_spill] sm:$0xff] }
0x1099   :  { %v8465_v34 = vpop.f32.mrf.mxu0 }
0x109a   :  { %v3775_v8 = vadd.f32 %v20040_v32, %v3576_v31 }
0x109b   :  { %v8825_v52 = vpop.f32.mrf.mxu1 }
0x109c   :  { %v3982_v59 = vadd.f32 %v20043_v63, %v3775_v8  ;;  %v20048_v8 = vld [vmem:[#allocation162_spill] sm:$0xff] }
0x109d   :  { %v8827_v46 = vpop.f32.mrf.mxu1 }
0x10a0   :  { %v8834_v37 = vpop.f32.mrf.mxu1 }
0x10a5   :  { %v8727_v13 = vpop.f32.mrf.mxu0 }
0x10a6   :  { %v8728_v36 = vadd.f32 %v8727_v13, %v8616_v56  ;;  %v8836_v13 = vpop.f32.mrf.mxu1  ;;  %v8618_v56 = vadd.f32 %v8617_v20, %v8454_v42  ;;  %v20046_v20 = vld [vmem:[#allocation92_spill] sm:$0xff] }
0x10a7   :  { %v8729_v54 = vpop.f32.mrf.mxu0 }
0x10a8   :  { %v8826_v1 = vadd.f32 %v8825_v52, %v8728_v36  ;;  %v4196_v36 = vadd.f32 %v20042_v40, %v3973_v22  ;;  %v8730_v55 = vadd.f32 %v8729_v54, %v8618_v56  ;;  %v20047_v22 = vld [vmem:[#allocation158_spill] sm:$0xff] }
0x10aa   :  { %v8735_v17 = vpop.f32.mrf.mxu0  ;;  %v8828_v32 = vadd.f32 %v8827_v46, %v8730_v55  ;;  %v20049_v55 = vld [vmem:[#allocation67_spill] sm:$0xff] }
0x10ab   :  { %v8736_v14 = vadd.f32 %v8735_v17, %v8623_v45  ;;  %v8625_v17 = vadd.f32 %v8624_v4, %v8465_v34  ;;  %v20044_v45 = vld [vmem:[#allocation155_spill] sm:$0xff] }
0x10ac   :  { %v8737_v0 = vpop.f32.mrf.mxu0  ;;  %v4381_v9 = vadd.f32 %v20044_v45, %v4196_v36 }
0x10ad   :  { %v8835_v61 = vadd.f32 %v8834_v37, %v8736_v14  ;;  %v20045_v37 = vld [vmem:[#allocation163_spill] sm:$0xff]  ;;  %v8738_v62 = vadd.f32 %v8737_v0, %v8625_v17  ;;  %v20050_v17 = vld [vmem:[#allocation165_spill] sm:$0xff] }
0x10ae   :  { %v4203_v14 = vadd.f32 %v20045_v37, %v3982_v59  ;;  %v8356_v40 = vadd.f32 %v4381_v9, %v20046_v20 }
0x10af   :  { %v9049_v52 = vpop.f32.mrf.mxu1  ;;  %v8837_v45 = vadd.f32 %v8836_v13, %v8738_v62 }
0x10b0   :  { %v4388_v54 = vadd.f32 %v20047_v22, %v4203_v14 }
0x10b1   :  { %v9051_v12 = vpop.f32.mrf.mxu1 }
0x10b2   :  { %v8358_v46 = vadd.f32 %v4388_v54, %v20049_v55 }
0x10b3   :  { %v9056_v56 = vpop.f32.mrf.mxu1 }
0x10b7   :  { %v8954_v24 = vpop.f32.mrf.mxu0 }
0x10b8   :  { %v8955_v31 = vadd.f32 %v8954_v24, %v8826_v1  ;;  %v9058_v1 = vpop.f32.mrf.mxu1 }
0x10b9   :  { %v8956_v38 = vpop.f32.mrf.mxu0 }
0x10ba   :  { %v9050_v25 = vadd.f32 %v9049_v52, %v8955_v31  ;;  %v8957_v42 = vadd.f32 %v8956_v38, %v8828_v32 }
0x10bb   :  { %v8961_v63 = vpop.f32.mrf.mxu0 }
0x10bc   :  { %v9061_v34 = vadd.f32 %v9050_v25, %v20048_v8  ;;  %v9052_v4 = vadd.f32 %v9051_v12, %v8957_v42  ;;  %v8962_v36 = vadd.f32 %v8961_v63, %v8835_v61 }
0x10bd   :  { %v8963_v59 = vpop.f32.mrf.mxu0 }
0x10be   :  { %v9062_v37 = vadd.f32 %v9052_v4, %v8356_v40  ;;  %v9057_v57 = vadd.f32 %v9056_v56, %v8962_v36  ;;  %v8964_v0 = vadd.f32 %v8963_v59, %v8837_v45 }
0x10c0   :  { %v12196_v52 = vmul.f32 -1.442695, %v9062_v37  ;;  %v9063_v24 = vadd.f32 %v9057_v57, %v20050_v17  ;;  %v9059_v9 = vadd.f32 %v9058_v1, %v8964_v0  ;;  %v12195_v57 = vmul.f32 -1.442695, %v9061_v34 }
0x10c2   :  { %13186 = vpow2.f32 %v12196_v52  ;;  %v9064_v14 = vadd.f32 %v9059_v9, %v8358_v46  ;;  %v12197_v22 = vmul.f32 -1.442695, %v9063_v24 }
0x10c4   :  { %v12198_v31 = vmul.f32 -1.442695, %v9064_v14 }
0x10c6   :  { %13188 = vpow2.f32 %v12198_v31 }
0x10cf   :  { %v13187_v32 = vpop.eup %13186 }
0x10d0   :  { %v9078_v38 = vadd.f32 1.0, %v13187_v32 }
0x10d2   :  { %13190 = vrcp.f32 %v9078_v38 }
0x10d3   :  { %v13189_v61 = vpop.eup %13188 }
0x10d4   :  { %v9080_v13 = vadd.f32 1.0, %v13189_v61 }
0x10d6   :  { %13192 = vrcp.f32 %v9080_v13 }
0x10d7   :  { %13194 = vpow2.f32 %v12195_v57 }
0x10d8   :  { %13196 = vpow2.f32 %v12197_v22 }
0x10df   :  { %v13191_v12 = vpop.eup %13190 }
0x10e0   :  { %v9089_v62 = vmul.f32 2.0, %v13191_v12 }
0x10e2   :  { %v12199_v25 = vadd.f32 -1.0, %v9089_v62 }
0x10e3   :  { %v13193_v42 = vpop.eup %13192 }
0x10e4   :  { %9097 = vrot.lane.b32.xlu0 %v12199_v25, %s13401_s5  ;;  %v9090_v20 = vmul.f32 2.0, %v13193_v42  ;;  %v13195_v54 = vpop.eup %13194 }
0x10e5   :  { %v9077_v56 = vadd.f32 1.0, %v13195_v54  ;;  %v13197_v63 = vpop.eup %13196  ;;  %v20051_v54 = vld [vmem:[#allocation81_spill] sm:$0xff] }
0x10e6   :  { %v12200_v40 = vadd.f32 -1.0, %v9090_v20  ;;  %v9079_v8 = vadd.f32 1.0, %v13197_v63  ;;  %v20053_v63 = vld [vmem:[#allocation37_spill] sm:$0xff] }
0x10e7   :  { %13198 = vrcp.f32 %v9077_v56  ;;  %v20052_v56 = vld [vmem:[#allocation50_spill] sm:$0xff] }
0x10e8   :  { %9099 = vrot.lane.b32.xlu1 %v12200_v40, %s13401_s5  ;;  %13200 = vrcp.f32 %v9079_v8  ;;  %v20054_v8 = vld [vmem:[#allocation16_spill] sm:$0xff] }
0x10f4   :  { %v13199_v4 = vpop.eup %13198 }
0x10f5   :  { %v13201_v59 = vpop.eup %13200  ;;  %v9093_v34 = vmul.f32 %v13199_v4, %v17467_v44 }
0x10f6   :  { %v9094_v46 = vmul.f32 %v13201_v59, %v17471_v23 }
0x1156   :  { %v9098_v36 = vpop.permute.xlu0 %9097 }
0x1157   :  { %v9103_v45 = vmul.f32 %v13199_v4, %v9098_v36  ;;  %v20055_v4 = vld [vmem:[#allocation42_spill] sm:$0xff]  ;;  %v20056_v36 = vld [vmem:[#allocation71_spill] sm:$0xff] }
0x1159   :  { %9107 = vrot.lane.b32.xlu0 %v9103_v45, %s13401_s5  ;;  %v20057_v45 = vld [vmem:[#allocation75_spill] sm:$0xff] }
0x115a   :  { %v9100_v37 = vpop.permute.xlu1 %9099 }
0x115b   :  { %v9104_v0 = vmul.f32 %v13201_v59, %v9100_v37  ;;  %v20058_v59 = vld [vmem:[#allocation32_spill] sm:$0xff] }
0x115c   :  { %v20059_v37 = vld [vmem:[#allocation84_spill] sm:$0xff] }
0x115d   :  { %9109 = vrot.lane.b32.xlu1 %v9104_v0, %s13401_s5  ;;  %v20060_v0 = vld [vmem:[#allocation48_spill] sm:$0xff] }
0x11cb   :  { %v9108_v1 = vpop.permute.xlu0 %9107 }
0x11cc   :  { %v17623_v55 = vadd.f32 %v9108_v1, %v9093_v34  ;;  %v20061_v34 = vld [vmem:[#allocation61_spill] sm:$0xff]  ;;  %v20062_v1 = vld [vmem:[#allocation70_spill] sm:$0xff] }
0x11ce   :  { %13202 = vtanh.f32 %v17623_v55 }
0x11cf   :  { %v9110_v52 = vpop.permute.xlu1 %9109 }
0x11d0   :  { %v17627_v17 = vadd.f32 %v9110_v52, %v9094_v46  ;;  %v20063_v46 = vld [vmem:[#allocation49_spill] sm:$0xff]  ;;  %v20064_v52 = vld [vmem:[#allocation72_spill] sm:$0xff] }
0x11d2   :  { %13204 = vtanh.f32 %v17627_v17 }
0x11db   :  { %v13203_v24 = vpop.eup %13202 }
0x11dc   :  { %9119 = vrot.lane.b32.xlu0 %v13203_v24, %s13401_s5  ;;  %v20065_v24 = vld [vmem:[#allocation41_spill] sm:$0xff] }
0x11df   :  { %v13205_v9 = vpop.eup %13204 }
0x11e0   :  { %9121 = vrot.lane.b32.xlu1 %v13205_v9, %s13401_s5  ;;  %v20066_v9 = vld [vmem:[#allocation96_spill] sm:$0xff] }
0x124e   :  { %v9120_v14 = vpop.permute.xlu0 %9119 }
0x124f   :  { %v9125_v44 = vmul.f32 %v13191_v12, %v9120_v14  ;;  %v20067_v14 = vld [vmem:[#allocation88_spill] sm:$0xff] }
0x1251   :  { %9127 = vst.msk [vmem:[#allocation2 + $0x50] sm:$0xff] %vm1847_vm0, %v9125_v44  ;;  %v9136_v31 = vsel %vm4480_vm1, %v9125_v44, 0 }
0x1252   :  { %9129 = vst.msk [vmem:[#allocation2 + $0x20] sm:$0xff] %vm5248_vm2, %v9125_v44  ;;  %v17635_v23 = vand.u32 4294901760, %v9136_v31  ;;  %v9122_v32 = vpop.permute.xlu1 %9121  ;;  %v20068_v44 = vld [vmem:[#allocation83_spill] sm:$0xff] }
0x1253   :  { %v9126_v38 = vmul.f32 %v13193_v42, %v9122_v32  ;;  %v20070_v32 = vld [vmem:[#allocation25_spill] sm:$0xff] }
0x1254   :  { %v9223_v61 = vsub.f32 %v9136_v31, %v17635_v23  ;;  %9390 = vmatmul.mubr.f32.vlgmr.msra.gmra.mxu1 %v17635_v23  ;;  %v20069_v31 = vld [vmem:[#allocation47_spill] sm:$0xff] }
0x1255   :  { %9128 = vst.msk [vmem:[#allocation2 + $0x58] sm:$0xff] %vm1847_vm0, %v9126_v38  ;;  %v9139_v13 = vsel %vm4480_vm1, %v9126_v38, 0  ;;  %9535 = vmatpush1.msra.mxu1 %v15879_v7  ;;  %9395 = vmatprep.mubr.f32.mxu1 %v19361_v29 }
0x1256   :  { %9130 = vst.msk [vmem:[#allocation2 + $0x28] sm:$0xff] %vm5248_vm2, %v9126_v38  ;;  %v9224_v12 = vand.u32 4294901760, %v9223_v61  ;;  %v17644_v62 = vand.u32 4294901760, %v9139_v13  ;;  %9537 = vmatprep.subr.mxu1 %v15881_v41  ;;  %v20071_v38 = vld [vmem:[#allocation15_spill] sm:$0xff] }
0x1257   :  { %9539 = vmatpush1.msra.mxu1 %v15902_v27 }
0x1258   :  { %v9225_v25 = vsub.f32 %v9223_v61, %v9224_v12  ;;  %v9234_v42 = vsub.f32 %v9139_v13, %v17644_v62  ;;  %9541 = vmatprep.subr.mxu1 %v15908_v30  ;;  %9397 = vmatmul.mubr.f32.gmra.mxu1 %v17644_v62  ;;  %v20073_v13 = vld [vmem:[#allocation53_spill] sm:$0xff] }
0x1259   :  { %9543 = vmatpush1.msra.mxu1 %v15940_v28  ;;  %9596 = vmatprep.mubr.f32.mxu1 %v19361_v29 }
0x125a   :  { %v9226_v20 = vand.u32 4294901760, %v9225_v25  ;;  %9545 = vmatprep.subr.mxu1 %v15951_v39  ;;  %v9235_v40 = vand.u32 4294901760, %v9234_v42  ;;  %v20075_v25 = vld [vmem:[#allocation95_spill] sm:$0xff] }
0x125b   :  { %9547 = vmatpush1.msra.mxu1 %v15956_v58 }
0x125c   :  { %9549 = vmatprep.subr.mxu1 %v15991_v5  ;;  %9227 = vmatmul.mubr.f32.vlgmr.msra.gmra.mxu0 %v9226_v20  ;;  %v9236_v57 = vsub.f32 %v9234_v42, %v9235_v40  ;;  %v20077_v20 = vld [vmem:[#allocation55_spill] sm:$0xff] }
0x125d   :  { %9424 = vmatpush1.msra.mxu0 %v19654_v26  ;;  %9551 = vmatpush1.msra.mxu1 %v15999_v60 }
0x125e   :  { %9427 = vmatprep.subr.mxu0 %v19655_v49  ;;  %9553 = vmatprep.subr.mxu1 %v16052_v51  ;;  %v9237_v22 = vand.u32 4294901760, %v9236_v57  ;;  %v20080_v57 = vld [vmem:[#allocation99_spill] sm:$0xff] }
0x125f   :  { %9430 = vmatpush1.msra.mxu0 %v19781_v19  ;;  %9555 = vmatpush1.msra.mxu1 %v19782_v43 }
0x1260   :  { %9232 = vmatprep.mubr.f32.mxu0 %v19361_v29  ;;  %9433 = vmatprep.subr.mxu0 %v19783_v2 }
0x1261   :  { %9557 = vmatprep.subr.mxu1 %v19784_v48  ;;  %9238 = vmatmul.mubr.f32.gmra.mxu0 %v9237_v22  ;;  %v20081_v22 = vld [vmem:[#allocation35_spill] sm:$0xff] }
0x1262   :  { %9436 = vmatpush1.msra.mxu0 %v19785_v50  ;;  %9559 = vmatpush1.msra.mxu1 %v19786_v53 }
0x1263   :  { %9439 = vmatprep.subr.mxu0 %v19787_v35  ;;  %9561 = vmatprep.subr.mxu1 %v19788_v16 }
0x1264   :  { %9442 = vmatpush1.msra.mxu0 %v19789_v6  ;;  %9563 = vmatpush1.msra.mxu1 %v19790_v10 }
0x1265   :  { %9445 = vmatprep.subr.mxu0 %v19791_v21  ;;  %9600 = vmatmul.mubr.f32.vlgmr.msra.gmra.mxu1 %v9224_v12  ;;  %v20074_v12 = vld [vmem:[#allocation29_spill] sm:$0xff] }
0x1266   :  { %9759 = vmatprep.subr.mxu1 %v19792_v15  ;;  %9448 = vmatpush1.msra.mxu0 %v19793_v11 }
0x1267   :  { %9761 = vmatpush1.msra.mxu1 %v15879_v7  ;;  %9451 = vmatprep.subr.mxu0 %v19843_v18 }
0x1268   :  { %9763 = vmatprep.subr.mxu1 %v15881_v41  ;;  %9454 = vmatpush1.msra.mxu0 %v19844_v3 }
0x1269   :  { %9605 = vmatprep.mubr.f32.mxu1 %v19361_v29  ;;  %9765 = vmatpush1.msra.mxu1 %v15902_v27 }
0x126a   :  { %9457 = vmatprep.subr.mxu0 %v19845_v47  ;;  %9609 = vmatmul.mubr.f32.gmra.mxu1 %v9235_v40  ;;  %v20078_v40 = vld [vmem:[#allocation73_spill] sm:$0xff] }
0x126b   :  { %9767 = vmatprep.subr.mxu1 %v15908_v30  ;;  %9460 = vmatpush1.msra.mxu0 %v19846_v33 }
0x126c   :  { %9769 = vmatpush1.msra.mxu1 %v15940_v28  ;;  %9463 = vmatprep.subr.mxu0 %v20051_v54 }
0x126d   :  { %9771 = vmatprep.subr.mxu1 %v15951_v39  ;;  %9466 = vmatpush1.msra.mxu0 %v20052_v56  ;;  %v20094_v56 = vld [vmem:[#allocation123_spill] sm:$0xff] }
0x126e   :  { %9499 = vmatprep.mubr.f32.mxu0 %v19361_v29  ;;  %9773 = vmatpush1.msra.mxu1 %v15956_v58 }
0x126f   :  { %9502 = vmatmul.mubr.f32.vlgmr.msra.gmra.mxu0 %v9223_v61  ;;  %9634 = vmatprep.subr.mxu0 %v20053_v63  ;;  %v20072_v61 = vld [vmem:[#allocation93_spill] sm:$0xff] }
0x1270   :  { %9775 = vmatprep.subr.mxu1 %v15991_v5  ;;  %9638 = vmatpush1.msra.mxu0 %v20054_v8  ;;  %v20093_v8 = vld [vmem:[#allocation154_spill] sm:$0xff] }
0x1271   :  { %9777 = vmatpush1.msra.mxu1 %v15999_v60  ;;  %9642 = vmatprep.subr.mxu0 %v20055_v4 }
0x1272   :  { %9779 = vmatprep.subr.mxu1 %v16052_v51  ;;  %9507 = vmatprep.mubr.f32.mxu0 %v19361_v29 }
0x1273   :  { %9646 = vmatpush1.msra.mxu0 %v20056_v36  ;;  %9781 = vmatpush1.msra.mxu1 %v19782_v43  ;;  %v20092_v36 = vld [vmem:[#allocation121_spill] sm:$0xff] }
0x1274   :  { %9510 = vmatmul.mubr.f32.gmra.mxu0 %v9234_v42  ;;  %9650 = vmatprep.subr.mxu0 %v20057_v45  ;;  %v20076_v42 = vld [vmem:[#allocation62_spill] sm:$0xff] }
0x1275   :  { %9783 = vmatprep.subr.mxu1 %v19784_v48  ;;  %9654 = vmatpush1.msra.mxu0 %v20058_v59  ;;  %v20090_v59 = vld [vmem:[#allocation23_spill] sm:$0xff] }
0x1276   :  { %9785 = vmatpush1.msra.mxu1 %v19786_v53  ;;  %9658 = vmatprep.subr.mxu0 %v20059_v37  ;;  %v20089_v37 = vld [vmem:[#allocation64_spill] sm:$0xff] }
0x1277   :  { %9787 = vmatprep.subr.mxu1 %v19788_v16  ;;  %9662 = vmatpush1.msra.mxu0 %v20060_v0  ;;  %v20088_v0 = vld [vmem:[#allocation124_spill] sm:$0xff] }
0x1278   :  { %9789 = vmatpush1.msra.mxu1 %v19790_v10  ;;  %9822 = vmatprep.mubr.f32.mxu1 %v19361_v29 }
0x1279   :  { %9666 = vmatprep.subr.mxu0 %v20061_v34  ;;  %9824 = vmatmul.mubr.f32.vlgmr.msra.gmra.mxu1 %v17635_v23 }
0x127a   :  { %9670 = vmatpush1.msra.mxu0 %v20062_v1  ;;  %9829 = vmatprep.mubr.f32.mxu1 %v19361_v29 }
0x127b   :  { %9674 = vmatprep.subr.mxu0 %v20063_v46  ;;  %9727 = vmatprep.mubr.f32.mxu0 %v19361_v29  ;;  %v20087_v46 = vld [vmem:[#allocation13_spill] sm:$0xff] }
0x127c   :  { %9678 = vmatpush1.msra.mxu0 %v20064_v52  ;;  %10041 = vmatprep.subr.mxu1 %v20065_v24  ;;  %v20082_v24 = vld [vmem:[#allocation19_spill] sm:$0xff]  ;;  %v20086_v52 = vld [vmem:[#allocation90_spill] sm:$0xff] }
0x127d   :  { %9682 = vmatprep.subr.mxu0 %v20066_v9  ;;  %9831 = vmatmul.mubr.f32.gmra.mxu1 %v17644_v62 }
0x127e   :  { %9686 = vmatpush1.msra.mxu0 %v20067_v14  ;;  %10047 = vmatpush1.msra.mxu1 %v20068_v44  ;;  %v20084_v44 = vld [vmem:[#allocation91_spill] sm:$0xff] }
0x127f   :  { %9690 = vmatprep.subr.mxu0 %v20069_v31  ;;  %10053 = vmatprep.subr.mxu1 %v20070_v32  ;;  %v20085_v32 = vld [vmem:[#allocation12_spill] sm:$0xff] }
0x1280   :  { %9694 = vmatpush1.msra.mxu0 %v20071_v38  ;;  %10059 = vmatpush1.msra.mxu1 %v20072_v61 }
0x1281   :  { %9729 = vmatmul.mubr.f32.vlgmr.msra.gmra.mxu0 %v17635_v23  ;;  %10065 = vmatprep.subr.mxu1 %v20073_v13  ;;  %v20079_v23 = vld [vmem:[#allocation31_spill] sm:$0xff] }
0x1282   :  { %9734 = vmatprep.mubr.f32.mxu0 %v19361_v29  ;;  %10071 = vmatpush1.msra.mxu1 %v20074_v12 }
0x1283   :  { %10077 = vmatprep.subr.mxu1 %v20075_v25  ;;  %9934 = vmatprep.subr.mxu0 %v19792_v15 }
0x1284   :  { %10083 = vmatpush1.msra.mxu1 %v20076_v42  ;;  %9936 = vmatpush1.msra.mxu0 %v15879_v7 }
0x1285   :  { %9736 = vmatmul.mubr.f32.gmra.mxu0 %v17644_v62  ;;  %10089 = vmatprep.subr.mxu1 %v20077_v20  ;;  %v20083_v62 = vld [vmem:[#allocation89_spill] sm:$0xff] }
0x1286   :  { %10095 = vmatpush1.msra.mxu1 %v20078_v40  ;;  %9938 = vmatprep.subr.mxu0 %v15881_v41 }
0x1287   :  { %10101 = vmatprep.subr.mxu1 %v20079_v23  ;;  %9940 = vmatpush1.msra.mxu0 %v15902_v27 }
0x1288   :  { %10107 = vmatpush1.msra.mxu1 %v20080_v57  ;;  %9942 = vmatprep.subr.mxu0 %v15908_v30 }
0x1289   :  { %10113 = vmatprep.subr.mxu1 %v20081_v22  ;;  %9944 = vmatpush1.msra.mxu0 %v15940_v28 }
0x128a   :  { %10119 = vmatpush1.msra.mxu1 %v20082_v24  ;;  %9946 = vmatprep.subr.mxu0 %v15951_v39 }
0x128b   :  { %10125 = vmatprep.subr.mxu1 %v20083_v62  ;;  %9948 = vmatpush1.msra.mxu0 %v15956_v58 }
0x128c   :  { %10131 = vmatpush1.msra.mxu1 %v20084_v44  ;;  %9950 = vmatprep.subr.mxu0 %v15991_v5 }
0x128d   :  { %10164 = vmatprep.mubr.f32.mxu1 %v19361_v29  ;;  %10309 = vmatprep.subr.mxu1 %v19792_v15 }
0x128e   :  { %9952 = vmatpush1.msra.mxu0 %v15999_v60  ;;  %9997 = vmatprep.mubr.f32.mxu0 %v19361_v29 }
0x128f   :  { %9954 = vmatprep.subr.mxu0 %v16052_v51 }
0x1290   :  { %9956 = vmatpush1.msra.mxu0 %v19782_v43 }
0x1291   :  { %9958 = vmatprep.subr.mxu0 %v19784_v48 }
0x1292   :  { %9960 = vmatpush1.msra.mxu0 %v19786_v53 }
0x1293   :  { %9962 = vmatprep.subr.mxu0 %v19788_v16 }
0x1294   :  { %9964 = vmatpush1.msra.mxu0 %v19790_v10 }
0x1295   :  { %10197 = vmatprep.subr.mxu0 %v20085_v32  ;;  %v3555_v32 = vadd.f32 %v20087_v46, %v20086_v52 }
0x1314   :  { %v9391_v61 = vpop.f32.mrf.mxu1 }
0x1316   :  { %v9393_v12 = vpop.f32.mrf.mxu1 }
0x1318   :  { %v9398_v20 = vpop.f32.mrf.mxu1 }
0x131a   :  { %v9400_v57 = vpop.f32.mrf.mxu1 }
0x131c   :  { %v9228_v13 = vpop.f32.mrf.mxu0 }
0x131d   :  { %v9392_v25 = vadd.f32 %v9391_v61, %v9228_v13  ;;  %v3751_v61 = vadd.f32 %v20088_v0, %v3555_v32 }
0x131e   :  { %v9230_v42 = vpop.f32.mrf.mxu0 }
0x131f   :  { %v3955_v4 = vadd.f32 %v20092_v36, %v3751_v61 }
0x1321   :  { %v9239_v40 = vpop.f32.mrf.mxu0 }
0x1322   :  { %v9399_v23 = vadd.f32 %v9398_v20, %v9239_v40  ;;  %v3562_v20 = vadd.f32 %v20090_v59, %v20089_v37  ;;  %v20091_v40 = vld [vmem:[#allocation126_spill] sm:$0xff] }
0x1323   :  { %v9241_v22 = vpop.f32.mrf.mxu0 }
0x1324   :  { %v3759_v45 = vadd.f32 %v20091_v40, %v3562_v20 }
0x1325   :  { %v9601_v24 = vpop.f32.mrf.mxu1 }
0x1326   :  { %v3964_v46 = vadd.f32 %v20094_v56, %v3759_v45  ;;  %v20099_v45 = vld [vmem:[#allocation156_spill] sm:$0xff] }
0x1327   :  { %v9603_v31 = vpop.f32.mrf.mxu1 }
0x132a   :  { %v9610_v34 = vpop.f32.mrf.mxu1 }
0x132f   :  { %v9503_v62 = vpop.f32.mrf.mxu0 }
0x1330   :  { %v9504_v44 = vadd.f32 %v9503_v62, %v9392_v25  ;;  %v9612_v25 = vpop.f32.mrf.mxu1  ;;  %v9394_v62 = vadd.f32 %v9393_v12, %v9230_v42  ;;  %v20097_v42 = vld [vmem:[#allocation98_spill] sm:$0xff] }
0x1331   :  { %v9505_v38 = vpop.f32.mrf.mxu0 }
0x1332   :  { %v9602_v14 = vadd.f32 %v9601_v24, %v9504_v44  ;;  %v4182_v24 = vadd.f32 %v20093_v8, %v3955_v4  ;;  %v9506_v63 = vadd.f32 %v9505_v38, %v9394_v62  ;;  %v20098_v4 = vld [vmem:[#allocation152_spill] sm:$0xff] }
0x1334   :  { %v9511_v9 = vpop.f32.mrf.mxu0  ;;  %v9604_v40 = vadd.f32 %v9603_v31, %v9506_v63  ;;  %v20100_v63 = vld [vmem:[#allocation14_spill] sm:$0xff] }
0x1335   :  { %v9512_v1 = vadd.f32 %v9511_v9, %v9399_v23  ;;  %v9401_v9 = vadd.f32 %v9400_v57, %v9241_v22  ;;  %v20095_v23 = vld [vmem:[#allocation149_spill] sm:$0xff] }
0x1336   :  { %v9513_v52 = vpop.f32.mrf.mxu0  ;;  %v4367_v0 = vadd.f32 %v20095_v23, %v4182_v24 }
0x1337   :  { %v9611_v13 = vadd.f32 %v9610_v34, %v9512_v1  ;;  %v20096_v34 = vld [vmem:[#allocation157_spill] sm:$0xff]  ;;  %v9514_v37 = vadd.f32 %v9513_v52, %v9401_v9  ;;  %v20101_v9 = vld [vmem:[#allocation159_spill] sm:$0xff] }
0x1338   :  { %v4189_v1 = vadd.f32 %v20096_v34, %v3964_v46  ;;  %v9132_v8 = vadd.f32 %v4367_v0, %v20097_v42 }
0x1339   :  { %v9825_v44 = vpop.f32.mrf.mxu1  ;;  %v9613_v23 = vadd.f32 %v9612_v25, %v9514_v37 }
0x133a   :  { %v4374_v38 = vadd.f32 %v20098_v4, %v4189_v1 }
0x133b   :  { %v9827_v32 = vpop.f32.mrf.mxu1 }
0x133c   :  { %v9134_v31 = vadd.f32 %v4374_v38, %v20100_v63 }
0x133d   :  { %v9832_v62 = vpop.f32.mrf.mxu1 }
0x1341   :  { %v9730_v59 = vpop.f32.mrf.mxu0 }
0x1342   :  { %v9731_v20 = vadd.f32 %v9730_v59, %v9602_v14  ;;  %v9834_v14 = vpop.f32.mrf.mxu1 }
0x1343   :  { %v9732_v36 = vpop.f32.mrf.mxu0 }
0x1344   :  { %v9826_v61 = vadd.f32 %v9825_v44, %v9731_v20  ;;  %v9733_v12 = vadd.f32 %v9732_v36, %v9604_v40 }
0x1345   :  { %v9737_v56 = vpop.f32.mrf.mxu0 }
0x1346   :  { %v9837_v57 = vadd.f32 %v9826_v61, %v20099_v45  ;;  %v9828_v22 = vadd.f32 %v9827_v32, %v9733_v12  ;;  %v9738_v24 = vadd.f32 %v9737_v56, %v9611_v13 }
0x1347   :  { %v9739_v46 = vpop.f32.mrf.mxu0 }
0x1348   :  { %v9838_v34 = vadd.f32 %v9828_v22, %v9132_v8  ;;  %v9833_v54 = vadd.f32 %v9832_v62, %v9738_v24  ;;  %v9740_v52 = vadd.f32 %v9739_v46, %v9613_v23 }
0x134a   :  { %v12202_v44 = vmul.f32 -1.442695, %v9838_v34  ;;  %v9839_v59 = vadd.f32 %v9833_v54, %v20101_v9  ;;  %v9835_v0 = vadd.f32 %v9834_v14, %v9740_v52  ;;  %v12201_v54 = vmul.f32 -1.442695, %v9837_v57 }
0x134c   :  { %13206 = vpow2.f32 %v12202_v44  ;;  %v9840_v1 = vadd.f32 %v9835_v0, %v9134_v31  ;;  %v12203_v4 = vmul.f32 -1.442695, %v9839_v59 }
0x134e   :  { %v12204_v20 = vmul.f32 -1.442695, %v9840_v1 }
0x1350   :  { %13208 = vpow2.f32 %v12204_v20 }
0x1359   :  { %v13207_v40 = vpop.eup %13206 }
0x135a   :  { %v9854_v36 = vadd.f32 1.0, %v13207_v40 }
0x135c   :  { %13210 = vrcp.f32 %v9854_v36 }
0x135d   :  { %v13209_v13 = vpop.eup %13208 }
0x135e   :  { %v9856_v25 = vadd.f32 1.0, %v13209_v13 }
0x1360   :  { %13212 = vrcp.f32 %v9856_v25 }
0x1361   :  { %13214 = vpow2.f32 %v12201_v54 }
0x1362   :  { %13216 = vpow2.f32 %v12203_v4 }
0x1369   :  { %v13211_v32 = vpop.eup %13210 }
0x136a   :  { %v9865_v37 = vmul.f32 2.0, %v13211_v32 }
0x136c   :  { %v12205_v61 = vadd.f32 -1.0, %v9865_v37 }
0x136d   :  { %v13213_v12 = vpop.eup %13212 }
0x136e   :  { %9873 = vrot.lane.b32.xlu0 %v12205_v61, %s13401_s5  ;;  %v9866_v42 = vmul.f32 2.0, %v13213_v12  ;;  %v13215_v38 = vpop.eup %13214 }
0x136f   :  { %v9853_v62 = vadd.f32 1.0, %v13215_v38  ;;  %v13217_v56 = vpop.eup %13216 }
0x1370   :  { %v12206_v8 = vadd.f32 -1.0, %v9866_v42  ;;  %v9855_v45 = vadd.f32 1.0, %v13217_v56 }
0x1371   :  { %13218 = vrcp.f32 %v9853_v62 }
0x1372   :  { %9875 = vrot.lane.b32.xlu1 %v12206_v8, %s13401_s5  ;;  %13220 = vrcp.f32 %v9855_v45 }
0x137e   :  { %v13219_v22 = vpop.eup %13218 }
0x137f   :  { %v13221_v46 = vpop.eup %13220  ;;  %v9869_v57 = vmul.f32 %v13219_v22, %v17623_v55 }
0x1380   :  { %v9870_v31 = vmul.f32 %v13221_v46, %v17627_v17 }
0x13e0   :  { %v9874_v24 = vpop.permute.xlu0 %9873 }
0x13e1   :  { %v9879_v23 = vmul.f32 %v13219_v22, %v9874_v24 }
0x13e3   :  { %9883 = vrot.lane.b32.xlu0 %v9879_v23, %s13401_s5  ;;  %v20121_v23 = vld [vmem:[#allocation79_spill] sm:$0xff] }
0x13e4   :  { %v9876_v34 = vpop.permute.xlu1 %9875 }
0x13e5   :  { %v9880_v52 = vmul.f32 %v13221_v46, %v9876_v34 }
0x13e7   :  { %9885 = vrot.lane.b32.xlu1 %v9880_v52, %s13401_s5 }
0x1455   :  { %v9884_v14 = vpop.permute.xlu0 %9883 }
0x1456   :  { %v17779_v63 = vadd.f32 %v9884_v14, %v9869_v57  ;;  %v20122_v57 = vld [vmem:[#allocation120_spill] sm:$0xff] }
0x1458   :  { %13222 = vtanh.f32 %v17779_v63 }
0x1459   :  { %v9886_v44 = vpop.permute.xlu1 %9885 }
0x145a   :  { %v17783_v9 = vadd.f32 %v9886_v44, %v9870_v31  ;;  %v20123_v44 = vld [vmem:[#allocation46_spill] sm:$0xff] }
0x145c   :  { %13224 = vtanh.f32 %v17783_v9 }
0x1465   :  { %v13223_v59 = vpop.eup %13222 }
0x1466   :  { %9895 = vrot.lane.b32.xlu0 %v13223_v59, %s13401_s5  ;;  %v20124_v59 = vld [vmem:[#allocation18_spill] sm:$0xff] }
0x1469   :  { %v13225_v0 = vpop.eup %13224 }
0x146a   :  { %9897 = vrot.lane.b32.xlu1 %v13225_v0, %s13401_s5  ;;  %v3548_v0 = vadd.f32 %v20124_v59, %v20123_v44 }
0x14d8   :  { %v9896_v1 = vpop.permute.xlu0 %9895 }
0x14d9   :  { %v9901_v55 = vmul.f32 %v13211_v32, %v9896_v1  ;;  %v20125_v1 = vld [vmem:[#allocation122_spill] sm:$0xff] }
0x14db   :  { %9903 = vst.msk [vmem:[#allocation2 + $0x60] sm:$0xff] %vm1847_vm0, %v9901_v55  ;;  %v9912_v20 = vsel %vm4480_vm1, %v9901_v55, 0 }
0x14dc   :  { %9905 = vst.msk [vmem:[#allocation2 + $0x10] sm:$0xff] %vm5248_vm2, %v9901_v55  ;;  %v17791_v17 = vand.u32 4294901760, %v9912_v20  ;;  %v9898_v40 = vpop.permute.xlu1 %9897  ;;  %v3743_v55 = vadd.f32 %v20125_v1, %v3548_v0 }
0x14dd   :  { %v9902_v36 = vmul.f32 %v13213_v12, %v9898_v40 }
0x14de   :  { %v9999_v13 = vsub.f32 %v9912_v20, %v17791_v17  ;;  %10166 = vmatmul.mubr.f32.vlgmr.msra.gmra.mxu1 %v17791_v17  ;;  %v20126_v20 = vld [vmem:[#allocation118_spill] sm:$0xff] }
0x14df   :  { %9904 = vst.msk [vmem:[#allocation2 + $0x68] sm:$0xff] %vm1847_vm0, %v9902_v36  ;;  %v9915_v25 = vsel %vm4480_vm1, %v9902_v36, 0  ;;  %10311 = vmatpush1.msra.mxu1 %v15879_v7  ;;  %10171 = vmatprep.mubr.f32.mxu1 %v19361_v29 }
0x14e0   :  { %9906 = vst.msk [vmem:[#allocation2 + $0x18] sm:$0xff] %vm5248_vm2, %v9902_v36  ;;  %v10000_v32 = vand.u32 4294901760, %v9999_v13  ;;  %v17800_v37 = vand.u32 4294901760, %v9915_v25  ;;  %10313 = vmatprep.subr.mxu1 %v15881_v41 }
0x14e1   :  { %10315 = vmatpush1.msra.mxu1 %v15902_v27 }
0x14e2   :  { %v10001_v61 = vsub.f32 %v9999_v13, %v10000_v32  ;;  %v10010_v12 = vsub.f32 %v9915_v25, %v17800_v37  ;;  %10317 = vmatprep.subr.mxu1 %v15908_v30  ;;  %10173 = vmatmul.mubr.f32.gmra.mxu1 %v17800_v37 }
0x14e3   :  { %10319 = vmatpush1.msra.mxu1 %v15940_v28  ;;  %10372 = vmatprep.mubr.f32.mxu1 %v19361_v29 }
0x14e4   :  { %v10002_v42 = vand.u32 4294901760, %v10001_v61  ;;  %10321 = vmatprep.subr.mxu1 %v15951_v39  ;;  %v10011_v8 = vand.u32 4294901760, %v10010_v12  ;;  %v20128_v61 = vld [vmem:[#allocation77_spill] sm:$0xff] }
0x14e5   :  { %10323 = vmatpush1.msra.mxu1 %v15956_v58 }
0x14e6   :  { %10325 = vmatprep.subr.mxu1 %v15991_v5  ;;  %10003 = vmatmul.mubr.f32.vlgmr.msra.gmra.mxu0 %v10002_v42  ;;  %v10012_v54 = vsub.f32 %v10010_v12, %v10011_v8 }
0x14e7   :  { %10200 = vmatpush1.msra.mxu0 %v19654_v26  ;;  %10327 = vmatpush1.msra.mxu1 %v15999_v60  ;;  %v20112_v26 = vld [vmem:[#allocation61_spill] sm:$0xff] }
0x14e8   :  { %10203 = vmatprep.subr.mxu0 %v19655_v49  ;;  %10329 = vmatprep.subr.mxu1 %v16052_v51  ;;  %v10013_v4 = vand.u32 4294901760, %v10012_v54  ;;  %v20113_v49 = vld [vmem:[#allocation70_spill] sm:$0xff] }
0x14e9   :  { %10206 = vmatpush1.msra.mxu0 %v19781_v19  ;;  %10331 = vmatpush1.msra.mxu1 %v19782_v43  ;;  %v20114_v19 = vld [vmem:[#allocation49_spill] sm:$0xff] }
0x14ea   :  { %10008 = vmatprep.mubr.f32.mxu0 %v19361_v29  ;;  %10209 = vmatprep.subr.mxu0 %v19783_v2  ;;  %v20116_v2 = vld [vmem:[#allocation96_spill] sm:$0xff] }
0x14eb   :  { %10333 = vmatprep.subr.mxu1 %v19784_v48  ;;  %10014 = vmatmul.mubr.f32.gmra.mxu0 %v10013_v4 }
0x14ec   :  { %10212 = vmatpush1.msra.mxu0 %v19785_v50  ;;  %10335 = vmatpush1.msra.mxu1 %v19786_v53  ;;  %v20118_v50 = vld [vmem:[#allocation47_spill] sm:$0xff] }
0x14ed   :  { %10215 = vmatprep.subr.mxu0 %v19787_v35  ;;  %10337 = vmatprep.subr.mxu1 %v19788_v16 }
0x14ee   :  { %10218 = vmatpush1.msra.mxu0 %v19789_v6  ;;  %10339 = vmatpush1.msra.mxu1 %v19790_v10 }
0x14ef   :  { %10221 = vmatprep.subr.mxu0 %v19791_v21  ;;  %10376 = vmatmul.mubr.f32.vlgmr.msra.gmra.mxu1 %v10000_v32 }
0x14f0   :  { %10535 = vmatprep.subr.mxu1 %v19792_v15  ;;  %10224 = vmatpush1.msra.mxu0 %v19793_v11 }
0x14f1   :  { %10537 = vmatpush1.msra.mxu1 %v15879_v7  ;;  %10227 = vmatprep.subr.mxu0 %v19843_v18  ;;  %v20102_v7 = vld [vmem:[#allocation81_spill] sm:$0xff] }
0x14f2   :  { %10539 = vmatprep.subr.mxu1 %v15881_v41  ;;  %10230 = vmatpush1.msra.mxu0 %v19844_v3  ;;  %v20103_v41 = vld [vmem:[#allocation50_spill] sm:$0xff] }
0x14f3   :  { %10381 = vmatprep.mubr.f32.mxu1 %v19361_v29  ;;  %10541 = vmatpush1.msra.mxu1 %v15902_v27  ;;  %v20104_v27 = vld [vmem:[#allocation37_spill] sm:$0xff] }
0x14f4   :  { %10233 = vmatprep.subr.mxu0 %v19845_v47  ;;  %10385 = vmatmul.mubr.f32.gmra.mxu1 %v10011_v8  ;;  %v20130_v8 = vld [vmem:[#allocation119_spill] sm:$0xff] }
0x14f5   :  { %10543 = vmatprep.subr.mxu1 %v15908_v30  ;;  %10236 = vmatpush1.msra.mxu0 %v19846_v33  ;;  %v20105_v30 = vld [vmem:[#allocation16_spill] sm:$0xff]  ;;  %v3946_v54 = vadd.f32 %v20130_v8, %v3743_v55 }
0x14f6   :  { %10545 = vmatpush1.msra.mxu1 %v15940_v28  ;;  %10239 = vmatprep.subr.mxu0 %v20102_v7  ;;  %v20106_v28 = vld [vmem:[#allocation42_spill] sm:$0xff] }
0x14f7   :  { %10547 = vmatprep.subr.mxu1 %v15951_v39  ;;  %10242 = vmatpush1.msra.mxu0 %v20103_v41  ;;  %v20107_v39 = vld [vmem:[#allocation71_spill] sm:$0xff]  ;;  %v20131_v41 = vld [vmem:[#allocation146_spill] sm:$0xff] }
0x14f8   :  { %10275 = vmatprep.mubr.f32.mxu0 %v19361_v29  ;;  %10549 = vmatpush1.msra.mxu1 %v15956_v58  ;;  %v20108_v58 = vld [vmem:[#allocation75_spill] sm:$0xff] }
0x14f9   :  { %10278 = vmatmul.mubr.f32.vlgmr.msra.gmra.mxu0 %v9999_v13  ;;  %10410 = vmatprep.subr.mxu0 %v20104_v27  ;;  %v20127_v13 = vld [vmem:[#allocation148_spill] sm:$0xff] }
0x14fa   :  { %10551 = vmatprep.subr.mxu1 %v15991_v5  ;;  %10414 = vmatpush1.msra.mxu0 %v20105_v30  ;;  %v20109_v5 = vld [vmem:[#allocation32_spill] sm:$0xff]  ;;  %v20132_v30 = vld [vmem:[#allocation151_spill] sm:$0xff] }
0x14fb   :  { %10553 = vmatpush1.msra.mxu1 %v15999_v60  ;;  %10418 = vmatprep.subr.mxu0 %v20106_v28  ;;  %v20110_v60 = vld [vmem:[#allocation84_spill] sm:$0xff]  ;;  %v4175_v28 = vadd.f32 %v20132_v30, %v3946_v54 }
0x14fc   :  { %10555 = vmatprep.subr.mxu1 %v16052_v51  ;;  %10283 = vmatprep.mubr.f32.mxu0 %v19361_v29  ;;  %v20111_v51 = vld [vmem:[#allocation48_spill] sm:$0xff] }
0x14fd   :  { %10422 = vmatpush1.msra.mxu0 %v20107_v39  ;;  %10557 = vmatpush1.msra.mxu1 %v19782_v43  ;;  %v20115_v43 = vld [vmem:[#allocation72_spill] sm:$0xff] }
0x14fe   :  { %10286 = vmatmul.mubr.f32.gmra.mxu0 %v10010_v12  ;;  %10426 = vmatprep.subr.mxu0 %v20108_v58  ;;  %v20129_v12 = vld [vmem:[#allocation39_spill] sm:$0xff] }
0x14ff   :  { %10559 = vmatprep.subr.mxu1 %v19784_v48  ;;  %10430 = vmatpush1.msra.mxu0 %v20109_v5  ;;  %v20117_v48 = vld [vmem:[#allocation88_spill] sm:$0xff]  ;;  %v2980_v42 = vadd.f32 %v20129_v12, %v20128_v61 }
0x1500   :  { %10561 = vmatpush1.msra.mxu1 %v19786_v53  ;;  %10434 = vmatprep.subr.mxu0 %v20110_v60  ;;  %v20119_v53 = vld [vmem:[#allocation15_spill] sm:$0xff] }
0x1501   :  { %10563 = vmatprep.subr.mxu1 %v19788_v16  ;;  %10438 = vmatpush1.msra.mxu0 %v20111_v51 }
0x1502   :  { %10565 = vmatpush1.msra.mxu1 %v19790_v10  ;;  %10598 = vmatprep.mubr.f32.mxu1 %v19361_v29 }
0x1503   :  { %10442 = vmatprep.subr.mxu0 %v20112_v26  ;;  %10600 = vmatmul.mubr.f32.vlgmr.msra.gmra.mxu1 %v17791_v17  ;;  %v20133_v26 = vld [vmem:[#allocation59_spill] sm:$0xff] }
0x1504   :  { %10446 = vmatpush1.msra.mxu0 %v20113_v49  ;;  %10605 = vmatprep.mubr.f32.mxu1 %v19361_v29  ;;  %v3165_v49 = vadd.f32 %v20133_v26, %v2980_v42 }
0x1505   :  { %10450 = vmatprep.subr.mxu0 %v20114_v19  ;;  %10503 = vmatprep.mubr.f32.mxu0 %v19361_v29 }
0x1506   :  { %10454 = vmatpush1.msra.mxu0 %v20115_v43  ;;  %v20134_v43 = vld [vmem:[#allocation17_spill] sm:$0xff] }
0x1507   :  { %10458 = vmatprep.subr.mxu0 %v20116_v2  ;;  %10607 = vmatmul.mubr.f32.gmra.mxu1 %v17800_v37  ;;  %v20135_v2 = vld [vmem:[#allocation69_spill] sm:$0xff] }
0x1508   :  { %10462 = vmatpush1.msra.mxu0 %v20117_v48  ;;  %v2987_v48 = vadd.f32 %v20135_v2, %v20134_v43  ;;  %v10703_v43 = vld [vmem:[%s18602_s6 + $0x20] sm:$0xff] }
0x1509   :  { %10466 = vmatprep.subr.mxu0 %v20118_v50 }
0x150a   :  { %10470 = vmatpush1.msra.mxu0 %v20119_v53 }
0x150b   :  { %10505 = vmatmul.mubr.f32.vlgmr.msra.gmra.mxu0 %v17791_v17 }
0x150c   :  { %10510 = vmatprep.mubr.f32.mxu0 %v19361_v29  ;;  %v20120_v29 = vld [vmem:[#allocation80_spill] sm:$0xff] }
0x150d   :  { %v3541_v46 = vadd.f32 %v20121_v23, %v20120_v29 }
0x150f   :  { %10512 = vmatmul.mubr.f32.gmra.mxu0 %v17800_v37  ;;  %v3735_v14 = vadd.f32 %v20122_v57, %v3541_v46  ;;  %v20139_v46 = vld [vmem:[#allocation153_spill] sm:$0xff] }
0x1511   :  { %v3937_v17 = vadd.f32 %v20126_v20, %v3735_v14 }
0x1513   :  { %v4168_v25 = vadd.f32 %v20127_v13, %v3937_v17 }
0x1515   :  { %v4353_v27 = vadd.f32 %v20131_v41, %v4168_v25 }
0x159e   :  { %v10167_v35 = vpop.f32.mrf.mxu1 }
0x15a0   :  { %v10169_v6 = vpop.f32.mrf.mxu1 }
0x15a2   :  { %v10174_v15 = vpop.f32.mrf.mxu1 }
0x15a4   :  { %v10176_v3 = vpop.f32.mrf.mxu1 }
0x15a6   :  { %v10004_v16 = vpop.f32.mrf.mxu0 }
0x15a7   :  { %v10168_v10 = vadd.f32 %v10167_v35, %v10004_v16  ;;  %v9908_v35 = vadd.f32 %v4353_v27, %v3165_v49  ;;  %v20136_v16 = vld [vmem:[#allocation147_spill] sm:$0xff]  ;;  %v10706_v27 = vld [vmem:[%s18602_s6 + $0x38] sm:$0xff] }
0x15a8   :  { %v10006_v21 = vpop.f32.mrf.mxu0  ;;  %v17911_v30 = vand.u32 4294901760, %v10706_v27 }
0x15a9   :  { %v10170_v36 = vadd.f32 %v10169_v6, %v10006_v21  ;;  %v4360_v6 = vadd.f32 %v20136_v16, %v4175_v28  ;;  %v10705_v28 = vld [vmem:[%s18602_s6 + $0x30] sm:$0xff]  ;;  %v10702_v16 = vld [vmem:[%s18602_s6 + $0x18] sm:$0xff] }
0x15aa   :  { %12839 = vmatprep.subr.mxu0 %v17911_v30 }
0x15ab   :  { %v10015_v11 = vpop.f32.mrf.mxu0  ;;  %12840 = vmatpush3.msra.mxu0 %v17911_v30 }
0x15ac   :  { %v10175_v18 = vadd.f32 %v10174_v15, %v10015_v11  ;;  %v20137_v15 = vld [vmem:[#allocation150_spill] sm:$0xff] }
0x15ad   :  { %v10017_v47 = vpop.f32.mrf.mxu0 }
0x15ae   :  { %v10177_v7 = vadd.f32 %v10176_v3, %v10017_v47 }
0x15af   :  { %v10377_v33 = vpop.f32.mrf.mxu1 }
0x15b1   :  { %v10379_v45 = vpop.f32.mrf.mxu1 }
0x15b4   :  { %v10386_v52 = vpop.f32.mrf.mxu1 }
0x15b6   :  { %v10388_v40 = vpop.f32.mrf.mxu1 }
0x15b9   :  { %v10279_v38 = vpop.f32.mrf.mxu0 }
0x15ba   :  { %v10280_v62 = vadd.f32 %v10279_v38, %v10168_v10  ;;  %v20138_v38 = vld [vmem:[#allocation68_spill] sm:$0xff] }
0x15bb   :  { %v10281_v56 = vpop.f32.mrf.mxu0 }
0x15bc   :  { %v10378_v22 = vadd.f32 %v10377_v33, %v10280_v62  ;;  %v10282_v37 = vadd.f32 %v10281_v56, %v10170_v36  ;;  %v3172_v62 = vadd.f32 %v20138_v38, %v2987_v48 }
0x15be   :  { %v10287_v24 = vpop.f32.mrf.mxu0  ;;  %v10380_v51 = vadd.f32 %v10379_v45, %v10282_v37  ;;  %v9910_v29 = vadd.f32 %v4360_v6, %v3172_v62 }
0x15bf   :  { %v10288_v34 = vadd.f32 %v10287_v24, %v10175_v18 }
0x15c0   :  { %v10289_v4 = vpop.f32.mrf.mxu0 }
0x15c1   :  { %v10387_v31 = vadd.f32 %v10386_v52, %v10288_v34  ;;  %v10290_v5 = vadd.f32 %v10289_v4, %v10177_v7 }
0x15c3   :  { %v10601_v32 = vpop.f32.mrf.mxu1  ;;  %v10389_v47 = vadd.f32 %v10388_v40, %v10290_v5  ;;  %v10704_v5 = vld [vmem:[%s18602_s6 + $0x28] sm:$0xff] }
0x15c4   :  { %v17933_v49 = vand.u32 4294901760, %v10704_v5 }
0x15c5   :  { %v10603_v39 = vpop.f32.mrf.mxu1 }
0x15c7   :  { %v10608_v10 = vpop.f32.mrf.mxu1 }
0x15c9   :  { %v10610_v24 = vpop.f32.mrf.mxu1 }
0x15cb   :  { %v10506_v58 = vpop.f32.mrf.mxu0 }
0x15cc   :  { %v10507_v60 = vadd.f32 %v10506_v58, %v10378_v22  ;;  %v17919_v58 = vand.u32 4294901760, %v10705_v28 }
0x15cd   :  { %v10508_v19 = vpop.f32.mrf.mxu0 }
0x15ce   :  { %v10602_v50 = vadd.f32 %v10601_v32, %v10507_v60  ;;  %v10509_v53 = vadd.f32 %v10508_v19, %v10380_v51  ;;  %v17931_v26 = vsub.f32 %v10705_v28, %v17919_v58  ;;  %12841 = vmatprep.subr.mxu0 %v17919_v58  ;;  %v10687_v28 = vld [vmem:[#allocation2 + $0x20] sm:$0xff] }
0x15cf   :  { %v10513_v21 = vpop.f32.mrf.mxu0  ;;  %12842 = vmatpush3.msra.mxu0 %v17919_v58 }
0x15d0   :  { %v10613_v11 = vadd.f32 %v10602_v50, %v20137_v15  ;;  %v10604_v18 = vadd.f32 %v10603_v39, %v10509_v53  ;;  %v10514_v3 = vadd.f32 %v10513_v21, %v10387_v31  ;;  %v17917_v39 = vsub.f32 %v10706_v27, %v17911_v30  ;;  %12843 = vmatprep.subr.mxu0 %v17933_v49  ;;  %v10686_v27 = vld [vmem:[#allocation2 + $0x18] sm:$0xff] }
0x15d1   :  { %v10515_v33 = vpop.f32.mrf.mxu0  ;;  %v17943_v48 = vand.u32 4294901760, %v17931_v26  ;;  %v17946_v50 = vsub.f32 %v10704_v5, %v17933_v49  ;;  %12844 = vmatpush3.msra.mxu0 %v17933_v49 }
0x15d2   :  { %v10614_v56 = vadd.f32 %v10604_v18, %v9908_v35  ;;  %v10609_v45 = vadd.f32 %v10608_v10, %v10514_v3  ;;  %v10516_v22 = vadd.f32 %v10515_v33, %v10389_v47  ;;  %v12207_v13 = vmul.f32 -1.442695, %v10613_v11  ;;  %v10701_v18 = vld [vmem:[%s18602_s6 + $0x10] sm:$0xff] }
0x15d3   :  { %v17928_v51 = vand.u32 4294901760, %v17917_v39  ;;  %v17950_v35 = vand.u32 4294901760, %v10703_v43  ;;  %v11022_v10 = vsub.f32 %v17931_v26, %v17943_v48  ;;  %v17959_v21 = vand.u32 4294901760, %v17946_v50 }
0x15d4   :  { %v12208_v23 = vmul.f32 -1.442695, %v10614_v56  ;;  %v10615_v34 = vadd.f32 %v10609_v45, %v20139_v46  ;;  %v10611_v52 = vadd.f32 %v10610_v24, %v10516_v22  ;;  %v17972_v38 = vand.u32 4294901760, %v10701_v18  ;;  %v10700_v45 = vld [vmem:[%s18602_s6 + $0x8] sm:$0xff] }
0x15d5   :  { %v17962_v11 = vsub.f32 %v10703_v43, %v17950_v35  ;;  %12845 = vmatprep.subr.mxu0 %v17950_v35  ;;  %v11023_v47 = vand.u32 4294901760, %v11022_v10  ;;  %v11029_v33 = vsub.f32 %v17946_v50, %v17959_v21  ;;  %v10727_v43 = vsel %vm4480_vm1, %v10687_v28, 0  ;;  %v10691_v10 = vld [vmem:[#allocation2 + $0x40] sm:$0xff] }
0x15d6   :  { %13226 = vpow2.f32 %v12208_v23  ;;  %v10616_v57 = vadd.f32 %v10611_v52, %v9910_v29  ;;  %v12209_v25 = vmul.f32 -1.442695, %v10615_v34  ;;  %12846 = vmatpush3.msra.mxu0 %v17950_v35  ;;  %v17986_v24 = vsub.f32 %v10701_v18, %v17972_v38  ;;  %v10699_v34 = vld [vmem:[%s18602_s6] sm:$0xff] }
0x15d7   :  { %v17976_v62 = vand.u32 4294901760, %v17962_v11  ;;  %v11030_v22 = vand.u32 4294901760, %v11029_v33  ;;  %v17988_v29 = vand.u32 4294901760, %v10700_v45 }
0x15d8   :  { %v12210_v14 = vmul.f32 -1.442695, %v10616_v57  ;;  %v18001_v52 = vand.u32 4294901760, %v17986_v24 }
0x15d9   :  { %v11036_v23 = vsub.f32 %v17962_v11, %v17976_v62  ;;  %v18004_v57 = vsub.f32 %v10700_v45, %v17988_v29 }
0x15da   :  { %13228 = vpow2.f32 %v12210_v14  ;;  %v18006_v14 = vand.u32 4294901760, %v10699_v34 }
0x15e3   :  { %v13227_v44 = vpop.eup %13226 }
0x15e4   :  { %v10630_v59 = vadd.f32 1.0, %v13227_v44  ;;  %v11037_v44 = vand.u32 4294901760, %v11036_v23 }
0x15e6   :  { %13230 = vrcp.f32 %v10630_v59 }
0x15e7   :  { %v13229_v31 = vpop.eup %13228 }
0x15e8   :  { %v10632_v0 = vadd.f32 1.0, %v13229_v31  ;;  %v11050_v31 = vsub.f32 %v17986_v24, %v18001_v52 }
0x15ea   :  { %13232 = vrcp.f32 %v10632_v0  ;;  %v18015_v0 = vand.u32 4294901760, %v18004_v57 }
0x15eb   :  { %13234 = vpow2.f32 %v12207_v13 }
0x15ec   :  { %13236 = vpow2.f32 %v12209_v25 }
0x15f3   :  { %v17898_v1 = vpop.eup %13230 }
0x15f4   :  { %v10641_v55 = vmul.f32 2.0, %v17898_v1 }
0x15f6   :  { %v12211_v20 = vadd.f32 -1.0, %v10641_v55  ;;  %v18018_v55 = vsub.f32 %v10699_v34, %v18006_v14  ;;  %v10739_v34 = vsel %vm4480_vm1, %v10691_v10, 0 }
0x15f7   :  { %v17901_v17 = vpop.eup %13232 }
0x15f8   :  { %10649 = vrot.lane.b32.xlu0 %v12211_v20, %s13401_s5  ;;  %v10642_v40 = vmul.f32 2.0, %v17901_v17  ;;  %v13235_v32 = vpop.eup %13234  ;;  %v18025_v13 = vand.u32 4294901760, %v18018_v55 }
0x15f9   :  { %v10629_v37 = vadd.f32 1.0, %v13235_v32  ;;  %v13237_v61 = vpop.eup %13236 }
0x15fa   :  { %v12212_v36 = vadd.f32 -1.0, %v10642_v40  ;;  %v10631_v12 = vadd.f32 1.0, %v13237_v61  ;;  %v11051_v40 = vand.u32 4294901760, %v11050_v31  ;;  %v11064_v32 = vsub.f32 %v18018_v55, %v18025_v13 }
0x15fb   :  { %13238 = vrcp.f32 %v10629_v37 }
0x15fc   :  { %10651 = vrot.lane.b32.xlu1 %v12212_v36, %s13401_s5  ;;  %13240 = vrcp.f32 %v10631_v12  ;;  %v11057_v36 = vsub.f32 %v18004_v57, %v18015_v0  ;;  %v11065_v61 = vand.u32 4294901760, %v11064_v32 }
0x15fe   :  { %v11058_v25 = vand.u32 4294901760, %v11057_v36 }
0x1608   :  { %v13239_v42 = vpop.eup %13238 }
0x1609   :  { %v13241_v4 = vpop.eup %13240  ;;  %v10645_v60 = vmul.f32 %v13239_v42, %v17779_v63  ;;  %v11015_v63 = vsub.f32 %v17917_v39, %v17928_v51 }
0x160a   :  { %v10646_v53 = vmul.f32 %v13241_v4, %v17783_v9  ;;  %v17964_v9 = vand.u32 4294901760, %v10702_v16 }
0x160b   :  { %v11016_v6 = vand.u32 4294901760, %v11015_v63 }
0x160c   :  { %v17979_v56 = vsub.f32 %v10702_v16, %v17964_v9  ;;  %12847 = vmatprep.subr.mxu0 %v17964_v9 }
0x160d   :  { %12879 = vmatprep.subr.mxu1 %v11016_v6  ;;  %12848 = vmatpush3.msra.mxu0 %v17964_v9 }
0x160e   :  { %12880 = vmatpush3.msra.mxu1 %v11016_v6  ;;  %v17994_v46 = vand.u32 4294901760, %v17979_v56  ;;  %12849 = vmatprep.subr.mxu0 %v17972_v38  ;;  %v10690_v6 = vld [vmem:[#allocation2 + $0x38] sm:$0xff] }
0x160f   :  { %12881 = vmatprep.subr.mxu1 %v11023_v47  ;;  %12850 = vmatpush3.msra.mxu0 %v17972_v38  ;;  %v10736_v23 = vsel %vm4480_vm1, %v10690_v6, 0  ;;  %v10695_v6 = vld [vmem:[#allocation2 + $0x60] sm:$0xff] }
0x1610   :  { %12882 = vmatpush3.msra.mxu1 %v11023_v47  ;;  %v11043_v59 = vsub.f32 %v17979_v56, %v17994_v46  ;;  %12851 = vmatprep.subr.mxu0 %v17988_v29 }
0x1611   :  { %12883 = vmatprep.subr.mxu1 %v11030_v22  ;;  %12852 = vmatpush3.msra.mxu0 %v17988_v29 }
0x1612   :  { %12884 = vmatpush3.msra.mxu1 %v11030_v22  ;;  %v11044_v20 = vand.u32 4294901760, %v11043_v59  ;;  %12853 = vmatprep.subr.mxu0 %v18006_v14 }
0x1613   :  { %12885 = vmatprep.subr.mxu1 %v11037_v44  ;;  %12854 = vmatpush3.msra.mxu0 %v18006_v14 }
0x1614   :  { %12886 = vmatpush3.msra.mxu1 %v11037_v44  ;;  %12919 = vmatprep.subr.mxu0 %v17917_v39 }
0x1615   :  { %12887 = vmatprep.subr.mxu1 %v11044_v20 }
0x1616   :  { %12888 = vmatpush3.msra.mxu1 %v11044_v20 }
0x1617   :  { %12889 = vmatprep.subr.mxu1 %v11051_v40 }
0x1618   :  { %12890 = vmatpush3.msra.mxu1 %v11051_v40  ;;  %v10692_v40 = vld [vmem:[#allocation2 + $0x48] sm:$0xff] }
0x1619   :  { %12891 = vmatprep.subr.mxu1 %v11058_v25 }
0x161a   :  { %12892 = vmatpush3.msra.mxu1 %v11058_v25 }
0x161b   :  { %12893 = vmatprep.subr.mxu1 %v11065_v61 }
0x161c   :  { %12894 = vmatpush3.msra.mxu1 %v11065_v61  ;;  %v18087_v61 = vand.u32 4294901760, %v10736_v23 }
0x161d   :  { %12959 = vmatprep.subr.mxu1 %v17911_v30 }
0x166a   :  { %v10650_v8 = vpop.permute.xlu0 %10649 }
0x166b   :  { %v10655_v54 = vmul.f32 %v13239_v42, %v10650_v8 }
0x166d   :  { %10659 = vrot.lane.b32.xlu0 %v10655_v54, %s13401_s5  ;;  %v10685_v54 = vld [vmem:[#allocation2 + $0x10] sm:$0xff] }
0x166e   :  { %v10652_v7 = vpop.permute.xlu1 %10651 }
0x166f   :  { %v10656_v41 = vmul.f32 %v13241_v4, %v10652_v7 }
0x1671   :  { %10661 = vrot.lane.b32.xlu1 %v10656_v41, %s13401_s5  ;;  %v10721_v41 = vsel %vm4480_vm1, %v10685_v54, 0  ;;  %v10693_v54 = vld [vmem:[#allocation2 + $0x50] sm:$0xff] }
0x1672   :  { %v18041_v5 = vand.u32 4294901760, %v10721_v41 }
0x16df   :  { %v10660_v19 = vpop.permute.xlu0 %10659 }
0x16e0   :  { %v10665_v2 = vadd.f32 %v10660_v19, %v10645_v60  ;;  %v10689_v60 = vld [vmem:[#allocation2 + $0x30] sm:$0xff] }
0x16e1   :  { %v10733_v16 = vsel %vm4480_vm1, %v10689_v60, 0 }
0x16e2   :  { %13242 = vtanh.f32 %v10665_v2  ;;  %v10688_v2 = vld [vmem:[#allocation2 + $0x28] sm:$0xff]  ;;  %v18062_v22 = vand.u32 4294901760, %v10733_v16 }
0x16e3   :  { %v10662_v15 = vpop.permute.xlu1 %10661  ;;  %v10730_v18 = vsel %vm4480_vm1, %v10688_v2, 0 }
0x16e4   :  { %v10666_v3 = vadd.f32 %v10662_v15, %v10646_v53  ;;  %v18051_v15 = vand.u32 4294901760, %v10727_v43  ;;  %v18072_v20 = vand.u32 4294901760, %v10730_v18 }
0x16e6   :  { %13244 = vtanh.f32 %v10666_v3  ;;  %v18055_v3 = vsub.f32 %v10721_v41, %v18041_v5  ;;  %v18076_v25 = vsub.f32 %v10727_v43, %v18051_v15  ;;  %v18097_v41 = vsub.f32 %v10730_v18, %v18072_v20  ;;  %v10694_v43 = vld [vmem:[#allocation2 + $0x58] sm:$0xff] }
0x16e8   :  { %v19019_v36 = vand.u32 4294901760, %v18055_v3 }
0x16ea   :  { %v10858_v28 = vsub.f32 %v18055_v3, %v19019_v36 }
0x16ef   :  { %v13243_v37 = vpop.eup %13242 }
0x16f0   :  { %10671 = vrot.lane.b32.xlu0 %v13243_v37, %s13401_s5 }
0x16f3   :  { %v13245_v12 = vpop.eup %13244 }
0x16f4   :  { %10673 = vrot.lane.b32.xlu1 %v13245_v12, %s13401_s5  ;;  %v18089_v12 = vand.u32 4294901760, %v10739_v34 }
0x1762   :  { %v10672_v42 = vpop.permute.xlu0 %10671 }
0x1763   :  { %v10677_v8 = vmul.f32 %v17898_v1, %v10672_v42  ;;  %v10724_v1 = vsel %vm4480_vm1, %v10686_v27, 0  ;;  %v10742_v42 = vsel %vm4480_vm1, %v10692_v40, 0  ;;  %v10859_v40 = vand.u32 4294901760, %v10858_v28 }
0x1764   :  { %v18048_v53 = vand.u32 4294901760, %v10724_v1  ;;  %v18112_v2 = vand.u32 4294901760, %v10742_v42 }
0x1765   :  { %10679 = vst.msk [vmem:[#allocation2 + $0x70] sm:$0xff] %vm1847_vm0, %v10677_v8 }
0x1766   :  { %10681 = vst.msk [vmem:[#allocation2] sm:$0xff] %vm5248_vm2, %v10677_v8  ;;  %v10674_v4 = vpop.permute.xlu1 %10673  ;;  %v18070_v31 = vsub.f32 %v10724_v1, %v18048_v53  ;;  %v18093_v8 = vsub.f32 %v10733_v16, %v18062_v22  ;;  %v19016_v1 = vand.u32 4294901760, %v18076_v25  ;;  %v18117_v16 = vsub.f32 %v10739_v34, %v18089_v12 }
0x1767   :  { %v10678_v7 = vmul.f32 %v17901_v17, %v10674_v4  ;;  %v18138_v28 = vsub.f32 %v10742_v42, %v18112_v2 }
0x1768   :  { %v19017_v27 = vand.u32 4294901760, %v18070_v31 }
0x1769   :  { %10680 = vst.msk [vmem:[#allocation2 + $0x78] sm:$0xff] %vm1847_vm0, %v10678_v7 }
0x176a   :  { %10682 = vst.msk [vmem:[#allocation2 + $0x8] sm:$0xff] %vm5248_vm2, %v10678_v7  ;;  %v10868_v18 = vsub.f32 %v18070_v31, %v19017_v27 }
0x176d   :  { %v10683_v19 = vld [vmem:[#allocation2] sm:$0xff] }
0x176e   :  { %v10715_v63 = vsel %vm4480_vm1, %v10683_v19, 0  ;;  %v10745_v19 = vsel %vm4480_vm1, %v10693_v54, 0  ;;  %v10748_v54 = vsel %vm4480_vm1, %v10694_v43, 0  ;;  %v19022_v43 = vand.u32 4294901760, %v18117_v16 }
0x176f   :  { %v18046_v17 = vand.u32 4294901760, %v10715_v63  ;;  %v18130_v34 = vand.u32 4294901760, %v10745_v19  ;;  %v18149_v27 = vand.u32 4294901760, %v10748_v54 }
0x1771   :  { %12895 = vmatprep.mubr.f32.mxu1 %v18046_v17  ;;  %v10684_v47 = vld [vmem:[#allocation2 + $0x8] sm:$0xff]  ;;  %v18059_v33 = vsub.f32 %v10715_v63, %v18046_v17  ;;  %v19018_v63 = vand.u32 4294901760, %v18093_v8 }
0x1772   :  { %v10718_v45 = vsel %vm4480_vm1, %v10684_v47, 0  ;;  %v18123_v47 = vsub.f32 %v10736_v23, %v18087_v61  ;;  %v10751_v23 = vsel %vm4480_vm1, %v10695_v6, 0 }
0x1773   :  { %v18066_v44 = vand.u32 4294901760, %v10718_v45  ;;  %v19024_v59 = vand.u32 4294901760, %v18059_v33 }
0x1775   :  { %v18079_v32 = vsub.f32 %v10718_v45, %v18066_v44  ;;  %12896 = vmatmul.mubr.f32.vlgmr.msra.gmra.mxu1 %v18066_v44  ;;  %v10838_v37 = vsub.f32 %v18059_v33, %v19024_v59  ;;  %v19020_v45 = vand.u32 4294901760, %v18097_v41 }
0x1776   :  { %12898 = vmatprep.mubr.f32.mxu1 %v18041_v5  ;;  %12960 = vmatpush3.msra.mxu1 %v17911_v30 }
0x1777   :  { %v10839_v4 = vand.u32 4294901760, %v10838_v37  ;;  %v19021_v7 = vand.u32 4294901760, %v18079_v32  ;;  %12961 = vmatprep.subr.mxu1 %v17919_v58  ;;  %v10878_v37 = vsub.f32 %v18076_v25, %v19016_v1  ;;  %v10697_v1 = vld [vmem:[#allocation2 + $0x70] sm:$0xff]  ;;  %v10888_v6 = vsub.f32 %v18097_v41, %v19020_v45  ;;  %v10698_v45 = vld [vmem:[#allocation2 + $0x78] sm:$0xff] }
0x1778   :  { %12962 = vmatpush3.msra.mxu1 %v17919_v58 }
0x1779   :  { %12855 = vmatprep.mubr.f32.mxu0 %v10839_v4  ;;  %12899 = vmatmul.mubr.f32.gmra.mxu1 %v18048_v53  ;;  %v10848_v60 = vsub.f32 %v18079_v32, %v19021_v7  ;;  %v10696_v4 = vld [vmem:[#allocation2 + $0x68] sm:$0xff]  ;;  %v10879_v42 = vand.u32 4294901760, %v10878_v37  ;;  %v10918_v37 = vsub.f32 %v18117_v16, %v19022_v43 }
0x177a   :  { %12901 = vmatprep.mubr.f32.mxu1 %v18051_v15  ;;  %12963 = vmatprep.subr.mxu1 %v17933_v49  ;;  %v10754_v36 = vsel %vm4480_vm1, %v10696_v4, 0  ;;  %v10927_v4 = vand.u32 4294901760, %v18138_v28 }
0x177b   :  { %v10849_v10 = vand.u32 4294901760, %v10848_v60  ;;  %12964 = vmatpush3.msra.mxu1 %v17933_v49  ;;  %v10898_v60 = vsub.f32 %v18093_v8, %v19018_v63  ;;  %v18153_v63 = vand.u32 4294901760, %v10751_v23 }
0x177c   :  { %12965 = vmatprep.subr.mxu1 %v17950_v35 }
0x177d   :  { %12856 = vmatmul.mubr.f32.vlgmr.msra.gmra.mxu0 %v10849_v10  ;;  %12902 = vmatmul.mubr.f32.gmra.mxu1 %v18072_v20  ;;  %v10869_v10 = vand.u32 4294901760, %v10868_v18  ;;  %v10757_v18 = vsel %vm4480_vm1, %v10697_v1, 0  ;;  %v10899_v7 = vand.u32 4294901760, %v10898_v60  ;;  %v18172_v1 = vsub.f32 %v10748_v54, %v18149_v27 }
0x177e   :  { %12858 = vmatprep.mubr.f32.mxu0 %v10859_v40  ;;  %12904 = vmatprep.mubr.f32.mxu1 %v18062_v22  ;;  %v19023_v40 = vand.u32 4294901760, %v18123_v47  ;;  %v18179_v43 = vand.u32 4294901760, %v10757_v18  ;;  %v10928_v54 = vsub.f32 %v18138_v28, %v10927_v4 }
0x177f   :  { %12920 = vmatpush3.msra.mxu0 %v17917_v39  ;;  %12966 = vmatpush3.msra.mxu1 %v17950_v35  ;;  %v18158_v39 = vsub.f32 %v10745_v19, %v18130_v34  ;;  %v10889_v19 = vand.u32 4294901760, %v10888_v6  ;;  %v18184_v6 = vsub.f32 %v10751_v23, %v18153_v63 }
0x1780   :  { %12921 = vmatprep.subr.mxu0 %v17931_v26  ;;  %12967 = vmatprep.subr.mxu1 %v17964_v9 }
0x1781   :  { %12859 = vmatmul.mubr.f32.gmra.mxu0 %v10869_v10  ;;  %12905 = vmatmul.mubr.f32.gmra.mxu1 %v18087_v61  ;;  %v10908_v10 = vsub.f32 %v18123_v47, %v19023_v40  ;;  %v19025_v60 = vand.u32 4294901760, %v18158_v39 }
0x1782   :  { %12861 = vmatprep.mubr.f32.mxu0 %v10879_v42  ;;  %12907 = vmatprep.mubr.f32.mxu1 %v18089_v12  ;;  %v18174_v42 = vand.u32 4294901760, %v10754_v36 }
0x1783   :  { %12922 = vmatpush3.msra.mxu0 %v17931_v26  ;;  %12968 = vmatpush3.msra.mxu1 %v17964_v9  ;;  %v10760_v26 = vsel %vm4480_vm1, %v10698_v45, 0  ;;  %v10909_v40 = vand.u32 4294901760, %v10908_v10  ;;  %v10947_v45 = vand.u32 4294901760, %v18172_v1 }
0x1784   :  { %12923 = vmatprep.subr.mxu0 %v17946_v50  ;;  %12969 = vmatprep.subr.mxu1 %v17972_v38  ;;  %v18193_v59 = vsub.f32 %v10754_v36, %v18174_v42  ;;  %v18197_v23 = vand.u32 4294901760, %v10760_v26  ;;  %v18206_v36 = vsub.f32 %v10757_v18, %v18179_v43 }
0x1785   :  { %12862 = vmatmul.mubr.f32.gmra.mxu0 %v10889_v19  ;;  %12908 = vmatmul.mubr.f32.gmra.mxu1 %v18112_v2  ;;  %v10938_v19 = vsub.f32 %v18158_v39, %v19025_v60  ;;  %v10948_v10 = vsub.f32 %v18172_v1, %v10947_v45 }
0x1786   :  { %12864 = vmatprep.mubr.f32.mxu0 %v10899_v7  ;;  %12910 = vmatprep.mubr.f32.mxu1 %v18130_v34  ;;  %v10919_v7 = vand.u32 4294901760, %v10918_v37  ;;  %v10929_v37 = vand.u32 4294901760, %v10928_v54  ;;  %v18215_v60 = vsub.f32 %v10760_v26, %v18197_v23  ;;  %v10967_v18 = vand.u32 4294901760, %v18193_v59 }
0x1787   :  { %12924 = vmatpush3.msra.mxu0 %v17946_v50  ;;  %12970 = vmatpush3.msra.mxu1 %v17972_v38  ;;  %v19026_v50 = vand.u32 4294901760, %v18184_v6  ;;  %v10949_v26 = vand.u32 4294901760, %v10948_v10 }
0x1788   :  { %12925 = vmatprep.subr.mxu0 %v17962_v11  ;;  %12971 = vmatprep.subr.mxu1 %v17988_v29  ;;  %v10968_v54 = vsub.f32 %v18193_v59, %v10967_v18 }
0x1789   :  { %12865 = vmatmul.mubr.f32.gmra.mxu0 %v10909_v40  ;;  %12911 = vmatmul.mubr.f32.gmra.mxu1 %v18149_v27  ;;  %v10939_v40 = vand.u32 4294901760, %v10938_v19  ;;  %v10987_v19 = vand.u32 4294901760, %v18215_v60 }
0x178a   :  { %12867 = vmatprep.mubr.f32.mxu0 %v10919_v7  ;;  %12913 = vmatprep.mubr.f32.mxu1 %v18153_v63  ;;  %v10958_v7 = vsub.f32 %v18184_v6, %v19026_v50  ;;  %v10969_v10 = vand.u32 4294901760, %v10968_v54  ;;  %v20144_v54 = vand.u32 4294901760, %v18076_v25 }
0x178b   :  { %12926 = vmatpush3.msra.mxu0 %v17962_v11  ;;  %12972 = vmatpush3.msra.mxu1 %v17988_v29  ;;  %v10977_v11 = vand.u32 4294901760, %v18206_v36 }
0x178c   :  { %12927 = vmatprep.subr.mxu0 %v17979_v56  ;;  %12973 = vmatprep.subr.mxu1 %v18006_v14  ;;  %v10959_v50 = vand.u32 4294901760, %v10958_v7 }
0x178d   :  { %12868 = vmatmul.mubr.f32.gmra.mxu0 %v10929_v37  ;;  %12914 = vmatmul.mubr.f32.gmra.mxu1 %v18174_v42  ;;  %v10978_v37 = vsub.f32 %v18206_v36, %v10977_v11 }
0x178e   :  { %12870 = vmatprep.mubr.f32.mxu0 %v10939_v40  ;;  %12916 = vmatprep.mubr.f32.mxu1 %v18179_v43  ;;  %v10988_v40 = vsub.f32 %v18215_v60, %v10987_v19 }
0x178f   :  { %12928 = vmatpush3.msra.mxu0 %v17979_v56  ;;  %12974 = vmatpush3.msra.mxu1 %v18006_v14  ;;  %v20140_v56 = vand.u32 4294901760, %v18059_v33  ;;  %v10979_v7 = vand.u32 4294901760, %v10978_v37 }
0x1790   :  { %12929 = vmatprep.subr.mxu0 %v17986_v24  ;;  %13039 = vmatprep.subr.mxu1 %v17911_v30 }
0x1791   :  { %12871 = vmatmul.mubr.f32.gmra.mxu0 %v10949_v26  ;;  %12917 = vmatmul.mubr.f32.gmra.mxu1 %v18197_v23  ;;  %v20141_v26 = vand.u32 4294901760, %v18079_v32 }
0x1792   :  { %12873 = vmatprep.mubr.f32.mxu0 %v10959_v50  ;;  %12930 = vmatpush3.msra.mxu0 %v17986_v24  ;;  %v20142_v24 = vand.u32 4294901760, %v18055_v3  ;;  %v10989_v50 = vand.u32 4294901760, %v10988_v40 }
0x1793   :  { %12975 = vmatprep.mubr.f32.mxu1 %v20140_v56  ;;  %12931 = vmatprep.subr.mxu0 %v18004_v57 }
0x1794   :  { %12932 = vmatpush3.msra.mxu0 %v18004_v57  ;;  %v20143_v57 = vand.u32 4294901760, %v18070_v31 }
0x1795   :  { %12874 = vmatmul.mubr.f32.gmra.mxu0 %v10969_v10  ;;  %12976 = vmatmul.mubr.f32.vlgmr.msra.gmra.mxu1 %v20141_v26 }
0x1796   :  { %12876 = vmatprep.mubr.f32.mxu0 %v10979_v7  ;;  %12978 = vmatprep.mubr.f32.mxu1 %v20142_v24 }
0x1797   :  { %12933 = vmatprep.subr.mxu0 %v18018_v55  ;;  %13040 = vmatpush3.msra.mxu1 %v17911_v30  ;;  %v20145_v30 = vand.u32 4294901760, %v18097_v41 }
0x1798   :  { %12934 = vmatpush3.msra.mxu0 %v18018_v55  ;;  %13041 = vmatprep.subr.mxu1 %v17919_v58  ;;  %v20146_v55 = vand.u32 4294901760, %v18093_v8 }
0x1799   :  { %12877 = vmatmul.mubr.f32.gmra.mxu0 %v10989_v50  ;;  %12979 = vmatmul.mubr.f32.gmra.mxu1 %v20143_v57 }
0x179a   :  { %12935 = vmatprep.mubr.f32.mxu0 %v18059_v33  ;;  %12981 = vmatprep.mubr.f32.mxu1 %v20144_v54 }
0x179b   :  { %12999 = vmatprep.subr.mxu0 %v17928_v51  ;;  %13042 = vmatpush3.msra.mxu1 %v17919_v58  ;;  %v20147_v58 = vand.u32 4294901760, %v18123_v47 }
0x179c   :  { %13043 = vmatprep.subr.mxu1 %v17933_v49 }
0x179d   :  { %12936 = vmatmul.mubr.f32.vlgmr.msra.gmra.mxu0 %v18079_v32  ;;  %12982 = vmatmul.mubr.f32.gmra.mxu1 %v20145_v30 }
0x179e   :  { %12938 = vmatprep.mubr.f32.mxu0 %v18055_v3  ;;  %12984 = vmatprep.mubr.f32.mxu1 %v20146_v55  ;;  %v20148_v3 = vand.u32 4294901760, %v18117_v16 }
0x179f   :  { %13000 = vmatpush3.msra.mxu0 %v17928_v51  ;;  %13044 = vmatpush3.msra.mxu1 %v17933_v49  ;;  %v20149_v51 = vand.u32 4294901760, %v18158_v39  ;;  %v20150_v49 = vand.u32 4294901760, %v18184_v6 }
0x17a0   :  { %13001 = vmatprep.subr.mxu0 %v17943_v48  ;;  %13045 = vmatprep.subr.mxu1 %v17950_v35 }
0x17a1   :  { %12939 = vmatmul.mubr.f32.gmra.mxu0 %v18070_v31  ;;  %12985 = vmatmul.mubr.f32.gmra.mxu1 %v20147_v58 }
0x17a2   :  { %12941 = vmatprep.mubr.f32.mxu0 %v18076_v25  ;;  %12987 = vmatprep.mubr.f32.mxu1 %v20148_v3 }
0x17a3   :  { %13002 = vmatpush3.msra.mxu0 %v17943_v48  ;;  %13046 = vmatpush3.msra.mxu1 %v17950_v35 }
0x17a4   :  { %13003 = vmatprep.subr.mxu0 %v17959_v21  ;;  %13047 = vmatprep.subr.mxu1 %v17964_v9 }
0x17a5   :  { %12942 = vmatmul.mubr.f32.gmra.mxu0 %v18097_v41  ;;  %12988 = vmatmul.mubr.f32.gmra.mxu1 %v10927_v4 }
0x17a6   :  { %12944 = vmatprep.mubr.f32.mxu0 %v18093_v8  ;;  %12990 = vmatprep.mubr.f32.mxu1 %v20149_v51 }
0x17a7   :  { %13004 = vmatpush3.msra.mxu0 %v17959_v21  ;;  %13048 = vmatpush3.msra.mxu1 %v17964_v9 }
0x17a8   :  { %13005 = vmatprep.subr.mxu0 %v17976_v62  ;;  %13049 = vmatprep.subr.mxu1 %v17972_v38 }
0x17a9   :  { %12945 = vmatmul.mubr.f32.gmra.mxu0 %v18123_v47  ;;  %12991 = vmatmul.mubr.f32.gmra.mxu1 %v10947_v45 }
0x17aa   :  { %12947 = vmatprep.mubr.f32.mxu0 %v18117_v16  ;;  %12993 = vmatprep.mubr.f32.mxu1 %v20150_v49 }
0x17ab   :  { %13006 = vmatpush3.msra.mxu0 %v17976_v62  ;;  %13050 = vmatpush3.msra.mxu1 %v17972_v38 }
0x17ac   :  { %13007 = vmatprep.subr.mxu0 %v17994_v46  ;;  %13051 = vmatprep.subr.mxu1 %v17988_v29 }
0x17ad   :  { %12948 = vmatmul.mubr.f32.gmra.mxu0 %v18138_v28  ;;  %12994 = vmatmul.mubr.f32.gmra.mxu1 %v10967_v18 }
0x17ae   :  { %12950 = vmatprep.mubr.f32.mxu0 %v18158_v39  ;;  %12996 = vmatprep.mubr.f32.mxu1 %v10977_v11 }
0x17af   :  { %13008 = vmatpush3.msra.mxu0 %v17994_v46  ;;  %13052 = vmatpush3.msra.mxu1 %v17988_v29  ;;  %v18369_v29 = vld [vmem:[%s18603_s7] ss:$0 sm:$0xff] }
0x17b0   :  { %13009 = vmatprep.subr.mxu0 %v18001_v52  ;;  %13053 = vmatprep.subr.mxu1 %v18006_v14 }
0x17b1   :  { %12951 = vmatmul.mubr.f32.gmra.mxu0 %v18172_v1  ;;  %12997 = vmatmul.mubr.f32.gmra.mxu1 %v10987_v19 }
0x17b2   :  { %12953 = vmatprep.mubr.f32.mxu0 %v18184_v6  ;;  %13010 = vmatpush3.msra.mxu0 %v18001_v52 }
0x17b3   :  { %13055 = vmatprep.mubr.f32.mxu1 %v18046_v17  ;;  %13054 = vmatpush3.msra.mxu1 %v18006_v14 }
0x17b4   :  { %13011 = vmatprep.subr.mxu0 %v18015_v0 }
0x17b5   :  { %12954 = vmatmul.mubr.f32.gmra.mxu0 %v18193_v59  ;;  %13056 = vmatmul.mubr.f32.vlgmr.msra.gmra.mxu1 %v18066_v44 }
0x17b6   :  { %12956 = vmatprep.mubr.f32.mxu0 %v18206_v36  ;;  %13012 = vmatpush3.msra.mxu0 %v18015_v0 }
0x17b7   :  { %13058 = vmatprep.mubr.f32.mxu1 %v18041_v5  ;;  %13013 = vmatprep.subr.mxu0 %v18025_v13 }
0x17b8   :  { %13014 = vmatpush3.msra.mxu0 %v18025_v13 }
0x17b9   :  { %12957 = vmatmul.mubr.f32.gmra.mxu0 %v18215_v60  ;;  %13059 = vmatmul.mubr.f32.gmra.mxu1 %v18048_v53 }
0x17ba   :  { %13015 = vmatprep.mubr.f32.mxu0 %v18046_v17  ;;  %13061 = vmatprep.mubr.f32.mxu1 %v18051_v15 }
0x17bd   :  { %13016 = vmatmul.mubr.f32.vlgmr.msra.gmra.mxu0 %v18066_v44  ;;  %13062 = vmatmul.mubr.f32.gmra.mxu1 %v18072_v20 }
0x17be   :  { %13018 = vmatprep.mubr.f32.mxu0 %v18041_v5  ;;  %13064 = vmatprep.mubr.f32.mxu1 %v18062_v22 }
0x17c1   :  { %13019 = vmatmul.mubr.f32.gmra.mxu0 %v18048_v53  ;;  %13065 = vmatmul.mubr.f32.gmra.mxu1 %v18087_v61 }
0x17c2   :  { %13021 = vmatprep.mubr.f32.mxu0 %v18051_v15  ;;  %13067 = vmatprep.mubr.f32.mxu1 %v18089_v12 }
0x17c5   :  { %13022 = vmatmul.mubr.f32.gmra.mxu0 %v18072_v20  ;;  %13068 = vmatmul.mubr.f32.gmra.mxu1 %v18112_v2 }
0x17c6   :  { %13024 = vmatprep.mubr.f32.mxu0 %v18062_v22  ;;  %13070 = vmatprep.mubr.f32.mxu1 %v18130_v34 }
0x17c9   :  { %13025 = vmatmul.mubr.f32.gmra.mxu0 %v18087_v61  ;;  %13071 = vmatmul.mubr.f32.gmra.mxu1 %v18149_v27 }
0x17ca   :  { %13027 = vmatprep.mubr.f32.mxu0 %v18089_v12  ;;  %13073 = vmatprep.mubr.f32.mxu1 %v18153_v63 }
0x17cd   :  { %13028 = vmatmul.mubr.f32.gmra.mxu0 %v18112_v2  ;;  %13074 = vmatmul.mubr.f32.gmra.mxu1 %v18174_v42 }
0x17ce   :  { %13030 = vmatprep.mubr.f32.mxu0 %v18130_v34  ;;  %13076 = vmatprep.mubr.f32.mxu1 %v18179_v43 }
0x17d1   :  { %13031 = vmatmul.mubr.f32.gmra.mxu0 %v18149_v27  ;;  %13077 = vmatmul.mubr.f32.gmra.mxu1 %v18197_v23 }
0x17d2   :  { %13033 = vmatprep.mubr.f32.mxu0 %v18153_v63 }
0x17d5   :  { %13034 = vmatmul.mubr.f32.gmra.mxu0 %v18174_v42 }
0x17d6   :  { %13036 = vmatprep.mubr.f32.mxu0 %v18179_v43 }
0x17d9   :  { %13037 = vmatmul.mubr.f32.gmra.mxu0 %v18197_v23 }
0x1835   :  { %v18358_v48 = vpop.f32.mrf.mxu1 }
0x1837   :  { %v11102_v35 = vpop.f32.mrf.mxu1 }
0x1839   :  { %v18360_v21 = vpop.f32.mrf.mxu1 }
0x183b   :  { %v11114_v9 = vpop.f32.mrf.mxu1 }
0x183d   :  { %v18362_v38 = vpop.f32.mrf.mxu0  ;;  %v18364_v62 = vpop.f32.mrf.mxu1 }
0x183f   :  { %v10841_v46 = vpop.f32.mrf.mxu0  ;;  %v11126_v52 = vpop.f32.mrf.mxu1 }
0x1840   :  { %v10842_v14 = vadd.f32 %v18369_v29, %v10841_v46 }
0x1841   :  { %v18372_v0 = vpop.f32.mrf.mxu0  ;;  %v18374_v13 = vpop.f32.mrf.mxu1 }
0x1842   :  { %v18376_v5 = vadd.f32 %v11102_v35, %v10842_v14 }
0x1843   :  { %v10861_v17 = vpop.f32.mrf.mxu0  ;;  %v11138_v53 = vpop.f32.mrf.mxu1 }
0x1844   :  { %v10862_v15 = vadd.f32 %v18369_v29, %v10861_v17 }
0x1845   :  { %v18379_v33 = vpop.f32.mrf.mxu0  ;;  %v18381_v22 = vpop.f32.mrf.mxu1 }
0x1846   :  { %v18383_v44 = vadd.f32 %v11114_v9, %v10862_v15 }
0x1847   :  { %v10881_v59 = vpop.f32.mrf.mxu0  ;;  %v11150_v31 = vpop.f32.mrf.mxu1 }
0x1848   :  { %v10882_v20 = vadd.f32 %v18369_v29, %v10881_v59 }
0x1849   :  { %v18386_v25 = vpop.f32.mrf.mxu0  ;;  %v18388_v32 = vpop.f32.mrf.mxu1 }
0x184a   :  { %v18390_v61 = vadd.f32 %v11126_v52, %v10882_v20 }
0x184b   :  { %v10901_v12 = vpop.f32.mrf.mxu0  ;;  %v11162_v8 = vpop.f32.mrf.mxu1 }
0x184c   :  { %v10902_v41 = vadd.f32 %v18369_v29, %v10901_v12  ;;  %v10852_v12 = vadd.f32 %v18362_v38, %v18369_v29 }
0x184d   :  { %v18393_v27 = vpop.f32.mrf.mxu0  ;;  %v18395_v2 = vpop.f32.mrf.mxu1 }
0x184e   :  { %v18397_v63 = vadd.f32 %v11138_v53, %v10902_v41 }
0x184f   :  { %v10921_v16 = vpop.f32.mrf.mxu0  ;;  %v11174_v47 = vpop.f32.mrf.mxu1 }
0x1850   :  { %v10922_v34 = vadd.f32 %v18369_v29, %v10921_v16 }
0x1851   :  { %v18400_v28 = vpop.f32.mrf.mxu0  ;;  %v18402_v43 = vpop.f32.mrf.mxu1 }
0x1852   :  { %v18404_v39 = vadd.f32 %v11150_v31, %v10922_v34  ;;  %v10872_v34 = vadd.f32 %v18372_v0, %v18369_v29 }
0x1853   :  { %v10941_v4 = vpop.f32.mrf.mxu0  ;;  %v11186_v1 = vpop.f32.mrf.mxu1 }
0x1854   :  { %v10942_v42 = vadd.f32 %v18369_v29, %v10941_v4  ;;  %v11109_v4 = vadd.f32 %v18358_v48, %v10852_v12 }
0x1855   :  { %v18407_v60 = vpop.f32.mrf.mxu0  ;;  %v12977_v6 = vpop.f32.mrf.mxu1 }
0x1856   :  { %v18409_v45 = vadd.f32 %v11162_v8, %v10942_v42 }
0x1857   :  { %v10961_v23 = vpop.f32.mrf.mxu0  ;;  %v18411_v36 = vpop.f32.mrf.mxu1 }
0x1858   :  { %v10962_v18 = vadd.f32 %v18369_v29, %v10961_v23 }
0x1859   :  { %v18414_v11 = vpop.f32.mrf.mxu0  ;;  %v12980_v19 = vpop.f32.mrf.mxu1 }
0x185a   :  { %v18416_v37 = vadd.f32 %v11174_v47, %v10962_v18 }
0x185b   :  { %v10981_v56 = vpop.f32.mrf.mxu0  ;;  %v18418_v10 = vpop.f32.mrf.mxu1 }
0x185c   :  { %v10982_v40 = vadd.f32 %v18369_v29, %v10981_v56  ;;  %v10892_v56 = vadd.f32 %v18379_v33, %v18369_v29 }
0x185d   :  { %v12937_v7 = vpop.f32.mrf.mxu0  ;;  %v12983_v26 = vpop.f32.mrf.mxu1 }
0x185e   :  { %v18421_v24 = vadd.f32 %v11186_v1, %v10982_v40  ;;  %v11288_v23 = vadd.f32 %v12937_v7, %v11109_v4  ;;  %v11121_v40 = vadd.f32 %v18360_v21, %v10872_v34  ;;  %v11133_v7 = vadd.f32 %v18364_v62, %v10892_v56 }
0x185f   :  { %v18423_v50 = vpop.f32.mrf.mxu0  ;;  %v18425_v57 = vpop.f32.mrf.mxu1 }
0x1860   :  { %20151 = vst [vmem:[#allocation22_spill] sm:$0xff] %v18421_v24 }
0x1861   :  { %v12940_v54 = vpop.f32.mrf.mxu0  ;;  %v18427_v30 = vpop.f32.mrf.mxu1 }
0x1862   :  { %v11302_v0 = vadd.f32 %v12940_v54, %v11121_v40  ;;  %v10932_v54 = vadd.f32 %v18393_v27, %v18369_v29 }
0x1863   :  { %v18429_v55 = vpop.f32.mrf.mxu0  ;;  %v18431_v58 = vpop.f32.mrf.mxu1 }
0x1864   :  { %20152 = vst [vmem:[#allocation26_spill] sm:$0xff] %v18431_v58  ;;  %v11491_v21 = vadd.f32 %v12980_v19, %v11302_v0  ;;  %v10952_v19 = vadd.f32 %v18400_v28, %v18369_v29 }
0x1865   :  { %v12943_v3 = vpop.f32.mrf.mxu0  ;;  %v18433_v51 = vpop.f32.mrf.mxu1 }
0x1866   :  { %v11316_v33 = vadd.f32 %v12943_v3, %v11133_v7  ;;  %v11157_v3 = vadd.f32 %v18381_v22, %v10932_v54  ;;  %v11281_v22 = vadd.f32 %v18423_v50, %v18376_v5  ;;  %v11295_v5 = vadd.f32 %v18429_v55, %v18383_v44 }
0x1867   :  { %v18435_v49 = vpop.f32.mrf.mxu0  ;;  %v18437_v35 = vpop.f32.mrf.mxu1 }
0x1868   :  { %20153 = vst [vmem:[#allocation78_spill] sm:$0xff] %v18437_v35  ;;  %v11507_v56 = vadd.f32 %v12983_v26, %v11316_v33 }
0x1869   :  { %v12946_v9 = vpop.f32.mrf.mxu0  ;;  %v18439_v46 = vpop.f32.mrf.mxu1 }
0x186b   :  { %v18441_v52 = vpop.f32.mrf.mxu0  ;;  %v18443_v14 = vpop.f32.mrf.mxu1 }
0x186c   :  { %20154 = vst [vmem:[#allocation38_spill] sm:$0xff] %v18443_v14  ;;  %v10912_v14 = vadd.f32 %v18386_v25, %v18369_v29 }
0x186d   :  { %v12949_v17 = vpop.f32.mrf.mxu0  ;;  %v18445_v53 = vpop.f32.mrf.mxu1 }
0x186f   :  { %v18447_v15 = vpop.f32.mrf.mxu0  ;;  %v18449_v59 = vpop.f32.mrf.mxu1 }
0x1870   :  { %20155 = vst [vmem:[#allocation87_spill] sm:$0xff] %v18449_v59  ;;  %v11475_v59 = vadd.f32 %v12977_v6, %v11288_v23  ;;  %v11145_v6 = vadd.f32 %v18374_v13, %v10912_v14  ;;  %v11344_v13 = vadd.f32 %v12949_v17, %v11157_v3 }
0x1871   :  { %v12952_v31 = vpop.f32.mrf.mxu0  ;;  %v18451_v20 = vpop.f32.mrf.mxu1 }
0x1872   :  { %20156 = vst [vmem:[#allocation97_spill] sm:$0xff] %v18451_v20  ;;  %v11330_v62 = vadd.f32 %v12946_v9, %v11145_v6  ;;  %v10972_v9 = vadd.f32 %v18407_v60, %v18369_v29  ;;  %v11539_v17 = vadd.f32 %v18433_v51, %v11344_v13  ;;  %v11309_v51 = vadd.f32 %v18435_v49, %v18390_v61  ;;  %v20161_v13 = vld [vmem:[#allocation78_spill] sm:$0xff] }
0x1873   :  { %v18455_v8 = vpop.f32.mrf.mxu0  ;;  %v18457_v41 = vpop.f32.mrf.mxu1 }
0x1874   :  { %20157 = vst [vmem:[#allocation54_spill] sm:$0xff] %v18457_v41  ;;  %v11523_v14 = vadd.f32 %v18427_v30, %v11330_v62  ;;  %v10992_v30 = vadd.f32 %v18414_v11, %v18369_v29  ;;  %v11467_v29 = vadd.f32 %v18411_v36, %v11281_v22  ;;  %v11483_v62 = vadd.f32 %v18418_v10, %v11295_v5  ;;  %v20166_v5 = vld [vmem:[#allocation22_spill] sm:$0xff] }
0x1875   :  { %v18459_v16 = vpop.f32.mrf.mxu0  ;;  %v13057_v47 = vpop.f32.mrf.mxu1  ;;  %v11323_v36 = vadd.f32 %v18441_v52, %v18397_v63 }
0x1876   :  { %v11193_v44 = vadd.f32 %v18402_v43, %v10992_v30  ;;  %v20164_v30 = vld [vmem:[#allocation38_spill] sm:$0xff] }
0x1877   :  { %v18464_v1 = vpop.f32.mrf.mxu0  ;;  %v18466_v42 = vpop.f32.mrf.mxu1 }
0x1879   :  { %v18468_v18 = vpop.f32.mrf.mxu0  ;;  %v13060_v38 = vpop.f32.mrf.mxu1 }
0x187a   :  { %v11386_v10 = vadd.f32 %v18468_v18, %v11193_v44  ;;  %v20160_v18 = vld [vmem:[#allocation26_spill] sm:$0xff] }
0x187b   :  { %v18473_v41 = vpop.f32.mrf.mxu0  ;;  %v18475_v24 = vpop.f32.mrf.mxu1 }
0x187c   :  { %20158 = vst [vmem:[#allocation45_spill] sm:$0xff] %v18473_v41 }
0x187d   :  { %v13017_v48 = vpop.f32.mrf.mxu0  ;;  %v13063_v12 = vpop.f32.mrf.mxu1 }
0x187e   :  { %v11688_v4 = vadd.f32 %v13017_v48, %v11475_v59 }
0x187f   :  { %v11681_v20 = vpop.f32.mrf.mxu0  ;;  %v18480_v35 = vpop.f32.mrf.mxu1 }
0x1880   :  { %20159 = vst [vmem:[#allocation74_spill] sm:$0xff] %v18480_v35  ;;  %v11857_v58 = vadd.f32 %v13057_v47, %v11688_v4  ;;  %v11682_v55 = vadd.f32 %v11681_v20, %v11467_v29 }
0x1881   :  { %v13020_v34 = vpop.f32.mrf.mxu0  ;;  %v13066_v41 = vpop.f32.mrf.mxu1 }
0x1882   :  { %13246 = vtanh.f32 %v11857_v58  ;;  %v11700_v23 = vadd.f32 %v13020_v34, %v11491_v21  ;;  %v11851_v3 = vadd.f32 %v18466_v42, %v11682_v55  ;;  %v20168_v55 = vld [vmem:[#allocation54_spill] sm:$0xff] }
0x1883   :  { %v11693_v40 = vpop.f32.mrf.mxu0  ;;  %v18485_v25 = vpop.f32.mrf.mxu1 }
0x1884   :  { %v11869_v59 = vadd.f32 %v13060_v38, %v11700_v23  ;;  %v11169_v38 = vadd.f32 %v18388_v32, %v10952_v19  ;;  %v18505_v32 = vld [vmem:[%s18604_s8] ss:$0 sm:$0xff]  ;;  %s13402_s8 = smov [#allocation8]  }
0x1885   :  { %v13023_v48 = vpop.f32.mrf.mxu0  ;;  %v13069_v35 = vpop.f32.mrf.mxu1  ;;  %s12155_s0 = sshll.u32 %s13402_s8, 4  ;;  %s12156_s0 = int_to_ptr.vmem [resolvable:$true] %s12155_s0 }
0x1886   :  { %13248 = vtanh.f32 %v11869_v59  ;;  %v11712_v47 = vadd.f32 %v13023_v48, %v11507_v56  ;;  %v11358_v33 = vadd.f32 %v12952_v31, %v11169_v38  ;;  %v11694_v56 = vadd.f32 %v11693_v40, %v11483_v62  ;;  %s13370_s29 = scalar_lea.vmem %s12156_s0, 128  ;;  %p13375_p11 = scmp.lt.s32.totalorder %s12156_s0, %s12156_s0 }
0x1887   :  { %v11705_v27 = vpop.f32.mrf.mxu0  ;;  %v18490_v0 = vpop.f32.mrf.mxu1  ;;  %v11515_v40 = vadd.f32 %v20160_v18, %v11323_v36  ;;  %v20163_v22 = vld [vmem:[#allocation74_spill] sm:$0xff]  ;;  %p13371_p10 = scmp.ne.s32.totalorder %s12156_s0, %s13370_s29  ;;  %p13376_p12 = scmp.lt.s32.totalorder %s13370_s29, %s13370_s29 }
0x1888   :  { %v11881_v58 = vadd.f32 %v13063_v12, %v11712_v47  ;;  %v11181_v12 = vadd.f32 %v18395_v2, %v10972_v9  ;;  %v11555_v54 = vadd.f32 %v18439_v46, %v11358_v33  ;;  %v11499_v46 = vadd.f32 %v18425_v57, %v11309_v51 }
0x1889   :  { %v13026_v26 = vpop.f32.mrf.mxu0  ;;  %v13072_v28 = vpop.f32.mrf.mxu1  ;;  %p13377_p13 = por %p13376_p12, %p13375_p11 }
0x188a   :  { %13250 = vtanh.f32 %v11881_v58  ;;  %v11724_v7 = vadd.f32 %v13026_v26, %v11523_v14  ;;  %v11706_v47 = vadd.f32 %v11705_v27, %v11499_v46  ;;  %v11863_v27 = vadd.f32 %v18475_v24, %v11694_v56  ;;  %v20162_v26 = vld [vmem:[#allocation97_spill] sm:$0xff]  ;;  %v20165_v24 = vld [vmem:[#allocation87_spill] sm:$0xff] }
0x188b   :  { %v11717_v4 = vpop.f32.mrf.mxu0  ;;  %v18513_v2 = vpop.f32.mrf.mxu1  ;;  %v11587_v38 = vadd.f32 %v20162_v26, %v11386_v10  ;;  %p13378_p0 = pnand %p13377_p13, %p13371_p10 }
0x188c   :  { %v11893_v21 = vadd.f32 %v13066_v41, %v11724_v7  ;;  %v11372_v41 = vadd.f32 %v18459_v16, %v11181_v12 }
0x188d   :  { %v13029_v60 = vpop.f32.mrf.mxu0  ;;  %v13075_v59 = vpop.f32.mrf.mxu1 }
0x188e   :  { %13252 = vtanh.f32 %v11893_v21  ;;  %v11736_v50 = vadd.f32 %v13029_v60, %v11539_v17  ;;  %v11571_v20 = vadd.f32 %v18445_v53, %v11372_v41  ;;  %v11365_v53 = vadd.f32 %v18464_v1, %v18416_v37 }
0x188f   :  { %v13247_v31 = vpop.eup %13246  ;;  %v11729_v11 = vpop.f32.mrf.mxu0 }
0x1890   :  { %v11905_v34 = vadd.f32 %v13069_v35, %v11736_v50  ;;  %v11968_v6 = vmul.f32 %v13247_v31, %v18505_v32  ;;  %v11337_v35 = vadd.f32 %v18447_v15, %v18404_v39  ;;  %v11351_v15 = vadd.f32 %v18455_v8, %v18409_v45  ;;  %v11922_v14 = vpop.f32.mrf.mxu1  ;;  %v20167_v50 = vld [vmem:[#allocation45_spill] sm:$0xff] }
0x1891   :  { %v13032_v23 = vpop.f32.mrf.mxu0  ;;  %v11875_v45 = vadd.f32 %v20163_v22, %v11706_v47  ;;  %v11718_v8 = vadd.f32 %v11717_v4, %v11515_v40  ;;  %v11563_v60 = vadd.f32 %v20165_v24, %v11365_v53  ;;  %v11379_v31 = vadd.f32 %v20167_v50, %v20166_v5 }
0x1892   :  { %13254 = vtanh.f32 %v11905_v34  ;;  %v11748_v61 = vadd.f32 %v13032_v23, %v11555_v54  ;;  %v11986_v49 = vsel %vm1847_vm0, %v11968_v6, 0.0  ;;  %v11531_v58 = vadd.f32 %v20161_v13, %v11337_v35  ;;  %v13078_v17 = vpop.f32.mrf.mxu1 }
0x1893   :  { %v13249_v16 = vpop.eup %13248  ;;  %11987 = vadd.xlane.f32.xlu0 %v11986_v49  ;;  %v11741_v43 = vpop.f32.mrf.mxu0  ;;  %v11547_v12 = vadd.f32 %v20164_v30, %v11351_v15  ;;  %v11887_v41 = vadd.f32 %v18485_v25, %v11718_v8  ;;  %v11579_v23 = vadd.f32 %v20168_v55, %v11379_v31 }
0x1894   :  { %v11917_v48 = vadd.f32 %v13072_v28, %v11748_v61  ;;  %v11970_v19 = vmul.f32 %v13249_v16, %v18505_v32  ;;  %v11730_v37 = vadd.f32 %v11729_v11, %v11531_v58  ;;  %v11934_v35 = vpop.f32.mrf.mxu1 }
0x1895   :  { %v13035_v63 = vpop.f32.mrf.mxu0  ;;  %v11742_v29 = vadd.f32 %v11741_v43, %v11547_v12 }
0x1896   :  { %13256 = vtanh.f32 %v11917_v48  ;;  %v11760_v52 = vadd.f32 %v13035_v63, %v11571_v20  ;;  %v11992_v39 = vsel %vm1847_vm0, %v11970_v19, 0.0  ;;  %v11899_v11 = vadd.f32 %v18490_v0, %v11730_v37 }
0x1897   :  { %v13251_v57 = vpop.eup %13250  ;;  %11993 = vadd.xlane.f32.xlu1 %v11992_v39  ;;  %v11753_v42 = vpop.f32.mrf.mxu0  ;;  %13258 = vtanh.f32 %v11851_v3  ;;  %v11911_v61 = vadd.f32 %v18513_v2, %v11742_v29 }
0x1898   :  { %v11929_v9 = vadd.f32 %v13075_v59, %v11760_v52  ;;  %v11972_v7 = vmul.f32 %v13251_v57, %v18505_v32  ;;  %v11754_v34 = vadd.f32 %v11753_v42, %v11563_v60 }
0x1899   :  { %v13038_v28 = vpop.f32.mrf.mxu0 }
0x189a   :  { %13260 = vtanh.f32 %v11929_v9  ;;  %v11772_v1 = vadd.f32 %v13038_v28, %v11587_v38  ;;  %v11998_v33 = vsel %vm1847_vm0, %v11972_v7, 0.0  ;;  %v11923_v49 = vadd.f32 %v11922_v14, %v11754_v34 }
0x189b   :  { %v13253_v21 = vpop.eup %13252  ;;  %11999 = vadd.xlane.f32.xlu0 %v11998_v33  ;;  %13262 = vtanh.f32 %v11863_v27  ;;  %v11765_v44 = vpop.f32.mrf.mxu0 }
0x189c   :  { %v11941_v51 = vadd.f32 %v13078_v17, %v11772_v1  ;;  %v11974_v4 = vmul.f32 %v13253_v21, %v18505_v32  ;;  %13264 = vtanh.f32 %v11875_v45  ;;  %v11766_v25 = vadd.f32 %v11765_v44, %v11579_v23 }
0x189e   :  { %13266 = vtanh.f32 %v11941_v51  ;;  %v12004_v54 = vsel %vm1847_vm0, %v11974_v4, 0.0  ;;  %v11935_v59 = vadd.f32 %v11934_v35, %v11766_v25 }
0x189f   :  { %v13255_v6 = vpop.eup %13254  ;;  %12005 = vadd.xlane.f32.xlu0 %v12004_v54  ;;  %13268 = vtanh.f32 %v11887_v41 }
0x18a0   :  { %v11976_v62 = vmul.f32 %v13255_v6, %v18505_v32  ;;  %13270 = vtanh.f32 %v11899_v11 }
0x18a1   :  { %13272 = vtanh.f32 %v11911_v61 }
0x18a2   :  { %v12010_v16 = vsel %vm1847_vm0, %v11976_v62, 0.0  ;;  %13274 = vtanh.f32 %v11923_v49 }
0x18a3   :  { %v13257_v0 = vpop.eup %13256  ;;  %12011 = vadd.xlane.f32.xlu1 %v12010_v16  ;;  %13276 = vtanh.f32 %v11935_v59 }
0x18a4   :  { %v11978_v36 = vmul.f32 %v13257_v0, %v18505_v32  ;;  %v13259_v46 = vpop.eup %13258 }
0x18a5   :  { %v11967_v19 = vmul.f32 %v13259_v46, %v18505_v32 }
0x18a6   :  { %v12016_v43 = vsel %vm1847_vm0, %v11978_v36, 0.0 }
0x18a7   :  { %v13261_v20 = vpop.eup %13260  ;;  %12017 = vadd.xlane.f32.xlu0 %v12016_v43  ;;  %v11983_v39 = vsel %vm1847_vm0, %v11967_v19, 0.0 }
0x18a8   :  { %v11980_v2 = vmul.f32 %v13261_v20, %v18505_v32  ;;  %v13263_v10 = vpop.eup %13262 }
0x18a9   :  { %v13265_v56 = vpop.eup %13264  ;;  %v11969_v57 = vmul.f32 %v13263_v10, %v18505_v32  ;;  %v13314_v10 = vld [vmem:[#allocation2 + $0x8] sm:$0xff] }
0x18aa   :  { %v12022_v48 = vsel %vm1847_vm0, %v11980_v2, 0.0  ;;  %v11971_v15 = vmul.f32 %v13265_v56, %v18505_v32 }
0x18ab   :  { %v13267_v3 = vpop.eup %13266  ;;  %12023 = vadd.xlane.f32.xlu1 %v12022_v48  ;;  %v11989_v40 = vsel %vm1847_vm0, %v11969_v57, 0.0  ;;  %v13315_v48 = vld [vmem:[#allocation2 + $0x18] sm:$0xff] }
0x18ac   :  { %v11982_v47 = vmul.f32 %v13267_v3, %v18505_v32  ;;  %v13269_v63 = vpop.eup %13268  ;;  %v11995_v13 = vsel %vm1847_vm0, %v11971_v15, 0.0  ;;  %v13316_v3 = vld [vmem:[#allocation2 + $0x28] sm:$0xff] }
0x18ad   :  { %v13271_v53 = vpop.eup %13270  ;;  %v11973_v58 = vmul.f32 %v13269_v63, %v18505_v32 }
0x18ae   :  { %v12028_v52 = vsel %vm1847_vm0, %v11982_v47, 0.0  ;;  %v13273_v18 = vpop.eup %13272  ;;  %v11975_v14 = vmul.f32 %v13271_v53, %v18505_v32 }
0x18af   :  { %12029 = vadd.xlane.f32.xlu0 %v12028_v52  ;;  %11984 = vadd.xlane.f32.xlu1 %v11983_v39  ;;  %v13275_v42 = vpop.eup %13274  ;;  %v12001_v27 = vsel %vm1847_vm0, %v11973_v58, 0.0  ;;  %v11977_v26 = vmul.f32 %v13273_v18, %v18505_v32  ;;  %v13317_v52 = vld [vmem:[#allocation2 + $0x38] sm:$0xff] }
0x18b0   :  { %v12007_v9 = vsel %vm1847_vm0, %v11975_v14, 0.0  ;;  %v11979_v38 = vmul.f32 %v13275_v42, %v18505_v32  ;;  %v13277_v7 = vpop.eup %13276 }
0x18b1   :  { %v12013_v22 = vsel %vm1847_vm0, %v11977_v26, 0.0  ;;  %v11981_v8 = vmul.f32 %v13277_v7, %v18505_v32  ;;  %v13320_v7 = vld [vmem:[#allocation2 + $0x68] sm:$0xff] }
0x18b2   :  { %v12019_v45 = vsel %vm1847_vm0, %v11979_v38, 0.0 }
0x18b3   :  { %11990 = vadd.xlane.f32.xlu0 %v11989_v40  ;;  %11996 = vadd.xlane.f32.xlu1 %v11995_v13  ;;  %v12025_v28 = vsel %vm1847_vm0, %v11981_v8, 0.0  ;;  %v13318_v40 = vld [vmem:[#allocation2 + $0x48] sm:$0xff] }
0x18b7   :  { %12002 = vadd.xlane.f32.xlu0 %v12001_v27  ;;  %12008 = vadd.xlane.f32.xlu1 %v12007_v9  ;;  %v13319_v27 = vld [vmem:[#allocation2 + $0x58] sm:$0xff] }
0x18bb   :  { %12014 = vadd.xlane.f32.xlu0 %v12013_v22  ;;  %12020 = vadd.xlane.f32.xlu1 %v12019_v45 }
0x18bf   :  { %12026 = vadd.xlane.f32.xlu0 %v12025_v28  ;;  %v13321_v28 = vld [vmem:[#allocation2 + $0x78] sm:$0xff] }
0x191c   :  { %v11988_v37 = vpop.xlane.xlu0 %11987 }
0x191d   :  { %v12033_v17 = vmul.f32 1.442695, %v11988_v37 }
0x1920   :  { %v11994_v33 = vpop.xlane.xlu1 %11993 }
0x1921   :  { %v12037_v21 = vmul.f32 1.442695, %v11994_v33 }
0x1923   :  { %13278 = vpow2.f32 %v12037_v21 }
0x1924   :  { %v12000_v1 = vpop.xlane.xlu0 %11999  ;;  %13280 = vpow2.f32 %v12033_v17 }
0x1925   :  { %v12041_v12 = vmul.f32 1.442695, %v12000_v1 }
0x1927   :  { %13282 = vpow2.f32 %v12041_v12 }
0x1928   :  { %v12006_v30 = vpop.xlane.xlu0 %12005 }
0x1929   :  { %v12045_v60 = vmul.f32 1.442695, %v12006_v30 }
0x192b   :  { %13284 = vpow2.f32 %v12045_v60 }
0x192c   :  { %v12012_v24 = vpop.xlane.xlu1 %12011 }
0x192d   :  { %v12049_v5 = vmul.f32 1.442695, %v12012_v24 }
0x192f   :  { %13286 = vpow2.f32 %v12049_v5 }
0x1930   :  { %v12018_v50 = vpop.xlane.xlu0 %12017  ;;  %v13279_v29 = vpop.eup %13278 }
0x1931   :  { %v12053_v32 = vmul.f32 1.442695, %v12018_v50  ;;  %v13281_v11 = vpop.eup %13280 }
0x1932   :  { %v12070_v54 = vadd.f32 %v13281_v11, %v13279_v29 }
0x1933   :  { %13288 = vpow2.f32 %v12053_v32 }
0x1934   :  { %v12024_v31 = vpop.xlane.xlu1 %12023  ;;  %v13283_v34 = vpop.eup %13282 }
0x1935   :  { %v12057_v51 = vmul.f32 1.442695, %v12024_v31  ;;  %v12071_v44 = vadd.f32 %v13283_v34, %v12070_v54 }
0x1937   :  { %13290 = vpow2.f32 %v12057_v51 }
0x1938   :  { %v12030_v4 = vpop.xlane.xlu0 %12029  ;;  %v13285_v6 = vpop.eup %13284 }
0x1939   :  { %v12061_v41 = vmul.f32 1.442695, %v12030_v4  ;;  %v12072_v23 = vadd.f32 %v13285_v6, %v12071_v44  ;;  %v11985_v24 = vpop.xlane.xlu1 %11984 }
0x193a   :  { %v12031_v50 = vmul.f32 1.442695, %v11985_v24 }
0x193b   :  { %13292 = vpow2.f32 %v12061_v41 }
0x193c   :  { %v13287_v55 = vpop.eup %13286  ;;  %v11991_v60 = vpop.xlane.xlu0 %11990 }
0x193d   :  { %v12073_v61 = vadd.f32 %v13287_v55, %v12072_v23  ;;  %v12035_v5 = vmul.f32 1.442695, %v11991_v60  ;;  %v11997_v32 = vpop.xlane.xlu1 %11996  ;;  %v13329_v60 = vld [vmem:[#allocation2 + $0x70] sm:$0xff] }
0x193e   :  { %v12039_v51 = vmul.f32 1.442695, %v11997_v32 }
0x1940   :  { %v13289_v62 = vpop.eup %13288  ;;  %v12003_v31 = vpop.xlane.xlu0 %12002 }
0x1941   :  { %v12074_v25 = vadd.f32 %v13289_v62, %v12073_v61  ;;  %v12043_v4 = vmul.f32 1.442695, %v12003_v31  ;;  %v12009_v41 = vpop.xlane.xlu1 %12008 }
0x1944   :  { %v13291_v49 = vpop.eup %13290 }
0x1945   :  { %v12075_v16 = vadd.f32 %v13291_v49, %v12074_v25  ;;  %v12021_v44 = vpop.xlane.xlu1 %12020 }
0x1948   :  { %v13293_v0 = vpop.eup %13292 }
0x1949   :  { %v12076_v36 = vadd.f32 %v13293_v0, %v12075_v16 }
0x194b   :  { %13294 = vrcp.f32 %v12076_v36 }
0x194c   :  { %13296 = vpow2.f32 %v12035_v5 }
0x194d   :  { %13298 = vpow2.f32 %v12031_v50 }
0x194e   :  { %13300 = vpow2.f32 %v12039_v51 }
0x194f   :  { %13302 = vpow2.f32 %v12043_v4 }
0x1958   :  { %v13295_v35 = vpop.eup %13294 }
0x1959   :  { %v12082_v46 = vmul.f32 %v13295_v35, %v13281_v11  ;;  %v12084_v59 = vmul.f32 %v13295_v35, %v13279_v29  ;;  %v12086_v43 = vmul.f32 %v13295_v35, %v13283_v34  ;;  %v12088_v20 = vmul.f32 %v13295_v35, %v13285_v6  ;;  %v12015_v29 = vpop.xlane.xlu0 %12014  ;;  %v13297_v54 = vpop.eup %13296 }
0x195a   :  { %v12090_v2 = vmul.f32 %v13295_v35, %v13287_v55  ;;  %v12092_v63 = vmul.f32 %v13295_v35, %v13289_v62  ;;  %v12094_v18 = vmul.f32 %v13295_v35, %v13291_v49  ;;  %v12096_v42 = vmul.f32 %v13295_v35, %v13293_v0  ;;  %v13299_v6 = vpop.eup %13298 }
0x195b   :  { %v12098_v56 = vmul.f32 %v13314_v10, %v12082_v46  ;;  %v12100_v19 = vmul.f32 %v13315_v48, %v12084_v59  ;;  %v12102_v47 = vmul.f32 %v13316_v3, %v12086_v43  ;;  %v12104_v39 = vmul.f32 %v13317_v52, %v12088_v20  ;;  %v13301_v61 = vpop.eup %13300  ;;  %v13322_v3 = vld [vmem:[#allocation2] sm:$0xff] }
0x195c   :  { %v12106_v13 = vmul.f32 %v13318_v40, %v12090_v2  ;;  %v12108_v9 = vmul.f32 %v13319_v27, %v12092_v63  ;;  %v12110_v22 = vmul.f32 %v13320_v7, %v12094_v18  ;;  %v12112_v37 = vmul.f32 %v13321_v28, %v12096_v42  ;;  %v13303_v16 = vpop.eup %13302  ;;  %v13323_v63 = vld [vmem:[#allocation2 + $0x10] sm:$0xff]  ;;  %v13324_v18 = vld [vmem:[#allocation2 + $0x20] sm:$0xff] }
0x195d   :  { %v12128_v57 = vsel %vm4480_vm1, %v12098_v56, 0.0  ;;  %v12129_v15 = vsel %vm4480_vm1, %v12100_v19, 0.0  ;;  %v12131_v58 = vsel %vm4480_vm1, %v12102_v47, 0.0  ;;  %v12133_v26 = vsel %vm4480_vm1, %v12104_v39, 0.0  ;;  %v12027_v23 = vpop.xlane.xlu0 %12026  ;;  %v13327_v28 = vld [vmem:[#allocation2 + $0x50] sm:$0xff] }
0x195e   :  { %v12130_v53 = vadd.f32 %v12129_v15, %v12128_v57  ;;  %v12135_v45 = vsel %vm4480_vm1, %v12106_v13, 0.0  ;;  %v12137_v1 = vsel %vm4480_vm1, %v12108_v9, 0.0  ;;  %v12139_v21 = vsel %vm4480_vm1, %v12110_v22, 0.0 }
0x195f   :  { %v12141_v30 = vsel %vm4480_vm1, %v12112_v37, 0.0  ;;  %v12047_v11 = vmul.f32 1.442695, %v12009_v41  ;;  %v12051_v34 = vmul.f32 1.442695, %v12015_v29  ;;  %v12063_v55 = vadd.f32 %v13299_v6, %v13297_v54 }
0x1960   :  { %v12132_v14 = vadd.f32 %v12131_v58, %v12130_v53  ;;  %v12055_v62 = vmul.f32 1.442695, %v12021_v44  ;;  %v12059_v25 = vmul.f32 1.442695, %v12027_v23 }
0x1961   :  { %13304 = vpow2.f32 %v12047_v11  ;;  %v12064_v49 = vadd.f32 %v13301_v61, %v12063_v55 }
0x1962   :  { %v12134_v38 = vadd.f32 %v12133_v26, %v12132_v14  ;;  %13306 = vpow2.f32 %v12051_v34  ;;  %v13325_v14 = vld [vmem:[#allocation2 + $0x30] sm:$0xff] }
0x1963   :  { %13308 = vpow2.f32 %v12055_v62  ;;  %v12065_v0 = vadd.f32 %v13303_v16, %v12064_v49 }
0x1964   :  { %v12136_v8 = vadd.f32 %v12135_v45, %v12134_v38  ;;  %13310 = vpow2.f32 %v12059_v25  ;;  %v13326_v38 = vld [vmem:[#allocation2 + $0x40] sm:$0xff] }
0x1966   :  { %v12138_v33 = vadd.f32 %v12137_v1, %v12136_v8 }
0x1968   :  { %v12140_v17 = vadd.f32 %v12139_v21, %v12138_v33 }
0x196a   :  { %v12142_v12 = vadd.f32 %v12141_v30, %v12140_v17  ;;  %v13328_v17 = vld [vmem:[#allocation2 + $0x60] sm:$0xff] }
0x196c   :  { %12144 = vrot.lane.b32.xlu1 %v12142_v12, %s13401_s5 }
0x196e   :  { %v13305_v36 = vpop.eup %13304 }
0x196f   :  { %v12066_v35 = vadd.f32 %v13305_v36, %v12065_v0  ;;  %v13307_v46 = vpop.eup %13306 }
0x1970   :  { %v13309_v43 = vpop.eup %13308 }
0x1971   :  { %v12067_v59 = vadd.f32 %v13307_v46, %v12066_v35  ;;  %v13311_v2 = vpop.eup %13310 }
0x1973   :  { %v12068_v20 = vadd.f32 %v13309_v43, %v12067_v59 }
0x1975   :  { %v12069_v10 = vadd.f32 %v13311_v2, %v12068_v20 }
0x1977   :  { %13312 = vrcp.f32 %v12069_v10 }
0x1984   :  { %v13313_v56 = vpop.eup %13312 }
0x1985   :  { %v12081_v48 = vmul.f32 %v13313_v56, %v13299_v6  ;;  %v12083_v19 = vmul.f32 %v13313_v56, %v13297_v54  ;;  %v12085_v39 = vmul.f32 %v13313_v56, %v13301_v61  ;;  %v12087_v53 = vmul.f32 %v13313_v56, %v13303_v16 }
0x1986   :  { %v12089_v58 = vmul.f32 %v13313_v56, %v13305_v36  ;;  %v12091_v26 = vmul.f32 %v13313_v56, %v13307_v46  ;;  %v12093_v8 = vmul.f32 %v13313_v56, %v13309_v43  ;;  %v12095_v21 = vmul.f32 %v13313_v56, %v13311_v2 }
0x1987   :  { %v12097_v47 = vmul.f32 %v13322_v3, %v12081_v48  ;;  %v12099_v52 = vmul.f32 %v13323_v63, %v12083_v19  ;;  %v12101_v40 = vmul.f32 %v13324_v18, %v12085_v39  ;;  %v12103_v42 = vmul.f32 %v13325_v14, %v12087_v53 }
0x1988   :  { %v12105_v7 = vmul.f32 %v13326_v38, %v12089_v58  ;;  %v12107_v37 = vmul.f32 %v13327_v28, %v12091_v26  ;;  %v12109_v30 = vmul.f32 %v13328_v17, %v12093_v8  ;;  %v12111_v5 = vmul.f32 %v13329_v60, %v12095_v21 }
0x1989   :  { %v12113_v57 = vsel %vm4480_vm1, %v12097_v47, 0.0  ;;  %v12114_v15 = vsel %vm4480_vm1, %v12099_v52, 0.0  ;;  %v12116_v27 = vsel %vm4480_vm1, %v12101_v40, 0.0  ;;  %v12118_v22 = vsel %vm4480_vm1, %v12103_v42, 0.0 }
0x198a   :  { %v12115_v13 = vadd.f32 %v12114_v15, %v12113_v57  ;;  %v12120_v1 = vsel %vm4480_vm1, %v12105_v7, 0.0  ;;  %v12122_v12 = vsel %vm4480_vm1, %v12107_v37, 0.0  ;;  %v12124_v50 = vsel %vm4480_vm1, %v12109_v30, 0.0 }
0x198b   :  { %v12126_v31 = vsel %vm4480_vm1, %v12111_v5, 0.0 }
0x198c   :  { %v12117_v9 = vadd.f32 %v12116_v27, %v12115_v13 }
0x198e   :  { %v12119_v45 = vadd.f32 %v12118_v22, %v12117_v9 }
0x1990   :  { %v12121_v33 = vadd.f32 %v12120_v1, %v12119_v45 }
0x1992   :  { %v12123_v24 = vadd.f32 %v12122_v12, %v12121_v33 }
0x1994   :  { %v12125_v32 = vadd.f32 %v12124_v50, %v12123_v24 }
0x1996   :  { %v12127_v51 = vadd.f32 %v12126_v31, %v12125_v32 }
0x19de   :  { %v12145_v4 = vpop.permute.xlu1 %12144 }
0x19df   :  { %v12147_v41 = vsel %vm4480_vm1, %v12127_v51, %v12145_v4 }
0x19e0   :  { %12148 = vst [vmem:[#allocation8] sm:$0xff] %v12147_v41 }
0x19e1   :  { %13381 = shalt.err (!%p13378_p0)
}
0x19e2   :  { %12158 = dma.vmem_to_hbm [thread:$0]  %s12156_s0, 128, %s18605_s9, [#allocation5]  }
0x19e3   :  { %13394 = dma.done.wait [#allocation5], 128  }
0x19e4   :  { %13395 = vsyncadd [#allocation5], 4294967168 }
0x19e5   :  { %12162 = vsyncpa [#allocation4], 1 }
0x19e6   :  { %12163 = vsyncpa [#allocation7], 1 }
0x19e7   :  { %12164 = vsyncpa [#allocation5], 1 }

</bundles_post_ra>
